<compile_context>
chip_gen: v7x
topology: tpu7x:2x2x1
jax: 0.10.0
libtpu: 0.0.40
codegen_flags: <defaults>
</compile_context>

<pallas_src>
import functools

import numpy as np
import jax
import jax.numpy as jnp
from jax import lax
from jax.experimental import pallas as pl
from jax.experimental.pallas import tpu as pltpu

PARAM_ORDER = (
    "w_msg", "b_msg", "w_gru", "b_gru",
    "w_c1", "b_c1", "w_c2", "b_c2",
    "w_cc1", "b_cc1", "w_cc2", "b_cc2",
    "w_my", "b_my", "w_mz", "b_mz",
    "s_pool1", "s_pool2", "s_avg",
)


# ----------------------------------------------------------------------------
# In-kernel helpers
# ----------------------------------------------------------------------------
def _conv_relu_k3(v, w_flat, b):
    """'valid' Conv1d(k=3) over the flattened seq axis as one im2col matmul."""
    l = v.shape[0]
    vcat = jnp.concatenate([v[0:l - 2], v[1:l - 1], v[2:l]], axis=-1)
    return jax.nn.relu(
        jnp.dot(vcat, w_flat, preferred_element_type=jnp.float32) + b)


def _pool_select(v, kernel, sel):
    """MaxPool1d(kernel, stride=2): elementwise max of `kernel` shifted slices,
    then one 0/1 selection matmul that applies the stride and drops any window
    crossing a graph boundary."""
    lm = v.shape[0] - kernel + 1
    m = v[0:lm]
    for s in range(1, kernel):
        m = jnp.maximum(m, v[s:s + lm])
    return jnp.dot(sel, m, preferred_element_type=jnp.float32)


def devign_kernel(*refs, num_steps, n_etypes, g_block, n_nodes, d_out,
                  use_bf16):
    x_ref, adj_ref, mask_ref = refs[0], refs[1], refs[2]
    out_ref = refs[-1]
    p = {name: r[...] for name, r in zip(PARAM_ORDER, refs[3:-1])}

    G, N, T, D = g_block, n_nodes, n_etypes, d_out
    GN = G * N
    d_in = x_ref.shape[-1]
    cdt = jnp.bfloat16 if use_bf16 else jnp.float32

    x2 = x_ref[0]                       # [G*N, Din]   (graph-major, node-minor)
    mask2 = mask_ref[0]                 # [G*N, 1]
    adj_all = adj_ref[...]              # [1, T, G*N, G*N] block-diagonal (cdt)
    adj_t = [adj_all[0, t] for t in range(T)]        # hoisted out of the loop

    # ---- GatedGraphConv (DGL): zero-pad input features to out_dim ----------
    if d_in < D:
        h2 = jnp.concatenate(
            [x2, jnp.zeros((GN, D - d_in), jnp.float32)], axis=-1)
    else:
        h2 = x2

    w_msg = p["w_msg"]                  # [D, >=128] fused msg transform (cdt)
    w_gru = p["w_gru"]                  # [2D, 4D]   fused GRU gates     (cdt)
    # Hoist bias broadcasts out of the step loop (JAX does not CSE them).
    b_msg = jnp.broadcast_to(p["b_msg"], (GN, w_msg.shape[-1]))
    b_gru = jnp.broadcast_to(p["b_gru"], (GN, 4 * D))

    def ggnn_step(_, h):
        # Fused per-edge-type message transform, output padded to full lanes.
        msg = jnp.dot(h.astype(cdt), w_msg,
                      preferred_element_type=jnp.float32) + b_msg
        msg_c = msg.astype(cdt)
        # Block-diagonal aggregation: T MXU-shaped [GN,GN] x [GN,D] matmuls.
        a = jnp.dot(adj_t[0], msg_c[:, 0:D],
                    preferred_element_type=jnp.float32)
        for t in range(1, T):
            a = a + jnp.dot(adj_t[t], msg_c[:, t * D:(t + 1) * D],
                            preferred_element_type=jnp.float32)
        # torch.nn.GRUCell (gate order r, z, n) as ONE [GN,2D] x [2D,4D] matmul;
        # columns are [r | z | i_n | h_n].
        ah = jnp.concatenate([a, h], axis=-1).astype(cdt)
        gates = jnp.dot(ah, w_gru, preferred_element_type=jnp.float32) + b_gru
        r = jax.nn.sigmoid(gates[:, 0:D])
        z = jax.nn.sigmoid(gates[:, D:2 * D])
        n = jnp.tanh(gates[:, 2 * D:3 * D] + r * gates[:, 3 * D:4 * D])
        return (1.0 - z) * n + z * h

    h2 = lax.fori_loop(0, num_steps, ggnn_step, h2)

    # unbatch_features: padded nodes are zero in both x and h.
    hm = h2 * mask2
    c2 = jnp.concatenate([hm, x2], axis=-1)              # [G*N, Din + Dout]

    # Y path: conv(k=3)+relu -> maxpool(3,2) -> conv(k=1)+relu -> maxpool(2,2)
    y1 = _conv_relu_k3(hm, p["w_c1"], p["b_c1"])
    y1 = _pool_select(y1, 3, p["s_pool1"])
    y2 = jax.nn.relu(
        jnp.dot(y1, p["w_c2"], preferred_element_type=jnp.float32) + p["b_c2"])
    y2 = _pool_select(y2, 2, p["s_pool2"])
    yy = jnp.dot(y2, p["w_my"], preferred_element_type=jnp.float32) + p["b_my"]

    # Z path: same pipeline on concat([h, x]).
    z1 = _conv_relu_k3(c2, p["w_cc1"], p["b_cc1"])
    z1 = _pool_select(z1, 3, p["s_pool1"])
    z2 = jax.nn.relu(
        jnp.dot(z1, p["w_cc2"], preferred_element_type=jnp.float32) + p["b_cc2"])
    z2 = _pool_select(z2, 2, p["s_pool2"])
    zz = jnp.dot(z2, p["w_mz"], preferred_element_type=jnp.float32) + p["b_mz"]

    before_avg = yy * zz                                 # [G*p2, 2]
    # Per-graph mean over the pooled-seq axis as a selection matmul.
    avg = jnp.dot(p["s_avg"], before_avg,
                  preferred_element_type=jnp.float32)    # [G, 2]
    m = jnp.max(avg, axis=-1, keepdims=True)
    e = jnp.exp(avg - m)
    out = e / jnp.sum(e, axis=-1, keepdims=True)         # softmax over 2 logits
    out_ref[...] = out.reshape(1, G, 2)


# ----------------------------------------------------------------------------
# Wrapper: parameter fusion + pallas_call
# ----------------------------------------------------------------------------
def _fuse_params(params, *, g_block, n_nodes, use_bf16):
    """Pre-fuse / pre-split weights and build the pooling selection matrices."""
    w_et, b_et = params["w_et"], params["b_et"]          # [T, D, D], [T, D]
    n_etypes, d_out, _ = w_et.shape
    T, D = n_etypes, d_out
    cdt = jnp.bfloat16 if use_bf16 else jnp.float32

    # Edge-type message transform fused into one matmul, padded to >=128 lanes.
    msg_cols = max(128, ((T * D + 127) // 128) * 128)
    w_msg = jnp.concatenate([w_et[t] for t in range(T)], axis=1)     # [D, T*D]
    b_msg = b_et.reshape(1, T * D)
    if msg_cols > T * D:
        w_msg = jnp.pad(w_msg, ((0, 0), (0, msg_cols - T * D)))
        b_msg = jnp.pad(b_msg, ((0, 0), (0, msg_cols - T * D)))

    # GRUCell gate weights (torch order r, z, n) fused into one [2D, 4D] matmul
    # applied to concat([a, h]); output columns are [r | z | i_n | h_n].
    w_ih, b_ih = params["w_ih"], params["b_ih"]          # [D, 3D], [1, 3D]
    w_hh, b_hh = params["w_hh"], params["b_hh"]
    zd = jnp.zeros((D, D), jnp.float32)
    w_gru = jnp.concatenate([
        jnp.concatenate([w_ih[:, 0:D], w_ih[:, D:2 * D],
                         w_ih[:, 2 * D:3 * D], zd], axis=1),
        jnp.concatenate([w_hh[:, 0:D], w_hh[:, D:2 * D],
                         zd, w_hh[:, 2 * D:3 * D]], axis=1),
    ], axis=0)                                           # [2D, 4D]
    b_gru = jnp.concatenate([
        b_ih[:, 0:D] + b_hh[:, 0:D],
        b_ih[:, D:2 * D] + b_hh[:, D:2 * D],
        b_ih[:, 2 * D:3 * D],
        b_hh[:, 2 * D:3 * D],
    ], axis=1)                                           # [1, 4D]

    # Conv1d(k=3) weights im2col'ed: [3, Cin, Cout] -> [3*Cin, Cout].
    w_c1 = params["w_c1"].reshape(-1, params["w_c1"].shape[-1])
    w_cc1 = params["w_cc1"].reshape(-1, params["w_cc1"].shape[-1])

    # Pooling / averaging selection matrices (stride + per-graph validity).
    G, N = g_block, n_nodes
    L = G * N
    l_c1 = N - 2                      # per-graph conv1 output length
    p1 = (l_c1 - 3) // 2 + 1          # per-graph length after maxpool(3, 2)
    p2 = (p1 - 2) // 2 + 1            # per-graph length after maxpool(2, 2)

    s1 = np.zeros((G * p1, L - 4), np.float32)
    for g in range(G):
        for j in range(p1):
            s1[g * p1 + j, g * N + 2 * j] = 1.0
    s2 = np.zeros((G * p2, G * p1 - 1), np.float32)
    for g in range(G):
        for j in range(p2):
            s2[g * p2 + j, g * p1 + 2 * j] = 1.0
    s_avg = np.zeros((G, G * p2), np.float32)
    for g in range(G):
        s_avg[g, g * p2:(g + 1) * p2] = 1.0 / p2

    return {
        "w_msg": w_msg.astype(cdt), "b_msg": b_msg,
        "w_gru": w_gru.astype(cdt), "b_gru": b_gru,
        "w_c1": w_c1, "b_c1": params["b_c1"],
        "w_c2": params["w_c2"], "b_c2": params["b_c2"],
        "w_cc1": w_cc1, "b_cc1": params["b_cc1"],
        "w_cc2": params["w_cc2"], "b_cc2": params["b_cc2"],
        "w_my": params["w_my"], "b_my": params["b_my"],
        "w_mz": params["w_mz"], "b_mz": params["b_mz"],
        "s_pool1": jnp.asarray(s1), "s_pool2": jnp.asarray(s2),
        "s_avg": jnp.asarray(s_avg),
    }


def devign_forward(x, adj, mask, params, *, num_steps=6, n_etypes=3,
                   graphs_per_block=16, use_bf16=True):
    """x: [B, N, Din], adj: [B, T, N, N] (adj[b,t,v,u]=1 iff edge u->v of type
    t), mask: [B, N, 1] -> class probabilities [B, 2]."""
    batch, n_nodes, d_in = x.shape
    d_out = params["w_et"].shape[2]
    T = n_etypes

    # v6e/v7x MXU is 256 wide: aim for G*N >= 256 (128 on v5e), but keep the
    # grid at >= 2 blocks so v7x's two TensorCores both get work.
    G = max(1, min(graphs_per_block, batch))
    if batch > 1 and -(-batch // G) < 2:
        G = -(-batch // 2)

    # Pad the batch so it divides into G-graph blocks (padded graphs are empty
    # and sliced off the output).
    pad = (-batch) % G
    if pad:
        x = jnp.concatenate(
            [x, jnp.zeros((pad, n_nodes, d_in), x.dtype)], axis=0)
        adj = jnp.concatenate(
            [adj, jnp.zeros((pad,) + adj.shape[1:], adj.dtype)], axis=0)
        mask = jnp.concatenate(
            [mask, jnp.zeros((pad,) + mask.shape[1:], mask.dtype)], axis=0)
    bp = batch + pad
    num_blocks = bp // G
    GN = G * n_nodes
    cdt = jnp.bfloat16 if use_bf16 else jnp.float32

    # Flatten graph-major/node-minor so the kernel sees [G*N, C] directly.
    x_flat = x.reshape(num_blocks, GN, d_in)
    mask_flat = mask.reshape(num_blocks, GN, 1)

    # Block-diagonal adjacency per edge type: [blocks, T, G*N, G*N] with a
    # >=128-lane last dim (no 16-wide lane-padding waste), pre-cast to the MXU
    # compute dtype (0/1 values are exact in bf16 -> halves DMA bytes).
    adj_r = adj.reshape(num_blocks, G, T, n_nodes, n_nodes)
    eye_g = jnp.eye(G, dtype=adj.dtype)
    adj_bd = jnp.einsum("bgtvu,gh->btgvhu", adj_r, eye_g).reshape(
        num_blocks, T, GN, GN).astype(cdt)

    fused = _fuse_params(params, g_block=G, n_nodes=n_nodes, use_bf16=use_bf16)
    param_list = [fused[k] for k in PARAM_ORDER]

    kernel = functools.partial(
        devign_kernel, num_steps=num_steps, n_etypes=T, g_block=G,
        n_nodes=n_nodes, d_out=d_out, use_bf16=use_bf16)

    def bcast_spec(arr):
        nd = arr.ndim
        # NOTE: these constant-index parameter blocks could be single-buffered
        # with pipeline_mode=pl.Buffered(1); total parameter footprint is
        # <1 MiB here so default buffering is kept for maximum compatibility.
        return pl.BlockSpec(arr.shape, lambda b, _nd=nd: (0,) * _nd)

    in_specs = (
        [pl.BlockSpec((1, GN, d_in), lambda b: (b, 0, 0)),
         pl.BlockSpec((1, T, GN, GN), lambda b: (b, 0, 0, 0)),
         pl.BlockSpec((1, GN, 1), lambda b: (b, 0, 0))]
        + [bcast_spec(w) for w in param_list])

    out = pl.pallas_call(
        kernel,
        out_shape=jax.ShapeDtypeStruct((num_blocks, G, 2), jnp.float32),
        grid_spec=pltpu.PrefetchScalarGridSpec(
            num_scalar_prefetch=0,
            grid=(num_blocks,),
            in_specs=in_specs,
            out_specs=pl.BlockSpec((1, G, 2), lambda b: (b, 0, 0)),
        ),
        compiler_params=pltpu.CompilerParams(
            dimension_semantics=("parallel",),
            vmem_limit_bytes=32 * 1024 * 1024),
    )(x_flat, adj_bd, mask_flat, *param_list)
    return out.reshape(bp, 2)[:batch]


# ----------------------------------------------------------------------------
# Pure-JAX per-graph reference (unfused, mirrors the PyTorch module exactly)
# ----------------------------------------------------------------------------
def _reference_single(x, adj, mask, p, num_steps, n_etypes):
    n_nodes, d_in = x.shape
    d_out = p["w_et"].shape[2]
    if d_in < d_out:
        h = jnp.concatenate(
            [x, jnp.zeros((n_nodes, d_out - d_in), jnp.float32)], axis=-1)
    else:
        h = x
    for _ in range(num_steps):
        a = jnp.zeros((n_nodes, d_out), jnp.float32)
        for t in range(n_etypes):
            msg = h @ p["w_et"][t] + p["b_et"][t][None, :]
            a = a + adj[t] @ msg
        gi = a @ p["w_ih"] + p["b_ih"]
        gh = h @ p["w_hh"] + p["b_hh"]
        i_r, i_z, i_n = jnp.split(gi, 3, axis=-1)
        h_r, h_z, h_n = jnp.split(gh, 3, axis=-1)
        r = jax.nn.sigmoid(i_r + h_r)
        z = jax.nn.sigmoid(i_z + h_z)
        n = jnp.tanh(i_n + r * h_n)
        h = (1.0 - z) * n + z * h
    h = h * mask
    c = jnp.concatenate([h, x], axis=-1)

    def conv1d(v, w, b):
        k = w.shape[0]
        lo = v.shape[0] - k + 1
        acc = sum(v[i:i + lo] @ w[i] for i in range(k))
        return acc + b

    def maxpool(v, k, s):
        lo = (v.shape[0] - k) // s + 1
        return jnp.stack(
            [jnp.max(v[j * s:j * s + k], axis=0) for j in range(lo)], axis=0)

    y = maxpool(jax.nn.relu(conv1d(h, p["w_c1"], p["b_c1"])), 3, 2)
    y = jax.nn.relu(y @ p["w_c2"] + p["b_c2"])
    y = maxpool(y, 2, 2)
    zp = maxpool(jax.nn.relu(conv1d(c, p["w_cc1"], p["b_cc1"])), 3, 2)
    zp = jax.nn.relu(zp @ p["w_cc2"] + p["b_cc2"])
    zp = maxpool(zp, 2, 2)
    before = (y @ p["w_my"] + p["b_my"]) * (zp @ p["w_mz"] + p["b_mz"])
    avg = jnp.mean(before, axis=0)
    return jax.nn.softmax(avg)


if __name__ == "__main__":
    B, N, DIN, DOUT, T, STEPS, G = 32, 16, 32, 32, 3, 6, 16
    DC = DIN + DOUT

    key = jax.random.PRNGKey(0)
    keys = jax.random.split(key, 24)

    # per-graph node counts (padded to N nodes per graph), deterministic
    node_counts = jnp.minimum(8 + jnp.arange(B) % 9, N)
    mask2d = (jnp.arange(N)[None, :] < node_counts[:, None]).astype(jnp.float32)
    mask = mask2d[:, :, None]                                   # [B, N, 1]

    x = jax.random.normal(keys[0], (B, N, DIN), jnp.float32) * mask
    adj = (jax.random.uniform(keys[1], (B, T, N, N)) < 0.25).astype(jnp.float32)
    adj = adj * mask2d[:, None, :, None] * mask2d[:, None, None, :]

    def w(k, shape, scale=0.1):
        return (jax.random.normal(k, shape, jnp.float32) * scale).astype(jnp.float32)

    # Parameters stored matmul-ready (channel-last):
    #  - linear W[out,in]    -> [in, out]
    #  - Conv1d W[out,in,k]  -> [k, in, out]
    #  - GRUCell W_ih[3H,H]  -> [H, 3H]   (gate order r, z, n)
    params = {
        "w_et":  w(keys[2],  (T, DOUT, DOUT)),
        "b_et":  w(keys[3],  (T, DOUT)),
        "w_ih":  w(keys[4],  (DOUT, 3 * DOUT)),
        "b_ih":  w(keys[5],  (1, 3 * DOUT)),
        "w_hh":  w(keys[6],  (DOUT, 3 * DOUT)),
        "b_hh":  w(keys[7],  (1, 3 * DOUT)),
        "w_c1":  w(keys[8],  (3, DOUT, DOUT)),
        "b_c1":  w(keys[9],  (1, DOUT)),
        "w_c2":  w(keys[10], (DOUT, DOUT)),
        "b_c2":  w(keys[11], (1, DOUT)),
        "w_cc1": w(keys[12], (3, DC, DC)),
        "b_cc1": w(keys[13], (1, DC)),
        "w_cc2": w(keys[14], (DC, DC)),
        "b_cc2": w(keys[15], (1, DC)),
        "w_my":  w(keys[16], (DOUT, 2)),
        "b_my":  w(keys[17], (1, 2)),
        "w_mz":  w(keys[18], (DC, 2)),
        "b_mz":  w(keys[19], (1, 2)),
    }

    # bf16 MXU operands in the GGNN loop (v6e/v7x fast path).
    out_bf16 = devign_forward(x, adj, mask, params, num_steps=STEPS,
                              n_etypes=T, graphs_per_block=G, use_bf16=True)
    out_bf16 = jax.block_until_ready(out_bf16)

    # f32 operands: faithful to the torch float32 numerics.
    out_f32 = devign_forward(x, adj, mask, params, num_steps=STEPS,
                             n_etypes=T, graphs_per_block=G, use_bf16=False)
    out_f32 = jax.block_until_ready(out_f32)

    # sanity check vs. plain-JAX per-graph evaluation of the identical math
    ref_fn = jax.jit(jax.vmap(
        lambda xb, ab, mb: _reference_single(xb, ab, mb, params, STEPS, T)))
    ref = jax.block_until_ready(ref_fn(x, adj, mask))

    assert out_bf16.shape == (B, 2) and out_f32.shape == (B, 2)
    assert bool(jnp.all(jnp.isfinite(out_bf16)))
    assert bool(jnp.all(jnp.isfinite(out_f32)))
    assert bool(jnp.allclose(out_f32, ref, atol=1e-4, rtol=1e-4))
    assert bool(jnp.allclose(out_bf16, ref, atol=2e-2, rtol=0.0))
    print("KERNEL_OK")
</pallas_src>

<mosaic_0001>
module attributes {stable_mosaic.version = 11 : i64} {
  func.func @devign_kernel(%arg0: i32, %arg1: memref<1x256x32xf32, #tpu.memory_space<vmem>>, %arg2: memref<1x3x256x256xbf16, #tpu.memory_space<vmem>>, %arg3: memref<1x256x1xf32, #tpu.memory_space<vmem>>, %arg4: memref<32x128xbf16, #tpu.memory_space<vmem>>, %arg5: memref<1x128xf32, #tpu.memory_space<vmem>>, %arg6: memref<64x128xbf16, #tpu.memory_space<vmem>>, %arg7: memref<1x128xf32, #tpu.memory_space<vmem>>, %arg8: memref<96x32xf32, #tpu.memory_space<vmem>>, %arg9: memref<1x32xf32, #tpu.memory_space<vmem>>, %arg10: memref<32x32xf32, #tpu.memory_space<vmem>>, %arg11: memref<1x32xf32, #tpu.memory_space<vmem>>, %arg12: memref<192x64xf32, #tpu.memory_space<vmem>>, %arg13: memref<1x64xf32, #tpu.memory_space<vmem>>, %arg14: memref<64x64xf32, #tpu.memory_space<vmem>>, %arg15: memref<1x64xf32, #tpu.memory_space<vmem>>, %arg16: memref<32x2xf32, #tpu.memory_space<vmem>>, %arg17: memref<1x2xf32, #tpu.memory_space<vmem>>, %arg18: memref<64x2xf32, #tpu.memory_space<vmem>>, %arg19: memref<1x2xf32, #tpu.memory_space<vmem>>, %arg20: memref<96x252xf32, #tpu.memory_space<vmem>>, %arg21: memref<48x95xf32, #tpu.memory_space<vmem>>, %arg22: memref<16x48xf32, #tpu.memory_space<vmem>>, %arg23: memref<1x16x2xf32, #tpu.memory_space<vmem>>) attributes {dimension_semantics = [#tpu.dimension_semantics<parallel>], iteration_bounds = array<i64: 2>, scalar_prefetch = 0 : i64, scratch_operands = 0 : i64, tpu.core_type = #tpu.core_type<tc>, window_params = [{transform_indices = @transform_0, window_bounds = array<i64: 1, 256, 32>}, {transform_indices = @transform_1, window_bounds = array<i64: 1, 3, 256, 256>}, {transform_indices = @transform_2, window_bounds = array<i64: 1, 256, 1>}, {pipeline_mode = #tpu.pipeline_mode<synchronous>, transform_indices = @transform_3, window_bounds = array<i64: 32, 128>}, {pipeline_mode = #tpu.pipeline_mode<synchronous>, transform_indices = @transform_4, window_bounds = array<i64: 1, 128>}, {pipeline_mode = #tpu.pipeline_mode<synchronous>, transform_indices = @transform_5, window_bounds = array<i64: 64, 128>}, {pipeline_mode = #tpu.pipeline_mode<synchronous>, transform_indices = @transform_6, window_bounds = array<i64: 1, 128>}, {pipeline_mode = #tpu.pipeline_mode<synchronous>, transform_indices = @transform_7, window_bounds = array<i64: 96, 32>}, {pipeline_mode = #tpu.pipeline_mode<synchronous>, transform_indices = @transform_8, window_bounds = array<i64: 1, 32>}, {pipeline_mode = #tpu.pipeline_mode<synchronous>, transform_indices = @transform_9, window_bounds = array<i64: 32, 32>}, {pipeline_mode = #tpu.pipeline_mode<synchronous>, transform_indices = @transform_10, window_bounds = array<i64: 1, 32>}, {pipeline_mode = #tpu.pipeline_mode<synchronous>, transform_indices = @transform_11, window_bounds = array<i64: 192, 64>}, {pipeline_mode = #tpu.pipeline_mode<synchronous>, transform_indices = @transform_12, window_bounds = array<i64: 1, 64>}, {pipeline_mode = #tpu.pipeline_mode<synchronous>, transform_indices = @transform_13, window_bounds = array<i64: 64, 64>}, {pipeline_mode = #tpu.pipeline_mode<synchronous>, transform_indices = @transform_14, window_bounds = array<i64: 1, 64>}, {pipeline_mode = #tpu.pipeline_mode<synchronous>, transform_indices = @transform_15, window_bounds = array<i64: 32, 2>}, {pipeline_mode = #tpu.pipeline_mode<synchronous>, transform_indices = @transform_16, window_bounds = array<i64: 1, 2>}, {pipeline_mode = #tpu.pipeline_mode<synchronous>, transform_indices = @transform_17, window_bounds = array<i64: 64, 2>}, {pipeline_mode = #tpu.pipeline_mode<synchronous>, transform_indices = @transform_18, window_bounds = array<i64: 1, 2>}, {pipeline_mode = #tpu.pipeline_mode<synchronous>, transform_indices = @transform_19, window_bounds = array<i64: 96, 252>}, {pipeline_mode = #tpu.pipeline_mode<synchronous>, transform_indices = @transform_20, window_bounds = array<i64: 48, 95>}, {pipeline_mode = #tpu.pipeline_mode<synchronous>, transform_indices = @transform_21, window_bounds = array<i64: 16, 48>}, {transform_indices = @transform_22, window_bounds = array<i64: 1, 16, 2>}]} {
    %c0 = arith.constant 0 : index
    %c0_0 = arith.constant 0 : index
    %0 = vector.load %arg4[%c0, %c0_0] : memref<32x128xbf16, #tpu.memory_space<vmem>>, vector<32x128xbf16>
    %c0_1 = arith.constant 0 : index
    %c0_2 = arith.constant 0 : index
    %1 = vector.load %arg5[%c0_1, %c0_2] : memref<1x128xf32, #tpu.memory_space<vmem>>, vector<1x128xf32>
    %c0_3 = arith.constant 0 : index
    %c0_4 = arith.constant 0 : index
    %2 = vector.load %arg6[%c0_3, %c0_4] : memref<64x128xbf16, #tpu.memory_space<vmem>>, vector<64x128xbf16>
    %c0_5 = arith.constant 0 : index
    %c0_6 = arith.constant 0 : index
    %3 = vector.load %arg7[%c0_5, %c0_6] : memref<1x128xf32, #tpu.memory_space<vmem>>, vector<1x128xf32>
    %c0_7 = arith.constant 0 : index
    %c0_8 = arith.constant 0 : index
    %4 = vector.load %arg8[%c0_7, %c0_8] : memref<96x32xf32, #tpu.memory_space<vmem>>, vector<96x32xf32>
    %c0_9 = arith.constant 0 : index
    %c0_10 = arith.constant 0 : index
    %5 = vector.load %arg9[%c0_9, %c0_10] : memref<1x32xf32, #tpu.memory_space<vmem>>, vector<1x32xf32>
    %c0_11 = arith.constant 0 : index
    %c0_12 = arith.constant 0 : index
    %6 = vector.load %arg10[%c0_11, %c0_12] : memref<32x32xf32, #tpu.memory_space<vmem>>, vector<32x32xf32>
    %c0_13 = arith.constant 0 : index
    %c0_14 = arith.constant 0 : index
    %7 = vector.load %arg11[%c0_13, %c0_14] : memref<1x32xf32, #tpu.memory_space<vmem>>, vector<1x32xf32>
    %c0_15 = arith.constant 0 : index
    %c0_16 = arith.constant 0 : index
    %8 = vector.load %arg12[%c0_15, %c0_16] : memref<192x64xf32, #tpu.memory_space<vmem>>, vector<192x64xf32>
    %c0_17 = arith.constant 0 : index
    %c0_18 = arith.constant 0 : index
    %9 = vector.load %arg13[%c0_17, %c0_18] : memref<1x64xf32, #tpu.memory_space<vmem>>, vector<1x64xf32>
    %c0_19 = arith.constant 0 : index
    %c0_20 = arith.constant 0 : index
    %10 = vector.load %arg14[%c0_19, %c0_20] : memref<64x64xf32, #tpu.memory_space<vmem>>, vector<64x64xf32>
    %c0_21 = arith.constant 0 : index
    %c0_22 = arith.constant 0 : index
    %11 = vector.load %arg15[%c0_21, %c0_22] : memref<1x64xf32, #tpu.memory_space<vmem>>, vector<1x64xf32>
    %c0_23 = arith.constant 0 : index
    %c0_24 = arith.constant 0 : index
    %12 = vector.load %arg16[%c0_23, %c0_24] : memref<32x2xf32, #tpu.memory_space<vmem>>, vector<32x2xf32>
    %c0_25 = arith.constant 0 : index
    %c0_26 = arith.constant 0 : index
    %13 = vector.load %arg17[%c0_25, %c0_26] : memref<1x2xf32, #tpu.memory_space<vmem>>, vector<1x2xf32>
    %c0_27 = arith.constant 0 : index
    %c0_28 = arith.constant 0 : index
    %14 = vector.load %arg18[%c0_27, %c0_28] : memref<64x2xf32, #tpu.memory_space<vmem>>, vector<64x2xf32>
    %c0_29 = arith.constant 0 : index
    %c0_30 = arith.constant 0 : index
    %15 = vector.load %arg19[%c0_29, %c0_30] : memref<1x2xf32, #tpu.memory_space<vmem>>, vector<1x2xf32>
    %c0_31 = arith.constant 0 : index
    %c0_32 = arith.constant 0 : index
    %16 = vector.load %arg20[%c0_31, %c0_32] : memref<96x252xf32, #tpu.memory_space<vmem>>, vector<96x252xf32>
    %c0_33 = arith.constant 0 : index
    %c0_34 = arith.constant 0 : index
    %17 = vector.load %arg21[%c0_33, %c0_34] : memref<48x95xf32, #tpu.memory_space<vmem>>, vector<48x95xf32>
    %c0_35 = arith.constant 0 : index
    %c0_36 = arith.constant 0 : index
    %18 = vector.load %arg22[%c0_35, %c0_36] : memref<16x48xf32, #tpu.memory_space<vmem>>, vector<16x48xf32>
    %c0_37 = arith.constant 0 : index
    %c0_38 = arith.constant 0 : index
    %c0_39 = arith.constant 0 : index
    %19 = vector.load %arg1[%c0_37, %c0_38, %c0_39] : memref<1x256x32xf32, #tpu.memory_space<vmem>>, vector<1x256x32xf32>
    %20 = vector.shape_cast %19 : vector<1x256x32xf32> to vector<256x32xf32>
    %c0_40 = arith.constant 0 : index
    %c0_41 = arith.constant 0 : index
    %c0_42 = arith.constant 0 : index
    %21 = vector.load %arg3[%c0_40, %c0_41, %c0_42] : memref<1x256x1xf32, #tpu.memory_space<vmem>>, vector<1x256x1xf32>
    %22 = vector.shape_cast %21 : vector<1x256x1xf32> to vector<256x1xf32>
    %c0_43 = arith.constant 0 : index
    %c0_44 = arith.constant 0 : index
    %c0_45 = arith.constant 0 : index
    %c0_46 = arith.constant 0 : index
    %23 = vector.load %arg2[%c0_43, %c0_44, %c0_45, %c0_46] : memref<1x3x256x256xbf16, #tpu.memory_space<vmem>>, vector<1x3x256x256xbf16>
    %24 = vector.extract_strided_slice %23 {offsets = [0, 0, 0, 0], sizes = [1, 1, 256, 256], strides = [1, 1, 1, 1]} : vector<1x3x256x256xbf16> to vector<1x1x256x256xbf16>
    %25 = vector.shape_cast %24 : vector<1x1x256x256xbf16> to vector<256x256xbf16>
    %26 = vector.extract_strided_slice %23 {offsets = [0, 1, 0, 0], sizes = [1, 1, 256, 256], strides = [1, 1, 1, 1]} : vector<1x3x256x256xbf16> to vector<1x1x256x256xbf16>
    %27 = vector.shape_cast %26 : vector<1x1x256x256xbf16> to vector<256x256xbf16>
    %28 = vector.extract_strided_slice %23 {offsets = [0, 2, 0, 0], sizes = [1, 1, 256, 256], strides = [1, 1, 1, 1]} : vector<1x3x256x256xbf16> to vector<1x1x256x256xbf16>
    %29 = vector.shape_cast %28 : vector<1x1x256x256xbf16> to vector<256x256xbf16>
    %30 = vector.shape_cast %1 : vector<1x128xf32> to vector<1x128xf32>
    %31 = vector.broadcast %30 : vector<1x128xf32> to vector<256x128xf32>
    %32 = vector.shape_cast %3 : vector<1x128xf32> to vector<1x128xf32>
    %33 = vector.broadcast %32 : vector<1x128xf32> to vector<256x128xf32>
    %c0_i32 = arith.constant 0 : i32
    %c6_i32 = arith.constant 6 : i32
    %34 = arith.addi %c0_i32, %c6_i32 : i32
    %c1_i32 = arith.constant 1 : i32
    %35 = scf.for %arg24 = %c0_i32 to %34 step %c1_i32 iter_args(%arg25 = %20) -> (vector<256x32xf32>)  : i32 {
      %106 = arith.truncf %arg25 : vector<256x32xf32> to vector<256x32xbf16>
      %cst_66 = arith.constant dense<0.000000e+00> : vector<256x128xf32>
      %107 = tpu.matmul %106, %0, %cst_66 {dimension_numbers = #tpu.dot_dimension_numbers<[1], [0], [0], [1], [0, 0, 1, 1], [], []>} : vector<256x32xbf16>, vector<32x128xbf16>, vector<256x128xf32> -> vector<256x128xf32>
      %108 = arith.addf %107, %31 : vector<256x128xf32>
      %109 = arith.truncf %108 : vector<256x128xf32> to vector<256x128xbf16>
      %110 = vector.extract_strided_slice %109 {offsets = [0, 0], sizes = [256, 32], strides = [1, 1]} : vector<256x128xbf16> to vector<256x32xbf16>
      %cst_67 = arith.constant dense<0.000000e+00> : vector<256x32xf32>
      %111 = tpu.matmul %25, %110, %cst_67 {dimension_numbers = #tpu.dot_dimension_numbers<[1], [0], [0], [1], [0, 0, 1, 1], [], []>} : vector<256x256xbf16>, vector<256x32xbf16>, vector<256x32xf32> -> vector<256x32xf32>
      %112 = vector.extract_strided_slice %109 {offsets = [0, 32], sizes = [256, 32], strides = [1, 1]} : vector<256x128xbf16> to vector<256x32xbf16>
      %cst_68 = arith.constant dense<0.000000e+00> : vector<256x32xf32>
      %113 = tpu.matmul %27, %112, %cst_68 {dimension_numbers = #tpu.dot_dimension_numbers<[1], [0], [0], [1], [0, 0, 1, 1], [], []>} : vector<256x256xbf16>, vector<256x32xbf16>, vector<256x32xf32> -> vector<256x32xf32>
      %114 = arith.addf %111, %113 : vector<256x32xf32>
      %115 = vector.extract_strided_slice %109 {offsets = [0, 64], sizes = [256, 32], strides = [1, 1]} : vector<256x128xbf16> to vector<256x32xbf16>
      %cst_69 = arith.constant dense<0.000000e+00> : vector<256x32xf32>
      %116 = tpu.matmul %29, %115, %cst_69 {dimension_numbers = #tpu.dot_dimension_numbers<[1], [0], [0], [1], [0, 0, 1, 1], [], []>} : vector<256x256xbf16>, vector<256x32xbf16>, vector<256x32xf32> -> vector<256x32xf32>
      %117 = arith.addf %114, %116 : vector<256x32xf32>
      %118 = tpu.concatenate %117, %arg25 in 1 : vector<256x32xf32>, vector<256x32xf32> -> vector<256x64xf32>
      %119 = arith.truncf %118 : vector<256x64xf32> to vector<256x64xbf16>
      %cst_70 = arith.constant dense<0.000000e+00> : vector<256x128xf32>
      %120 = tpu.matmul %119, %2, %cst_70 {dimension_numbers = #tpu.dot_dimension_numbers<[1], [0], [0], [1], [0, 0, 1, 1], [], []>} : vector<256x64xbf16>, vector<64x128xbf16>, vector<256x128xf32> -> vector<256x128xf32>
      %121 = arith.addf %120, %33 : vector<256x128xf32>
      %122 = vector.extract_strided_slice %121 {offsets = [0, 0], sizes = [256, 32], strides = [1, 1]} : vector<256x128xf32> to vector<256x32xf32>
      %123 = arith.negf %122 : vector<256x32xf32>
      %124 = math.exp %123 : vector<256x32xf32>
      %cst_71 = arith.constant 1.000000e+00 : f32
      %125 = vector.broadcast %cst_71 : f32 to vector<256x32xf32>
      %126 = arith.addf %125, %124 : vector<256x32xf32>
      %127 = arith.divf %125, %126 : vector<256x32xf32>
      %128 = vector.extract_strided_slice %121 {offsets = [0, 32], sizes = [256, 32], strides = [1, 1]} : vector<256x128xf32> to vector<256x32xf32>
      %129 = arith.negf %128 : vector<256x32xf32>
      %130 = math.exp %129 : vector<256x32xf32>
      %cst_72 = arith.constant 1.000000e+00 : f32
      %131 = vector.broadcast %cst_72 : f32 to vector<256x32xf32>
      %132 = arith.addf %131, %130 : vector<256x32xf32>
      %133 = arith.divf %131, %132 : vector<256x32xf32>
      %134 = vector.extract_strided_slice %121 {offsets = [0, 64], sizes = [256, 32], strides = [1, 1]} : vector<256x128xf32> to vector<256x32xf32>
      %135 = vector.extract_strided_slice %121 {offsets = [0, 96], sizes = [256, 32], strides = [1, 1]} : vector<256x128xf32> to vector<256x32xf32>
      %136 = arith.mulf %127, %135 : vector<256x32xf32>
      %137 = arith.addf %134, %136 : vector<256x32xf32>
      %138 = math.tanh %137 : vector<256x32xf32>
      %cst_73 = arith.constant 1.000000e+00 : f32
      %139 = vector.broadcast %cst_73 : f32 to vector<256x32xf32>
      %140 = arith.subf %139, %133 : vector<256x32xf32>
      %141 = arith.mulf %140, %138 : vector<256x32xf32>
      %142 = arith.mulf %133, %arg25 : vector<256x32xf32>
      %143 = arith.addf %141, %142 : vector<256x32xf32>
      scf.yield %143 : vector<256x32xf32>
    }
    %36 = vector.broadcast %22 : vector<256x1xf32> to vector<256x32xf32>
    %37 = arith.mulf %35, %36 : vector<256x32xf32>
    %38 = tpu.concatenate %37, %20 in 1 : vector<256x32xf32>, vector<256x32xf32> -> vector<256x64xf32>
    %39 = vector.extract_strided_slice %37 {offsets = [0, 0], sizes = [254, 32], strides = [1, 1]} : vector<256x32xf32> to vector<254x32xf32>
    %40 = vector.extract_strided_slice %37 {offsets = [1, 0], sizes = [254, 32], strides = [1, 1]} : vector<256x32xf32> to vector<254x32xf32>
    %41 = vector.extract_strided_slice %37 {offsets = [2, 0], sizes = [254, 32], strides = [1, 1]} : vector<256x32xf32> to vector<254x32xf32>
    %42 = tpu.concatenate %39, %40, %41 in 1 : vector<254x32xf32>, vector<254x32xf32>, vector<254x32xf32> -> vector<254x96xf32>
    %cst = arith.constant dense<0.000000e+00> : vector<254x32xf32>
    %43 = tpu.matmul %42, %4, %cst {dimension_numbers = #tpu.dot_dimension_numbers<[1], [0], [0], [1], [0, 0, 1, 1], [], []>} : vector<254x96xf32>, vector<96x32xf32>, vector<254x32xf32> -> vector<254x32xf32>
    %44 = vector.broadcast %5 : vector<1x32xf32> to vector<254x32xf32>
    %45 = arith.addf %43, %44 : vector<254x32xf32>
    %cst_47 = arith.constant 0.000000e+00 : f32
    %46 = vector.broadcast %cst_47 : f32 to vector<254x32xf32>
    %47 = arith.maximumf %45, %46 : vector<254x32xf32>
    %48 = vector.extract_strided_slice %47 {offsets = [0, 0], sizes = [252, 32], strides = [1, 1]} : vector<254x32xf32> to vector<252x32xf32>
    %49 = vector.extract_strided_slice %47 {offsets = [1, 0], sizes = [252, 32], strides = [1, 1]} : vector<254x32xf32> to vector<252x32xf32>
    %50 = arith.maximumf %48, %49 : vector<252x32xf32>
    %51 = vector.extract_strided_slice %47 {offsets = [2, 0], sizes = [252, 32], strides = [1, 1]} : vector<254x32xf32> to vector<252x32xf32>
    %52 = arith.maximumf %50, %51 : vector<252x32xf32>
    %cst_48 = arith.constant dense<0.000000e+00> : vector<96x32xf32>
    %53 = tpu.matmul %16, %52, %cst_48 {dimension_numbers = #tpu.dot_dimension_numbers<[1], [0], [0], [1], [0, 0, 1, 1], [], []>} : vector<96x252xf32>, vector<252x32xf32>, vector<96x32xf32> -> vector<96x32xf32>
    %cst_49 = arith.constant dense<0.000000e+00> : vector<96x32xf32>
    %54 = tpu.matmul %53, %6, %cst_49 {dimension_numbers = #tpu.dot_dimension_numbers<[1], [0], [0], [1], [0, 0, 1, 1], [], []>} : vector<96x32xf32>, vector<32x32xf32>, vector<96x32xf32> -> vector<96x32xf32>
    %55 = vector.broadcast %7 : vector<1x32xf32> to vector<96x32xf32>
    %56 = arith.addf %54, %55 : vector<96x32xf32>
    %cst_50 = arith.constant 0.000000e+00 : f32
    %57 = vector.broadcast %cst_50 : f32 to vector<96x32xf32>
    %58 = arith.maximumf %56, %57 : vector<96x32xf32>
    %59 = vector.extract_strided_slice %58 {offsets = [0, 0], sizes = [95, 32], strides = [1, 1]} : vector<96x32xf32> to vector<95x32xf32>
    %60 = vector.extract_strided_slice %58 {offsets = [1, 0], sizes = [95, 32], strides = [1, 1]} : vector<96x32xf32> to vector<95x32xf32>
    %61 = arith.maximumf %59, %60 : vector<95x32xf32>
    %cst_51 = arith.constant dense<0.000000e+00> : vector<48x32xf32>
    %62 = tpu.matmul %17, %61, %cst_51 {dimension_numbers = #tpu.dot_dimension_numbers<[1], [0], [0], [1], [0, 0, 1, 1], [], []>} : vector<48x95xf32>, vector<95x32xf32>, vector<48x32xf32> -> vector<48x32xf32>
    %cst_52 = arith.constant dense<0.000000e+00> : vector<48x2xf32>
    %63 = tpu.matmul %62, %12, %cst_52 {dimension_numbers = #tpu.dot_dimension_numbers<[1], [0], [0], [1], [0, 0, 1, 1], [], []>} : vector<48x32xf32>, vector<32x2xf32>, vector<48x2xf32> -> vector<48x2xf32>
    %64 = vector.broadcast %13 : vector<1x2xf32> to vector<48x2xf32>
    %65 = arith.addf %63, %64 : vector<48x2xf32>
    %66 = vector.extract_strided_slice %38 {offsets = [0, 0], sizes = [254, 64], strides = [1, 1]} : vector<256x64xf32> to vector<254x64xf32>
    %67 = vector.extract_strided_slice %38 {offsets = [1, 0], sizes = [254, 64], strides = [1, 1]} : vector<256x64xf32> to vector<254x64xf32>
    %68 = vector.extract_strided_slice %38 {offsets = [2, 0], sizes = [254, 64], strides = [1, 1]} : vector<256x64xf32> to vector<254x64xf32>
    %69 = tpu.concatenate %66, %67, %68 in 1 : vector<254x64xf32>, vector<254x64xf32>, vector<254x64xf32> -> vector<254x192xf32>
    %cst_53 = arith.constant dense<0.000000e+00> : vector<254x64xf32>
    %70 = tpu.matmul %69, %8, %cst_53 {dimension_numbers = #tpu.dot_dimension_numbers<[1], [0], [0], [1], [0, 0, 1, 1], [], []>} : vector<254x192xf32>, vector<192x64xf32>, vector<254x64xf32> -> vector<254x64xf32>
    %71 = vector.broadcast %9 : vector<1x64xf32> to vector<254x64xf32>
    %72 = arith.addf %70, %71 : vector<254x64xf32>
    %cst_54 = arith.constant 0.000000e+00 : f32
    %73 = vector.broadcast %cst_54 : f32 to vector<254x64xf32>
    %74 = arith.maximumf %72, %73 : vector<254x64xf32>
    %75 = vector.extract_strided_slice %74 {offsets = [0, 0], sizes = [252, 64], strides = [1, 1]} : vector<254x64xf32> to vector<252x64xf32>
    %76 = vector.extract_strided_slice %74 {offsets = [1, 0], sizes = [252, 64], strides = [1, 1]} : vector<254x64xf32> to vector<252x64xf32>
    %77 = arith.maximumf %75, %76 : vector<252x64xf32>
    %78 = vector.extract_strided_slice %74 {offsets = [2, 0], sizes = [252, 64], strides = [1, 1]} : vector<254x64xf32> to vector<252x64xf32>
    %79 = arith.maximumf %77, %78 : vector<252x64xf32>
    %cst_55 = arith.constant dense<0.000000e+00> : vector<96x64xf32>
    %80 = tpu.matmul %16, %79, %cst_55 {dimension_numbers = #tpu.dot_dimension_numbers<[1], [0], [0], [1], [0, 0, 1, 1], [], []>} : vector<96x252xf32>, vector<252x64xf32>, vector<96x64xf32> -> vector<96x64xf32>
    %cst_56 = arith.constant dense<0.000000e+00> : vector<96x64xf32>
    %81 = tpu.matmul %80, %10, %cst_56 {dimension_numbers = #tpu.dot_dimension_numbers<[1], [0], [0], [1], [0, 0, 1, 1], [], []>} : vector<96x64xf32>, vector<64x64xf32>, vector<96x64xf32> -> vector<96x64xf32>
    %82 = vector.broadcast %11 : vector<1x64xf32> to vector<96x64xf32>
    %83 = arith.addf %81, %82 : vector<96x64xf32>
    %cst_57 = arith.constant 0.000000e+00 : f32
    %84 = vector.broadcast %cst_57 : f32 to vector<96x64xf32>
    %85 = arith.maximumf %83, %84 : vector<96x64xf32>
    %86 = vector.extract_strided_slice %85 {offsets = [0, 0], sizes = [95, 64], strides = [1, 1]} : vector<96x64xf32> to vector<95x64xf32>
    %87 = vector.extract_strided_slice %85 {offsets = [1, 0], sizes = [95, 64], strides = [1, 1]} : vector<96x64xf32> to vector<95x64xf32>
    %88 = arith.maximumf %86, %87 : vector<95x64xf32>
    %cst_58 = arith.constant dense<0.000000e+00> : vector<48x64xf32>
    %89 = tpu.matmul %17, %88, %cst_58 {dimension_numbers = #tpu.dot_dimension_numbers<[1], [0], [0], [1], [0, 0, 1, 1], [], []>} : vector<48x95xf32>, vector<95x64xf32>, vector<48x64xf32> -> vector<48x64xf32>
    %cst_59 = arith.constant dense<0.000000e+00> : vector<48x2xf32>
    %90 = tpu.matmul %89, %14, %cst_59 {dimension_numbers = #tpu.dot_dimension_numbers<[1], [0], [0], [1], [0, 0, 1, 1], [], []>} : vector<48x64xf32>, vector<64x2xf32>, vector<48x2xf32> -> vector<48x2xf32>
    %91 = vector.broadcast %15 : vector<1x2xf32> to vector<48x2xf32>
    %92 = arith.addf %90, %91 : vector<48x2xf32>
    %93 = arith.mulf %65, %92 : vector<48x2xf32>
    %cst_60 = arith.constant dense<0.000000e+00> : vector<16x2xf32>
    %94 = tpu.matmul %18, %93, %cst_60 {dimension_numbers = #tpu.dot_dimension_numbers<[1], [0], [0], [1], [0, 0, 1, 1], [], []>} : vector<16x48xf32>, vector<48x2xf32>, vector<16x2xf32> -> vector<16x2xf32>
    %cst_61 = arith.constant dense<0xFF800000> : vector<16xf32>
    %95 = vector.multi_reduction <maximumf>, %94, %cst_61 [1] : vector<16x2xf32> to vector<16xf32>
    %96 = vector.shape_cast %95 : vector<16xf32> to vector<16x1xf32>
    %97 = vector.broadcast %96 : vector<16x1xf32> to vector<16x2xf32>
    %98 = arith.subf %94, %97 : vector<16x2xf32>
    %99 = math.exp %98 : vector<16x2xf32>
    %cst_62 = arith.constant dense<0.000000e+00> : vector<16xf32>
    %100 = vector.multi_reduction <add>, %99, %cst_62 [1] : vector<16x2xf32> to vector<16xf32>
    %101 = vector.shape_cast %100 : vector<16xf32> to vector<16x1xf32>
    %102 = vector.broadcast %101 : vector<16x1xf32> to vector<16x2xf32>
    %103 = arith.divf %99, %102 : vector<16x2xf32>
    %104 = vector.shape_cast %103 : vector<16x2xf32> to vector<1x16x2xf32>
    %c0_63 = arith.constant 0 : index
    %c0_64 = arith.constant 0 : index
    %c0_65 = arith.constant 0 : index
    %105 = vector.load %arg23[%c0_63, %c0_64, %c0_65] : memref<1x16x2xf32, #tpu.memory_space<vmem>>, vector<1x16x2xf32>
    tpu.vector_store %arg23[%c0_63, %c0_64, %c0_65], %104 {strides = array<i32>} : memref<1x16x2xf32, #tpu.memory_space<vmem>>, vector<1x16x2xf32>,
    return
  }
  func.func @transform_0(%arg0: i32) -> (i32, i32, i32) {
    %c0_i32 = arith.constant 0 : i32
    %c0_i32_0 = arith.constant 0 : i32
    %c0_i32_1 = arith.constant 0 : i32
    return %arg0, %c0_i32, %c0_i32_0 : i32, i32, i32
  }
  func.func @transform_1(%arg0: i32) -> (i32, i32, i32, i32) {
    %c0_i32 = arith.constant 0 : i32
    %c0_i32_0 = arith.constant 0 : i32
    %c0_i32_1 = arith.constant 0 : i32
    %c0_i32_2 = arith.constant 0 : i32
    return %arg0, %c0_i32, %c0_i32_0, %c0_i32_1 : i32, i32, i32, i32
  }
  func.func @transform_2(%arg0: i32) -> (i32, i32, i32) {
    %c0_i32 = arith.constant 0 : i32
    %c0_i32_0 = arith.constant 0 : i32
    %c0_i32_1 = arith.constant 0 : i32
    return %arg0, %c0_i32, %c0_i32_0 : i32, i32, i32
  }
  func.func @transform_3(%arg0: i32) -> (i32, i32) {
    %c0_i32 = arith.constant 0 : i32
    %c0_i32_0 = arith.constant 0 : i32
    %c0_i32_1 = arith.constant 0 : i32
    return %c0_i32, %c0_i32_0 : i32, i32
  }
  func.func @transform_4(%arg0: i32) -> (i32, i32) {
    %c0_i32 = arith.constant 0 : i32
    %c0_i32_0 = arith.constant 0 : i32
    %c0_i32_1 = arith.constant 0 : i32
    return %c0_i32, %c0_i32_0 : i32, i32
  }
  func.func @transform_5(%arg0: i32) -> (i32, i32) {
    %c0_i32 = arith.constant 0 : i32
    %c0_i32_0 = arith.constant 0 : i32
    %c0_i32_1 = arith.constant 0 : i32
    return %c0_i32, %c0_i32_0 : i32, i32
  }
  func.func @transform_6(%arg0: i32) -> (i32, i32) {
    %c0_i32 = arith.constant 0 : i32
    %c0_i32_0 = arith.constant 0 : i32
    %c0_i32_1 = arith.constant 0 : i32
    return %c0_i32, %c0_i32_0 : i32, i32
  }
  func.func @transform_7(%arg0: i32) -> (i32, i32) {
    %c0_i32 = arith.constant 0 : i32
    %c0_i32_0 = arith.constant 0 : i32
    %c0_i32_1 = arith.constant 0 : i32
    return %c0_i32, %c0_i32_0 : i32, i32
  }
  func.func @transform_8(%arg0: i32) -> (i32, i32) {
    %c0_i32 = arith.constant 0 : i32
    %c0_i32_0 = arith.constant 0 : i32
    %c0_i32_1 = arith.constant 0 : i32
    return %c0_i32, %c0_i32_0 : i32, i32
  }
  func.func @transform_9(%arg0: i32) -> (i32, i32) {
    %c0_i32 = arith.constant 0 : i32
    %c0_i32_0 = arith.constant 0 : i32
    %c0_i32_1 = arith.constant 0 : i32
    return %c0_i32, %c0_i32_0 : i32, i32
  }
  func.func @transform_10(%arg0: i32) -> (i32, i32) {
    %c0_i32 = arith.constant 0 : i32
    %c0_i32_0 = arith.constant 0 : i32
    %c0_i32_1 = arith.constant 0 : i32
    return %c0_i32, %c0_i32_0 : i32, i32
  }
  func.func @transform_11(%arg0: i32) -> (i32, i32) {
    %c0_i32 = arith.constant 0 : i32
    %c0_i32_0 = arith.constant 0 : i32
    %c0_i32_1 = arith.constant 0 : i32
    return %c0_i32, %c0_i32_0 : i32, i32
  }
  func.func @transform_12(%arg0: i32) -> (i32, i32) {
    %c0_i32 = arith.constant 0 : i32
    %c0_i32_0 = arith.constant 0 : i32
    %c0_i32_1 = arith.constant 0 : i32
    return %c0_i32, %c0_i32_0 : i32, i32
  }
  func.func @transform_13(%arg0: i32) -> (i32, i32) {
    %c0_i32 = arith.constant 0 : i32
    %c0_i32_0 = arith.constant 0 : i32
    %c0_i32_1 = arith.constant 0 : i32
    return %c0_i32, %c0_i32_0 : i32, i32
  }
  func.func @transform_14(%arg0: i32) -> (i32, i32) {
    %c0_i32 = arith.constant 0 : i32
    %c0_i32_0 = arith.constant 0 : i32
    %c0_i32_1 = arith.constant 0 : i32
    return %c0_i32, %c0_i32_0 : i32, i32
  }
  func.func @transform_15(%arg0: i32) -> (i32, i32) {
    %c0_i32 = arith.constant 0 : i32
    %c0_i32_0 = arith.constant 0 : i32
    %c0_i32_1 = arith.constant 0 : i32
    return %c0_i32, %c0_i32_0 : i32, i32
  }
  func.func @transform_16(%arg0: i32) -> (i32, i32) {
    %c0_i32 = arith.constant 0 : i32
    %c0_i32_0 = arith.constant 0 : i32
    %c0_i32_1 = arith.constant 0 : i32
    return %c0_i32, %c0_i32_0 : i32, i32
  }
  func.func @transform_17(%arg0: i32) -> (i32, i32) {
    %c0_i32 = arith.constant 0 : i32
    %c0_i32_0 = arith.constant 0 : i32
    %c0_i32_1 = arith.constant 0 : i32
    return %c0_i32, %c0_i32_0 : i32, i32
  }
  func.func @transform_18(%arg0: i32) -> (i32, i32) {
    %c0_i32 = arith.constant 0 : i32
    %c0_i32_0 = arith.constant 0 : i32
    %c0_i32_1 = arith.constant 0 : i32
    return %c0_i32, %c0_i32_0 : i32, i32
  }
  func.func @transform_19(%arg0: i32) -> (i32, i32) {
    %c0_i32 = arith.constant 0 : i32
    %c0_i32_0 = arith.constant 0 : i32
    %c0_i32_1 = arith.constant 0 : i32
    return %c0_i32, %c0_i32_0 : i32, i32
  }
  func.func @transform_20(%arg0: i32) -> (i32, i32) {
    %c0_i32 = arith.constant 0 : i32
    %c0_i32_0 = arith.constant 0 : i32
    %c0_i32_1 = arith.constant 0 : i32
    return %c0_i32, %c0_i32_0 : i32, i32
  }
  func.func @transform_21(%arg0: i32) -> (i32, i32) {
    %c0_i32 = arith.constant 0 : i32
    %c0_i32_0 = arith.constant 0 : i32
    %c0_i32_1 = arith.constant 0 : i32
    return %c0_i32, %c0_i32_0 : i32, i32
  }
  func.func @transform_22(%arg0: i32) -> (i32, i32, i32) {
    %c0_i32 = arith.constant 0 : i32
    %c0_i32_0 = arith.constant 0 : i32
    %c0_i32_1 = arith.constant 0 : i32
    return %arg0, %c0_i32, %c0_i32_0 : i32, i32, i32
  }
}

</mosaic_0001>

<bundles_post_ra>
// kernel: tpu_custom_call.1
= control target key start
LH: loop header
LB: loop body
LE: loop exit
PB: predicated region body
PF: predicated region fallthrough
CT: control target
= control target key end

     0   :  { %s15367_s0 = inlined_call_operand.vmem [shape: f32[2,256,32], index: 0, kind: input, shape index: {}]   ;;  %s15368_s1 = inlined_call_operand.vmem [shape: bf16[2,3,256,256], index: 1, kind: input, shape index: {}]   ;;  %s15369_s2 = inlined_call_operand.vmem [shape: f32[2,256,1], index: 2, kind: input, shape index: {}]   ;;  %s15370_s3 = inlined_call_operand.hbm [shape: bf16[32,128], index: 3, kind: input, shape index: {}]   ;;  %s15371_s4 = inlined_call_operand.vmem [shape: f32[1,128], index: 4, kind: input, shape index: {}]   ;;  %s15372_s5 = inlined_call_operand.hbm [shape: bf16[64,128], index: 5, kind: input, shape index: {}]   ;;  %s15373_s6 = inlined_call_operand.hbm [shape: f32[1,128], index: 6, kind: input, shape index: {}]   ;;  %s15374_s7 = inlined_call_operand.vmem [shape: f32[96,32], index: 7, kind: input, shape index: {}]   ;;  %s15375_s8 = inlined_call_operand.hbm [shape: f32[1,32], index: 8, kind: input, shape index: {}]   ;;  %s15376_s9 = inlined_call_operand.hbm [shape: f32[32,32], index: 9, kind: input, shape index: {}]   ;;  %s15377_s10 = inlined_call_operand.hbm [shape: f32[1,32], index: 10, kind: input, shape index: {}]   ;;  %s15378_s11 = inlined_call_operand.vmem [shape: f32[192,64], index: 11, kind: input, shape index: {}]   ;;  %s15379_s12 = inlined_call_operand.hbm [shape: f32[1,64], index: 12, kind: input, shape index: {}]   ;;  %s15380_s13 = inlined_call_operand.hbm [shape: f32[64,64], index: 13, kind: input, shape index: {}]   ;;  %s15381_s14 = inlined_call_operand.hbm [shape: f32[1,64], index: 14, kind: input, shape index: {}]   ;;  %s15382_s15 = inlined_call_operand.vmem [shape: f32[32,2], index: 15, kind: input, shape index: {}]   ;;  %s15383_s16 = inlined_call_operand.hbm [shape: f32[1,2], index: 16, kind: input, shape index: {}]   ;;  %s15384_s17 = inlined_call_operand.vmem [shape: f32[64,2], index: 17, kind: input, shape index: {}]   ;;  %s15385_s18 = inlined_call_operand.hbm [shape: f32[1,2], index: 18, kind: input, shape index: {}]   ;;  %s15386_s19 = inlined_call_operand.vmem [shape: f32[96,252], index: 19, kind: input, shape index: {}]   ;;  %s15387_s20 = inlined_call_operand.vmem [shape: f32[48,95], index: 20, kind: input, shape index: {}]   ;;  %s15388_s21 = inlined_call_operand.hbm [shape: f32[16,48], index: 21, kind: input, shape index: {}]   ;;  %s15389_s22 = inlined_call_operand.vmem [shape: f32[2,16,2], index: 22, kind: output, shape index: {}]  }
   0x1   :  { %15760 = sst [smem:[#allocation353_spill]] %s15367_s0 }
   0x2   :  { %15761 = sst [smem:[#allocation354_spill]] %s15368_s1 }
   0x3   :  { %15762 = sst [smem:[#allocation355_spill]] %s15369_s2 }
   0x4   :  { %15763 = sst [smem:[#allocation356_spill]] %s15370_s3 }
   0x5   :  { %15764 = sst [smem:[#allocation357_spill]] %s15371_s4 }
   0x6   :  { %15765 = sst [smem:[#allocation358_spill]] %s15372_s5 }
   0x7   :  { %15766 = sst [smem:[#allocation359_spill]] %s15373_s6 }
   0x8   :  { %15767 = sst [smem:[#allocation360_spill]] %s15375_s8 }
   0x9   :  { %15768 = sst [smem:[#allocation361_spill]] %s15382_s15 }
   0xa   :  { %15769 = sst [smem:[#allocation362_spill]] %s15384_s17 }
   0xb   :  { %15770 = sst [smem:[#allocation363_spill]] %s15386_s19 }
   0xc   :  { %15771 = sst [smem:[#allocation364_spill]] %s15387_s20 }
   0xd   :  { %27 = vsyncpa [#allocation3], 0 }
   0xe   :  { %28 = vsyncpa [#allocation5], 0 }
   0xf   :  { %29 = vsyncpa [#allocation8], 0 }
  0x10   :  { %30 = vsyncpa [#allocation11], 0 }
  0x11   :  { %31 = vsyncpa [#allocation14], 0 }
  0x12   :  { %32 = vsyncpa [#allocation17], 0 }
  0x13   :  { %33 = vsyncpa [#allocation20], 0  ;;  %s10822_s3 = smov 0  }
  0x14 LB: > { %15772 = sst [smem:[#allocation28_spill]] %s10549_s3  ;;  %s10828_s28 = sadd.s32 4294967295, %s10549_s3   ;;  %s10549_s3 = sphi %s10822_s3, %s39_s3  }
  0x15   : > { %p7857_p0 = scmp.ge.s32.totalorder %s10549_s3, 1  ;;  %p547_p1 = scmp.lt.s32.totalorder %s10549_s3, 3 }
  0x16   : > { %p15398_p2 = scmp.eq.s32.totalorder %s10828_s28, 0  ;;  %s10683_s30 = smov [#allocation4]  }
  0x17   : > { %p10833_p3 = pnand %p7857_p0, %p547_p1  ;;  %s575_s4 = sshll.u32 %s10683_s30, 4  ;;  %s10837_s4 = int_to_ptr.vmem [resolvable:$true] %s575_s4 }
  0x18   : > { %s10684_s0 = smov [#allocation7]   ;;  %s10685_s5 = smov [#allocation10]  }
  0x19   : > { %s15773_s29 = scalar_select %p10833_p3, 1, 0 }
  0x1a   : > { %p9488_p4 = pneg %p10833_p3  ;;  %s603_s23 = sshll.u32 %s10684_s0, 4  ;;  %s10841_s23 = int_to_ptr.vmem [resolvable:$true] %s603_s23 }
  0x1b   : > { %s627_s24 = sshll.u32 %s10685_s5, 4  ;;  %s15775_s26 = sld [smem:[#allocation358_spill]]  ;;  %s10849_s24 = int_to_ptr.vmem [resolvable:$true] %s627_s24 }
  0x1c   : > { %p10845_p5 = pnand %p15398_p2, %p9488_p4 }
  0x1e   : > { %p10859_p7 = pneg %p10845_p5 }
  0x21   : > { %s10047_s2 = scalar_lea.hbm %s15775_s26, 512 }
  0x22   : > { %p10048_p6 = scmp.ne.s32.totalorder %s15775_s26, %s10047_s2  ;;  %p10054_p10 = scmp.lt.u32.totalorder %s10047_s2, %s15775_s26 }
  0x24   : > { %p10050_p8 = pnand %p10859_p7, %p10048_p6 }
  0x26   : > { %p10051_p9 = pneg %p10050_p8 }
  0x28   : > { %p10056_p11 = pnand %p10054_p10, %p10051_p9 }
  0x2a   : > { %10059 = shalt.err (!%p10056_p11)
}
  0x2b   : > { %s10060_s6 = scalar_lea.vmem %s10837_s4, 512  ;;  %p10068_p1 = scmp.lt.s32.totalorder %s10837_s4, %s10837_s4 }
  0x2c   : > { %p10061_p12 = scmp.ne.s32.totalorder %s10837_s4, %s10060_s6  ;;  %p10069_p4 = scmp.lt.s32.totalorder %s10060_s6, %s10060_s6 }
  0x2e   : > { %p10063_p13 = pnand %p10061_p12, %p10859_p7  ;;  %p10070_p6 = por %p10069_p4, %p10068_p1 }
  0x30   : > { %p10064_p0 = pneg %p10063_p13 }
  0x32   : > { %p10071_p8 = pnand %p10070_p6, %p10064_p0 }
  0x34   : > { %10074 = shalt.err (!%p10071_p8)
}
  0x35   : > { %s15400_s25 = smov 64   ;;  %s10687_s3 = smov 4  }
  0x36   : > { %9494 = dma.hbm_to_vmem [thread:$0]  (!%p10845_p5), %s15775_s26, 512, %s10837_s4, [#allocation5], %s15400_s25, %s15400_s25, %s10687_s3  }
  0x37   : > { %s15777_s8 = sld [smem:[#allocation360_spill]] }
  0x3d   : > { %s10075_s6 = scalar_lea.hbm %s15777_s8, 16 }
  0x3e   : > { %p10076_p9 = scmp.ne.s32.totalorder %s15777_s8, %s10075_s6  ;;  %p10082_p12 = scmp.lt.u32.totalorder %s10075_s6, %s15777_s8 }
  0x40   : > { %p10078_p10 = pnand %p10076_p9, %p10859_p7 }
  0x42   : > { %p10079_p11 = pneg %p10078_p10 }
  0x44   : > { %p10084_p13 = pnand %p10082_p12, %p10079_p11 }
  0x46   : > { %10087 = shalt.err (!%p10084_p13)
}
  0x47   : > { %s10088_s4 = scalar_lea.vmem %s10841_s23, 16  ;;  %s10095_s19 = scalar_lea.vmem %s10841_s23, 32 }
  0x48   : > { %p10089_p0 = scmp.ne.s32.totalorder %s10841_s23, %s10088_s4  ;;  %p10096_p6 = scmp.lt.s32.totalorder %s10841_s23, %s10841_s23 }
  0x49   : > { %p10097_p8 = scmp.lt.s32.totalorder %s10095_s19, %s10088_s4 }
  0x4a   : > { %p10091_p1 = pnand %p10089_p0, %p10859_p7 }
  0x4b   : > { %p10098_p9 = por %p10097_p8, %p10096_p6 }
  0x4c   : > { %p10092_p4 = pneg %p10091_p1 }
  0x4e   : > { %p10099_p10 = pnand %p10098_p9, %p10092_p4 }
  0x50   : > { %10102 = shalt.err (!%p10099_p10)
}
  0x51   : > { %9500 = dma.hbm_to_vmem [thread:$0]  (!%p10845_p5), %s15777_s8, 16, %s10841_s23, [#allocation8]  }
  0x52   : > { %s10103_s27 = scalar_lea.hbm %s15377_s10, 16 }
  0x53   : > { %p10104_p11 = scmp.ne.s32.totalorder %s15377_s10, %s10103_s27  ;;  %p10110_p0 = scmp.lt.u32.totalorder %s10103_s27, %s15377_s10 }
  0x55   : > { %p10106_p12 = pnand %p10104_p11, %p10859_p7 }
  0x57   : > { %p10107_p13 = pneg %p10106_p12 }
  0x59   : > { %p10112_p1 = pnand %p10110_p0, %p10107_p13 }
  0x5b   : > { %10115 = shalt.err (!%p10112_p1)
}
  0x5c   : > { %s10116_s23 = scalar_lea.vmem %s10849_s24, 16  ;;  %s10123_s19 = scalar_lea.vmem %s10849_s24, 32 }
  0x5d   : > { %p10117_p4 = scmp.ne.s32.totalorder %s10849_s24, %s10116_s23  ;;  %p10124_p9 = scmp.lt.s32.totalorder %s10849_s24, %s10849_s24 }
  0x5e   : > { %p10125_p10 = scmp.lt.s32.totalorder %s10123_s19, %s10116_s23 }
  0x5f   : > { %p10119_p6 = pnand %p10117_p4, %p10859_p7 }
  0x60   : > { %p10126_p11 = por %p10125_p10, %p10124_p9 }
  0x61   : > { %p10120_p8 = pneg %p10119_p6 }
  0x63   : > { %p10127_p12 = pnand %p10126_p11, %p10120_p8 }
  0x65   : > { %10130 = shalt.err (!%p10127_p12)
}
  0x66   : > { %9506 = dma.hbm_to_vmem [thread:$0]  (!%p10845_p5), %s15377_s10, 16, %s10849_s24, [#allocation11]  }
  0x67   : > { %s10688_s20 = smov [#allocation13]   ;;  %s10689_s27 = smov [#allocation16]  }
  0x68   : > { %s651_s2 = sshll.u32 %s10688_s20, 4  ;;  %s679_s30 = sshll.u32 %s10689_s27, 4  ;;  %s652_s2 = int_to_ptr.vmem [resolvable:$true] %s651_s2  ;;  %s10931_s30 = int_to_ptr.vmem [resolvable:$true] %s679_s30 }
  0x69   : > { %s10131_s4 = scalar_lea.hbm %s15380_s13, 1024 }
  0x6a   : > { %p10132_p13 = scmp.ne.s32.totalorder %s15380_s13, %s10131_s4  ;;  %p10138_p4 = scmp.lt.u32.totalorder %s10131_s4, %s15380_s13 }
  0x6c   : > { %p10134_p0 = pnand %p10132_p13, %p10859_p7 }
  0x6e   : > { %p10135_p1 = pneg %p10134_p0 }
  0x70   : > { %p10140_p6 = pnand %p10138_p4, %p10135_p1 }
  0x72   : > { %10143 = shalt.err (!%p10140_p6)
}
  0x73   : > { %s10144_s17 = scalar_lea.vmem %s652_s2, 1024  ;;  %p10152_p11 = scmp.lt.s32.totalorder %s652_s2, %s652_s2 }
  0x74   : > { %p10145_p8 = scmp.ne.s32.totalorder %s652_s2, %s10144_s17  ;;  %p10153_p12 = scmp.lt.s32.totalorder %s10144_s17, %s10144_s17 }
  0x76   : > { %p10147_p9 = pnand %p10145_p8, %p10859_p7  ;;  %p10154_p2 = por %p10153_p12, %p10152_p11 }
  0x78   : > { %p10148_p10 = pneg %p10147_p9 }
  0x7a   : > { %p10155_p3 = pnand %p10154_p2, %p10148_p10 }
  0x7c   : > { %10158 = shalt.err (!%p10155_p3)
}
  0x7d   : > { %s15401_s20 = smov 128   ;;  %s15403_s27 = smov 8  }
  0x7e   : > { %9512 = dma.hbm_to_vmem [thread:$0]  (!%p10845_p5), %s15380_s13, 1024, %s652_s2, [#allocation14], %s15401_s20, %s15401_s20, %s15403_s27  }
  0x7f   : > { %s10159_s19 = scalar_lea.hbm %s15383_s16, 16 }
  0x80   : > { %p10160_p2 = scmp.ne.s32.totalorder %s15383_s16, %s10159_s19  ;;  %p10166_p0 = scmp.lt.u32.totalorder %s10159_s19, %s15383_s16 }
  0x82   : > { %p10162_p3 = pnand %p10160_p2, %p10859_p7 }
  0x84   : > { %p10163_p13 = pneg %p10162_p3 }
  0x86   : > { %p10168_p1 = pnand %p10166_p0, %p10163_p13 }
  0x88   : > { %10171 = shalt.err (!%p10168_p1)
}
  0x89   : > { %s10172_s2 = scalar_lea.vmem %s10931_s30, 16  ;;  %s10179_s5 = scalar_lea.vmem %s10931_s30, 32 }
  0x8a   : > { %p10173_p4 = scmp.ne.s32.totalorder %s10931_s30, %s10172_s2  ;;  %p10180_p9 = scmp.lt.s32.totalorder %s10931_s30, %s10931_s30 }
  0x8b   : > { %p10181_p10 = scmp.lt.s32.totalorder %s10179_s5, %s10172_s2 }
  0x8c   : > { %p10175_p6 = pnand %p10173_p4, %p10859_p7 }
  0x8d   : > { %p10182_p11 = por %p10181_p10, %p10180_p9 }
  0x8e   : > { %p10176_p8 = pneg %p10175_p6 }
  0x90   : > { %p10183_p12 = pnand %p10182_p11, %p10176_p8 }
  0x92   : > { %10186 = shalt.err (!%p10183_p12)
}
  0x93   : > { %9518 = dma.hbm_to_vmem [thread:$0]  (!%p10845_p5), %s15383_s16, 16, %s10931_s30, [#allocation17]  }
  0x94   : > { %s10692_s4 = smov [#allocation2]   ;;  %s10693_s19 = smov [#allocation6]  }
  0x95   : > { %s559_s23 = sshll.u32 %s10692_s4, 4  ;;  %s589_s15 = sshll.u32 %s10693_s19, 4  ;;  %s560_s23 = int_to_ptr.vmem [resolvable:$true] %s559_s23  ;;  %s10978_s15 = int_to_ptr.vmem [resolvable:$true] %s589_s15 }
  0x96   : > { %s15778_s2 = sld [smem:[#allocation356_spill]] }
  0x9c   : > { %s10187_s5 = scalar_lea.hbm %s15778_s2, 256 }
  0x9d   : > { %p10188_p2 = scmp.ne.s32.totalorder %s15778_s2, %s10187_s5  ;;  %p10194_p0 = scmp.lt.u32.totalorder %s10187_s5, %s15778_s2 }
  0x9f   : > { %p10190_p3 = pnand %p10188_p2, %p10859_p7 }
  0xa1   : > { %p10191_p13 = pneg %p10190_p3 }
  0xa3   : > { %p10196_p1 = pnand %p10194_p0, %p10191_p13 }
  0xa5   : > { %10199 = shalt.err (!%p10196_p1)
}
  0xa6   : > { %s10200_s6 = scalar_lea.vmem %s560_s23, 256  ;;  %p10208_p9 = scmp.lt.s32.totalorder %s560_s23, %s560_s23 }
  0xa7   : > { %p10201_p4 = scmp.ne.s32.totalorder %s560_s23, %s10200_s6  ;;  %p10209_p10 = scmp.lt.s32.totalorder %s10200_s6, %s10200_s6 }
  0xa9   : > { %p10203_p6 = pnand %p10201_p4, %p10859_p7  ;;  %p10210_p11 = por %p10209_p10, %p10208_p9 }
  0xab   : > { %p10204_p8 = pneg %p10203_p6 }
  0xad   : > { %p10211_p12 = pnand %p10210_p11, %p10204_p8 }
  0xaf   : > { %10214 = shalt.err (!%p10211_p12)
}
  0xb0   : > { %s15779_s20 = smov 64   ;;  %s15780_s17 = sld [smem:[#allocation359_spill]] }
  0xb1   : > { %9491 = dma.hbm_to_vmem [thread:$0]  (!%p10845_p5), %s15778_s2, 256, %s560_s23, [#allocation3], %s15779_s20, %s15779_s20, %s10687_s3  }
  0xb6   : > { %s10215_s5 = scalar_lea.hbm %s15780_s17, 16 }
  0xb7   : > { %p10216_p2 = scmp.ne.s32.totalorder %s15780_s17, %s10215_s5  ;;  %p10222_p0 = scmp.lt.u32.totalorder %s10215_s5, %s15780_s17 }
  0xb9   : > { %p10218_p3 = pnand %p10216_p2, %p10859_p7 }
  0xbb   : > { %p10219_p13 = pneg %p10218_p3 }
  0xbd   : > { %p10224_p1 = pnand %p10222_p0, %p10219_p13 }
  0xbf   : > { %10227 = shalt.err (!%p10224_p1)
}
  0xc0   : > { %s10228_s3 = scalar_lea.vmem %s10978_s15, 16  ;;  %s10235_s23 = scalar_lea.vmem %s10978_s15, 32 }
  0xc1   : > { %p10229_p4 = scmp.ne.s32.totalorder %s10978_s15, %s10228_s3  ;;  %p10236_p9 = scmp.lt.s32.totalorder %s10978_s15, %s10978_s15 }
  0xc2   : > { %p10237_p10 = scmp.lt.s32.totalorder %s10235_s23, %s10228_s3 }
  0xc3   : > { %p10231_p6 = pnand %p10229_p4, %p10859_p7 }
  0xc4   : > { %p10238_p11 = por %p10237_p10, %p10236_p9 }
  0xc5   : > { %p10232_p8 = pneg %p10231_p6 }
  0xc7   : > { %p10239_p12 = pnand %p10238_p11, %p10232_p8 }
  0xc9   : > { %10242 = shalt.err (!%p10239_p12)
}
  0xca   : > { %9497 = dma.hbm_to_vmem [thread:$0]  (!%p10845_p5), %s15780_s17, 16, %s10978_s15, [#allocation5]  }
  0xcb   : > { %s10694_s27 = smov [#allocation9]   ;;  %s10695_s19 = smov [#allocation12]  }
  0xcc   : > { %s613_s4 = sshll.u32 %s10694_s27, 4  ;;  %s641_s24 = sshll.u32 %s10695_s19, 4  ;;  %s614_s4 = int_to_ptr.vmem [resolvable:$true] %s613_s4  ;;  %s11025_s24 = int_to_ptr.vmem [resolvable:$true] %s641_s24 }
  0xcd   : > { %s10243_s30 = scalar_lea.hbm %s15376_s9, 512 }
  0xce   : > { %p10244_p2 = scmp.ne.s32.totalorder %s15376_s9, %s10243_s30  ;;  %p10250_p0 = scmp.lt.u32.totalorder %s10243_s30, %s15376_s9 }
  0xd0   : > { %p10246_p3 = pnand %p10244_p2, %p10859_p7 }
  0xd2   : > { %p10247_p13 = pneg %p10246_p3 }
  0xd4   : > { %p10252_p1 = pnand %p10250_p0, %p10247_p13 }
  0xd6   : > { %10255 = shalt.err (!%p10252_p1)
}
  0xd7   : > { %s10256_s8 = scalar_lea.vmem %s614_s4, 512  ;;  %p10264_p9 = scmp.lt.s32.totalorder %s614_s4, %s614_s4 }
  0xd8   : > { %p10257_p4 = scmp.ne.s32.totalorder %s614_s4, %s10256_s8  ;;  %p10265_p10 = scmp.lt.s32.totalorder %s10256_s8, %s10256_s8 }
  0xda   : > { %p10259_p6 = pnand %p10257_p4, %p10859_p7  ;;  %p10266_p11 = por %p10265_p10, %p10264_p9 }
  0xdc   : > { %p10260_p8 = pneg %p10259_p6 }
  0xde   : > { %p10267_p12 = pnand %p10266_p11, %p10260_p8 }
  0xe0   : > { %10270 = shalt.err (!%p10267_p12)
}
  0xe1   : > { %s15781_s20 = smov 8   ;;  %s15782_s27 = smov 128  }
  0xe2   : > { %9503 = dma.hbm_to_vmem [thread:$0]  (!%p10845_p5), %s15376_s9, 512, %s614_s4, [#allocation8], %s15782_s27, %s15782_s27, %s15781_s20  }
  0xe3   : > { %s10271_s6 = scalar_lea.hbm %s15379_s12, 16 }
  0xe4   : > { %p10272_p2 = scmp.ne.s32.totalorder %s15379_s12, %s10271_s6  ;;  %p10278_p0 = scmp.lt.u32.totalorder %s10271_s6, %s15379_s12 }
  0xe6   : > { %p10274_p3 = pnand %p10272_p2, %p10859_p7 }
  0xe8   : > { %p10275_p13 = pneg %p10274_p3 }
  0xea   : > { %p10280_p1 = pnand %p10278_p0, %p10275_p13 }
  0xec   : > { %10283 = shalt.err (!%p10280_p1)
}
  0xed   : > { %s10284_s4 = scalar_lea.vmem %s11025_s24, 16  ;;  %s10291_s19 = scalar_lea.vmem %s11025_s24, 32 }
  0xee   : > { %p10285_p4 = scmp.ne.s32.totalorder %s11025_s24, %s10284_s4  ;;  %p10292_p9 = scmp.lt.s32.totalorder %s11025_s24, %s11025_s24 }
  0xef   : > { %p10293_p10 = scmp.lt.s32.totalorder %s10291_s19, %s10284_s4 }
  0xf0   : > { %p10287_p6 = pnand %p10285_p4, %p10859_p7 }
  0xf1   : > { %p10294_p11 = por %p10293_p10, %p10292_p9 }
  0xf2   : > { %p10288_p8 = pneg %p10287_p6 }
  0xf4   : > { %p10295_p12 = pnand %p10294_p11, %p10288_p8 }
  0xf6   : > { %10298 = shalt.err (!%p10295_p12)
}
  0xf7   : > { %9509 = dma.hbm_to_vmem [thread:$0]  (!%p10845_p5), %s15379_s12, 16, %s11025_s24, [#allocation11]  }
  0xf8   : > { %s10696_s30 = smov [#allocation15]   ;;  %s10697_s3 = smov [#allocation18]  }
  0xf9   : > { %s665_s6 = sshll.u32 %s10696_s30, 4  ;;  %s693_s23 = sshll.u32 %s10697_s3, 4  ;;  %s666_s6 = int_to_ptr.vmem [resolvable:$true] %s665_s6  ;;  %s11072_s23 = int_to_ptr.vmem [resolvable:$true] %s693_s23 }
  0xfa   : > { %s10299_s4 = scalar_lea.hbm %s15381_s14, 16 }
  0xfb   : > { %p10300_p2 = scmp.ne.s32.totalorder %s15381_s14, %s10299_s4  ;;  %p10306_p0 = scmp.lt.u32.totalorder %s10299_s4, %s15381_s14 }
  0xfd   : > { %p10302_p3 = pnand %p10300_p2, %p10859_p7 }
  0xff   : > { %p10303_p13 = pneg %p10302_p3 }
 0x101   : > { %p10308_p1 = pnand %p10306_p0, %p10303_p13 }
 0x103   : > { %10311 = shalt.err (!%p10308_p1)
}
 0x104   : > { %s10312_s25 = scalar_lea.vmem %s666_s6, 16  ;;  %s10319_s30 = scalar_lea.vmem %s666_s6, 32 }
 0x105   : > { %p10313_p4 = scmp.ne.s32.totalorder %s666_s6, %s10312_s25  ;;  %p10320_p9 = scmp.lt.s32.totalorder %s666_s6, %s666_s6 }
 0x106   : > { %p10321_p10 = scmp.lt.s32.totalorder %s10319_s30, %s10312_s25 }
 0x107   : > { %p10315_p6 = pnand %p10313_p4, %p10859_p7 }
 0x108   : > { %p10322_p11 = por %p10321_p10, %p10320_p9 }
 0x109   : > { %p10316_p8 = pneg %p10315_p6 }
 0x10b   : > { %p10323_p12 = pnand %p10322_p11, %p10316_p8 }
 0x10d   : > { %10326 = shalt.err (!%p10323_p12)
}
 0x10e   : > { %9515 = dma.hbm_to_vmem [thread:$0]  (!%p10845_p5), %s15381_s14, 16, %s666_s6, [#allocation14]  }
 0x10f   : > { %s10327_s4 = scalar_lea.hbm %s15385_s18, 16 }
 0x110   : > { %p10328_p2 = scmp.ne.s32.totalorder %s15385_s18, %s10327_s4  ;;  %p10334_p0 = scmp.lt.u32.totalorder %s10327_s4, %s15385_s18 }
 0x112   : > { %p10330_p3 = pnand %p10328_p2, %p10859_p7 }
 0x114   : > { %p10331_p13 = pneg %p10330_p3 }
 0x116   : > { %p10336_p1 = pnand %p10334_p0, %p10331_p13 }
 0x118   : > { %10339 = shalt.err (!%p10336_p1)
}
 0x119   : > { %s10340_s6 = scalar_lea.vmem %s11072_s23, 16  ;;  %s10347_s30 = scalar_lea.vmem %s11072_s23, 32 }
 0x11a   : > { %p10341_p4 = scmp.ne.s32.totalorder %s11072_s23, %s10340_s6  ;;  %p10348_p9 = scmp.lt.s32.totalorder %s11072_s23, %s11072_s23 }
 0x11b   : > { %p10349_p10 = scmp.lt.s32.totalorder %s10347_s30, %s10340_s6 }
 0x11c   : > { %p10343_p6 = pnand %p10341_p4, %p10859_p7 }
 0x11d   : > { %p10350_p11 = por %p10349_p10, %p10348_p9 }
 0x11e   : > { %p10344_p8 = pneg %p10343_p6 }
 0x120   : > { %p10351_p12 = pnand %p10350_p11, %p10344_p8 }
 0x122   : > { %10354 = shalt.err (!%p10351_p12)
}
 0x123   : > { %9521 = dma.hbm_to_vmem [thread:$0]  (!%p10845_p5), %s15385_s18, 16, %s11072_s23, [#allocation17]  }
 0x124   : > { %s10698_s15 = smov [#allocation19]   ;;  %s10355_s5 = scalar_lea.hbm %s15388_s21, 256 }
 0x125   : > { %s709_s8 = sshll.u32 %s10698_s15, 4  ;;  %p10356_p2 = scmp.ne.s32.totalorder %s15388_s21, %s10355_s5  ;;  %s710_s8 = int_to_ptr.vmem [resolvable:$true] %s709_s8 }
 0x126   : > { %p10362_p0 = scmp.lt.u32.totalorder %s10355_s5, %s15388_s21 }
 0x127   : > { %p10358_p3 = pnand %p10356_p2, %p10859_p7 }
 0x129   : > { %p10359_p13 = pneg %p10358_p3 }
 0x12b   : > { %p10364_p1 = pnand %p10362_p0, %p10359_p13 }
 0x12d   : > { %10367 = shalt.err (!%p10364_p1)
}
 0x12e   : > { %s10368_s23 = scalar_lea.vmem %s710_s8, 256  ;;  %p10376_p9 = scmp.lt.s32.totalorder %s710_s8, %s710_s8 }
 0x12f   : > { %p10369_p4 = scmp.ne.s32.totalorder %s710_s8, %s10368_s23  ;;  %p10377_p10 = scmp.lt.s32.totalorder %s10368_s23, %s10368_s23 }
 0x131   : > { %p10371_p6 = pnand %p10369_p4, %p10859_p7  ;;  %p10378_p11 = por %p10377_p10, %p10376_p9 }
 0x133   : > { %p10372_p8 = pneg %p10371_p6 }
 0x135   : > { %p10379_p12 = pnand %p10378_p11, %p10372_p8 }
 0x137   : > { %10382 = shalt.err (!%p10379_p12)
}
 0x138   : > { %9524 = dma.hbm_to_vmem [thread:$0]  (!%p10845_p5), %s15388_s21, 256, %s710_s8, [#allocation20], %s15782_s27, %s15782_s27, %s15781_s20  }
 0x139   : > { %p15783_p2 = scmp.ne.s32.totalorder %s15773_s29, 0 }
 0x13b   : > { %749 = sbr.rel (%p15783_p2) target bundleno = 4902 (0x1326), region = 108 }
 0x142   : > { %p15784_p7 = scmp.eq.s32.totalorder %s10828_s28, 0 }
 0x144   : > { %10520 = dma.done.wait (%p15784_p7), [#allocation3], 256   ;;  %p15785_p3 = pmov %p15784_p7 }
 0x146   : > { %10522 = vsyncadd (%p15785_p3), [#allocation3], 4294967040  ;;  %p15786_p13 = pmov %p15785_p3 }
 0x147   : > { %p15787_p0 = pmov %p15785_p3 }
 0x148   : > { %10524 = dma.done.wait (%p15786_p13), [#allocation5], 528  }
 0x149   : > { %10526 = vsyncadd (%p15787_p0), [#allocation5], 4294966768  ;;  %p15788_p1 = pmov %p15787_p0 }
 0x14a   : > { %p15789_p5 = pmov %p15787_p0 }
 0x14b   : > { %10528 = dma.done.wait (%p15788_p1), [#allocation8], 528  }
 0x14c   : > { %10530 = vsyncadd (%p15789_p5), [#allocation8], 4294966768  ;;  %p15790_p4 = pmov %p15787_p0 }
 0x14d   : > { %p15791_p6 = pmov %p15787_p0 }
 0x14e   : > { %10532 = dma.done.wait (%p15790_p4), [#allocation11], 32  }
 0x14f   : > { %10534 = vsyncadd (%p15791_p6), [#allocation11], 4294967264  ;;  %p15792_p8 = pmov %p15787_p0 }
 0x150   : > { %p15793_p9 = pmov %p15787_p0 }
 0x151   : > { %10536 = dma.done.wait (%p15792_p8), [#allocation14], 1040  }
 0x152   : > { %10538 = vsyncadd (%p15793_p9), [#allocation14], 4294966256  ;;  %p15794_p10 = pmov %p15787_p0 }
 0x153   : > { %p15795_p11 = pmov %p15787_p0 }
 0x154   : > { %10540 = dma.done.wait (%p15794_p10), [#allocation17], 32  }
 0x155   : > { %10542 = vsyncadd (%p15795_p11), [#allocation17], 4294967264  ;;  %p15796_p12 = pmov %p15787_p0 }
 0x156   : > { %p15797_p2 = pmov %p15787_p0 }
 0x157   : > { %10544 = dma.done.wait (%p15796_p12), [#allocation20], 256  }
 0x158   : > { %10546 = vsyncadd (%p15797_p2), [#allocation20], 4294967040  ;;  %p865_p7 = scmp.lt.s32.totalorder %s10828_s28, 1  ;;  %v11177_v0 = vld [vmem:[#allocation2] sm:$0xf]  ;;  %s15802_s8 = sld [smem:[#allocation357_spill]] }
 0x159   : > { %15798 = vst [vmem:[#allocation29_spill] sm:$0xff] %v11177_v0  ;;  %v11179_v1 = vld [vmem:[#allocation2 + $0x4] sm:$0xf]  ;;  %v11181_v2 = vld [vmem:[#allocation2 + $0x8] sm:$0xf]  ;;  %v11221_v16 = vld [vmem:[%s15374_s7 + $0x10] sm:$0xff] }
 0x15a   : > { %s16705_s28 = smov (!%p865_p7, %s10828_s28), 1  ;;  %15799 = vst [vmem:[#allocation30_spill] sm:$0xff] %v11179_v1  ;;  %15800 = vst [vmem:[#allocation31_spill] sm:$0xff] %v11181_v2  ;;  %v11183_v3 = vld [vmem:[#allocation2 + $0xc] sm:$0xf]  ;;  %v11211_v14 = vld [vmem:[%s15374_s7] sm:$0xff] }
 0x15b   : > { %s8211_s29 = sshll.u32 %s16705_s28, 4  ;;  %15801 = vst [vmem:[#allocation32_spill] sm:$0xff] %v11183_v3  ;;  %v11190_v5 = vld [vmem:[#allocation4] sm:$0xf]  ;;  %v11192_v6 = vld [vmem:[#allocation4 + $0x4] sm:$0xf] }
 0x15c   : > { %s11175_s20 = scalar_lea.vmem %s15389_s22, %s8211_s29  ;;  %15804 = vst [vmem:[#allocation34_spill] sm:$0xff] %v11190_v5  ;;  %15805 = vst [vmem:[#allocation35_spill] sm:$0xff] %v11192_v6  ;;  %v11194_v7 = vld [vmem:[#allocation4 + $0x8] sm:$0xf]  ;;  %v11196_v8 = vld [vmem:[#allocation4 + $0xc] sm:$0xf] }
 0x15d   : > { %15806 = vst [vmem:[#allocation36_spill] sm:$0xff] %v11194_v7  ;;  %15807 = vst [vmem:[#allocation37_spill] sm:$0xff] %v11196_v8  ;;  %v11198_v9 = vld [vmem:[#allocation4 + $0x10] sm:$0xf]  ;;  %v11200_v10 = vld [vmem:[#allocation4 + $0x14] sm:$0xf] }
 0x15e   : > { %v11188_v4 = vld [vmem:[%s15802_s8] ss:$0 sm:$0xff]  ;;  %15808 = vst [vmem:[#allocation38_spill] sm:$0xff] %v11198_v9  ;;  %15809 = vst [vmem:[#allocation39_spill] sm:$0xff] %v11200_v10  ;;  %v11202_v11 = vld [vmem:[#allocation4 + $0x18] sm:$0xf] }
 0x15f   : > { %15803 = vst [vmem:[#allocation33_spill] sm:$0xff] %v11188_v4  ;;  %15810 = vst [vmem:[#allocation40_spill] sm:$0xff] %v11202_v11  ;;  %v11204_v12 = vld [vmem:[#allocation4 + $0x1c] sm:$0xf]  ;;  %v11206_v13 = vld [vmem:[#allocation6] ss:$0 sm:$0xff] }
 0x160   : > { %15811 = vst [vmem:[#allocation41_spill] sm:$0xff] %v11204_v12  ;;  %15812 = vst [vmem:[#allocation42_spill] sm:$0xff] %v11206_v13  ;;  %v11216_v15 = vld [vmem:[%s15374_s7 + $0x8] sm:$0xff]  ;;  %v11226_v17 = vld [vmem:[%s15374_s7 + $0x18] sm:$0xff]  ;;  %s15865_s29 = sld [smem:[#allocation361_spill]]  ;;  %s15871_s24 = sld [smem:[#allocation362_spill]] }
 0x161   : > { %15813 = vst [vmem:[#allocation43_spill] sm:$0xff] %v11211_v14  ;;  %15814 = vst [vmem:[#allocation44_spill] sm:$0xff] %v11216_v15  ;;  %v11231_v18 = vld [vmem:[%s15374_s7 + $0x20] sm:$0xff]  ;;  %v11236_v19 = vld [vmem:[%s15374_s7 + $0x28] sm:$0xff]  ;;  %s15881_s30 = sld [smem:[#allocation363_spill]]  ;;  %s8209_s25 = sshll.u32 %s16705_s28, 8 }
 0x162   : > { %15815 = vst [vmem:[#allocation45_spill] sm:$0xff] %v11221_v16  ;;  %15816 = vst [vmem:[#allocation46_spill] sm:$0xff] %v11226_v17  ;;  %v11241_v20 = vld [vmem:[%s15374_s7 + $0x30] sm:$0xff]  ;;  %v11246_v21 = vld [vmem:[%s15374_s7 + $0x38] sm:$0xff]  ;;  %s15904_s8 = sld [smem:[#allocation353_spill]]  ;;  %s15907_s1 = sld [smem:[#allocation364_spill]] }
 0x163   : > { %15817 = vst [vmem:[#allocation47_spill] sm:$0xff] %v11231_v18  ;;  %15818 = vst [vmem:[#allocation48_spill] sm:$0xff] %v11236_v19  ;;  %v11251_v22 = vld [vmem:[%s15374_s7 + $0x40] sm:$0xff]  ;;  %v11256_v23 = vld [vmem:[%s15374_s7 + $0x48] sm:$0xff]  ;;  %s15939_s15 = sld [smem:[#allocation355_spill]]  ;;  %s15970_s19 = sld [smem:[#allocation354_spill]] }
 0x164   : > { %15819 = vst [vmem:[#allocation49_spill] sm:$0xff] %v11241_v20  ;;  %15820 = vst [vmem:[#allocation50_spill] sm:$0xff] %v11246_v21  ;;  %v11261_v24 = vld [vmem:[%s15374_s7 + $0x50] sm:$0xff]  ;;  %v11266_v25 = vld [vmem:[%s15374_s7 + $0x58] sm:$0xff]  ;;  %s12235_s6 = smov 0  }
 0x165   : > { %15821 = vst [vmem:[#allocation51_spill] sm:$0xff] %v11251_v22  ;;  %15822 = vst [vmem:[#allocation52_spill] sm:$0xff] %v11256_v23  ;;  %v11268_v26 = vld [vmem:[#allocation7] ss:$0 sm:$0xff]  ;;  %v11270_v27 = vld [vmem:[#allocation9] sm:$0xff] }
 0x166   : > { %15823 = vst [vmem:[#allocation53_spill] sm:$0xff] %v11261_v24  ;;  %15824 = vst [vmem:[#allocation54_spill] sm:$0xff] %v11266_v25  ;;  %v11272_v28 = vld [vmem:[#allocation9 + $0x8] sm:$0xff]  ;;  %v11274_v29 = vld [vmem:[#allocation9 + $0x10] sm:$0xff] }
 0x167   : > { %15825 = vst [vmem:[#allocation55_spill] sm:$0xff] %v11268_v26  ;;  %15826 = vst [vmem:[#allocation56_spill] sm:$0xff] %v11270_v27  ;;  %v11276_v30 = vld [vmem:[#allocation9 + $0x18] sm:$0xff]  ;;  %v11278_v31 = vld [vmem:[#allocation10] ss:$0 sm:$0xff] }
 0x168   : > { %15827 = vst [vmem:[#allocation57_spill] sm:$0xff] %v11272_v28  ;;  %15828 = vst [vmem:[#allocation58_spill] sm:$0xff] %v11274_v29  ;;  %v11283_v32 = vld [vmem:[%s15378_s11] sm:$0xff]  ;;  %v11288_v33 = vld [vmem:[%s15378_s11 + $0x8] sm:$0xff]  ;;  %s11600_s4 = scalar_lea.vmem %s15904_s8, %s8209_s25 }
 0x169   : > { %15829 = vst [vmem:[#allocation59_spill] sm:$0xff] %v11276_v30  ;;  %15830 = vst [vmem:[#allocation60_spill] sm:$0xff] %v11278_v31  ;;  %v11293_v34 = vld [vmem:[%s15378_s11 + $0x10] sm:$0xff]  ;;  %v11298_v35 = vld [vmem:[%s15378_s11 + $0x18] sm:$0xff]  ;;  %s11720_s8 = scalar_lea.vmem %s15939_s15, %s8209_s25  ;;  %s9439_s25 = smul.u32 768, %s16705_s28 }
 0x16a   : > { %15831 = vst [vmem:[#allocation61_spill] sm:$0xff] %v11283_v32  ;;  %15832 = vst [vmem:[#allocation62_spill] sm:$0xff] %v11288_v33  ;;  %v11303_v36 = vld [vmem:[%s15378_s11 + $0x20] sm:$0xff]  ;;  %v11308_v37 = vld [vmem:[%s15378_s11 + $0x28] sm:$0xff] }
 0x16b   : > { %15833 = vst [vmem:[#allocation63_spill] sm:$0xff] %v11293_v34  ;;  %15834 = vst [vmem:[#allocation64_spill] sm:$0xff] %v11298_v35  ;;  %v11313_v38 = vld [vmem:[%s15378_s11 + $0x30] sm:$0xff]  ;;  %v11318_v39 = vld [vmem:[%s15378_s11 + $0x38] sm:$0xff]  ;;  %s11816_s5 = scalar_lea.vmem %s15970_s19, %s9439_s25 }
 0x16c   : > { %15835 = vst [vmem:[#allocation65_spill] sm:$0xff] %v11303_v36  ;;  %15836 = vst [vmem:[#allocation66_spill] sm:$0xff] %v11308_v37  ;;  %v11323_v40 = vld [vmem:[%s15378_s11 + $0x40] sm:$0xff]  ;;  %v11328_v41 = vld [vmem:[%s15378_s11 + $0x48] sm:$0xff] }
 0x16d   : > { %15837 = vst [vmem:[#allocation67_spill] sm:$0xff] %v11313_v38  ;;  %15838 = vst [vmem:[#allocation68_spill] sm:$0xff] %v11318_v39  ;;  %v11333_v42 = vld [vmem:[%s15378_s11 + $0x50] sm:$0xff]  ;;  %v11338_v43 = vld [vmem:[%s15378_s11 + $0x58] sm:$0xff] }
 0x16e   : > { %15839 = vst [vmem:[#allocation69_spill] sm:$0xff] %v11323_v40  ;;  %15840 = vst [vmem:[#allocation70_spill] sm:$0xff] %v11328_v41  ;;  %v11343_v44 = vld [vmem:[%s15378_s11 + $0x60] sm:$0xff]  ;;  %v11348_v45 = vld [vmem:[%s15378_s11 + $0x68] sm:$0xff] }
 0x16f   : > { %15841 = vst [vmem:[#allocation71_spill] sm:$0xff] %v11333_v42  ;;  %15842 = vst [vmem:[#allocation72_spill] sm:$0xff] %v11338_v43  ;;  %v11353_v46 = vld [vmem:[%s15378_s11 + $0x70] sm:$0xff]  ;;  %v11358_v47 = vld [vmem:[%s15378_s11 + $0x78] sm:$0xff] }
 0x170   : > { %15843 = vst [vmem:[#allocation73_spill] sm:$0xff] %v11343_v44  ;;  %15844 = vst [vmem:[#allocation74_spill] sm:$0xff] %v11348_v45  ;;  %v11363_v48 = vld [vmem:[%s15378_s11 + $0x80] sm:$0xff]  ;;  %v11368_v49 = vld [vmem:[%s15378_s11 + $0x88] sm:$0xff] }
 0x171   : > { %15845 = vst [vmem:[#allocation75_spill] sm:$0xff] %v11353_v46  ;;  %15846 = vst [vmem:[#allocation76_spill] sm:$0xff] %v11358_v47  ;;  %v11373_v50 = vld [vmem:[%s15378_s11 + $0x90] sm:$0xff]  ;;  %v11378_v51 = vld [vmem:[%s15378_s11 + $0x98] sm:$0xff] }
 0x172   : > { %15847 = vst [vmem:[#allocation77_spill] sm:$0xff] %v11363_v48  ;;  %15848 = vst [vmem:[#allocation78_spill] sm:$0xff] %v11368_v49  ;;  %v11383_v52 = vld [vmem:[%s15378_s11 + $0xa0] sm:$0xff]  ;;  %v11388_v53 = vld [vmem:[%s15378_s11 + $0xa8] sm:$0xff] }
 0x173   : > { %15849 = vst [vmem:[#allocation79_spill] sm:$0xff] %v11373_v50  ;;  %15850 = vst [vmem:[#allocation80_spill] sm:$0xff] %v11378_v51  ;;  %v11393_v54 = vld [vmem:[%s15378_s11 + $0xb0] sm:$0xff]  ;;  %v11398_v55 = vld [vmem:[%s15378_s11 + $0xb8] sm:$0xff] }
 0x174   : > { %15851 = vst [vmem:[#allocation81_spill] sm:$0xff] %v11383_v52  ;;  %15852 = vst [vmem:[#allocation82_spill] sm:$0xff] %v11388_v53  ;;  %v11400_v56 = vld [vmem:[#allocation12] ss:$0 sm:$0xff]  ;;  %v11402_v57 = vld [vmem:[#allocation13] sm:$0xff] }
 0x175   : > { %15853 = vst [vmem:[#allocation83_spill] sm:$0xff] %v11393_v54  ;;  %15854 = vst [vmem:[#allocation84_spill] sm:$0xff] %v11398_v55  ;;  %v11404_v58 = vld [vmem:[#allocation13 + $0x8] sm:$0xff]  ;;  %v11406_v59 = vld [vmem:[#allocation13 + $0x10] sm:$0xff] }
 0x176   : > { %15855 = vst [vmem:[#allocation85_spill] sm:$0xff] %v11400_v56  ;;  %15856 = vst [vmem:[#allocation86_spill] sm:$0xff] %v11402_v57  ;;  %v11408_v60 = vld [vmem:[#allocation13 + $0x18] sm:$0xff]  ;;  %v11410_v61 = vld [vmem:[#allocation13 + $0x20] sm:$0xff] }
 0x177   : > { %15857 = vst [vmem:[#allocation87_spill] sm:$0xff] %v11404_v58  ;;  %15858 = vst [vmem:[#allocation88_spill] sm:$0xff] %v11406_v59  ;;  %v11412_v62 = vld [vmem:[#allocation13 + $0x28] sm:$0xff]  ;;  %v11414_v63 = vld [vmem:[#allocation13 + $0x30] sm:$0xff] }
 0x178   : > { %15859 = vst [vmem:[#allocation89_spill] sm:$0xff] %v11408_v60  ;;  %15860 = vst [vmem:[#allocation90_spill] sm:$0xff] %v11410_v61  ;;  %v11416_v31 = vld [vmem:[#allocation13 + $0x38] sm:$0xff]  ;;  %v11418_v54 = vld [vmem:[#allocation15] ss:$0 sm:$0xff] }
 0x179   : > { %15861 = vst [vmem:[#allocation91_spill] sm:$0xff] %v11412_v62  ;;  %15862 = vst [vmem:[#allocation92_spill] sm:$0xff] %v11414_v63  ;;  %v11423_v57 = vld [vmem:[%s15865_s29] sm:$0xff]  ;;  %v11428_v59 = vld [vmem:[%s15865_s29 + $0x8] sm:$0xff] }
 0x17a   : > { %15863 = vst [vmem:[#allocation93_spill] sm:$0xff] %v11416_v31  ;;  %15864 = vst [vmem:[#allocation94_spill] sm:$0xff] %v11418_v54  ;;  %v11433_v62 = vld [vmem:[%s15865_s29 + $0x10] sm:$0xff]  ;;  %v11438_v31 = vld [vmem:[%s15865_s29 + $0x18] sm:$0xff] }
 0x17b   : > { %15866 = vst [vmem:[#allocation95_spill] sm:$0xff] %v11423_v57  ;;  %15867 = vst [vmem:[#allocation96_spill] sm:$0xff] %v11428_v59  ;;  %v11440_v54 = vld [vmem:[#allocation16] ss:$0 sm:$0xff]  ;;  %v11445_v63 = vld [vmem:[%s15871_s24] sm:$0xff] }
 0x17c   : > { %15868 = vst [vmem:[#allocation97_spill] sm:$0xff] %v11433_v62  ;;  %15869 = vst [vmem:[#allocation98_spill] sm:$0xff] %v11438_v31  ;;  %v11450_v61 = vld [vmem:[%s15871_s24 + $0x8] sm:$0xff]  ;;  %v11455_v60 = vld [vmem:[%s15871_s24 + $0x10] sm:$0xff] }
 0x17d   : > { %15870 = vst [vmem:[#allocation99_spill] sm:$0xff] %v11440_v54  ;;  %15872 = vst [vmem:[#allocation100_spill] sm:$0xff] %v11445_v63  ;;  %v11460_v58 = vld [vmem:[%s15871_s24 + $0x18] sm:$0xff]  ;;  %v11465_v54 = vld [vmem:[%s15871_s24 + $0x20] sm:$0xff] }
 0x17e   : > { %15873 = vst [vmem:[#allocation101_spill] sm:$0xff] %v11450_v61  ;;  %15874 = vst [vmem:[#allocation102_spill] sm:$0xff] %v11455_v60  ;;  %v11470_v63 = vld [vmem:[%s15871_s24 + $0x28] sm:$0xff]  ;;  %v11475_v61 = vld [vmem:[%s15871_s24 + $0x30] sm:$0xff] }
 0x17f   : > { %15875 = vst [vmem:[#allocation103_spill] sm:$0xff] %v11460_v58  ;;  %15876 = vst [vmem:[#allocation104_spill] sm:$0xff] %v11465_v54  ;;  %v11480_v58 = vld [vmem:[%s15871_s24 + $0x38] sm:$0xff]  ;;  %v11487_v54 = vld [vmem:[%s15881_s30] sm:$0xff] }
 0x180   : > { %15877 = vst [vmem:[#allocation105_spill] sm:$0xff] %v11470_v63  ;;  %15878 = vst [vmem:[#allocation106_spill] sm:$0xff] %v11475_v61  ;;  %v11482_v60 = vld [vmem:[#allocation18] ss:$0 sm:$0xff]  ;;  %v11492_v63 = vld [vmem:[%s15881_s30 + $0x8] sm:$0xff] }
 0x181   : > { %15879 = vst [vmem:[#allocation107_spill] sm:$0xff] %v11480_v58  ;;  %15880 = vst [vmem:[#allocation108_spill] sm:$0xff] %v11482_v60  ;;  %v11497_v61 = vld [vmem:[%s15881_s30 + $0x10] sm:$0xff]  ;;  %v11502_v58 = vld [vmem:[%s15881_s30 + $0x18] sm:$0xff] }
 0x182   : > { %15882 = vst [vmem:[#allocation109_spill] sm:$0xff] %v11487_v54  ;;  %15883 = vst [vmem:[#allocation110_spill] sm:$0xff] %v11492_v63  ;;  %v11507_v60 = vld [vmem:[%s15881_s30 + $0x20] sm:$0xff]  ;;  %v11512_v31 = vld [vmem:[%s15881_s30 + $0x28] sm:$0xff] }
 0x183   : > { %15884 = vst [vmem:[#allocation111_spill] sm:$0xff] %v11497_v61  ;;  %15885 = vst [vmem:[#allocation112_spill] sm:$0xff] %v11502_v58  ;;  %v11517_v62 = vld [vmem:[%s15881_s30 + $0x30] sm:$0xff]  ;;  %v11522_v59 = vld [vmem:[%s15881_s30 + $0x38] sm:$0xff] }
 0x184   : > { %15886 = vst [vmem:[#allocation113_spill] sm:$0xff] %v11507_v60  ;;  %15887 = vst [vmem:[#allocation114_spill] sm:$0xff] %v11512_v31  ;;  %v11527_v57 = vld [vmem:[%s15881_s30 + $0x40] sm:$0xff]  ;;  %v11532_v56 = vld [vmem:[%s15881_s30 + $0x48] sm:$0xff] }
 0x185   : > { %15888 = vst [vmem:[#allocation115_spill] sm:$0xff] %v11517_v62  ;;  %15889 = vst [vmem:[#allocation116_spill] sm:$0xff] %v11522_v59  ;;  %v11537_v55 = vld [vmem:[%s15881_s30 + $0x50] sm:$0xff]  ;;  %v11542_v53 = vld [vmem:[%s15881_s30 + $0x58] sm:$0xff] }
 0x186   : > { %15890 = vst [vmem:[#allocation117_spill] sm:$0xff] %v11527_v57  ;;  %15891 = vst [vmem:[#allocation118_spill] sm:$0xff] %v11532_v56  ;;  %v11547_v52 = vld [vmem:[%s15881_s30 + $0x60] sm:$0xff]  ;;  %v11553_v51 = vld [vmem:[%s15881_s30 + $0x68] sm:$0xff] }
 0x187   : > { %15892 = vst [vmem:[#allocation119_spill] sm:$0xff] %v11537_v55  ;;  %15893 = vst [vmem:[#allocation120_spill] sm:$0xff] %v11542_v53  ;;  %v11558_v50 = vld [vmem:[%s15881_s30 + $0x70] sm:$0xff]  ;;  %v11563_v49 = vld [vmem:[%s15881_s30 + $0x78] sm:$0xff] }
 0x188   : > { %15894 = vst [vmem:[#allocation121_spill] sm:$0xff] %v11547_v52  ;;  %15895 = vst [vmem:[#allocation122_spill] sm:$0xff] %v11553_v51  ;;  %v11568_v48 = vld [vmem:[%s15881_s30 + $0x80] sm:$0xff]  ;;  %v11573_v47 = vld [vmem:[%s15881_s30 + $0x88] sm:$0xff] }
 0x189   : > { %15896 = vst [vmem:[#allocation123_spill] sm:$0xff] %v11558_v50  ;;  %15897 = vst [vmem:[#allocation124_spill] sm:$0xff] %v11563_v49  ;;  %v11578_v46 = vld [vmem:[%s15881_s30 + $0x90] sm:$0xff]  ;;  %v11583_v45 = vld [vmem:[%s15881_s30 + $0x98] sm:$0xff] }
 0x18a   : > { %15898 = vst [vmem:[#allocation125_spill] sm:$0xff] %v11568_v48  ;;  %15899 = vst [vmem:[#allocation126_spill] sm:$0xff] %v11573_v47  ;;  %v11588_v44 = vld [vmem:[%s15881_s30 + $0xa0] sm:$0xff]  ;;  %v11593_v43 = vld [vmem:[%s15881_s30 + $0xa8] sm:$0xff] }
 0x18b   : > { %15900 = vst [vmem:[#allocation127_spill] sm:$0xff] %v11578_v46  ;;  %15901 = vst [vmem:[#allocation128_spill] sm:$0xff] %v11583_v45  ;;  %v11605_v42 = vld [vmem:[%s15881_s30 + $0xb0] sm:$0xff]  ;;  %v11610_v41 = vld [vmem:[%s15881_s30 + $0xb8] sm:$0xff] }
 0x18c   : > { %15902 = vst [vmem:[#allocation129_spill] sm:$0xff] %v11588_v44  ;;  %15903 = vst [vmem:[#allocation130_spill] sm:$0xff] %v11593_v43  ;;  %v11615_v40 = vld [vmem:[%s15907_s1] sm:$0xff]  ;;  %v11620_v39 = vld [vmem:[%s15907_s1 + $0x8] sm:$0xff] }
 0x18d   : > { %15905 = vst [vmem:[#allocation131_spill] sm:$0xff] %v11605_v42  ;;  %15906 = vst [vmem:[#allocation132_spill] sm:$0xff] %v11610_v41  ;;  %v11625_v38 = vld [vmem:[%s15907_s1 + $0x10] sm:$0xff]  ;;  %v11630_v37 = vld [vmem:[%s15907_s1 + $0x18] sm:$0xff] }
 0x18e   : > { %15908 = vst [vmem:[#allocation133_spill] sm:$0xff] %v11615_v40  ;;  %15909 = vst [vmem:[#allocation134_spill] sm:$0xff] %v11620_v39  ;;  %v11635_v40 = vld [vmem:[%s15907_s1 + $0x20] sm:$0xff]  ;;  %v11640_v39 = vld [vmem:[%s15907_s1 + $0x28] sm:$0xff] }
 0x18f   : > { %15910 = vst [vmem:[#allocation135_spill] sm:$0xff] %v11625_v38  ;;  %15911 = vst [vmem:[#allocation136_spill] sm:$0xff] %v11630_v37  ;;  %v11642_v38 = vld [vmem:[#allocation19] sm:$0xff]  ;;  %v11644_v36 = vld [vmem:[#allocation19 + $0x8] sm:$0xff] }
 0x190   : > { %15912 = vst [vmem:[#allocation137_spill] sm:$0xff] %v11635_v40  ;;  %15913 = vst [vmem:[#allocation138_spill] sm:$0xff] %v11640_v39  ;;  %v11647_v37 = vld [vmem:[%s11600_s4] sm:$0xff]   ;;  %v11650_v35 = vld [vmem:[%s11600_s4 + $0x8] sm:$0xff]  }
 0x191   : > { %15914 = vst [vmem:[#allocation139_spill] sm:$0xff] %v11642_v38  ;;  %15915 = vst [vmem:[#allocation140_spill] sm:$0xff] %v11644_v36  ;;  %v11653_v40 = vld [vmem:[%s11600_s4 + $0x10] sm:$0xff]   ;;  %v11656_v34 = vld [vmem:[%s11600_s4 + $0x18] sm:$0xff]  }
 0x192   : > { %15916 = vst [vmem:[#allocation141_spill] sm:$0xff] %v11647_v37  ;;  %15917 = vst [vmem:[#allocation142_spill] sm:$0xff] %v11650_v35  ;;  %v11659_v39 = vld [vmem:[%s11600_s4 + $0x20] sm:$0xff]   ;;  %v11662_v38 = vld [vmem:[%s11600_s4 + $0x28] sm:$0xff]  }
 0x193   : > { %15918 = vst [vmem:[#allocation143_spill] sm:$0xff] %v11653_v40  ;;  %15919 = vst [vmem:[#allocation144_spill] sm:$0xff] %v11656_v34  ;;  %v11665_v36 = vld [vmem:[%s11600_s4 + $0x30] sm:$0xff]   ;;  %v11668_v33 = vld [vmem:[%s11600_s4 + $0x38] sm:$0xff]  }
 0x194   : > { %15920 = vst [vmem:[#allocation145_spill] sm:$0xff] %v11659_v39  ;;  %15921 = vst [vmem:[#allocation146_spill] sm:$0xff] %v11662_v38  ;;  %v11671_v32 = vld [vmem:[%s11600_s4 + $0x40] sm:$0xff]   ;;  %v11674_v30 = vld [vmem:[%s11600_s4 + $0x48] sm:$0xff]  }
 0x195   : > { %15922 = vst [vmem:[#allocation147_spill] sm:$0xff] %v11665_v36  ;;  %15923 = vst [vmem:[#allocation148_spill] sm:$0xff] %v11668_v33  ;;  %v11677_v29 = vld [vmem:[%s11600_s4 + $0x50] sm:$0xff]   ;;  %v11680_v42 = vld [vmem:[%s11600_s4 + $0x58] sm:$0xff]  }
 0x196   : > { %15924 = vst [vmem:[#allocation149_spill] sm:$0xff] %v11671_v32  ;;  %15925 = vst [vmem:[#allocation150_spill] sm:$0xff] %v11674_v30  ;;  %v11683_v41 = vld [vmem:[%s11600_s4 + $0x60] sm:$0xff]   ;;  %v11686_v44 = vld [vmem:[%s11600_s4 + $0x68] sm:$0xff]  }
 0x197   : > { %15926 = vst [vmem:[#allocation151_spill] sm:$0xff] %v11677_v29  ;;  %15927 = vst [vmem:[#allocation152_spill] sm:$0xff] %v11680_v42  ;;  %v11689_v43 = vld [vmem:[%s11600_s4 + $0x70] sm:$0xff]   ;;  %v11692_v46 = vld [vmem:[%s11600_s4 + $0x78] sm:$0xff]  }
 0x198   : > { %15928 = vst [vmem:[#allocation153_spill] sm:$0xff] %v11683_v41  ;;  %15929 = vst [vmem:[#allocation154_spill] sm:$0xff] %v11686_v44  ;;  %v11695_v45 = vld [vmem:[%s11600_s4 + $0x80] sm:$0xff]   ;;  %v11698_v48 = vld [vmem:[%s11600_s4 + $0x88] sm:$0xff]  }
 0x199   : > { %15930 = vst [vmem:[#allocation155_spill] sm:$0xff] %v11689_v43  ;;  %15931 = vst [vmem:[#allocation156_spill] sm:$0xff] %v11692_v46  ;;  %v11701_v47 = vld [vmem:[%s11600_s4 + $0x90] sm:$0xff]   ;;  %v11704_v50 = vld [vmem:[%s11600_s4 + $0x98] sm:$0xff]  }
 0x19a   : > { %15932 = vst [vmem:[#allocation157_spill] sm:$0xff] %v11695_v45  ;;  %15933 = vst [vmem:[#allocation158_spill] sm:$0xff] %v11698_v48  ;;  %v11707_v49 = vld [vmem:[%s11600_s4 + $0xa0] sm:$0xff]   ;;  %v11710_v52 = vld [vmem:[%s11600_s4 + $0xa8] sm:$0xff]  }
 0x19b   : > { %15934 = vst [vmem:[#allocation159_spill] sm:$0xff] %v11701_v47  ;;  %15935 = vst [vmem:[#allocation160_spill] sm:$0xff] %v11704_v50  ;;  %v11713_v51 = vld [vmem:[%s11600_s4 + $0xb0] sm:$0xff]   ;;  %v11723_v55 = vld [vmem:[%s11600_s4 + $0xb8] sm:$0xff]  }
 0x19c   : > { %15936 = vst [vmem:[#allocation161_spill] sm:$0xff] %v11707_v49  ;;  %15937 = vst [vmem:[#allocation162_spill] sm:$0xff] %v11710_v52  ;;  %v11726_v53 = vld [vmem:[%s11600_s4 + $0xc0] sm:$0xff]   ;;  %v11729_v57 = vld [vmem:[%s11600_s4 + $0xc8] sm:$0xff]  }
 0x19d   : > { %15938 = vst [vmem:[#allocation163_spill] sm:$0xff] %v11713_v51  ;;  %15940 = vst [vmem:[#allocation164_spill] sm:$0xff] %v11723_v55  ;;  %v11732_v56 = vld [vmem:[%s11600_s4 + $0xd0] sm:$0xff]   ;;  %v11735_v62 = vld [vmem:[%s11600_s4 + $0xd8] sm:$0xff]  }
 0x19e   : > { %15941 = vst [vmem:[#allocation165_spill] sm:$0xff] %v11726_v53  ;;  %15942 = vst [vmem:[#allocation166_spill] sm:$0xff] %v11729_v57  ;;  %v11738_v59 = vld [vmem:[%s11600_s4 + $0xe0] sm:$0xff]   ;;  %v11741_v60 = vld [vmem:[%s11600_s4 + $0xe8] sm:$0xff]  }
 0x19f   : > { %15943 = vst [vmem:[#allocation167_spill] sm:$0xff] %v11732_v56  ;;  %15944 = vst [vmem:[#allocation168_spill] sm:$0xff] %v11735_v62  ;;  %v11744_v31 = vld [vmem:[%s11600_s4 + $0xf0] sm:$0xff]   ;;  %v11747_v61 = vld [vmem:[%s11600_s4 + $0xf8] sm:$0xff]  }
 0x1a0   : > { %15945 = vst [vmem:[#allocation169_spill] sm:$0xff] %v11738_v59  ;;  %15946 = vst [vmem:[#allocation170_spill] sm:$0xff] %v11741_v60  ;;  %v11750_v58 = vld [vmem:[%s11720_s8] sm:$0xff]  ;;  %v11753_v54 = vld [vmem:[%s11720_s8 + $0x8] sm:$0xff] }
 0x1a1   : > { %15947 = vst [vmem:[#allocation171_spill] sm:$0xff] %v11744_v31  ;;  %15948 = vst [vmem:[#allocation172_spill] sm:$0xff] %v11747_v61  ;;  %v11756_v28 = vld [vmem:[%s11720_s8 + $0x10] sm:$0xff]  ;;  %v11759_v27 = vld [vmem:[%s11720_s8 + $0x18] sm:$0xff] }
 0x1a2   : > { %15949 = vst [vmem:[#allocation173_spill] sm:$0xff] %v11750_v58  ;;  %15950 = vst [vmem:[#allocation174_spill] sm:$0xff] %v11753_v54  ;;  %v11762_v63 = vld [vmem:[%s11720_s8 + $0x20] sm:$0xff]  ;;  %v11765_v26 = vld [vmem:[%s11720_s8 + $0x28] sm:$0xff] }
 0x1a3   : > { %15951 = vst [vmem:[#allocation175_spill] sm:$0xff] %v11756_v28  ;;  %15952 = vst [vmem:[#allocation176_spill] sm:$0xff] %v11759_v27  ;;  %v11768_v25 = vld [vmem:[%s11720_s8 + $0x30] sm:$0xff]  ;;  %v11771_v24 = vld [vmem:[%s11720_s8 + $0x38] sm:$0xff] }
 0x1a4   : > { %15953 = vst [vmem:[#allocation177_spill] sm:$0xff] %v11762_v63  ;;  %15954 = vst [vmem:[#allocation178_spill] sm:$0xff] %v11765_v26  ;;  %v11774_v23 = vld [vmem:[%s11720_s8 + $0x40] sm:$0xff]  ;;  %v11778_v22 = vld [vmem:[%s11720_s8 + $0x48] sm:$0xff] }
 0x1a5   : > { %15955 = vst [vmem:[#allocation179_spill] sm:$0xff] %v11768_v25  ;;  %15956 = vst [vmem:[#allocation180_spill] sm:$0xff] %v11771_v24  ;;  %v11781_v21 = vld [vmem:[%s11720_s8 + $0x50] sm:$0xff]  ;;  %v11784_v20 = vld [vmem:[%s11720_s8 + $0x58] sm:$0xff] }
 0x1a6   : > { %15957 = vst [vmem:[#allocation181_spill] sm:$0xff] %v11774_v23  ;;  %15958 = vst [vmem:[#allocation182_spill] sm:$0xff] %v11778_v22  ;;  %v11787_v19 = vld [vmem:[%s11720_s8 + $0x60] sm:$0xff]  ;;  %v11790_v18 = vld [vmem:[%s11720_s8 + $0x68] sm:$0xff] }
 0x1a7   : > { %15959 = vst [vmem:[#allocation183_spill] sm:$0xff] %v11781_v21  ;;  %15960 = vst [vmem:[#allocation184_spill] sm:$0xff] %v11784_v20  ;;  %v11793_v17 = vld [vmem:[%s11720_s8 + $0x70] sm:$0xff]  ;;  %v11796_v16 = vld [vmem:[%s11720_s8 + $0x78] sm:$0xff] }
 0x1a8   : > { %15961 = vst [vmem:[#allocation185_spill] sm:$0xff] %v11787_v19  ;;  %15962 = vst [vmem:[#allocation186_spill] sm:$0xff] %v11790_v18  ;;  %v11799_v15 = vld [vmem:[%s11720_s8 + $0x80] sm:$0xff]  ;;  %v11802_v14 = vld [vmem:[%s11720_s8 + $0x88] sm:$0xff] }
 0x1a9   : > { %15963 = vst [vmem:[#allocation187_spill] sm:$0xff] %v11793_v17  ;;  %15964 = vst [vmem:[#allocation188_spill] sm:$0xff] %v11796_v16  ;;  %v11805_v21 = vld [vmem:[%s11720_s8 + $0x90] sm:$0xff]  ;;  %v11808_v20 = vld [vmem:[%s11720_s8 + $0x98] sm:$0xff] }
 0x1aa   : > { %15965 = vst [vmem:[#allocation189_spill] sm:$0xff] %v11799_v15  ;;  %15966 = vst [vmem:[#allocation190_spill] sm:$0xff] %v11802_v14  ;;  %v11811_v19 = vld [vmem:[%s11720_s8 + $0xa0] sm:$0xff]  ;;  %v11819_v15 = vld [vmem:[%s11720_s8 + $0xa8] sm:$0xff] }
 0x1ab   : > { %15967 = vst [vmem:[#allocation191_spill] sm:$0xff] %v11805_v21  ;;  %15968 = vst [vmem:[#allocation192_spill] sm:$0xff] %v11808_v20  ;;  %v11822_v14 = vld [vmem:[%s11720_s8 + $0xb0] sm:$0xff]  ;;  %v11825_v21 = vld [vmem:[%s11720_s8 + $0xb8] sm:$0xff] }
 0x1ac   : > { %15969 = vst [vmem:[#allocation193_spill] sm:$0xff] %v11811_v19  ;;  %15971 = vst [vmem:[#allocation194_spill] sm:$0xff] %v11819_v15  ;;  %v11828_v19 = vld [vmem:[%s11720_s8 + $0xc0] sm:$0xff]  ;;  %v11831_v20 = vld [vmem:[%s11720_s8 + $0xc8] sm:$0xff] }
 0x1ad   : > { %15972 = vst [vmem:[#allocation195_spill] sm:$0xff] %v11822_v14  ;;  %15973 = vst [vmem:[#allocation196_spill] sm:$0xff] %v11825_v21  ;;  %v11834_v17 = vld [vmem:[%s11720_s8 + $0xd0] sm:$0xff]  ;;  %v11837_v16 = vld [vmem:[%s11720_s8 + $0xd8] sm:$0xff] }
 0x1ae   : > { %15974 = vst [vmem:[#allocation197_spill] sm:$0xff] %v11828_v19  ;;  %15975 = vst [vmem:[#allocation198_spill] sm:$0xff] %v11831_v20  ;;  %v11840_v15 = vld [vmem:[%s11720_s8 + $0xe0] sm:$0xff]  ;;  %v11843_v14 = vld [vmem:[%s11720_s8 + $0xe8] sm:$0xff] }
 0x1af   : > { %15976 = vst [vmem:[#allocation199_spill] sm:$0xff] %v11834_v17  ;;  %15977 = vst [vmem:[#allocation200_spill] sm:$0xff] %v11837_v16  ;;  %v11846_v21 = vld [vmem:[%s11720_s8 + $0xf0] sm:$0xff]  ;;  %v11849_v19 = vld [vmem:[%s11720_s8 + $0xf8] sm:$0xff] }
 0x1b0   : > { %15978 = vst [vmem:[#allocation201_spill] sm:$0xff] %v11840_v15  ;;  %15979 = vst [vmem:[#allocation202_spill] sm:$0xff] %v11843_v14  ;;  %v11852_v20 = vld [vmem:[%s11816_s5] sm:$0xff]  ;;  %v11855_v17 = vld [vmem:[%s11816_s5 + $0x8] sm:$0xff] }
 0x1b1   : > { %15980 = vst [vmem:[#allocation203_spill] sm:$0xff] %v11846_v21  ;;  %15981 = vst [vmem:[#allocation204_spill] sm:$0xff] %v11849_v19  ;;  %v11858_v16 = vld [vmem:[%s11816_s5 + $0x10] sm:$0xff]  ;;  %v11861_v15 = vld [vmem:[%s11816_s5 + $0x18] sm:$0xff] }
 0x1b2   : > { %15982 = vst [vmem:[#allocation205_spill] sm:$0xff] %v11852_v20  ;;  %15983 = vst [vmem:[#allocation206_spill] sm:$0xff] %v11855_v17  ;;  %v11864_v14 = vld [vmem:[%s11816_s5 + $0x20] sm:$0xff]  ;;  %v11867_v21 = vld [vmem:[%s11816_s5 + $0x28] sm:$0xff] }
 0x1b3   : > { %15984 = vst [vmem:[#allocation207_spill] sm:$0xff] %v11858_v16  ;;  %15985 = vst [vmem:[#allocation208_spill] sm:$0xff] %v11861_v15  ;;  %v11870_v19 = vld [vmem:[%s11816_s5 + $0x30] sm:$0xff]  ;;  %v11873_v18 = vld [vmem:[%s11816_s5 + $0x38] sm:$0xff] }
 0x1b4   : > { %15986 = vst [vmem:[#allocation209_spill] sm:$0xff] %v11864_v14  ;;  %15987 = vst [vmem:[#allocation210_spill] sm:$0xff] %v11867_v21  ;;  %v11876_v23 = vld [vmem:[%s11816_s5 + $0x40] sm:$0xff]  ;;  %v11879_v22 = vld [vmem:[%s11816_s5 + $0x48] sm:$0xff] }
 0x1b5   : > { %15988 = vst [vmem:[#allocation211_spill] sm:$0xff] %v11870_v19  ;;  %15989 = vst [vmem:[#allocation212_spill] sm:$0xff] %v11873_v18  ;;  %v11882_v25 = vld [vmem:[%s11816_s5 + $0x50] sm:$0xff]  ;;  %v11885_v24 = vld [vmem:[%s11816_s5 + $0x58] sm:$0xff] }
 0x1b6   : > { %15990 = vst [vmem:[#allocation213_spill] sm:$0xff] %v11876_v23  ;;  %15991 = vst [vmem:[#allocation214_spill] sm:$0xff] %v11879_v22  ;;  %v11888_v63 = vld [vmem:[%s11816_s5 + $0x60] sm:$0xff]  ;;  %v11891_v26 = vld [vmem:[%s11816_s5 + $0x68] sm:$0xff] }
 0x1b7   : > { %15992 = vst [vmem:[#allocation215_spill] sm:$0xff] %v11882_v25  ;;  %15993 = vst [vmem:[#allocation216_spill] sm:$0xff] %v11885_v24  ;;  %v11894_v54 = vld [vmem:[%s11816_s5 + $0x70] sm:$0xff]  ;;  %v11897_v27 = vld [vmem:[%s11816_s5 + $0x78] sm:$0xff] }
 0x1b8   : > { %15994 = vst [vmem:[#allocation217_spill] sm:$0xff] %v11888_v63  ;;  %15995 = vst [vmem:[#allocation218_spill] sm:$0xff] %v11891_v26  ;;  %v11900_v58 = vld [vmem:[%s11816_s5 + $0x80] sm:$0xff]  ;;  %v11903_v28 = vld [vmem:[%s11816_s5 + $0x88] sm:$0xff] }
 0x1b9   : > { %15996 = vst [vmem:[#allocation219_spill] sm:$0xff] %v11894_v54  ;;  %15997 = vst [vmem:[#allocation220_spill] sm:$0xff] %v11897_v27  ;;  %v11906_v13 = vld [vmem:[%s11816_s5 + $0x90] sm:$0xff]  ;;  %v11909_v11 = vld [vmem:[%s11816_s5 + $0x98] sm:$0xff] }
 0x1ba   : > { %15998 = vst [vmem:[#allocation221_spill] sm:$0xff] %v11900_v58  ;;  %15999 = vst [vmem:[#allocation222_spill] sm:$0xff] %v11903_v28  ;;  %v11912_v12 = vld [vmem:[%s11816_s5 + $0xa0] sm:$0xff]  ;;  %v11915_v9 = vld [vmem:[%s11816_s5 + $0xa8] sm:$0xff] }
 0x1bb   : > { %16000 = vst [vmem:[#allocation223_spill] sm:$0xff] %v11906_v13  ;;  %16001 = vst [vmem:[#allocation224_spill] sm:$0xff] %v11909_v11  ;;  %v11918_v10 = vld [vmem:[%s11816_s5 + $0xb0] sm:$0xff]  ;;  %v11921_v7 = vld [vmem:[%s11816_s5 + $0xb8] sm:$0xff] }
 0x1bc   : > { %16002 = vst [vmem:[#allocation225_spill] sm:$0xff] %v11912_v12  ;;  %16003 = vst [vmem:[#allocation226_spill] sm:$0xff] %v11915_v9  ;;  %v11924_v8 = vld [vmem:[%s11816_s5 + $0xc0] sm:$0xff]  ;;  %v11927_v5 = vld [vmem:[%s11816_s5 + $0xc8] sm:$0xff] }
 0x1bd   : > { %16004 = vst [vmem:[#allocation227_spill] sm:$0xff] %v11918_v10  ;;  %16005 = vst [vmem:[#allocation228_spill] sm:$0xff] %v11921_v7  ;;  %v11930_v6 = vld [vmem:[%s11816_s5 + $0xd0] sm:$0xff]  ;;  %v11933_v12 = vld [vmem:[%s11816_s5 + $0xd8] sm:$0xff] }
 0x1be   : > { %16006 = vst [vmem:[#allocation229_spill] sm:$0xff] %v11924_v8  ;;  %16007 = vst [vmem:[#allocation230_spill] sm:$0xff] %v11927_v5  ;;  %v11936_v9 = vld [vmem:[%s11816_s5 + $0xe0] sm:$0xff]  ;;  %v11939_v10 = vld [vmem:[%s11816_s5 + $0xe8] sm:$0xff] }
 0x1bf   : > { %16008 = vst [vmem:[#allocation231_spill] sm:$0xff] %v11930_v6  ;;  %16009 = vst [vmem:[#allocation232_spill] sm:$0xff] %v11933_v12  ;;  %v11942_v7 = vld [vmem:[%s11816_s5 + $0xf0] sm:$0xff]  ;;  %v11945_v8 = vld [vmem:[%s11816_s5 + $0xf8] sm:$0xff] }
 0x1c0   : > { %16010 = vst [vmem:[#allocation233_spill] sm:$0xff] %v11936_v9  ;;  %16011 = vst [vmem:[#allocation234_spill] sm:$0xff] %v11939_v10  ;;  %v11948_v5 = vld [vmem:[%s11816_s5 + $0x100] sm:$0xff]  ;;  %v11951_v6 = vld [vmem:[%s11816_s5 + $0x108] sm:$0xff] }
 0x1c1   : > { %16012 = vst [vmem:[#allocation235_spill] sm:$0xff] %v11942_v7  ;;  %16013 = vst [vmem:[#allocation236_spill] sm:$0xff] %v11945_v8  ;;  %v11954_v12 = vld [vmem:[%s11816_s5 + $0x110] sm:$0xff]  ;;  %v11957_v9 = vld [vmem:[%s11816_s5 + $0x118] sm:$0xff] }
 0x1c2   : > { %16014 = vst [vmem:[#allocation237_spill] sm:$0xff] %v11948_v5  ;;  %16015 = vst [vmem:[#allocation238_spill] sm:$0xff] %v11951_v6  ;;  %v11960_v10 = vld [vmem:[%s11816_s5 + $0x120] sm:$0xff]  ;;  %v11963_v7 = vld [vmem:[%s11816_s5 + $0x128] sm:$0xff] }
 0x1c3   : > { %16016 = vst [vmem:[#allocation239_spill] sm:$0xff] %v11954_v12  ;;  %16017 = vst [vmem:[#allocation240_spill] sm:$0xff] %v11957_v9  ;;  %v11966_v8 = vld [vmem:[%s11816_s5 + $0x130] sm:$0xff]  ;;  %v11969_v13 = vld [vmem:[%s11816_s5 + $0x138] sm:$0xff] }
 0x1c4   : > { %16018 = vst [vmem:[#allocation241_spill] sm:$0xff] %v11960_v10  ;;  %16019 = vst [vmem:[#allocation242_spill] sm:$0xff] %v11963_v7  ;;  %v11972_v11 = vld [vmem:[%s11816_s5 + $0x140] sm:$0xff]  ;;  %v11975_v12 = vld [vmem:[%s11816_s5 + $0x148] sm:$0xff] }
 0x1c5   : > { %16020 = vst [vmem:[#allocation243_spill] sm:$0xff] %v11966_v8  ;;  %16021 = vst [vmem:[#allocation244_spill] sm:$0xff] %v11969_v13  ;;  %v11978_v9 = vld [vmem:[%s11816_s5 + $0x150] sm:$0xff]  ;;  %v11981_v10 = vld [vmem:[%s11816_s5 + $0x158] sm:$0xff] }
 0x1c6   : > { %16022 = vst [vmem:[#allocation245_spill] sm:$0xff] %v11972_v11  ;;  %16023 = vst [vmem:[#allocation246_spill] sm:$0xff] %v11975_v12  ;;  %v11984_v7 = vld [vmem:[%s11816_s5 + $0x160] sm:$0xff]  ;;  %v11987_v8 = vld [vmem:[%s11816_s5 + $0x168] sm:$0xff] }
 0x1c7   : > { %16024 = vst [vmem:[#allocation247_spill] sm:$0xff] %v11978_v9  ;;  %16025 = vst [vmem:[#allocation248_spill] sm:$0xff] %v11981_v10  ;;  %v11990_v13 = vld [vmem:[%s11816_s5 + $0x170] sm:$0xff]  ;;  %v11993_v11 = vld [vmem:[%s11816_s5 + $0x178] sm:$0xff] }
 0x1c8   : > { %16026 = vst [vmem:[#allocation249_spill] sm:$0xff] %v11984_v7  ;;  %16027 = vst [vmem:[#allocation250_spill] sm:$0xff] %v11987_v8  ;;  %v11996_v12 = vld [vmem:[%s11816_s5 + $0x180] sm:$0xff]  ;;  %v11999_v9 = vld [vmem:[%s11816_s5 + $0x188] sm:$0xff] }
 0x1c9   : > { %16028 = vst [vmem:[#allocation251_spill] sm:$0xff] %v11990_v13  ;;  %16029 = vst [vmem:[#allocation252_spill] sm:$0xff] %v11993_v11  ;;  %v12002_v10 = vld [vmem:[%s11816_s5 + $0x190] sm:$0xff]  ;;  %v12005_v7 = vld [vmem:[%s11816_s5 + $0x198] sm:$0xff] }
 0x1ca   : > { %16030 = vst [vmem:[#allocation253_spill] sm:$0xff] %v11996_v12  ;;  %16031 = vst [vmem:[#allocation254_spill] sm:$0xff] %v11999_v9  ;;  %v12008_v8 = vld [vmem:[%s11816_s5 + $0x1a0] sm:$0xff]  ;;  %v12011_v13 = vld [vmem:[%s11816_s5 + $0x1a8] sm:$0xff] }
 0x1cb   : > { %16032 = vst [vmem:[#allocation255_spill] sm:$0xff] %v12002_v10  ;;  %16033 = vst [vmem:[#allocation256_spill] sm:$0xff] %v12005_v7  ;;  %v12014_v11 = vld [vmem:[%s11816_s5 + $0x1b0] sm:$0xff]  ;;  %v12017_v12 = vld [vmem:[%s11816_s5 + $0x1b8] sm:$0xff] }
 0x1cc   : > { %16034 = vst [vmem:[#allocation257_spill] sm:$0xff] %v12008_v8  ;;  %16035 = vst [vmem:[#allocation258_spill] sm:$0xff] %v12011_v13  ;;  %v12020_v9 = vld [vmem:[%s11816_s5 + $0x1c0] sm:$0xff]  ;;  %v12023_v10 = vld [vmem:[%s11816_s5 + $0x1c8] sm:$0xff] }
 0x1cd   : > { %16036 = vst [vmem:[#allocation259_spill] sm:$0xff] %v12014_v11  ;;  %16037 = vst [vmem:[#allocation260_spill] sm:$0xff] %v12017_v12  ;;  %v12026_v7 = vld [vmem:[%s11816_s5 + $0x1d0] sm:$0xff]  ;;  %v12029_v8 = vld [vmem:[%s11816_s5 + $0x1d8] sm:$0xff] }
 0x1ce   : > { %16038 = vst [vmem:[#allocation261_spill] sm:$0xff] %v12020_v9  ;;  %16039 = vst [vmem:[#allocation262_spill] sm:$0xff] %v12023_v10  ;;  %v12032_v13 = vld [vmem:[%s11816_s5 + $0x1e0] sm:$0xff]  ;;  %v12035_v11 = vld [vmem:[%s11816_s5 + $0x1e8] sm:$0xff] }
 0x1cf   : > { %16040 = vst [vmem:[#allocation263_spill] sm:$0xff] %v12026_v7  ;;  %16041 = vst [vmem:[#allocation264_spill] sm:$0xff] %v12029_v8  ;;  %v12038_v12 = vld [vmem:[%s11816_s5 + $0x1f0] sm:$0xff]  ;;  %v12041_v9 = vld [vmem:[%s11816_s5 + $0x1f8] sm:$0xff] }
 0x1d0   : > { %16042 = vst [vmem:[#allocation265_spill] sm:$0xff] %v12032_v13  ;;  %16043 = vst [vmem:[#allocation266_spill] sm:$0xff] %v12035_v11  ;;  %v12044_v10 = vld [vmem:[%s11816_s5 + $0x200] sm:$0xff]  ;;  %v12047_v7 = vld [vmem:[%s11816_s5 + $0x208] sm:$0xff] }
 0x1d1   : > { %16044 = vst [vmem:[#allocation267_spill] sm:$0xff] %v12038_v12  ;;  %16045 = vst [vmem:[#allocation268_spill] sm:$0xff] %v12041_v9  ;;  %v12050_v8 = vld [vmem:[%s11816_s5 + $0x210] sm:$0xff]  ;;  %v12053_v13 = vld [vmem:[%s11816_s5 + $0x218] sm:$0xff] }
 0x1d2   : > { %16046 = vst [vmem:[#allocation269_spill] sm:$0xff] %v12044_v10  ;;  %16047 = vst [vmem:[#allocation270_spill] sm:$0xff] %v12047_v7  ;;  %v12056_v11 = vld [vmem:[%s11816_s5 + $0x220] sm:$0xff]  ;;  %v12059_v12 = vld [vmem:[%s11816_s5 + $0x228] sm:$0xff] }
 0x1d3   : > { %16048 = vst [vmem:[#allocation271_spill] sm:$0xff] %v12050_v8  ;;  %16049 = vst [vmem:[#allocation272_spill] sm:$0xff] %v12053_v13  ;;  %v12062_v9 = vld [vmem:[%s11816_s5 + $0x230] sm:$0xff]  ;;  %v12065_v10 = vld [vmem:[%s11816_s5 + $0x238] sm:$0xff] }
 0x1d4   : > { %16050 = vst [vmem:[#allocation273_spill] sm:$0xff] %v12056_v11  ;;  %16051 = vst [vmem:[#allocation274_spill] sm:$0xff] %v12059_v12  ;;  %v12068_v7 = vld [vmem:[%s11816_s5 + $0x240] sm:$0xff]  ;;  %v12071_v8 = vld [vmem:[%s11816_s5 + $0x248] sm:$0xff] }
 0x1d5   : > { %16052 = vst [vmem:[#allocation275_spill] sm:$0xff] %v12062_v9  ;;  %16053 = vst [vmem:[#allocation276_spill] sm:$0xff] %v12065_v10  ;;  %v12074_v13 = vld [vmem:[%s11816_s5 + $0x250] sm:$0xff]  ;;  %v12077_v11 = vld [vmem:[%s11816_s5 + $0x258] sm:$0xff] }
 0x1d6   : > { %16054 = vst [vmem:[#allocation277_spill] sm:$0xff] %v12068_v7  ;;  %16055 = vst [vmem:[#allocation278_spill] sm:$0xff] %v12071_v8  ;;  %v12080_v12 = vld [vmem:[%s11816_s5 + $0x260] sm:$0xff]  ;;  %v12083_v9 = vld [vmem:[%s11816_s5 + $0x268] sm:$0xff] }
 0x1d7   : > { %16056 = vst [vmem:[#allocation279_spill] sm:$0xff] %v12074_v13  ;;  %16057 = vst [vmem:[#allocation280_spill] sm:$0xff] %v12077_v11  ;;  %v12086_v10 = vld [vmem:[%s11816_s5 + $0x270] sm:$0xff]  ;;  %v12089_v7 = vld [vmem:[%s11816_s5 + $0x278] sm:$0xff] }
 0x1d8   : > { %16058 = vst [vmem:[#allocation281_spill] sm:$0xff] %v12080_v12  ;;  %16059 = vst [vmem:[#allocation282_spill] sm:$0xff] %v12083_v9  ;;  %v12092_v8 = vld [vmem:[%s11816_s5 + $0x280] sm:$0xff]  ;;  %v12095_v58 = vld [vmem:[%s11816_s5 + $0x288] sm:$0xff] }
 0x1d9   : > { %16060 = vst [vmem:[#allocation283_spill] sm:$0xff] %v12086_v10  ;;  %16061 = vst [vmem:[#allocation284_spill] sm:$0xff] %v12089_v7  ;;  %v12098_v13 = vld [vmem:[%s11816_s5 + $0x290] sm:$0xff]  ;;  %v12101_v11 = vld [vmem:[%s11816_s5 + $0x298] sm:$0xff] }
 0x1da   : > { %16062 = vst [vmem:[#allocation285_spill] sm:$0xff] %v12092_v8  ;;  %16063 = vst [vmem:[#allocation286_spill] sm:$0xff] %v12095_v58  ;;  %v12104_v28 = vld [vmem:[%s11816_s5 + $0x2a0] sm:$0xff]  ;;  %v12107_v12 = vld [vmem:[%s11816_s5 + $0x2a8] sm:$0xff] }
 0x1db   : > { %16064 = vst [vmem:[#allocation287_spill] sm:$0xff] %v12098_v13  ;;  %16065 = vst [vmem:[#allocation288_spill] sm:$0xff] %v12101_v11  ;;  %v12110_v9 = vld [vmem:[%s11816_s5 + $0x2b0] sm:$0xff]  ;;  %v12113_v54 = vld [vmem:[%s11816_s5 + $0x2b8] sm:$0xff] }
 0x1dc   : > { %16066 = vst [vmem:[#allocation289_spill] sm:$0xff] %v12104_v28  ;;  %16067 = vst [vmem:[#allocation290_spill] sm:$0xff] %v12107_v12  ;;  %v12116_v10 = vld [vmem:[%s11816_s5 + $0x2c0] sm:$0xff]  ;;  %v12119_v7 = vld [vmem:[%s11816_s5 + $0x2c8] sm:$0xff] }
 0x1dd   : > { %16068 = vst [vmem:[#allocation291_spill] sm:$0xff] %v12110_v9  ;;  %16069 = vst [vmem:[#allocation292_spill] sm:$0xff] %v12113_v54  ;;  %v12122_v27 = vld [vmem:[%s11816_s5 + $0x2d0] sm:$0xff]  ;;  %v12125_v8 = vld [vmem:[%s11816_s5 + $0x2d8] sm:$0xff]  ;;  %v16078_v9 = vmov %v11747_v61  ;;  %v16085_v61 = vmov %v11726_v53  ;;  %v16092_v53 = vmov %v11698_v48  ;;  %v16099_v48 = vmov %v11677_v29 }
 0x1de   : > { %16070 = vst [vmem:[#allocation293_spill] sm:$0xff] %v12116_v10  ;;  %16071 = vst [vmem:[#allocation294_spill] sm:$0xff] %v12119_v7  ;;  %v12128_v58 = vld [vmem:[%s11816_s5 + $0x2e0] sm:$0xff]  ;;  %v12131_v13 = vld [vmem:[%s11816_s5 + $0x2e8] sm:$0xff]  ;;  %v16079_v10 = vmov %v11744_v31  ;;  %v16080_v7 = vmov %v11741_v60  ;;  %v16086_v31 = vmov %v11723_v55  ;;  %v16087_v60 = vmov %v11713_v51 }
 0x1df   : > { %16072 = vst [vmem:[#allocation295_spill] sm:$0xff] %v12122_v27  ;;  %16073 = vst [vmem:[#allocation296_spill] sm:$0xff] %v12125_v8  ;;  %v12134_v11 = vld [vmem:[%s11816_s5 + $0x2f0] sm:$0xff]  ;;  %v12137_v28 = vld [vmem:[%s11816_s5 + $0x2f8] sm:$0xff]  ;;  %v16081_v27 = vmov %v11738_v59  ;;  %v16088_v59 = vmov %v11710_v52  ;;  %v16093_v55 = vmov %v11695_v45  ;;  %v16094_v51 = vmov %v11692_v46 }
 0x1e0   : > { %16074 = vst [vmem:[#allocation297_spill] sm:$0xff] %v12128_v58  ;;  %16075 = vst [vmem:[#allocation298_spill] sm:$0xff] %v12131_v13  ;;  %v16082_v58 = vmov %v11735_v62  ;;  %v16089_v62 = vmov %v11707_v49  ;;  %v16095_v52 = vmov %v11689_v43  ;;  %v16096_v49 = vmov %v11686_v44 }
 0x1e1   : > { %16076 = vst [vmem:[#allocation299_spill] sm:$0xff] %v12134_v11  ;;  %16077 = vst [vmem:[#allocation300_spill] sm:$0xff] %v12137_v28  ;;  %v16083_v11 = vmov %v11732_v56  ;;  %v16084_v28 = vmov %v11729_v57  ;;  %v16090_v56 = vmov %v11704_v50  ;;  %v16091_v57 = vmov %v11701_v47 }
 0x1e2   : > { %v16097_v50 = vmov %v11683_v41  ;;  %v16098_v47 = vmov %v11680_v42  ;;  %v16100_v45 = vmov %v11674_v30  ;;  %v16101_v46 = vmov %v11671_v32 }
 0x1e3   : > { %v16102_v43 = vmov %v11668_v33  ;;  %v16103_v44 = vmov %v11665_v36  ;;  %v16104_v41 = vmov %v11662_v38  ;;  %v16105_v42 = vmov %v11659_v39 }
 0x1e4   : > { %v16106_v29 = vmov %v11656_v34  ;;  %v16107_v30 = vmov %v11653_v40  ;;  %v16108_v32 = vmov %v11650_v35  ;;  %v16109_v33 = vmov %v11647_v37 }
 0x1e5 LB: >> { %v16110_v63 = vld [vmem:[#allocation217_spill] sm:$0xff]  ;;  %v16111_v26 = vld [vmem:[#allocation218_spill] sm:$0xff]  ;;  %v16112_v25 = vld [vmem:[#allocation215_spill] sm:$0xff]  ;;  %16127 = vst [vmem:[#allocation301_spill] sm:$0xff] %v10553_v9  ;;  %vm1236_vm0 = vcmask 261120   ;;  %v1208_v39 = vpack.c.bf16 %v10673_v32, %v10677_v33  ;;  %v1209_v34 = vpack.c.bf16 %v10665_v29, %v10669_v30  ;;  %v1210_v40 = vpack.c.bf16 %v10657_v41, %v10661_v42  ;;  %s10699_s23 = smov 96   ;;  %v10617_v51 = vphi %v16094_v51, %v16447_v51   ;;  %v10613_v55 = vphi %v16093_v55, %v16446_v55   ;;  %v10609_v53 = vphi %v16092_v53, %v16445_v53   ;;  %v10605_v57 = vphi %v16091_v57, %v16444_v57   ;;  %v10601_v56 = vphi %v16090_v56, %v16443_v56   ;;  %v10597_v62 = vphi %v16089_v62, %v16442_v62   ;;  %v10593_v59 = vphi %v16088_v59, %v16441_v59   ;;  %v10589_v60 = vphi %v16087_v60, %v16440_v60   ;;  %v10585_v31 = vphi %v16086_v31, %v16439_v31   ;;  %v10581_v61 = vphi %v16085_v61, %v16438_v61   ;;  %v10577_v28 = vphi %v16084_v28, %v16437_v28   ;;  %v10573_v11 = vphi %v16083_v11, %v16436_v11   ;;  %v10569_v58 = vphi %v16082_v58, %v16434_v58   ;;  %v10565_v27 = vphi %v16081_v27, %v16433_v27   ;;  %v10561_v7 = vphi %v16080_v7, %v16432_v7   ;;  %v10557_v10 = vphi %v16079_v10, %v16430_v10   ;;  %v10553_v9 = vphi %v16078_v9, %v16428_v9   ;;  %s10681_s6 = sphi %s12235_s6, %s16463_s6   ;;  %v10677_v33 = vphi %v16109_v33, %v16462_v33   ;;  %v10673_v32 = vphi %v16108_v32, %v16461_v32   ;;  %v10669_v30 = vphi %v16107_v30, %v16460_v30   ;;  %v10665_v29 = vphi %v16106_v29, %v16459_v29   ;;  %v10661_v42 = vphi %v16105_v42, %v16458_v42   ;;  %v10657_v41 = vphi %v16104_v41, %v16457_v41   ;;  %v10653_v44 = vphi %v16103_v44, %v16456_v44   ;;  %v10649_v43 = vphi %v16102_v43, %v16455_v43   ;;  %v10645_v46 = vphi %v16101_v46, %v16454_v46   ;;  %v10641_v45 = vphi %v16100_v45, %v16453_v45   ;;  %v10637_v48 = vphi %v16099_v48, %v16452_v48   ;;  %v10633_v47 = vphi %v16098_v47, %v16451_v47   ;;  %v10629_v50 = vphi %v16097_v50, %v16450_v50   ;;  %v10625_v49 = vphi %v16096_v49, %v16449_v49   ;;  %v10621_v52 = vphi %v16095_v52, %v16448_v52  }
 0x1e6   : >> { %v16113_v24 = vld [vmem:[#allocation216_spill] sm:$0xff]  ;;  %v16114_v23 = vld [vmem:[#allocation213_spill] sm:$0xff]  ;;  %v16115_v22 = vld [vmem:[#allocation214_spill] sm:$0xff]  ;;  %16128 = vst [vmem:[#allocation302_spill] sm:$0xff] %v10557_v10  ;;  %s10700_s2 = smov 64   ;;  %s10701_s3 = smov 32  }
 0x1e7   : >> { %v16116_v21 = vld [vmem:[#allocation210_spill] sm:$0xff]  ;;  %v16117_v20 = vld [vmem:[#allocation205_spill] sm:$0xff]  ;;  %v16118_v19 = vld [vmem:[#allocation211_spill] sm:$0xff]  ;;  %16129 = vst [vmem:[#allocation303_spill] sm:$0xff] %v10561_v7  ;;  %8874 = vmatprep.mubr.msk.bf16.mxu0 %vm1236_vm0, %v1208_v39  ;;  %v1214_v39 = vpack.c.bf16 %v10625_v49, %v10629_v50  ;;  %vm2769_vm1 = vcmask 523264   ;;  %s1175_s0 = sadd.s32 1, %s10681_s6  }
 0x1e8   : >> { %v16119_v18 = vld [vmem:[#allocation212_spill] sm:$0xff]  ;;  %v16120_v17 = vld [vmem:[#allocation206_spill] sm:$0xff]  ;;  %v16121_v16 = vld [vmem:[#allocation207_spill] sm:$0xff]  ;;  %16130 = vst [vmem:[#allocation304_spill] sm:$0xff] %v10565_v27  ;;  %p13686_p3 = scmp.ge.s32.totalorder %s1175_s0, 6   ;;  %s16463_s6 = smov %s1175_s0 }
 0x1e9   : >> { %v16122_v15 = vld [vmem:[#allocation208_spill] sm:$0xff]  ;;  %v16123_v6 = vld [vmem:[#allocation238_spill] sm:$0xff]  ;;  %v16124_v5 = vld [vmem:[#allocation237_spill] sm:$0xff]  ;;  %16131 = vst [vmem:[#allocation305_spill] sm:$0xff] %v10569_v58  ;;  %vm4292_vm2 = vcmask (%p13686_p3), 1046528   ;;  %s10703_s15 = smov (%p13686_p3), 32  }
 0x1ea   : >> { %v16125_v14 = vld [vmem:[#allocation209_spill] sm:$0xff]  ;;  %16132 = vst [vmem:[#allocation306_spill] sm:$0xff] %v10573_v11  ;;  %16133 = vst [vmem:[#allocation307_spill] sm:$0xff] %v10577_v28  ;;  %v16136_v1 = vld [vmem:[#allocation30_spill] sm:$0xff]  ;;  %vm4452_vm3 = vcmask (%p13686_p3), 1045504   ;;  %s10704_s8 = smov (%p13686_p3), 64  }
 0x1eb   : >> { %v16126_v4 = vld [vmem:[#allocation33_spill] sm:$0xff]  ;;  %16134 = vst [vmem:[#allocation308_spill] sm:$0xff] %v10581_v61  ;;  %16135 = vst [vmem:[#allocation309_spill] sm:$0xff] %v10585_v31  ;;  %v16138_v3 = vld [vmem:[#allocation32_spill] sm:$0xff]  ;;  %vm4683_vm4 = vcmask (%p13686_p3), 785408   ;;  %vm5323_vm5 = vcmask (%p13686_p3), 1014784  }
 0x1ec   : >> { %v16137_v0 = vld [vmem:[#allocation29_spill] sm:$0xff]  ;;  %v16139_v2 = vld [vmem:[#allocation31_spill] sm:$0xff]  ;;  %vm5360_vm6 = vcmask (%p13686_p3), 1043456   ;;  %vm10705_vm7 = vmmov (%p13686_p3), 1   ;;  %vm5727_vm9 = vcmask (%p13686_p3), 777216   ;;  %vm7451_vm11 = vcmask (%p13686_p3), 392192  }
 0x1ed   : >> { %v7893_v36 = vcombine.low %v16137_v0, %v16136_v1  ;;  %v7894_v38 = vcombine.low %v16139_v2, %v16138_v3  ;;  %v1211_v0 = vpack.c.bf16 %v10649_v43, %v10653_v44  ;;  %vm14700_vm8 = vmpackc.low (%p13686_p3), %vm5360_vm6, %vm10705_vm7  ;;  %vm7533_vm12 = vcmask (%p13686_p3), 15360  }
 0x1ee   : > { %vm14985_vm10 = vmpackc.low (%p13686_p3), %vm4292_vm2, %vm10705_vm7 }
 0x1ef   : >> { %8870 = vmatprep.subr.bf16.mxu0 %v7893_v36 }
 0x1f0   : >> { %8871 = vmatpush3.bf16.msra.mxu0 %v7893_v36  ;;  %v1212_v36 = vpack.c.bf16 %v10641_v45, %v10645_v46 }
 0x1f1   : >> { %8872 = vmatprep.subr.bf16.mxu0 %v7894_v38 }
 0x1f4   : >> { %8873 = vmatpush3.bf16.msra.mxu0 %v7894_v38  ;;  %v1213_v38 = vpack.c.bf16 %v10633_v47, %v10637_v48 }
 0x1f7   : >> { %8875 = vmatmul.mubr.msk.bf16.vlgmr.msra.gmra.mrb[0].mxu0 %vm1236_vm0, %v1209_v34  ;;  %v1215_v34 = vpack.c.bf16 %v10617_v51, %v10621_v52 }
 0x1f8   : >> { %8878 = vmatprep.mubr.msk.bf16.mxu0 %vm1236_vm0, %v1210_v40  ;;  %v1216_v40 = vpack.c.bf16 %v10609_v53, %v10613_v55 }
 0x1ff   : >> { %8879 = vmatmul.mubr.msk.bf16.gmra.mrb[4].mxu0 %vm1236_vm0, %v1211_v0  ;;  %v1217_v0 = vpack.c.bf16 %v10601_v56, %v10605_v57 }
 0x200   : >> { %8882 = vmatprep.mubr.msk.bf16.mxu0 %vm1236_vm0, %v1212_v36  ;;  %v1218_v36 = vpack.c.bf16 %v10593_v59, %v10597_v62 }
 0x207   : >> { %8883 = vmatmul.mubr.msk.bf16.gmra.mrb[8].mxu0 %vm1236_vm0, %v1213_v38  ;;  %v1219_v38 = vpack.c.bf16 %v10585_v31, %v10589_v60 }
 0x208   : >> { %8886 = vmatprep.mubr.msk.bf16.mxu0 %vm1236_vm0, %v1214_v39  ;;  %v1220_v39 = vpack.c.bf16 %v10577_v28, %v10581_v61 }
 0x20f   : >> { %8887 = vmatmul.mubr.msk.bf16.gmra.mrb[12].mxu0 %vm1236_vm0, %v1215_v34  ;;  %v1221_v34 = vpack.c.bf16 %v10569_v58, %v10573_v11 }
 0x210   : >> { %8890 = vmatprep.mubr.msk.bf16.mxu0 %vm1236_vm0, %v1216_v40  ;;  %v1222_v40 = vpack.c.bf16 %v10561_v7, %v10565_v27 }
 0x217   : >> { %8891 = vmatmul.mubr.msk.bf16.gmra.mrb[16].mxu0 %vm1236_vm0, %v1217_v0  ;;  %v1223_v0 = vpack.c.bf16 %v10553_v9, %v10557_v10 }
 0x218   : >> { %8894 = vmatprep.mubr.msk.bf16.mxu0 %vm1236_vm0, %v1218_v36 }
 0x21f   : >> { %8895 = vmatmul.mubr.msk.bf16.gmra.mrb[20].mxu0 %vm1236_vm0, %v1219_v38 }
 0x220   : >> { %8898 = vmatprep.mubr.msk.bf16.mxu0 %vm1236_vm0, %v1220_v39 }
 0x227   : >> { %8899 = vmatmul.mubr.msk.bf16.gmra.mrb[24].mxu0 %vm1236_vm0, %v1221_v34 }
 0x228   : >> { %8902 = vmatprep.mubr.msk.bf16.mxu0 %vm1236_vm0, %v1222_v40 }
 0x22f   : >> { %8903 = vmatmul.mubr.msk.bf16.gmra.mrb[28].mxu0 %vm1236_vm0, %v1223_v0 }
 0x2ca   : >> { %v8876_v36 = vpop.f32.mrb[0].mxu0 }
 0x2cb   : >> { %v1319_v1 = vpop.f32.mrb[1].mxu0  ;;  %v1328_v39 = vadd.f32 %v8876_v36, %v16126_v4 }
 0x2cc   : >> { %v8877_v38 = vpop.f32.mrb[2].mxu0  ;;  %v1320_v35 = vadd.f32 %v16126_v4, %v1319_v1 }
 0x2cd   : >> { %v1331_v2 = vadd.f32 %v8877_v38, %v16126_v4  ;;  %v1322_v3 = vpop.f32.mrb[3].mxu0 }
 0x2ce   : >> { %v1323_v37 = vadd.f32 %v16126_v4, %v1322_v3 }
 0x2cf   : >> { %v12392_v34 = vpack.c.bf16 %v1331_v2, %v1328_v39 }
 0x2d0   : >> { %v12394_v40 = vpack.c.bf16 %v1323_v37, %v1320_v35 }
 0x2d2   : >> { %v8880_v13 = vpop.f32.mrb[4].mxu0 }
 0x2d3   : >> { %v1335_v8 = vpop.f32.mrb[5].mxu0  ;;  %v1344_v0 = vadd.f32 %v8880_v13, %v16126_v4 }
 0x2d4   : >> { %v8881_v54 = vpop.f32.mrb[6].mxu0  ;;  %v1336_v36 = vadd.f32 %v16126_v4, %v1335_v8 }
 0x2d5   : >> { %v1347_v12 = vadd.f32 %v8881_v54, %v16126_v4  ;;  %v1338_v9 = vpop.f32.mrb[7].mxu0 }
 0x2d6   : >> { %v1339_v38 = vadd.f32 %v16126_v4, %v1338_v9 }
 0x2d7   : >> { %v12400_v10 = vpack.c.bf16 %v1347_v12, %v1344_v0 }
 0x2d8   : >> { %v12402_v1 = vpack.c.bf16 %v1339_v38, %v1336_v36 }
 0x2da   : >> { %v8884_v2 = vpop.f32.mrb[8].mxu0 }
 0x2db   : >> { %v1351_v3 = vpop.f32.mrb[9].mxu0  ;;  %v1360_v37 = vadd.f32 %v8884_v2, %v16126_v4 }
 0x2dc   : >> { %v8885_v35 = vpop.f32.mrb[10].mxu0  ;;  %v1352_v13 = vadd.f32 %v16126_v4, %v1351_v3 }
 0x2dd   : >> { %v1363_v39 = vadd.f32 %v8885_v35, %v16126_v4  ;;  %v1354_v7 = vpop.f32.mrb[11].mxu0 }
 0x2de   : >> { %v1355_v54 = vadd.f32 %v16126_v4, %v1354_v7 }
 0x2df   : >> { %v12408_v27 = vpack.c.bf16 %v1363_v39, %v1360_v37 }
 0x2e0   : >> { %v12410_v8 = vpack.c.bf16 %v1355_v54, %v1352_v13 }
 0x2e2   : >> { %v8888_v9 = vpop.f32.mrb[12].mxu0 }
 0x2e3   : >> { %v1367_v12 = vpop.f32.mrb[13].mxu0  ;;  %v1376_v36 = vadd.f32 %v8888_v9, %v16126_v4 }
 0x2e4   : >> { %v8889_v0 = vpop.f32.mrb[14].mxu0  ;;  %v1368_v2 = vadd.f32 %v16126_v4, %v1367_v12 }
 0x2e5   : >> { %v1379_v38 = vadd.f32 %v8889_v0, %v16126_v4  ;;  %v1370_v58 = vpop.f32.mrb[15].mxu0 }
 0x2e6   : >> { %v1371_v35 = vadd.f32 %v16126_v4, %v1370_v58 }
 0x2e7   : >> { %v12416_v11 = vpack.c.bf16 %v1379_v38, %v1376_v36 }
 0x2e8   : >> { %v12418_v3 = vpack.c.bf16 %v1371_v35, %v1368_v2 }
 0x2ea   : >> { %v8892_v7 = vpop.f32.mrb[16].mxu0 }
 0x2eb   : >> { %v1383_v37 = vpop.f32.mrb[17].mxu0  ;;  %v1392_v13 = vadd.f32 %v8892_v7, %v16126_v4 }
 0x2ec   : >> { %v8893_v39 = vpop.f32.mrb[18].mxu0  ;;  %v1384_v9 = vadd.f32 %v16126_v4, %v1383_v37 }
 0x2ed   : >> { %v1395_v54 = vadd.f32 %v8893_v39, %v16126_v4  ;;  %v1386_v28 = vpop.f32.mrb[19].mxu0 }
 0x2ee   : >> { %v1387_v0 = vadd.f32 %v16126_v4, %v1386_v28 }
 0x2ef   : >> { %v12424_v61 = vpack.c.bf16 %v1395_v54, %v1392_v13 }
 0x2f0   : >> { %v12426_v12 = vpack.c.bf16 %v1387_v0, %v1384_v9 }
 0x2f1   : >> { %1656 = vrot.lane.b32.xlu1 %v12424_v61, %s10699_s23 }
 0x2f2   : >> { %1654 = vrot.lane.b32.xlu0 %v12426_v12, %s10699_s23  ;;  %v8896_v58 = vpop.f32.mrb[20].mxu0  ;;  %8342 = vmatprep.subr.bf16.mxu0 %v12426_v12 }
 0x2f3   : >> { %v1408_v36 = vadd.f32 %v8896_v58, %v16126_v4  ;;  %v1399_v38 = vpop.f32.mrb[21].mxu0  ;;  %8343 = vmatpush3.bf16.msra.mxu0 %v12394_v40 }
 0x2f4   : >> { %v1400_v28 = vadd.f32 %v16126_v4, %v1399_v38  ;;  %v8897_v2 = vpop.f32.mrb[22].mxu0  ;;  %8344 = vmatprep.subr.bf16.mxu0 %v12424_v61 }
 0x2f5   : >> { %v1411_v35 = vadd.f32 %v8897_v2, %v16126_v4  ;;  %1640 = vrot.lane.b32.xlu1 %v12392_v34, %s10699_s23  ;;  %v1402_v7 = vpop.f32.mrb[23].mxu0 }
 0x2f6   : >> { %v1403_v37 = vadd.f32 %v16126_v4, %v1402_v7  ;;  %1638 = vrot.lane.b32.xlu0 %v12394_v40, %s10699_s23 }
 0x2f7   : >> { %v12443_v39 = vpack.c.bf16 %v1411_v35, %v1408_v36  ;;  %8345 = vmatpush3.bf16.msra.mxu0 %v12392_v34 }
 0x2f8   : >> { %v1456_v13 = vpack.c.bf16 %v1403_v37, %v1400_v28 }
 0x2f9   : >> { %1642 = vrot.lane.b32.xlu1 %v12402_v1, %s10699_s23 }
 0x2fa   : >> { %1658 = vrot.lane.b32.xlu0 %v1456_v13, %s10699_s23  ;;  %v8900_v54 = vpop.f32.mrb[24].mxu0  ;;  %8346 = vmatprep.subr.bf16.mxu0 %v1456_v13 }
 0x2fb   : >> { %v1424_v9 = vadd.f32 %v8900_v54, %v16126_v4  ;;  %v1415_v0 = vpop.f32.mrb[25].mxu0  ;;  %8347 = vmatpush3.bf16.msra.mxu0 %v12402_v1 }
 0x2fc   : >> { %v1416_v58 = vadd.f32 %v16126_v4, %v1415_v0  ;;  %v8901_v38 = vpop.f32.mrb[26].mxu0  ;;  %8348 = vmatprep.subr.bf16.mxu0 %v12443_v39 }
 0x2fd   : >> { %v1427_v36 = vadd.f32 %v8901_v38, %v16126_v4  ;;  %1644 = vrot.lane.b32.xlu1 %v12400_v10, %s10699_s23  ;;  %v1418_v28 = vpop.f32.mrb[27].mxu0 }
 0x2fe   : >> { %v1419_v2 = vadd.f32 %v16126_v4, %v1418_v28  ;;  %1660 = vrot.lane.b32.xlu0 %v12443_v39, %s10699_s23 }
 0x2ff   : >> { %v1459_v35 = vpack.c.bf16 %v1427_v36, %v1424_v9  ;;  %8349 = vmatpush3.bf16.msra.mxu0 %v12400_v10  ;;  %v7912_v36 = vcombine.high %v16124_v5, %v16123_v6 }
 0x300   : >> { %v1458_v7 = vpack.c.bf16 %v1419_v2, %v1416_v58  ;;  %v7944_v2 = vcombine.high %v16117_v20, %v16120_v17 }
 0x301   : >> { %1646 = vrot.lane.b32.xlu1 %v12410_v8, %s10699_s23  ;;  %1718 = vmatprep.mubr.bf16.mxu1 %v7912_v36 }
 0x302   : >> { %1662 = vrot.lane.b32.xlu0 %v1458_v7, %s10699_s23  ;;  %v8904_v37 = vpop.f32.mrb[28].mxu0  ;;  %8350 = vmatprep.subr.bf16.mxu0 %v1458_v7 }
 0x303   : >> { %v1440_v54 = vadd.f32 %v8904_v37, %v16126_v4  ;;  %v1431_v0 = vpop.f32.mrb[29].mxu0  ;;  %8351 = vmatpush3.bf16.msra.mxu0 %v12410_v8  ;;  %2039 = vmatprep.mubr.bf16.mxu0 %v7944_v2 }
 0x304   : >> { %v1432_v38 = vadd.f32 %v16126_v4, %v1431_v0  ;;  %v8905_v28 = vpop.f32.mrb[30].mxu0  ;;  %8352 = vmatprep.subr.bf16.mxu0 %v1459_v35 }
 0x305   : >> { %v1443_v9 = vadd.f32 %v8905_v28, %v16126_v4  ;;  %1648 = vrot.lane.b32.xlu1 %v12408_v27, %s10699_s23  ;;  %v1434_v58 = vpop.f32.mrb[31].mxu0  ;;  %v7945_v28 = vcombine.low %v16121_v16, %v16122_v15 }
 0x306   : >> { %v1435_v37 = vadd.f32 %v16126_v4, %v1434_v58  ;;  %1664 = vrot.lane.b32.xlu0 %v1459_v35, %s10699_s23  ;;  %v16145_v58 = vld [vmem:[#allocation221_spill] sm:$0xff] }
 0x307   : >> { %v1461_v31 = vpack.c.bf16 %v1443_v9, %v1440_v54  ;;  %8353 = vmatpush3.bf16.msra.mxu0 %v12408_v27  ;;  %v7943_v54 = vcombine.low %v16117_v20, %v16120_v17  ;;  %v7948_v9 = vcombine.high %v16125_v14, %v16116_v21  ;;  %v16146_v2 = vmov %v16145_v58 }
 0x308   : >> { %v1460_v0 = vpack.c.bf16 %v1435_v37, %v1432_v38  ;;  %v7946_v38 = vcombine.high %v16121_v16, %v16122_v15 }
 0x309   : >> { %1650 = vrot.lane.b32.xlu1 %v12418_v3, %s10699_s23 }
 0x30a   : >> { %1666 = vrot.lane.b32.xlu0 %v1460_v0, %s10699_s23  ;;  %8354 = vmatprep.subr.bf16.mxu0 %v1460_v0 }
 0x30b   : >> { %8355 = vmatpush3.bf16.msra.mxu0 %v12418_v3 }
 0x30c   : >> { %8356 = vmatprep.subr.bf16.mxu0 %v1461_v31 }
 0x30d   : >> { %1652 = vrot.lane.b32.xlu1 %v12416_v11, %s10699_s23 }
 0x30e   : >> { %1668 = vrot.lane.b32.xlu0 %v1461_v31, %s10699_s23 }
 0x30f   : >> { %8357 = vmatpush3.bf16.msra.mxu0 %v12416_v11 }
 0x311   : >> { %2328 = vrot.lane.b32.xlu1 %v12394_v40, %s10700_s2  ;;  %v7952_v40 = vcombine.high %v16114_v23, %v16115_v22 }
 0x312   : >> { %2344 = vrot.lane.b32.xlu0 %v12426_v12, %s10700_s2  ;;  %2040 = vmatmul.mubr.bf16.vlgmr.msra.gmra.mrb[32].mxu0 %v7943_v54  ;;  %v16147_v54 = vld [vmem:[#allocation224_spill] sm:$0xff] }
 0x313   : >> { %2047 = vmatprep.mubr.bf16.mxu0 %v7946_v38  ;;  %v16148_v38 = vld [vmem:[#allocation223_spill] sm:$0xff] }
 0x315   : >> { %2330 = vrot.lane.b32.xlu1 %v12392_v34, %s10700_s2  ;;  %v7950_v34 = vcombine.high %v16118_v19, %v16119_v18 }
 0x316   : >> { %2346 = vrot.lane.b32.xlu0 %v12424_v61, %s10700_s2  ;;  %v7947_v61 = vcombine.low %v16125_v14, %v16116_v21  ;;  %v16286_v21 = vld [vmem:[#allocation39_spill] sm:$0xff] }
 0x319   : >> { %2332 = vrot.lane.b32.xlu1 %v12402_v1, %s10700_s2  ;;  %v7954_v1 = vcombine.high %v16112_v25, %v16113_v24 }
 0x31a   : >> { %2348 = vrot.lane.b32.xlu0 %v1456_v13, %s10700_s2  ;;  %2048 = vmatmul.mubr.bf16.gmra.mrb[36].mxu0 %v7945_v28  ;;  %v7962_v28 = vcombine.high %v16148_v38, %v16147_v54 }
 0x31b   : >> { %2055 = vmatprep.mubr.bf16.mxu0 %v7948_v9  ;;  %v7961_v9 = vcombine.low %v16148_v38, %v16147_v54 }
 0x31d   : >> { %2334 = vrot.lane.b32.xlu1 %v12400_v10, %s10700_s2  ;;  %v7949_v10 = vcombine.low %v16118_v19, %v16119_v18 }
 0x31e   : >> { %2350 = vrot.lane.b32.xlu0 %v12443_v39, %s10700_s2  ;;  %v16142_v39 = vld [vmem:[#allocation219_spill] sm:$0xff] }
 0x321   : >> { %2336 = vrot.lane.b32.xlu1 %v12410_v8, %s10700_s2  ;;  %v7953_v8 = vcombine.low %v16112_v25, %v16113_v24 }
 0x322   : >> { %2352 = vrot.lane.b32.xlu0 %v1458_v7, %s10700_s2  ;;  %2056 = vmatmul.mubr.bf16.gmra.mrb[40].mxu0 %v7947_v61  ;;  %v16143_v7 = vld [vmem:[#allocation222_spill] sm:$0xff] }
 0x323   : >> { %2063 = vmatprep.mubr.bf16.mxu0 %v7950_v34  ;;  %v16144_v36 = vmov %v16143_v7  ;;  %v7960_v37 = vcombine.high %v16145_v58, %v16143_v7  ;;  %v16149_v61 = vld [vmem:[#allocation226_spill] sm:$0xff] }
 0x324   : >> { %v16150_v34 = vmov %v16149_v61  ;;  %v16155_v58 = vld [vmem:[#allocation230_spill] sm:$0xff] }
 0x325   : >> { %2338 = vrot.lane.b32.xlu1 %v12408_v27, %s10700_s2  ;;  %v7951_v27 = vcombine.low %v16114_v23, %v16115_v22  ;;  %v16290_v22 = vld [vmem:[#allocation295_spill] sm:$0xff] }
 0x326   : >> { %2354 = vrot.lane.b32.xlu0 %v1459_v35, %s10700_s2 }
 0x329   : >> { %2340 = vrot.lane.b32.xlu1 %v12418_v3, %s10700_s2  ;;  %v7956_v3 = vcombine.high %v16110_v63, %v16111_v26 }
 0x32a   : >> { %2356 = vrot.lane.b32.xlu0 %v1460_v0, %s10700_s2  ;;  %2064 = vmatmul.mubr.bf16.gmra.mrb[44].mxu0 %v7949_v10  ;;  %v7959_v0 = vcombine.low %v16146_v2, %v16144_v36  ;;  %v16151_v10 = vld [vmem:[#allocation225_spill] sm:$0xff]  ;;  %v16160_v2 = vld [vmem:[#allocation231_spill] sm:$0xff] }
 0x32b   : >> { %2071 = vmatprep.mubr.bf16.mxu0 %v7952_v40  ;;  %v16152_v40 = vmov %v16151_v10 }
 0x32d   : >> { %2342 = vrot.lane.b32.xlu1 %v12416_v11, %s10700_s2  ;;  %v7955_v11 = vcombine.low %v16110_v63, %v16111_v26 }
 0x32e   : >> { %2358 = vrot.lane.b32.xlu0 %v1461_v31, %s10700_s2  ;;  %v16140_v31 = vld [vmem:[#allocation220_spill] sm:$0xff] }
 0x32f   : >> { %v16141_v12 = vmov %v16140_v31  ;;  %v7958_v13 = vcombine.high %v16142_v39, %v16140_v31 }
 0x330   : >> { %v7957_v35 = vcombine.low %v16142_v39, %v16141_v12 }
 0x331   : >> { %2603 = vrot.lane.b32.xlu1 %v10673_v32, %s10701_s3 }
 0x332   : >> { %2072 = vmatmul.mubr.bf16.gmra.mrb[48].mxu0 %v7951_v27  ;;  %v7964_v27 = vcombine.high %v16151_v10, %v16149_v61  ;;  %2601 = vrot.lane.b32.xlu0 %v10677_v33, %s10701_s3 }
 0x333   : >> { %2079 = vmatprep.mubr.bf16.mxu0 %v7954_v1  ;;  %v7963_v1 = vcombine.low %v16152_v40, %v16150_v34 }
 0x335   : >> { %2607 = vrot.lane.b32.xlu1 %v10665_v29, %s10701_s3 }
 0x336   : >> { %2605 = vrot.lane.b32.xlu0 %v10669_v30, %s10701_s3 }
 0x339   : >> { %2611 = vrot.lane.b32.xlu1 %v10657_v41, %s10701_s3 }
 0x33a   : >> { %2080 = vmatmul.mubr.bf16.gmra.mrb[52].mxu0 %v7953_v8  ;;  %v16153_v8 = vld [vmem:[#allocation228_spill] sm:$0xff]  ;;  %2609 = vrot.lane.b32.xlu0 %v10661_v42, %s10701_s3 }
 0x33b   : >> { %2087 = vmatprep.mubr.bf16.mxu0 %v7956_v3  ;;  %v16154_v3 = vld [vmem:[#allocation227_spill] sm:$0xff] }
 0x33d   : >> { %2615 = vrot.lane.b32.xlu1 %v10649_v43, %s10701_s3 }
 0x33e   : >> { %2613 = vrot.lane.b32.xlu0 %v10653_v44, %s10701_s3 }
 0x341   : >> { %2619 = vrot.lane.b32.xlu1 %v10641_v45, %s10701_s3 }
 0x342   : >> { %2088 = vmatmul.mubr.bf16.gmra.mrb[56].mxu0 %v7955_v11  ;;  %v7966_v11 = vcombine.high %v16154_v3, %v16153_v8  ;;  %2617 = vrot.lane.b32.xlu0 %v10645_v46, %s10701_s3 }
 0x343   : >> { %2095 = vmatprep.mubr.bf16.mxu0 %v7958_v13 }
 0x345   : >> { %2623 = vrot.lane.b32.xlu1 %v10633_v47, %s10701_s3 }
 0x346   : >> { %2621 = vrot.lane.b32.xlu0 %v10637_v48, %s10701_s3 }
 0x349   : >> { %2627 = vrot.lane.b32.xlu1 %v10625_v49, %s10701_s3 }
 0x34a   : >> { %2096 = vmatmul.mubr.bf16.gmra.mrb[60].mxu0 %v7957_v35  ;;  %v7965_v35 = vcombine.low %v16154_v3, %v16153_v8  ;;  %2625 = vrot.lane.b32.xlu0 %v10629_v50, %s10701_s3 }
 0x34b   : >> { %2103 = vmatprep.mubr.bf16.mxu0 %v7960_v37  ;;  %v16156_v37 = vmov %v16155_v58 }
 0x34d   : >> { %2631 = vrot.lane.b32.xlu1 %v10617_v51, %s10701_s3 }
 0x34e   : >> { %2629 = vrot.lane.b32.xlu0 %v10621_v52, %s10701_s3 }
 0x351   : >> { %2635 = vrot.lane.b32.xlu1 %v10609_v53, %s10701_s3 }
 0x352   : >> { %2104 = vmatmul.mubr.bf16.gmra.mrb[64].mxu0 %v7959_v0  ;;  %v16157_v0 = vld [vmem:[#allocation229_spill] sm:$0xff]  ;;  %2633 = vrot.lane.b32.xlu0 %v10613_v55, %s10701_s3 }
 0x353   : >> { %2111 = vmatprep.mubr.bf16.mxu0 %v7962_v28  ;;  %v7968_v28 = vcombine.high %v16157_v0, %v16155_v58 }
 0x355   : >> { %2639 = vrot.lane.b32.xlu1 %v10601_v56, %s10701_s3 }
 0x356   : >> { %2637 = vrot.lane.b32.xlu0 %v10605_v57, %s10701_s3 }
 0x359   : >> { %2643 = vrot.lane.b32.xlu1 %v10593_v59, %s10701_s3 }
 0x35a   : >> { %2112 = vmatmul.mubr.bf16.gmra.mrb[68].mxu0 %v7961_v9  ;;  %2641 = vrot.lane.b32.xlu0 %v10597_v62, %s10701_s3 }
 0x35b   : >> { %2119 = vmatprep.mubr.bf16.mxu0 %v7964_v27  ;;  %v7967_v27 = vcombine.low %v16157_v0, %v16156_v37 }
 0x35e   : >> { %2645 = vrot.lane.b32.xlu0 %v10589_v60, %s10701_s3 }
 0x362   : >> { %2120 = vmatmul.mubr.bf16.gmra.mrb[72].mxu0 %v7963_v1 }
 0x363   : >> { %v1657_v31 = vpop.permute.xlu1 %1656  ;;  %2127 = vmatprep.mubr.bf16.mxu0 %v7966_v11  ;;  %v16158_v11 = vld [vmem:[#allocation232_spill] sm:$0xff] }
 0x364   : >> { %v1655_v13 = vpop.permute.xlu0 %1654  ;;  %v7970_v3 = vcombine.high %v16160_v2, %v16158_v11 }
 0x365   : >> { %8230 = vmatprep.subr.bf16.mxu1 %v1655_v13  ;;  %v16159_v13 = vmov %v16158_v11 }
 0x367   : >> { %v1641_v7 = vpop.permute.xlu1 %1640 }
 0x368   : >> { %v1639_v9 = vpop.permute.xlu0 %1638 }
 0x369   : >> { %8231 = vmatpush3.bf16.msra.mxu1 %v1639_v9  ;;  %v16163_v9 = vld [vmem:[#allocation233_spill] sm:$0xff] }
 0x36a   : >> { %8232 = vmatprep.subr.bf16.mxu1 %v1657_v31  ;;  %2128 = vmatmul.mubr.bf16.gmra.mrb[76].mxu0 %v7965_v35  ;;  %v7969_v35 = vcombine.low %v16160_v2, %v16159_v13  ;;  %v16164_v12 = vmov %v16163_v9 }
 0x36b   : >> { %v1643_v61 = vpop.permute.xlu1 %1642  ;;  %2135 = vmatprep.mubr.bf16.mxu0 %v7968_v28  ;;  %v16161_v28 = vld [vmem:[#allocation234_spill] sm:$0xff] }
 0x36c   : >> { %v1659_v10 = vpop.permute.xlu0 %1658  ;;  %v16162_v8 = vmov %v16161_v28 }
 0x36d   : >> { %8233 = vmatpush3.bf16.msra.mxu1 %v1641_v7 }
 0x36e   : >> { %8234 = vmatprep.subr.bf16.mxu1 %v1659_v10  ;;  %v7972_v10 = vcombine.high %v16163_v9, %v16161_v28 }
 0x36f   : >> { %v1645_v1 = vpop.permute.xlu1 %1644 }
 0x370   : >> { %v1661_v4 = vpop.permute.xlu0 %1660 }
 0x371   : >> { %8235 = vmatpush3.bf16.msra.mxu1 %v1643_v61 }
 0x372   : >> { %8236 = vmatprep.subr.bf16.mxu1 %v1661_v4  ;;  %2136 = vmatmul.mubr.bf16.gmra.mrb[80].mxu0 %v7967_v27  ;;  %v16165_v27 = vld [vmem:[#allocation236_spill] sm:$0xff] }
 0x373   : >> { %v1647_v58 = vpop.permute.xlu1 %1646  ;;  %2143 = vmatprep.mubr.bf16.mxu0 %v7970_v3  ;;  %v7971_v3 = vcombine.low %v16164_v12, %v16162_v8 }
 0x374   : >> { %v1663_v31 = vpop.permute.xlu0 %1662 }
 0x375   : >> { %8237 = vmatpush3.bf16.msra.mxu1 %v1645_v1  ;;  %v16166_v1 = vmov %v16165_v27 }
 0x376   : >> { %8238 = vmatprep.subr.bf16.mxu1 %v1663_v31  ;;  %v16167_v31 = vld [vmem:[#allocation235_spill] sm:$0xff] }
 0x377   : >> { %v1649_v7 = vpop.permute.xlu1 %1648  ;;  %v16168_v14 = vmov %v16167_v31  ;;  %v7974_v2 = vcombine.high %v16167_v31, %v16165_v27 }
 0x378   : >> { %v1665_v0 = vpop.permute.xlu0 %1664 }
 0x379   : >> { %8239 = vmatpush3.bf16.msra.mxu1 %v1647_v58  ;;  %v7911_v58 = vcombine.low %v16124_v5, %v16123_v6 }
 0x37a   : >> { %8240 = vmatprep.subr.bf16.mxu1 %v1665_v0  ;;  %2144 = vmatmul.mubr.bf16.gmra.mrb[84].mxu0 %v7969_v35  ;;  %v16169_v35 = vld [vmem:[#allocation240_spill] sm:$0xff] }
 0x37b   : >> { %v1651_v11 = vpop.permute.xlu1 %1650  ;;  %2151 = vmatprep.mubr.bf16.mxu0 %v7972_v10  ;;  %v7973_v10 = vcombine.low %v16168_v14, %v16166_v1 }
 0x37c   : >> { %v1667_v4 = vpop.permute.xlu0 %1666 }
 0x37d   : >> { %8241 = vmatpush3.bf16.msra.mxu1 %v1649_v7  ;;  %v16170_v7 = vld [vmem:[#allocation239_spill] sm:$0xff] }
 0x37e   : >> { %8242 = vmatprep.subr.bf16.mxu1 %v1667_v4  ;;  %v16171_v4 = vmov %v16170_v7  ;;  %v7914_v9 = vcombine.high %v16170_v7, %v16169_v35 }
 0x37f   : >> { %v1653_v61 = vpop.permute.xlu1 %1652 }
 0x380   : >> { %v1669_v13 = vpop.permute.xlu0 %1668 }
 0x381   : >> { %8243 = vmatpush3.bf16.msra.mxu1 %v1651_v11  ;;  %v7913_v11 = vcombine.low %v16171_v4, %v16169_v35 }
 0x382   : >> { %8244 = vmatprep.subr.bf16.mxu1 %v1669_v13  ;;  %2152 = vmatmul.mubr.bf16.gmra.mrb[88].mxu0 %v7971_v3  ;;  %v16172_v3 = vld [vmem:[#allocation242_spill] sm:$0xff] }
 0x383   : >> { %v2329_v28 = vpop.permute.xlu1 %2328  ;;  %2159 = vmatprep.mubr.bf16.mxu0 %v7974_v2 }
 0x384   : >> { %v2345_v0 = vpop.permute.xlu0 %2344 }
 0x385   : >> { %8245 = vmatpush3.bf16.msra.mxu1 %v1653_v61  ;;  %v16173_v61 = vld [vmem:[#allocation241_spill] sm:$0xff] }
 0x386   : >> { %8454 = vmatprep.subr.bf16.mxu1 %v2345_v0  ;;  %v16174_v5 = vmov %v16173_v61  ;;  %v7916_v31 = vcombine.high %v16173_v61, %v16172_v3 }
 0x387   : >> { %v2331_v8 = vpop.permute.xlu1 %2330 }
 0x388   : >> { %1719 = vmatmul.mubr.bf16.vlgmr.msra.gmra.mrb[0].mxu1 %v7911_v58  ;;  %v2347_v27 = vpop.permute.xlu0 %2346 }
 0x389   : >> { %8455 = vmatpush3.bf16.msra.mxu1 %v2329_v28  ;;  %1726 = vmatprep.mubr.bf16.mxu1 %v7914_v9  ;;  %v7915_v9 = vcombine.low %v16174_v5, %v16172_v3 }
 0x38a   : >> { %8456 = vmatprep.subr.bf16.mxu1 %v2347_v27  ;;  %2160 = vmatmul.mubr.bf16.gmra.mrb[92].mxu0 %v7973_v10  ;;  %v16175_v10 = vld [vmem:[#allocation244_spill] sm:$0xff]  ;;  %v16177_v27 = vld [vmem:[#allocation243_spill] sm:$0xff] }
 0x38b   : >> { %v2333_v2 = vpop.permute.xlu1 %2332  ;;  %v16176_v1 = vmov %v16175_v10  ;;  %v16178_v6 = vmov %v16177_v27  ;;  %v7918_v4 = vcombine.high %v16177_v27, %v16175_v10 }
 0x38c   : >> { %v2349_v13 = vpop.permute.xlu0 %2348 }
 0x38d   : >> { %8457 = vmatpush3.bf16.msra.mxu1 %v2331_v8 }
 0x38e   : >> { %8458 = vmatprep.subr.bf16.mxu1 %v2349_v13 }
 0x38f   : >> { %v2335_v0 = vpop.permute.xlu1 %2334 }
 0x390   : >> { %1727 = vmatmul.mubr.bf16.gmra.mrb[4].mxu1 %v7913_v11  ;;  %v2351_v7 = vpop.permute.xlu0 %2350  ;;  %v16179_v11 = vld [vmem:[#allocation246_spill] sm:$0xff] }
 0x391   : >> { %8459 = vmatpush3.bf16.msra.mxu1 %v2333_v2  ;;  %1734 = vmatprep.mubr.bf16.mxu1 %v7916_v31  ;;  %v7917_v2 = vcombine.low %v16178_v6, %v16176_v1  ;;  %v16180_v12 = vmov %v16179_v11  ;;  %v16181_v31 = vld [vmem:[#allocation245_spill] sm:$0xff] }
 0x392   : >> { %8460 = vmatprep.subr.bf16.mxu1 %v2351_v7  ;;  %v16182_v14 = vmov %v16181_v31  ;;  %v7920_v7 = vcombine.high %v16181_v31, %v16179_v11  ;;  %v16190_v11 = vld [vmem:[#allocation252_spill] sm:$0xff]  ;;  %v16192_v31 = vld [vmem:[#allocation251_spill] sm:$0xff] }
 0x393   : >> { %v2337_v28 = vpop.permute.xlu1 %2336  ;;  %v16193_v1 = vmov %v16192_v31 }
 0x394   : >> { %v2353_v58 = vpop.permute.xlu0 %2352 }
 0x395   : >> { %8461 = vmatpush3.bf16.msra.mxu1 %v2335_v0 }
 0x396   : >> { %8462 = vmatprep.subr.bf16.mxu1 %v2353_v58 }
 0x397   : >> { %v2339_v8 = vpop.permute.xlu1 %2338 }
 0x398   : >> { %1735 = vmatmul.mubr.bf16.gmra.mrb[8].mxu1 %v7915_v9  ;;  %v2355_v61 = vpop.permute.xlu0 %2354  ;;  %v16185_v9 = vld [vmem:[#allocation247_spill] sm:$0xff] }
 0x399   : >> { %8463 = vmatpush3.bf16.msra.mxu1 %v2337_v28  ;;  %1742 = vmatprep.mubr.bf16.mxu1 %v7918_v4  ;;  %v7919_v4 = vcombine.low %v16182_v14, %v16180_v12  ;;  %v16183_v28 = vld [vmem:[#allocation248_spill] sm:$0xff]  ;;  %v16186_v15 = vmov %v16185_v9 }
 0x39a   : >> { %8464 = vmatprep.subr.bf16.mxu1 %v2355_v61  ;;  %v16184_v5 = vmov %v16183_v28  ;;  %v7922_v10 = vcombine.high %v16185_v9, %v16183_v28  ;;  %v16188_v61 = vld [vmem:[#allocation249_spill] sm:$0xff] }
 0x39b   : >> { %v2341_v3 = vpop.permute.xlu1 %2340  ;;  %v7921_v27 = vcombine.low %v16186_v15, %v16184_v5  ;;  %v16195_v28 = vld [vmem:[#allocation253_spill] sm:$0xff] }
 0x39c   : >> { %v2357_v13 = vpop.permute.xlu0 %2356  ;;  %v16196_v6 = vmov %v16195_v28 }
 0x39d   : >> { %8465 = vmatpush3.bf16.msra.mxu1 %v2339_v8  ;;  %v16187_v8 = vld [vmem:[#allocation250_spill] sm:$0xff] }
 0x39e   : >> { %8466 = vmatprep.subr.bf16.mxu1 %v2357_v13  ;;  %v16189_v13 = vmov %v16188_v61 }
 0x39f   : >> { %v2343_v58 = vpop.permute.xlu1 %2342 }
 0x3a0   : >> { %1743 = vmatmul.mubr.bf16.gmra.mrb[12].mxu1 %v7917_v2  ;;  %v2359_v0 = vpop.permute.xlu0 %2358  ;;  %v7924_v2 = vcombine.high %v16188_v61, %v16187_v8  ;;  %v16199_v61 = vld [vmem:[#allocation255_spill] sm:$0xff] }
 0x3a1   : >> { %8467 = vmatpush3.bf16.msra.mxu1 %v2341_v3  ;;  %1750 = vmatprep.mubr.bf16.mxu1 %v7920_v7  ;;  %v7923_v3 = vcombine.low %v16189_v13, %v16187_v8  ;;  %v7926_v7 = vcombine.high %v16192_v31, %v16190_v11  ;;  %v16200_v5 = vmov %v16199_v61  ;;  %v16203_v31 = vld [vmem:[#allocation257_spill] sm:$0xff] }
 0x3a2   : >> { %8468 = vmatprep.subr.bf16.mxu1 %v2359_v0  ;;  %v16191_v0 = vmov %v16190_v11  ;;  %v16201_v11 = vld [vmem:[#allocation258_spill] sm:$0xff]  ;;  %v16204_v13 = vmov %v16203_v31 }
 0x3a3   : >> { %v16202_v8 = vmov %v16201_v11 }
 0x3a5   : >> { %8469 = vmatpush3.bf16.msra.mxu1 %v2343_v58  ;;  %v7925_v58 = vcombine.low %v16193_v1, %v16191_v0 }
 0x3a8   : >> { %1751 = vmatmul.mubr.bf16.gmra.mrb[16].mxu1 %v7919_v4  ;;  %v16194_v4 = vld [vmem:[#allocation254_spill] sm:$0xff] }
 0x3a9   : >> { %1758 = vmatprep.mubr.bf16.mxu1 %v7922_v10  ;;  %v7928_v9 = vcombine.high %v16195_v28, %v16194_v4  ;;  %v7927_v10 = vcombine.low %v16196_v6, %v16194_v4  ;;  %v16205_v28 = vld [vmem:[#allocation260_spill] sm:$0xff] }
 0x3aa   : >> { %v16206_v0 = vmov %v16205_v28 }
 0x3b0   : >> { %1759 = vmatmul.mubr.bf16.gmra.mrb[20].mxu1 %v7921_v27  ;;  %v16197_v27 = vld [vmem:[#allocation256_spill] sm:$0xff] }
 0x3b1   : >> { %1766 = vmatprep.mubr.bf16.mxu1 %v7924_v2  ;;  %v16198_v2 = vmov %v16197_v27  ;;  %v7930_v12 = vcombine.high %v16199_v61, %v16197_v27  ;;  %v16210_v27 = vld [vmem:[#allocation261_spill] sm:$0xff] }
 0x3b2   : >> { %v16211_v4 = vmov %v16210_v27 }
 0x3b8   : >> { %1767 = vmatmul.mubr.bf16.gmra.mrb[24].mxu1 %v7923_v3  ;;  %v7929_v3 = vcombine.low %v16200_v5, %v16198_v2 }
 0x3b9   : >> { %1774 = vmatprep.mubr.bf16.mxu1 %v7926_v7  ;;  %v7932_v7 = vcombine.high %v16203_v31, %v16201_v11  ;;  %v16212_v11 = vld [vmem:[#allocation264_spill] sm:$0xff]  ;;  %v16214_v31 = vld [vmem:[#allocation263_spill] sm:$0xff] }
 0x3ba   : >> { %v16213_v2 = vmov %v16212_v11  ;;  %v16215_v5 = vmov %v16214_v31 }
 0x3c0   : >> { %1775 = vmatmul.mubr.bf16.gmra.mrb[28].mxu1 %v7925_v58  ;;  %v7931_v58 = vcombine.low %v16204_v13, %v16202_v8 }
 0x3c1   : >> { %1782 = vmatprep.mubr.bf16.mxu1 %v7928_v9  ;;  %v16207_v9 = vld [vmem:[#allocation259_spill] sm:$0xff] }
 0x3c2   : >> { %v16208_v1 = vmov %v16207_v9  ;;  %v7934_v14 = vcombine.high %v16207_v9, %v16205_v28  ;;  %v7937_v9 = vcombine.low %v16215_v5, %v16213_v2 }
 0x3c8   : >> { %1783 = vmatmul.mubr.bf16.gmra.mrb[32].mxu1 %v7927_v10  ;;  %v7933_v10 = vcombine.low %v16208_v1, %v16206_v0 }
 0x3c9   : >> { %1790 = vmatprep.mubr.bf16.mxu1 %v7930_v12  ;;  %v16209_v12 = vld [vmem:[#allocation262_spill] sm:$0xff] }
 0x3ca   : >> { %v7936_v61 = vcombine.high %v16210_v27, %v16209_v12  ;;  %v16218_v27 = vld [vmem:[#allocation265_spill] sm:$0xff] }
 0x3cb   : >> { %v16219_v1 = vmov %v16218_v27 }
 0x3d0   : >> { %1791 = vmatmul.mubr.bf16.gmra.mrb[36].mxu1 %v7929_v3  ;;  %v7935_v3 = vcombine.low %v16211_v4, %v16209_v12 }
 0x3d1   : >> { %1798 = vmatprep.mubr.bf16.mxu1 %v7932_v7  ;;  %v7938_v7 = vcombine.high %v16214_v31, %v16212_v11  ;;  %v16220_v31 = vld [vmem:[#allocation268_spill] sm:$0xff] }
 0x3d8   : >> { %1799 = vmatmul.mubr.bf16.gmra.mrb[40].mxu1 %v7931_v58 }
 0x3d9   : >> { %1806 = vmatprep.mubr.bf16.mxu1 %v7934_v14 }
 0x3e0   : >> { %1807 = vmatmul.mubr.bf16.gmra.mrb[44].mxu1 %v7933_v10  ;;  %v16216_v10 = vld [vmem:[#allocation266_spill] sm:$0xff] }
 0x3e1   : >> { %1814 = vmatprep.mubr.bf16.mxu1 %v7936_v61  ;;  %v16217_v0 = vmov %v16216_v10  ;;  %v7940_v61 = vcombine.high %v16218_v27, %v16216_v10  ;;  %v16224_v10 = vld [vmem:[#allocation270_spill] sm:$0xff]  ;;  %v16226_v27 = vld [vmem:[#allocation269_spill] sm:$0xff] }
 0x3e2   : >> { %v7939_v33 = vcombine.low %v16219_v1, %v16217_v0  ;;  %v7976_v41 = vcombine.high %v16226_v27, %v16224_v10 }
 0x3e5   : >> { %v8358_v6 = vpop.f32.mrb[32].mxu0 }
 0x3e6   : >> { %v8359_v8 = vpop.f32.mrb[33].mxu0 }
 0x3e7   : >> { %v12625_v13 = vadd.f32 %v8359_v8, %v8358_v6  ;;  %v8361_v58 = vpop.f32.mrb[34].mxu0 }
 0x3e8   : >> { %1815 = vmatmul.mubr.bf16.gmra.mrb[48].mxu1 %v7935_v3  ;;  %v8362_v14 = vpop.f32.mrb[35].mxu0 }
 0x3e9   : >> { %1822 = vmatprep.mubr.bf16.mxu1 %v7938_v7  ;;  %v12627_v28 = vadd.f32 %v8362_v14, %v8361_v58  ;;  %v16221_v14 = vmov %v16220_v31  ;;  %v16222_v7 = vld [vmem:[#allocation267_spill] sm:$0xff] }
 0x3ea   : >> { %v16223_v2 = vmov %v16222_v7  ;;  %v7942_v32 = vcombine.high %v16222_v7, %v16220_v31 }
 0x3eb   : >> { %v7941_v42 = vcombine.low %v16223_v2, %v16221_v14 }
 0x3ed   : >> { %v8364_v4 = vpop.f32.mrb[36].mxu0 }
 0x3ee   : >> { %v8365_v12 = vpop.f32.mrb[37].mxu0 }
 0x3ef   : >> { %v12637_v6 = vadd.f32 %v8365_v12, %v8364_v4  ;;  %v8367_v8 = vpop.f32.mrb[38].mxu0 }
 0x3f0   : >> { %1823 = vmatmul.mubr.bf16.gmra.mrb[52].mxu1 %v7937_v9  ;;  %v8368_v3 = vpop.f32.mrb[39].mxu0 }
 0x3f1   : >> { %1830 = vmatprep.mubr.bf16.mxu1 %v7940_v61  ;;  %v12639_v11 = vadd.f32 %v8368_v3, %v8367_v8  ;;  %v16225_v8 = vmov %v16224_v10  ;;  %v16227_v3 = vmov %v16226_v27  ;;  %v16231_v27 = vld [vmem:[#allocation274_spill] sm:$0xff] }
 0x3f2   : >> { %v7975_v46 = vcombine.low %v16227_v3, %v16225_v8  ;;  %v16232_v0 = vmov %v16231_v27 }
 0x3f5   : >> { %v8370_v4 = vpop.f32.mrb[40].mxu0 }
 0x3f6   : >> { %v8371_v12 = vpop.f32.mrb[41].mxu0 }
 0x3f7   : >> { %v12653_v58 = vadd.f32 %v8371_v12, %v8370_v4  ;;  %v8373_v30 = vpop.f32.mrb[42].mxu0  ;;  %v16230_v12 = vld [vmem:[#allocation271_spill] sm:$0xff] }
 0x3f8   : >> { %1831 = vmatmul.mubr.bf16.gmra.mrb[56].mxu1 %v7939_v33  ;;  %v8374_v9 = vpop.f32.mrb[43].mxu0 }
 0x3f9   : >> { %1838 = vmatprep.mubr.bf16.mxu1 %v7942_v32  ;;  %v12655_v29 = vadd.f32 %v8374_v9, %v8373_v30  ;;  %v16228_v32 = vld [vmem:[#allocation272_spill] sm:$0xff] }
 0x3fa   : >> { %v16229_v4 = vmov %v16228_v32  ;;  %v7978_v45 = vcombine.high %v16230_v12, %v16228_v32  ;;  %v16237_v32 = vld [vmem:[#allocation275_spill] sm:$0xff] }
 0x3fb   : >> { %v7977_v50 = vcombine.low %v16230_v12, %v16229_v4  ;;  %v16238_v3 = vmov %v16237_v32 }
 0x3fd   : >> { %v8376_v61 = vpop.f32.mrb[44].mxu0 }
 0x3fe   : >> { %v8377_v31 = vpop.f32.mrb[45].mxu0 }
 0x3ff   : >> { %v12669_v33 = vadd.f32 %v8377_v31, %v8376_v61  ;;  %v8379_v44 = vpop.f32.mrb[46].mxu0 }
 0x400   : >> { %1839 = vmatmul.mubr.bf16.gmra.mrb[60].mxu1 %v7941_v42  ;;  %v8380_v7 = vpop.f32.mrb[47].mxu0 }
 0x401   : >> { %2408 = vmatprep.mubr.bf16.mxu1 %v7976_v41  ;;  %v12671_v43 = vadd.f32 %v8380_v7, %v8379_v44  ;;  %v16233_v41 = vld [vmem:[#allocation273_spill] sm:$0xff] }
 0x402   : >> { %v16234_v1 = vmov %v16233_v41  ;;  %v7980_v49 = vcombine.high %v16233_v41, %v16231_v27  ;;  %v16242_v27 = vld [vmem:[#allocation277_spill] sm:$0xff] }
 0x403   : >> { %v7979_v55 = vcombine.low %v16234_v1, %v16232_v0  ;;  %v16243_v1 = vmov %v16242_v27 }
 0x405   : >> { %v8382_v30 = vpop.f32.mrb[48].mxu0 }
 0x406   : >> { %v8383_v9 = vpop.f32.mrb[49].mxu0 }
 0x407   : >> { %v12685_v42 = vadd.f32 %v8383_v9, %v8382_v30  ;;  %v8385_v48 = vpop.f32.mrb[50].mxu0 }
 0x408   : >> { %2409 = vmatmul.mubr.bf16.vlgmr.msra.gmra.mrb[64].mxu1 %v7975_v46  ;;  %v8386_v10 = vpop.f32.mrb[51].mxu0  ;;  %v16235_v46 = vld [vmem:[#allocation276_spill] sm:$0xff] }
 0x409   : >> { %2416 = vmatprep.mubr.bf16.mxu1 %v7978_v45  ;;  %v12687_v47 = vadd.f32 %v8386_v10, %v8385_v48  ;;  %v16236_v2 = vmov %v16235_v46  ;;  %v7982_v53 = vcombine.high %v16237_v32, %v16235_v46  ;;  %v16239_v10 = vld [vmem:[#allocation309_spill] sm:$0xff]  ;;  %v16246_v46 = vld [vmem:[#allocation306_spill] sm:$0xff] }
 0x40a   : >> { %2647 = vrot.lane.b32.xlu1 %v16239_v10, %s10701_s3  ;;  %v7981_v62 = vcombine.low %v16238_v3, %v16236_v2  ;;  %v16247_v32 = vld [vmem:[#allocation305_spill] sm:$0xff] }
 0x40d   : >> { %v8388_v61 = vpop.f32.mrb[52].mxu0 }
 0x40e   : >> { %v8389_v31 = vpop.f32.mrb[53].mxu0 }
 0x40f   : >> { %v12701_v44 = vadd.f32 %v8389_v31, %v8388_v61  ;;  %v8391_v52 = vpop.f32.mrb[54].mxu0  ;;  %v16244_v61 = vld [vmem:[#allocation308_spill] sm:$0xff]  ;;  %v16245_v31 = vld [vmem:[#allocation307_spill] sm:$0xff] }
 0x410   : >> { %2417 = vmatmul.mubr.bf16.gmra.mrb[68].mxu1 %v7977_v50  ;;  %v8392_v7 = vpop.f32.mrb[55].mxu0  ;;  %v16240_v50 = vld [vmem:[#allocation278_spill] sm:$0xff]  ;;  %2649 = vrot.lane.b32.xlu0 %v16244_v61, %s10701_s3  ;;  %v16254_v61 = vld [vmem:[#allocation35_spill] sm:$0xff] }
 0x411   : >> { %2424 = vmatprep.mubr.bf16.mxu1 %v7980_v49  ;;  %v12703_v51 = vadd.f32 %v8392_v7, %v8391_v52  ;;  %v16241_v0 = vmov %v16240_v50  ;;  %v7984_v59 = vcombine.high %v16242_v27, %v16240_v50  ;;  %2651 = vrot.lane.b32.xlu1 %v16245_v31, %s10701_s3  ;;  %v16253_v50 = vld [vmem:[#allocation303_spill] sm:$0xff]  ;;  %v16255_v31 = vld [vmem:[#allocation34_spill] sm:$0xff] }
 0x414   : >> { %2653 = vrot.lane.b32.xlu0 %v16246_v46, %s10701_s3  ;;  %v16257_v46 = vld [vmem:[#allocation301_spill] sm:$0xff] }
 0x415   : >> { %v8394_v45 = vpop.f32.mrb[56].mxu0  ;;  %2655 = vrot.lane.b32.xlu1 %v16247_v32, %s10701_s3 }
 0x416   : >> { %v8395_v30 = vpop.f32.mrb[57].mxu0 }
 0x417   : >> { %v12717_v9 = vadd.f32 %v8395_v30, %v8394_v45  ;;  %v8397_v57 = vpop.f32.mrb[58].mxu0  ;;  %v16248_v45 = vld [vmem:[#allocation280_spill] sm:$0xff]  ;;  %v16250_v30 = vld [vmem:[#allocation279_spill] sm:$0xff] }
 0x418   : >> { %2425 = vmatmul.mubr.bf16.gmra.mrb[72].mxu1 %v7979_v55  ;;  %v8398_v48 = vpop.f32.mrb[59].mxu0  ;;  %v16249_v2 = vmov %v16248_v45  ;;  %v16251_v3 = vmov %v16250_v30 }
 0x419   : >> { %2432 = vmatprep.mubr.bf16.mxu1 %v7982_v53  ;;  %v12719_v56 = vadd.f32 %v8398_v48, %v8397_v57  ;;  %v7983_v53 = vcombine.low %v16243_v1, %v16241_v0  ;;  %v7986_v57 = vcombine.high %v16250_v30, %v16248_v45  ;;  %2659 = vrot.lane.b32.xlu1 %v16253_v50, %s10701_s3  ;;  %v16258_v45 = vld [vmem:[#allocation282_spill] sm:$0xff] }
 0x41a   : >> { %v7985_v32 = vcombine.low %v16251_v3, %v16249_v2  ;;  %v16259_v0 = vmov %v16258_v45 }
 0x41d   : >> { %v8400_v41 = vpop.f32.mrb[60].mxu0  ;;  %2663 = vrot.lane.b32.xlu1 %v16257_v46, %s10701_s3 }
 0x41e   : >> { %v8401_v49 = vpop.f32.mrb[61].mxu0 }
 0x41f   : >> { %v12733_v52 = vadd.f32 %v8401_v49, %v8400_v41  ;;  %v8403_v60 = vpop.f32.mrb[62].mxu0 }
 0x420   : >> { %2433 = vmatmul.mubr.bf16.gmra.mrb[76].mxu1 %v7981_v62  ;;  %v8404_v7 = vpop.f32.mrb[63].mxu0  ;;  %v16252_v62 = vld [vmem:[#allocation304_spill] sm:$0xff] }
 0x421   : >> { %2440 = vmatprep.mubr.bf16.mxu1 %v7984_v59  ;;  %v12735_v55 = vadd.f32 %v8404_v7, %v8403_v60  ;;  %2657 = vrot.lane.b32.xlu0 %v16252_v62, %s10701_s3  ;;  %v8007_v60 = vcombine.low %v16255_v31, %v16254_v61  ;;  %v16256_v7 = vld [vmem:[#allocation302_spill] sm:$0xff]  ;;  %v16262_v61 = vld [vmem:[#allocation284_spill] sm:$0xff] }
 0x422   : >> { %v16263_v4 = vmov %v16262_v61  ;;  %v16264_v31 = vld [vmem:[#allocation283_spill] sm:$0xff] }
 0x423   : >> { %8906 = vmatprep.subr.bf16.mxu0 %v8007_v60  ;;  %v16265_v5 = vmov %v16264_v31 }
 0x424   : >> { %8907 = vmatpush3.bf16.msra.mxu0 %v8007_v60 }
 0x425   : >> { %v8406_v48 = vpop.f32.mrb[64].mxu0  ;;  %2661 = vrot.lane.b32.xlu0 %v16256_v7, %s10701_s3  ;;  %v7990_v7 = vcombine.high %v16264_v31, %v16262_v61 }
 0x426   : >> { %v8407_v10 = vpop.f32.mrb[65].mxu0 }
 0x427   : >> { %v12749_v27 = vadd.f32 %v8407_v10, %v8406_v48  ;;  %v8409_v59 = vpop.f32.mrb[66].mxu0 }
 0x428   : >> { %2441 = vmatmul.mubr.bf16.gmra.mrb[80].mxu1 %v7983_v53  ;;  %v8410_v41 = vpop.f32.mrb[67].mxu0  ;;  %v16260_v53 = vld [vmem:[#allocation281_spill] sm:$0xff] }
 0x429   : >> { %2448 = vmatprep.mubr.bf16.mxu1 %v7986_v57  ;;  %v12751_v49 = vadd.f32 %v8410_v41, %v8409_v59  ;;  %v16261_v1 = vmov %v16260_v53  ;;  %v7988_v30 = vcombine.high %v16260_v53, %v16258_v45 }
 0x42a   : >> { %v7987_v41 = vcombine.low %v16261_v1, %v16259_v0 }
 0x42d   : >> { %v8412_v57 = vpop.f32.mrb[68].mxu0 }
 0x42e   : >> { %v8413_v48 = vpop.f32.mrb[69].mxu0 }
 0x42f   : >> { %v12763_v10 = vadd.f32 %v8413_v48, %v8412_v57  ;;  %v8415_v62 = vpop.f32.mrb[70].mxu0  ;;  %v16268_v48 = vld [vmem:[#allocation285_spill] sm:$0xff] }
 0x430   : >> { %2449 = vmatmul.mubr.bf16.gmra.mrb[84].mxu1 %v7985_v32  ;;  %v8416_v50 = vpop.f32.mrb[71].mxu0  ;;  %v7989_v32 = vcombine.low %v16265_v5, %v16263_v4  ;;  %v16269_v8 = vmov %v16268_v48 }
 0x431   : >> { %2456 = vmatprep.mubr.bf16.mxu1 %v7988_v30  ;;  %v12765_v59 = vadd.f32 %v8416_v50, %v8415_v62  ;;  %v16266_v30 = vld [vmem:[#allocation286_spill] sm:$0xff] }
 0x432   : >> { %v16267_v3 = vmov %v16266_v30  ;;  %v7992_v62 = vcombine.high %v16268_v48, %v16266_v30 }
 0x435   : >> { %v8418_v60 = vpop.f32.mrb[72].mxu0 }
 0x436   : >> { %v8419_v46 = vpop.f32.mrb[73].mxu0 }
 0x437   : >> { %v12771_v2 = vadd.f32 %v8419_v46, %v8418_v60  ;;  %v8421_v45 = vpop.f32.mrb[74].mxu0  ;;  %v16272_v46 = vld [vmem:[#allocation287_spill] sm:$0xff] }
 0x438   : >> { %2457 = vmatmul.mubr.bf16.gmra.mrb[88].mxu1 %v7987_v41  ;;  %v8422_v53 = vpop.f32.mrb[75].mxu0  ;;  %v7991_v41 = vcombine.low %v16269_v8, %v16267_v3  ;;  %v16273_v14 = vmov %v16272_v46 }
 0x439   : >> { %2464 = vmatprep.mubr.bf16.mxu1 %v7990_v7  ;;  %v12773_v57 = vadd.f32 %v8422_v53, %v8421_v45  ;;  %v16270_v7 = vld [vmem:[#allocation288_spill] sm:$0xff] }
 0x43a   : >> { %v16271_v12 = vmov %v16270_v7  ;;  %v7994_v45 = vcombine.high %v16272_v46, %v16270_v7  ;;  %v16278_v7 = vld [vmem:[#allocation289_spill] sm:$0xff] }
 0x43b   : >> { %v16279_v8 = vmov %v16278_v7 }
 0x43d   : >> { %v8424_v50 = vpop.f32.mrb[76].mxu0 }
 0x43e   : >> { %v8425_v0 = vpop.f32.mrb[77].mxu0 }
 0x43f   : >> { %v12779_v1 = vadd.f32 %v8425_v0, %v8424_v50  ;;  %v8427_v61 = vpop.f32.mrb[78].mxu0 }
 0x440   : >> { %2465 = vmatmul.mubr.bf16.gmra.mrb[92].mxu1 %v7989_v32  ;;  %v8428_v31 = vpop.f32.mrb[79].mxu0  ;;  %v16274_v32 = vld [vmem:[#allocation37_spill] sm:$0xff] }
 0x441   : >> { %2472 = vmatprep.mubr.bf16.mxu1 %v7992_v62  ;;  %v12781_v60 = vadd.f32 %v8428_v31, %v8427_v61  ;;  %v16275_v62 = vld [vmem:[#allocation36_spill] sm:$0xff]  ;;  %v7993_v61 = vcombine.low %v16273_v14, %v16271_v12  ;;  %v16276_v31 = vld [vmem:[#allocation290_spill] sm:$0xff] }
 0x442   : >> { %v8008_v50 = vcombine.low %v16275_v62, %v16274_v32  ;;  %v16277_v3 = vmov %v16276_v31  ;;  %v7996_v46 = vcombine.high %v16278_v7, %v16276_v31  ;;  %v16280_v32 = vld [vmem:[#allocation292_spill] sm:$0xff]  ;;  %v16282_v62 = vld [vmem:[#allocation291_spill] sm:$0xff] }
 0x443   : >> { %v16281_v16 = vmov %v16280_v32  ;;  %v16283_v17 = vmov %v16282_v62  ;;  %v7998_v12 = vcombine.high %v16282_v62, %v16280_v32 }
 0x444   : >> { %8908 = vmatprep.subr.bf16.mxu0 %v8008_v50 }
 0x445   : >> { %v8430_v53 = vpop.f32.mrb[80].mxu0  ;;  %8909 = vmatpush3.bf16.msra.mxu0 %v8008_v50 }
 0x446   : >> { %v8431_v4 = vpop.f32.mrb[81].mxu0 }
 0x447   : >> { %v12787_v5 = vadd.f32 %v8431_v4, %v8430_v53  ;;  %v8433_v30 = vpop.f32.mrb[82].mxu0 }
 0x448   : >> { %2473 = vmatmul.mubr.bf16.gmra.mrb[96].mxu1 %v7991_v41  ;;  %v8434_v0 = vpop.f32.mrb[83].mxu0 }
 0x449   : >> { %2480 = vmatprep.mubr.bf16.mxu1 %v7994_v45  ;;  %v12789_v48 = vadd.f32 %v8434_v0, %v8433_v30  ;;  %v7995_v0 = vcombine.low %v16279_v8, %v16277_v3  ;;  %v16284_v3 = vld [vmem:[#allocation294_spill] sm:$0xff]  ;;  %v16285_v8 = vld [vmem:[#allocation293_spill] sm:$0xff] }
 0x44a   : >> { %v8000_v32 = vcombine.high %v16285_v8, %v16284_v3 }
 0x44d   : >> { %v8436_v15 = vpop.f32.mrb[84].mxu0 }
 0x44e   : >> { %v8437_v4 = vpop.f32.mrb[85].mxu0 }
 0x44f   : >> { %v12797_v53 = vadd.f32 %v8437_v4, %v8436_v15  ;;  %v8439_v41 = vpop.f32.mrb[86].mxu0  ;;  %v7997_v4 = vcombine.low %v16283_v17, %v16281_v16  ;;  %v7999_v17 = vcombine.low %v16285_v8, %v16284_v3 }
 0x450   : >> { %2481 = vmatmul.mubr.bf16.gmra.mrb[100].mxu1 %v7993_v61  ;;  %v8440_v45 = vpop.f32.mrb[87].mxu0 }
 0x451   : >> { %2488 = vmatprep.mubr.bf16.mxu1 %v7996_v46  ;;  %v12799_v30 = vadd.f32 %v8440_v45, %v8439_v41 }
 0x455   : >> { %v8442_v50 = vpop.f32.mrb[88].mxu0 }
 0x456   : >> { %v8443_v14 = vpop.f32.mrb[89].mxu0 }
 0x457   : >> { %v12805_v18 = vadd.f32 %v8443_v14, %v8442_v50  ;;  %v8445_v31 = vpop.f32.mrb[90].mxu0 }
 0x458   : >> { %2489 = vmatmul.mubr.bf16.gmra.mrb[104].mxu1 %v7995_v0  ;;  %v8446_v15 = vpop.f32.mrb[91].mxu0 }
 0x459   : >> { %2496 = vmatprep.mubr.bf16.mxu1 %v7998_v12  ;;  %v12807_v7 = vadd.f32 %v8446_v15, %v8445_v31 }
 0x45b   : >> { %v8246_v61 = vpop.f32.mrb[0].mxu1 }
 0x45c   : >> { %v8247_v46 = vpop.f32.mrb[1].mxu1 }
 0x45d   : >> { %v8248_v41 = vadd.f32 %v8247_v46, %v8246_v61  ;;  %v8249_v45 = vpop.f32.mrb[2].mxu1  ;;  %v8448_v62 = vpop.f32.mrb[92].mxu0 }
 0x45e   : >> { %v8250_v19 = vpop.f32.mrb[3].mxu1  ;;  %v8449_v14 = vpop.f32.mrb[93].mxu0 }
 0x45f   : >> { %v12814_v50 = vadd.f32 %v12625_v13, %v8248_v41  ;;  %v8251_v0 = vadd.f32 %v8250_v19, %v8249_v45  ;;  %v12816_v12 = vadd.f32 %v8449_v14, %v8448_v62  ;;  %v8451_v31 = vpop.f32.mrb[94].mxu0  ;;  %v16287_v13 = vld [vmem:[#allocation38_spill] sm:$0xff]  ;;  %v16288_v62 = vld [vmem:[#allocation296_spill] sm:$0xff] }
 0x460   : >> { %2497 = vmatmul.mubr.bf16.gmra.mrb[108].mxu1 %v7997_v4  ;;  %v8452_v15 = vpop.f32.mrb[95].mxu0  ;;  %v8009_v41 = vcombine.low %v16287_v13, %v16286_v21  ;;  %v16289_v14 = vmov %v16288_v62  ;;  %v8002_v4 = vcombine.high %v16290_v22, %v16288_v62 }
 0x461   : >> { %v12819_v20 = vadd.f32 %v12627_v28, %v8251_v0  ;;  %2504 = vmatprep.mubr.bf16.mxu1 %v8000_v32  ;;  %v12821_v61 = vadd.f32 %v8452_v15, %v8451_v31  ;;  %v16291_v0 = vld [vmem:[#allocation41_spill] sm:$0xff]  ;;  %v16292_v31 = vld [vmem:[#allocation40_spill] sm:$0xff] }
 0x462   : >> { %8910 = vmatprep.subr.bf16.mxu0 %v8009_v41  ;;  %v8010_v15 = vcombine.low %v16292_v31, %v16291_v0 }
 0x463   : >> { %v8252_v46 = vpop.f32.mrb[4].mxu1  ;;  %8911 = vmatpush3.bf16.msra.mxu0 %v8009_v41 }
 0x464   : >> { %v8253_v16 = vpop.f32.mrb[5].mxu1  ;;  %8912 = vmatprep.subr.bf16.mxu0 %v8010_v15 }
 0x465   : >> { %v8254_v19 = vadd.f32 %v8253_v16, %v8252_v46  ;;  %v8255_v45 = vpop.f32.mrb[6].mxu1  ;;  %v8001_v46 = vcombine.low %v16290_v22, %v16289_v14 }
 0x466   : >> { %v8256_v23 = vpop.f32.mrb[7].mxu1 }
 0x467   : >> { %v12830_v28 = vadd.f32 %v12637_v6, %v8254_v19  ;;  %v8257_v32 = vadd.f32 %v8256_v23, %v8255_v45  ;;  %8913 = vmatpush3.bf16.msra.mxu0 %v8010_v15  ;;  %v16293_v19 = vld [vmem:[#allocation298_spill] sm:$0xff]  ;;  %v16294_v23 = vld [vmem:[#allocation297_spill] sm:$0xff] }
 0x468   : >> { %2505 = vmatmul.mubr.bf16.gmra.mrb[112].mxu1 %v7999_v17  ;;  %v8004_v41 = vcombine.high %v16294_v23, %v16293_v19  ;;  %v8003_v0 = vcombine.low %v16294_v23, %v16293_v19 }
 0x469   : >> { %v12835_v3 = vadd.f32 %v12639_v11, %v8257_v32  ;;  %2512 = vmatprep.mubr.bf16.mxu1 %v8002_v4 }
 0x46b   : >> { %v8258_v16 = vpop.f32.mrb[8].mxu1 }
 0x46c   : >> { %v8259_v21 = vpop.f32.mrb[9].mxu1 }
 0x46d   : >> { %v8260_v13 = vadd.f32 %v8259_v21, %v8258_v16  ;;  %v8261_v6 = vpop.f32.mrb[10].mxu1  ;;  %v16295_v16 = vld [vmem:[#allocation300_spill] sm:$0xff]  ;;  %v16296_v21 = vld [vmem:[#allocation299_spill] sm:$0xff] }
 0x46e   : >> { %v8262_v17 = vpop.f32.mrb[11].mxu1  ;;  %v8006_v8 = vcombine.high %v16296_v21, %v16295_v16 }
 0x46f   : >> { %v12842_v45 = vadd.f32 %v12653_v58, %v8260_v13  ;;  %v8263_v62 = vadd.f32 %v8262_v17, %v8261_v6 }
 0x470   : >> { %2513 = vmatmul.mubr.bf16.gmra.mrb[116].mxu1 %v8001_v46 }
 0x471   : >> { %v12845_v11 = vadd.f32 %v12655_v29, %v8263_v62  ;;  %2520 = vmatprep.mubr.bf16.mxu1 %v8004_v41  ;;  %v8005_v41 = vcombine.low %v16296_v21, %v16295_v16 }
 0x473   : >> { %v8264_v4 = vpop.f32.mrb[12].mxu1 }
 0x474   : >> { %v8265_v32 = vpop.f32.mrb[13].mxu1 }
 0x475   : >> { %v8266_v31 = vadd.f32 %v8265_v32, %v8264_v4  ;;  %v8267_v15 = vpop.f32.mrb[14].mxu1 }
 0x476   : >> { %v8268_v14 = vpop.f32.mrb[15].mxu1 }
 0x477   : >> { %v12852_v58 = vadd.f32 %v12669_v33, %v8266_v31  ;;  %v8269_v13 = vadd.f32 %v8268_v14, %v8267_v15 }
 0x478   : >> { %2521 = vmatmul.mubr.bf16.gmra.mrb[120].mxu1 %v8003_v0 }
 0x479   : >> { %v12855_v29 = vadd.f32 %v12671_v43, %v8269_v13  ;;  %2528 = vmatprep.mubr.bf16.mxu1 %v8006_v8 }
 0x47b   : >> { %v8270_v46 = vpop.f32.mrb[16].mxu1 }
 0x47c   : >> { %v8271_v6 = vpop.f32.mrb[17].mxu1 }
 0x47d   : >> { %v8272_v17 = vadd.f32 %v8271_v6, %v8270_v46  ;;  %v8273_v62 = vpop.f32.mrb[18].mxu1 }
 0x47e   : >> { %v8274_v4 = vpop.f32.mrb[19].mxu1 }
 0x47f   : >> { %v12860_v32 = vadd.f32 %v12685_v42, %v8272_v17  ;;  %v8275_v19 = vadd.f32 %v8274_v4, %v8273_v62 }
 0x480   : >> { %2529 = vmatmul.mubr.bf16.gmra.mrb[124].mxu1 %v8005_v41 }
 0x481   : >> { %v12863_v33 = vadd.f32 %v12687_v47, %v8275_v19 }
 0x483   : >> { %v8276_v14 = vpop.f32.mrb[20].mxu1 }
 0x484   : >> { %v8277_v43 = vpop.f32.mrb[21].mxu1 }
 0x485   : >> { %v8278_v0 = vadd.f32 %v8277_v43, %v8276_v14  ;;  %v8279_v8 = vpop.f32.mrb[22].mxu1 }
 0x486   : >> { %v8280_v31 = vpop.f32.mrb[23].mxu1 }
 0x487   : >> { %v12866_v15 = vadd.f32 %v12701_v44, %v8278_v0  ;;  %v8281_v13 = vadd.f32 %v8280_v31, %v8279_v8 }
 0x489   : >> { %v12869_v46 = vadd.f32 %v12703_v51, %v8281_v13 }
 0x48b   : >> { %v8282_v6 = vpop.f32.mrb[24].mxu1 }
 0x48c   : >> { %v8283_v42 = vpop.f32.mrb[25].mxu1 }
 0x48d   : >> { %v8284_v17 = vadd.f32 %v8283_v42, %v8282_v6  ;;  %v8285_v62 = vpop.f32.mrb[26].mxu1 }
 0x48e   : >> { %v8286_v41 = vpop.f32.mrb[27].mxu1 }
 0x48f   : >> { %v12872_v47 = vadd.f32 %v12717_v9, %v8284_v17  ;;  %v8287_v19 = vadd.f32 %v8286_v41, %v8285_v62 }
 0x491   : >> { %v12875_v4 = vadd.f32 %v12719_v56, %v8287_v19 }
 0x493   : >> { %v8288_v14 = vpop.f32.mrb[28].mxu1 }
 0x494   : >> { %v8289_v43 = vpop.f32.mrb[29].mxu1 }
 0x495   : >> { %v8290_v44 = vadd.f32 %v8289_v43, %v8288_v14  ;;  %v8291_v0 = vpop.f32.mrb[30].mxu1 }
 0x496   : >> { %v8292_v8 = vpop.f32.mrb[31].mxu1 }
 0x497   : >> { %v12878_v51 = vadd.f32 %v12733_v52, %v8290_v44  ;;  %v8293_v31 = vadd.f32 %v8292_v8, %v8291_v0 }
 0x499   : >> { %v12881_v13 = vadd.f32 %v12735_v55, %v8293_v31 }
 0x49b   : >> { %v8294_v6 = vpop.f32.mrb[32].mxu1 }
 0x49c   : >> { %v8295_v42 = vpop.f32.mrb[33].mxu1 }
 0x49d   : >> { %v8296_v9 = vadd.f32 %v8295_v42, %v8294_v6  ;;  %v8297_v17 = vpop.f32.mrb[34].mxu1 }
 0x49e   : >> { %v8298_v62 = vpop.f32.mrb[35].mxu1 }
 0x49f   : >> { %v12884_v56 = vadd.f32 %v12749_v27, %v8296_v9  ;;  %v8299_v41 = vadd.f32 %v8298_v62, %v8297_v17 }
 0x4a1   : >> { %v12887_v19 = vadd.f32 %v12751_v49, %v8299_v41 }
 0x4a3   : >> { %v8300_v14 = vpop.f32.mrb[36].mxu1 }
 0x4a4   : >> { %v8301_v43 = vpop.f32.mrb[37].mxu1 }
 0x4a5   : >> { %v8302_v52 = vadd.f32 %v8301_v43, %v8300_v14  ;;  %v8303_v44 = vpop.f32.mrb[38].mxu1 }
 0x4a6   : >> { %v8304_v0 = vpop.f32.mrb[39].mxu1 }
 0x4a7   : >> { %v12890_v55 = vadd.f32 %v12763_v10, %v8302_v52  ;;  %v8305_v8 = vadd.f32 %v8304_v0, %v8303_v44 }
 0x4a9   : >> { %v12893_v31 = vadd.f32 %v12765_v59, %v8305_v8 }
 0x4ab   : >> { %v8306_v6 = vpop.f32.mrb[40].mxu1 }
 0x4ac   : >> { %v8307_v42 = vpop.f32.mrb[41].mxu1 }
 0x4ad   : >> { %v8308_v27 = vadd.f32 %v8307_v42, %v8306_v6  ;;  %v8309_v9 = vpop.f32.mrb[42].mxu1 }
 0x4ae   : >> { %v8310_v17 = vpop.f32.mrb[43].mxu1 }
 0x4af   : >> { %v12896_v49 = vadd.f32 %v12771_v2, %v8308_v27  ;;  %v8311_v62 = vadd.f32 %v8310_v17, %v8309_v9 }
 0x4b1   : >> { %v12899_v41 = vadd.f32 %v12773_v57, %v8311_v62 }
 0x4b3   : >> { %v8312_v14 = vpop.f32.mrb[44].mxu1 }
 0x4b4   : >> { %v8313_v43 = vpop.f32.mrb[45].mxu1 }
 0x4b5   : >> { %v8314_v10 = vadd.f32 %v8313_v43, %v8312_v14  ;;  %v8315_v52 = vpop.f32.mrb[46].mxu1 }
 0x4b6   : >> { %v8316_v44 = vpop.f32.mrb[47].mxu1 }
 0x4b7   : >> { %v12902_v59 = vadd.f32 %v12779_v1, %v8314_v10  ;;  %v8317_v0 = vadd.f32 %v8316_v44, %v8315_v52 }
 0x4b9   : >> { %v12905_v8 = vadd.f32 %v12781_v60, %v8317_v0 }
 0x4bb   : >> { %v8318_v6 = vpop.f32.mrb[48].mxu1 }
 0x4bc   : >> { %v8319_v42 = vpop.f32.mrb[49].mxu1 }
 0x4bd   : >> { %v8320_v2 = vadd.f32 %v8319_v42, %v8318_v6  ;;  %v8321_v27 = vpop.f32.mrb[50].mxu1 }
 0x4be   : >> { %v8322_v9 = vpop.f32.mrb[51].mxu1 }
 0x4bf   : >> { %v12908_v57 = vadd.f32 %v12787_v5, %v8320_v2  ;;  %v8323_v17 = vadd.f32 %v8322_v9, %v8321_v27 }
 0x4c1   : >> { %v12911_v62 = vadd.f32 %v12789_v48, %v8323_v17 }
 0x4c3   : >> { %v8324_v14 = vpop.f32.mrb[52].mxu1 }
 0x4c4   : >> { %v8325_v43 = vpop.f32.mrb[53].mxu1 }
 0x4c5   : >> { %v8326_v1 = vadd.f32 %v8325_v43, %v8324_v14  ;;  %v8327_v10 = vpop.f32.mrb[54].mxu1 }
 0x4c6   : >> { %v8328_v52 = vpop.f32.mrb[55].mxu1 }
 0x4c7   : >> { %v12914_v60 = vadd.f32 %v12797_v53, %v8326_v1  ;;  %v8329_v44 = vadd.f32 %v8328_v52, %v8327_v10 }
 0x4c9   : >> { %v12917_v0 = vadd.f32 %v12799_v30, %v8329_v44 }
 0x4cb   : >> { %v8330_v6 = vpop.f32.mrb[56].mxu1 }
 0x4cc   : >> { %v8331_v42 = vpop.f32.mrb[57].mxu1 }
 0x4cd   : >> { %v8332_v5 = vadd.f32 %v8331_v42, %v8330_v6  ;;  %v8333_v2 = vpop.f32.mrb[58].mxu1 }
 0x4ce   : >> { %v8334_v27 = vpop.f32.mrb[59].mxu1 }
 0x4cf   : >> { %v12920_v48 = vadd.f32 %v12805_v18, %v8332_v5  ;;  %v8335_v9 = vadd.f32 %v8334_v27, %v8333_v2 }
 0x4d1   : >> { %v12923_v17 = vadd.f32 %v12807_v7, %v8335_v9  ;;  %v12932_v9 = vpop.permute.xlu0 %2601 }
 0x4d3   : >> { %v8336_v14 = vpop.f32.mrb[60].mxu1 }
 0x4d4   : >> { %v8337_v43 = vpop.f32.mrb[61].mxu1 }
 0x4d5   : >> { %v8338_v53 = vadd.f32 %v8337_v43, %v8336_v14  ;;  %v8339_v1 = vpop.f32.mrb[62].mxu1  ;;  %v12934_v14 = vpop.permute.xlu1 %2603 }
 0x4d6   : >> { %v8340_v10 = vpop.f32.mrb[63].mxu1 }
 0x4d7   : >> { %v12926_v30 = vadd.f32 %v12816_v12, %v8338_v53  ;;  %v8341_v52 = vadd.f32 %v8340_v10, %v8339_v1 }
 0x4d9   : >> { %v12929_v44 = vadd.f32 %v12821_v61, %v8341_v52 }
 0x4db   : >> { %v8470_v6 = vpop.f32.mrb[64].mxu1 }
 0x4dc   : >> { %v8471_v42 = vpop.f32.mrb[65].mxu1 }
 0x4dd   : >> { %v8472_v18 = vadd.f32 %v8471_v42, %v8470_v6  ;;  %v8473_v5 = vpop.f32.mrb[66].mxu1 }
 0x4de   : >> { %v8474_v2 = vpop.f32.mrb[67].mxu1 }
 0x4df   : >> { %v2537_v7 = vadd.f32 %v8472_v18, %v12814_v50  ;;  %v8475_v27 = vadd.f32 %v8474_v2, %v8473_v5  ;;  %v12943_v5 = vpop.permute.xlu0 %2605 }
 0x4e1   : >> { %v2538_v43 = vadd.f32 %v8475_v27, %v12819_v20  ;;  %v2697_v12 = vsel %vm1236_vm0, %v2537_v7, %v12932_v9  ;;  %v12945_v20 = vpop.permute.xlu1 %2607 }
 0x4e3   : >> { %v2698_v61 = vsel %vm1236_vm0, %v2538_v43, %v12934_v14  ;;  %v8476_v53 = vpop.f32.mrb[68].mxu1 }
 0x4e4   : >> { %v2729_v1 = vpack.c.bf16 %v2698_v61, %v2697_v12  ;;  %v8477_v10 = vpop.f32.mrb[69].mxu1 }
 0x4e5   : >> { %v8478_v52 = vadd.f32 %v8477_v10, %v8476_v53  ;;  %v8479_v6 = vpop.f32.mrb[70].mxu1 }
 0x4e6   : >> { %v8480_v50 = vpop.f32.mrb[71].mxu1  ;;  %8914 = vmatprep.mubr.msk.bf16.mxu0 %vm2769_vm1, %v2729_v1 }
 0x4e7   : >> { %v2539_v42 = vadd.f32 %v8478_v52, %v12830_v28  ;;  %v8481_v18 = vadd.f32 %v8480_v50, %v8479_v6  ;;  %v12954_v6 = vpop.permute.xlu0 %2609 }
 0x4e9   : >> { %v2540_v2 = vadd.f32 %v8481_v18, %v12835_v3  ;;  %v2699_v7 = vsel %vm1236_vm0, %v2539_v42, %v12943_v5  ;;  %v12956_v3 = vpop.permute.xlu1 %2611 }
 0x4ea   : >> { %16297 = vst [vmem:[#allocation309_spill] sm:$0xff] %v12956_v3 }
 0x4eb   : >> { %v2700_v27 = vsel %vm1236_vm0, %v2540_v2, %v12945_v20  ;;  %v8482_v43 = vpop.f32.mrb[72].mxu1 }
 0x4ec   : >> { %v2730_v12 = vpack.c.bf16 %v2700_v27, %v2699_v7  ;;  %v8483_v61 = vpop.f32.mrb[73].mxu1 }
 0x4ed   : >> { %v8484_v53 = vadd.f32 %v8483_v61, %v8482_v43  ;;  %v8485_v1 = vpop.f32.mrb[74].mxu1 }
 0x4ee   : >> { %v8486_v10 = vpop.f32.mrb[75].mxu1  ;;  %8915 = vmatmul.mubr.msk.bf16.vlgmr.msra.gmra.mrb[96].mxu0 %vm2769_vm1, %v2730_v12 }
 0x4ef   : >> { %v2541_v28 = vadd.f32 %v8484_v53, %v12842_v45  ;;  %v8487_v52 = vadd.f32 %v8486_v10, %v8485_v1  ;;  %v12965_v1 = vpop.permute.xlu0 %2613 }
 0x4f1   : >> { %v2542_v50 = vadd.f32 %v8487_v52, %v12845_v11  ;;  %v2701_v42 = vsel %vm1236_vm0, %v2541_v28, %v12954_v6  ;;  %v12967_v11 = vpop.permute.xlu1 %2615 }
 0x4f3   : >> { %v2702_v18 = vsel %vm1236_vm0, %v2542_v50, %v12956_v3  ;;  %v8488_v2 = vpop.f32.mrb[76].mxu1 }
 0x4f4   : >> { %v2731_v7 = vpack.c.bf16 %v2702_v18, %v2701_v42  ;;  %v8489_v27 = vpop.f32.mrb[77].mxu1 }
 0x4f5   : >> { %v8490_v43 = vadd.f32 %v8489_v27, %v8488_v2  ;;  %v8491_v12 = vpop.f32.mrb[78].mxu1 }
 0x4f6   : >> { %v8492_v61 = vpop.f32.mrb[79].mxu1  ;;  %8918 = vmatprep.mubr.msk.bf16.mxu0 %vm2769_vm1, %v2731_v7 }
 0x4f7   : >> { %v2543_v45 = vadd.f32 %v8490_v43, %v12852_v58  ;;  %v8493_v53 = vadd.f32 %v8492_v61, %v8491_v12  ;;  %v12976_v12 = vpop.permute.xlu0 %2617 }
 0x4f8   : >> { %16298 = vst [vmem:[#allocation308_spill] sm:$0xff] %v12976_v12 }
 0x4f9   : >> { %v2544_v10 = vadd.f32 %v8493_v53, %v12855_v29  ;;  %v2703_v28 = vsel %vm1236_vm0, %v2543_v45, %v12965_v1  ;;  %v12978_v29 = vpop.permute.xlu1 %2619 }
 0x4fa   : >> { %16299 = vst [vmem:[#allocation307_spill] sm:$0xff] %v12978_v29 }
 0x4fb   : >> { %v2704_v52 = vsel %vm1236_vm0, %v2544_v10, %v12967_v11  ;;  %v8494_v50 = vpop.f32.mrb[80].mxu1 }
 0x4fc   : >> { %v2732_v42 = vpack.c.bf16 %v2704_v52, %v2703_v28  ;;  %v8495_v18 = vpop.f32.mrb[81].mxu1 }
 0x4fd   : >> { %v8496_v2 = vadd.f32 %v8495_v18, %v8494_v50  ;;  %v8497_v7 = vpop.f32.mrb[82].mxu1 }
 0x4fe   : >> { %v8498_v27 = vpop.f32.mrb[83].mxu1  ;;  %8919 = vmatmul.mubr.msk.bf16.gmra.mrb[100].mxu0 %vm2769_vm1, %v2732_v42 }
 0x4ff   : >> { %v2545_v58 = vadd.f32 %v8496_v2, %v12860_v32  ;;  %v8499_v43 = vadd.f32 %v8498_v27, %v8497_v7  ;;  %v12987_v7 = vpop.permute.xlu0 %2621 }
 0x500   : >> { %16300 = vst [vmem:[#allocation306_spill] sm:$0xff] %v12987_v7 }
 0x501   : >> { %v2546_v61 = vadd.f32 %v8499_v43, %v12863_v33  ;;  %v2705_v45 = vsel %vm1236_vm0, %v2545_v58, %v12976_v12  ;;  %v12989_v33 = vpop.permute.xlu1 %2623 }
 0x502   : >> { %16301 = vst [vmem:[#allocation305_spill] sm:$0xff] %v12989_v33 }
 0x503   : >> { %v2706_v53 = vsel %vm1236_vm0, %v2546_v61, %v12978_v29  ;;  %v8500_v10 = vpop.f32.mrb[84].mxu1 }
 0x504   : >> { %v2733_v28 = vpack.c.bf16 %v2706_v53, %v2705_v45  ;;  %v8501_v52 = vpop.f32.mrb[85].mxu1 }
 0x505   : >> { %v8502_v50 = vadd.f32 %v8501_v52, %v8500_v10  ;;  %v8503_v42 = vpop.f32.mrb[86].mxu1 }
 0x506   : >> { %v8504_v18 = vpop.f32.mrb[87].mxu1  ;;  %8922 = vmatprep.mubr.msk.bf16.mxu0 %vm2769_vm1, %v2733_v28 }
 0x507   : >> { %v2547_v32 = vadd.f32 %v8502_v50, %v12866_v15  ;;  %v8505_v2 = vadd.f32 %v8504_v18, %v8503_v42  ;;  %v12998_v42 = vpop.permute.xlu0 %2625 }
 0x508   : >> { %16302 = vst [vmem:[#allocation304_spill] sm:$0xff] %v12998_v42 }
 0x509   : >> { %v2548_v27 = vadd.f32 %v8505_v2, %v12869_v46  ;;  %v2707_v58 = vsel %vm1236_vm0, %v2547_v32, %v12987_v7  ;;  %v13000_v46 = vpop.permute.xlu1 %2627 }
 0x50a   : >> { %16303 = vst [vmem:[#allocation303_spill] sm:$0xff] %v13000_v46 }
 0x50b   : >> { %v2708_v43 = vsel %vm1236_vm0, %v2548_v27, %v12989_v33  ;;  %v8506_v61 = vpop.f32.mrb[88].mxu1 }
 0x50c   : >> { %v2734_v45 = vpack.c.bf16 %v2708_v43, %v2707_v58  ;;  %v8507_v53 = vpop.f32.mrb[89].mxu1 }
 0x50d   : >> { %v8508_v10 = vadd.f32 %v8507_v53, %v8506_v61  ;;  %v8509_v28 = vpop.f32.mrb[90].mxu1 }
 0x50e   : >> { %v8510_v52 = vpop.f32.mrb[91].mxu1  ;;  %8923 = vmatmul.mubr.msk.bf16.gmra.mrb[104].mxu0 %vm2769_vm1, %v2734_v45 }
 0x50f   : >> { %v2549_v15 = vadd.f32 %v8508_v10, %v12872_v47  ;;  %v8511_v50 = vadd.f32 %v8510_v52, %v8509_v28  ;;  %v13009_v28 = vpop.permute.xlu0 %2629 }
 0x510   : >> { %16304 = vst [vmem:[#allocation302_spill] sm:$0xff] %v13009_v28 }
 0x511   : >> { %v2550_v18 = vadd.f32 %v8511_v50, %v12875_v4  ;;  %v2709_v32 = vsel %vm1236_vm0, %v2549_v15, %v12998_v42  ;;  %v13011_v4 = vpop.permute.xlu1 %2631 }
 0x512   : >> { %16305 = vst [vmem:[#allocation301_spill] sm:$0xff] %v13011_v4 }
 0x513   : >> { %v2710_v2 = vsel %vm1236_vm0, %v2550_v18, %v13000_v46  ;;  %v8512_v27 = vpop.f32.mrb[92].mxu1 }
 0x514   : >> { %v2735_v58 = vpack.c.bf16 %v2710_v2, %v2709_v32  ;;  %v8513_v43 = vpop.f32.mrb[93].mxu1 }
 0x515   : >> { %v8514_v61 = vadd.f32 %v8513_v43, %v8512_v27  ;;  %v8515_v45 = vpop.f32.mrb[94].mxu1 }
 0x516   : >> { %v8516_v53 = vpop.f32.mrb[95].mxu1  ;;  %8926 = vmatprep.mubr.msk.bf16.mxu0 %vm2769_vm1, %v2735_v58 }
 0x517   : >> { %v2551_v47 = vadd.f32 %v8514_v61, %v12878_v51  ;;  %v8517_v10 = vadd.f32 %v8516_v53, %v8515_v45  ;;  %v13020_v45 = vpop.permute.xlu0 %2633 }
 0x518   : >> { %16306 = vst [vmem:[#allocation310_spill] sm:$0xff] %v13020_v45 }
 0x519   : >> { %v2552_v52 = vadd.f32 %v8517_v10, %v12881_v13  ;;  %v2711_v15 = vsel %vm1236_vm0, %v2551_v47, %v13009_v28  ;;  %v13022_v13 = vpop.permute.xlu1 %2635 }
 0x51a   : >> { %16307 = vst [vmem:[#allocation311_spill] sm:$0xff] %v13022_v13 }
 0x51b   : >> { %v2712_v50 = vsel %vm1236_vm0, %v2552_v52, %v13011_v4  ;;  %v8518_v18 = vpop.f32.mrb[96].mxu1 }
 0x51c   : >> { %v2736_v32 = vpack.c.bf16 %v2712_v50, %v2711_v15  ;;  %v8519_v2 = vpop.f32.mrb[97].mxu1 }
 0x51d   : >> { %v8520_v27 = vadd.f32 %v8519_v2, %v8518_v18  ;;  %v8521_v58 = vpop.f32.mrb[98].mxu1 }
 0x51e   : >> { %v8522_v43 = vpop.f32.mrb[99].mxu1  ;;  %8927 = vmatmul.mubr.msk.bf16.gmra.mrb[108].mxu0 %vm2769_vm1, %v2736_v32 }
 0x51f   : >> { %v2553_v51 = vadd.f32 %v8520_v27, %v12884_v56  ;;  %v8523_v61 = vadd.f32 %v8522_v43, %v8521_v58  ;;  %v13031_v58 = vpop.permute.xlu0 %2637 }
 0x520   : >> { %16308 = vst [vmem:[#allocation312_spill] sm:$0xff] %v13031_v58 }
 0x521   : >> { %v2554_v53 = vadd.f32 %v8523_v61, %v12887_v19  ;;  %v2713_v47 = vsel %vm1236_vm0, %v2553_v51, %v13020_v45  ;;  %v13033_v19 = vpop.permute.xlu1 %2639 }
 0x522   : >> { %16309 = vst [vmem:[#allocation313_spill] sm:$0xff] %v13033_v19 }
 0x523   : >> { %v2714_v10 = vsel %vm1236_vm0, %v2554_v53, %v13022_v13  ;;  %v8524_v52 = vpop.f32.mrb[100].mxu1 }
 0x524   : >> { %v2737_v15 = vpack.c.bf16 %v2714_v10, %v2713_v47  ;;  %v8525_v50 = vpop.f32.mrb[101].mxu1 }
 0x525   : >> { %v8526_v18 = vadd.f32 %v8525_v50, %v8524_v52  ;;  %v8527_v32 = vpop.f32.mrb[102].mxu1 }
 0x526   : >> { %v8528_v2 = vpop.f32.mrb[103].mxu1  ;;  %8930 = vmatprep.mubr.msk.bf16.mxu0 %vm2769_vm1, %v2737_v15 }
 0x527   : >> { %v2555_v56 = vadd.f32 %v8526_v18, %v12890_v55  ;;  %v8529_v27 = vadd.f32 %v8528_v2, %v8527_v32  ;;  %v13042_v32 = vpop.permute.xlu0 %2641 }
 0x528   : >> { %16310 = vst [vmem:[#allocation314_spill] sm:$0xff] %v13042_v32 }
 0x529   : >> { %v2556_v43 = vadd.f32 %v8529_v27, %v12893_v31  ;;  %v2715_v51 = vsel %vm1236_vm0, %v2555_v56, %v13031_v58  ;;  %v13044_v31 = vpop.permute.xlu1 %2643 }
 0x52a   : >> { %16311 = vst [vmem:[#allocation315_spill] sm:$0xff] %v13044_v31 }
 0x52b   : >> { %v2716_v61 = vsel %vm1236_vm0, %v2556_v43, %v13033_v19  ;;  %v8530_v53 = vpop.f32.mrb[104].mxu1 }
 0x52c   : >> { %v2738_v47 = vpack.c.bf16 %v2716_v61, %v2715_v51  ;;  %v8531_v10 = vpop.f32.mrb[105].mxu1 }
 0x52d   : >> { %v8532_v52 = vadd.f32 %v8531_v10, %v8530_v53  ;;  %v8533_v15 = vpop.f32.mrb[106].mxu1 }
 0x52e   : >> { %v8534_v50 = vpop.f32.mrb[107].mxu1  ;;  %8931 = vmatmul.mubr.msk.bf16.gmra.mrb[112].mxu0 %vm2769_vm1, %v2738_v47 }
 0x52f   : >> { %v2557_v55 = vadd.f32 %v8532_v52, %v12896_v49  ;;  %v8535_v18 = vadd.f32 %v8534_v50, %v8533_v15  ;;  %v13053_v15 = vpop.permute.xlu0 %2645 }
 0x530   : >> { %16312 = vst [vmem:[#allocation316_spill] sm:$0xff] %v13053_v15 }
 0x531   : >> { %v2558_v2 = vadd.f32 %v8535_v18, %v12899_v41  ;;  %v2717_v56 = vsel %vm1236_vm0, %v2557_v55, %v13042_v32  ;;  %v13055_v41 = vpop.permute.xlu1 %2647 }
 0x532   : >> { %16313 = vst [vmem:[#allocation317_spill] sm:$0xff] %v13055_v41 }
 0x533   : >> { %v2718_v27 = vsel %vm1236_vm0, %v2558_v2, %v13044_v31  ;;  %v8536_v43 = vpop.f32.mrb[108].mxu1 }
 0x534   : >> { %v2739_v51 = vpack.c.bf16 %v2718_v27, %v2717_v56  ;;  %v8537_v61 = vpop.f32.mrb[109].mxu1 }
 0x535   : >> { %v8538_v53 = vadd.f32 %v8537_v61, %v8536_v43  ;;  %v8539_v47 = vpop.f32.mrb[110].mxu1 }
 0x536   : >> { %v8540_v10 = vpop.f32.mrb[111].mxu1  ;;  %8934 = vmatprep.mubr.msk.bf16.mxu0 %vm2769_vm1, %v2739_v51 }
 0x537   : >> { %v2559_v49 = vadd.f32 %v8538_v53, %v12902_v59  ;;  %v8541_v52 = vadd.f32 %v8540_v10, %v8539_v47  ;;  %v13064_v47 = vpop.permute.xlu0 %2649 }
 0x538   : >> { %16314 = vst [vmem:[#allocation318_spill] sm:$0xff] %v13064_v47 }
 0x539   : >> { %v2560_v50 = vadd.f32 %v8541_v52, %v12905_v8  ;;  %v2719_v55 = vsel %vm1236_vm0, %v2559_v49, %v13053_v15  ;;  %v13066_v8 = vpop.permute.xlu1 %2651 }
 0x53a   : >> { %16315 = vst [vmem:[#allocation319_spill] sm:$0xff] %v13066_v8 }
 0x53b   : >> { %v2720_v18 = vsel %vm1236_vm0, %v2560_v50, %v13055_v41  ;;  %v8542_v2 = vpop.f32.mrb[112].mxu1 }
 0x53c   : >> { %v2740_v56 = vpack.c.bf16 %v2720_v18, %v2719_v55  ;;  %v8543_v27 = vpop.f32.mrb[113].mxu1 }
 0x53d   : >> { %v8544_v43 = vadd.f32 %v8543_v27, %v8542_v2  ;;  %v8545_v51 = vpop.f32.mrb[114].mxu1 }
 0x53e   : >> { %v8546_v61 = vpop.f32.mrb[115].mxu1  ;;  %8935 = vmatmul.mubr.msk.bf16.gmra.mrb[116].mxu0 %vm2769_vm1, %v2740_v56 }
 0x53f   : >> { %v2561_v59 = vadd.f32 %v8544_v43, %v12908_v57  ;;  %v8547_v53 = vadd.f32 %v8546_v61, %v8545_v51  ;;  %v13075_v51 = vpop.permute.xlu0 %2653 }
 0x540   : >> { %16316 = vst [vmem:[#allocation320_spill] sm:$0xff] %v13075_v51 }
 0x541   : >> { %v2562_v10 = vadd.f32 %v8547_v53, %v12911_v62  ;;  %v2721_v49 = vsel %vm1236_vm0, %v2561_v59, %v13064_v47  ;;  %v13077_v62 = vpop.permute.xlu1 %2655 }
 0x542   : >> { %16317 = vst [vmem:[#allocation321_spill] sm:$0xff] %v13077_v62 }
 0x543   : >> { %v2722_v52 = vsel %vm1236_vm0, %v2562_v10, %v13066_v8  ;;  %v8548_v50 = vpop.f32.mrb[116].mxu1 }
 0x544   : >> { %v2741_v55 = vpack.c.bf16 %v2722_v52, %v2721_v49  ;;  %v8549_v18 = vpop.f32.mrb[117].mxu1 }
 0x545   : >> { %v8550_v2 = vadd.f32 %v8549_v18, %v8548_v50  ;;  %v8551_v56 = vpop.f32.mrb[118].mxu1 }
 0x546   : >> { %v8552_v27 = vpop.f32.mrb[119].mxu1  ;;  %8938 = vmatprep.mubr.msk.bf16.mxu0 %vm2769_vm1, %v2741_v55 }
 0x547   : >> { %v2563_v57 = vadd.f32 %v8550_v2, %v12914_v60  ;;  %v8553_v43 = vadd.f32 %v8552_v27, %v8551_v56  ;;  %v13086_v56 = vpop.permute.xlu0 %2657 }
 0x548   : >> { %16318 = vst [vmem:[#allocation322_spill] sm:$0xff] %v13086_v56 }
 0x549   : >> { %v2564_v61 = vadd.f32 %v8553_v43, %v12917_v0  ;;  %v2723_v59 = vsel %vm1236_vm0, %v2563_v57, %v13075_v51  ;;  %v13088_v0 = vpop.permute.xlu1 %2659 }
 0x54a   : >> { %16319 = vst [vmem:[#allocation323_spill] sm:$0xff] %v13088_v0 }
 0x54b   : >> { %v2724_v53 = vsel %vm1236_vm0, %v2564_v61, %v13077_v62  ;;  %v8554_v10 = vpop.f32.mrb[120].mxu1 }
 0x54c   : >> { %v2742_v49 = vpack.c.bf16 %v2724_v53, %v2723_v59  ;;  %v8555_v52 = vpop.f32.mrb[121].mxu1 }
 0x54d   : >> { %v8556_v50 = vadd.f32 %v8555_v52, %v8554_v10  ;;  %v8557_v55 = vpop.f32.mrb[122].mxu1 }
 0x54e   : >> { %v8558_v18 = vpop.f32.mrb[123].mxu1  ;;  %8939 = vmatmul.mubr.msk.bf16.gmra.mrb[120].mxu0 %vm2769_vm1, %v2742_v49 }
 0x54f   : >> { %v2565_v60 = vadd.f32 %v8556_v50, %v12920_v48  ;;  %v8559_v2 = vadd.f32 %v8558_v18, %v8557_v55  ;;  %v13097_v55 = vpop.permute.xlu0 %2661 }
 0x550   : >> { %16320 = vst [vmem:[#allocation324_spill] sm:$0xff] %v13097_v55 }
 0x551   : >> { %v2566_v27 = vadd.f32 %v8559_v2, %v12923_v17  ;;  %v2725_v57 = vsel %vm1236_vm0, %v2565_v60, %v13086_v56  ;;  %v13099_v17 = vpop.permute.xlu1 %2663 }
 0x552   : >> { %16321 = vst [vmem:[#allocation325_spill] sm:$0xff] %v13099_v17 }
 0x553   : >> { %v2726_v43 = vsel %vm1236_vm0, %v2566_v27, %v13088_v0  ;;  %v8560_v61 = vpop.f32.mrb[124].mxu1 }
 0x554   : >> { %v2743_v59 = vpack.c.bf16 %v2726_v43, %v2725_v57  ;;  %v8561_v53 = vpop.f32.mrb[125].mxu1  ;;  %v16322_v43 = vld [vmem:[#allocation42_spill] sm:$0xff] }
 0x555   : >> { %v8562_v10 = vadd.f32 %v8561_v53, %v8560_v61  ;;  %v8563_v49 = vpop.f32.mrb[126].mxu1  ;;  %v16323_v16 = vmov %v16322_v43 }
 0x556   : >> { %v8564_v52 = vpop.f32.mrb[127].mxu1  ;;  %8942 = vmatprep.mubr.msk.bf16.mxu0 %vm2769_vm1, %v2743_v59 }
 0x557   : >> { %v2567_v48 = vadd.f32 %v8562_v10, %v12926_v30  ;;  %v8565_v50 = vadd.f32 %v8564_v52, %v8563_v49 }
 0x559   : >> { %v2568_v18 = vadd.f32 %v8565_v50, %v12929_v44  ;;  %v2727_v60 = vsel %vm1236_vm0, %v2567_v48, %v13097_v55 }
 0x55b   : >> { %v2728_v2 = vsel %vm1236_vm0, %v2568_v18, %v13099_v17 }
 0x55c   : >> { %v2744_v27 = vpack.c.bf16 %v2728_v2, %v2727_v60 }
 0x55e   : >> { %8943 = vmatmul.mubr.msk.bf16.gmra.mrb[124].mxu0 %vm2769_vm1, %v2744_v27 }
 0x5c1   : >> { %v8916_v57 = vpop.f32.mrb[96].mxu0 }
 0x5c2   : >> { %v13108_v61 = vadd.f32 %v8916_v57, %v16322_v43  ;;  %v2852_v30 = vpop.f32.mrb[97].mxu0 }
 0x5c3   : >> { %v8917_v59 = vpop.f32.mrb[98].mxu0  ;;  %v13116_v10 = vadd.f32 %v16323_v16, %v2852_v30 }
 0x5c4   : >> { %v13111_v53 = vadd.f32 %v8917_v59, %v16323_v16  ;;  %3207 = vrot.lane.b32.xlu0 %v13108_v61, %s10701_s3  ;;  %v2855_v44 = vpop.f32.mrb[99].mxu0 }
 0x5c5   : >> { %v13121_v49 = vadd.f32 %v16323_v16, %v2855_v44 }
 0x5c6   : >> { %3209 = vrot.lane.b32.xlu1 %v13111_v53, %s10701_s3 }
 0x5c7   : >> { %v8028_v40 = vmul.f32 -1.442695, %v13121_v49 }
 0x5c8   : >> { %3203 = vrot.lane.b32.xlu0 %v13116_v10, %s10701_s3 }
 0x5ca   : >> { %3205 = vrot.lane.b32.xlu1 %v13121_v49, %s10701_s3 }
 0x5d1   : >> { %v8920_v52 = vpop.f32.mrb[100].mxu0 }
 0x5d2   : >> { %v13128_v48 = vadd.f32 %v8920_v52, %v16323_v16  ;;  %v2868_v50 = vpop.f32.mrb[101].mxu0 }
 0x5d3   : >> { %v8921_v18 = vpop.f32.mrb[102].mxu0  ;;  %v13136_v27 = vadd.f32 %v16323_v16, %v2868_v50 }
 0x5d4   : >> { %v13131_v60 = vadd.f32 %v8921_v18, %v16323_v16  ;;  %v2871_v2 = vpop.f32.mrb[103].mxu0  ;;  %3215 = vrot.lane.b32.xlu0 %v13128_v48, %s10701_s3 }
 0x5d5   : >> { %v13141_v57 = vadd.f32 %v16323_v16, %v2871_v2 }
 0x5d6   : >> { %3217 = vrot.lane.b32.xlu1 %v13131_v60, %s10701_s3 }
 0x5d7   : >> { %v8032_v62 = vmul.f32 -1.442695, %v13141_v57 }
 0x5d8   : >> { %3211 = vrot.lane.b32.xlu0 %v13136_v27, %s10701_s3 }
 0x5da   : >> { %3213 = vrot.lane.b32.xlu1 %v13141_v57, %s10701_s3 }
 0x5e1   : >> { %v8924_v43 = vpop.f32.mrb[104].mxu0 }
 0x5e2   : >> { %v13148_v30 = vadd.f32 %v8924_v43, %v16323_v16  ;;  %v2884_v59 = vpop.f32.mrb[105].mxu0 }
 0x5e3   : >> { %v8925_v44 = vpop.f32.mrb[106].mxu0  ;;  %v13156_v18 = vadd.f32 %v16323_v16, %v2884_v59 }
 0x5e4   : >> { %v13151_v52 = vadd.f32 %v8925_v44, %v16323_v16  ;;  %v2887_v50 = vpop.f32.mrb[107].mxu0  ;;  %3223 = vrot.lane.b32.xlu0 %v13148_v30, %s10701_s3 }
 0x5e5   : >> { %v13161_v2 = vadd.f32 %v16323_v16, %v2887_v50 }
 0x5e6   : >> { %3225 = vrot.lane.b32.xlu1 %v13151_v52, %s10701_s3 }
 0x5e8   : >> { %3219 = vrot.lane.b32.xlu0 %v13156_v18, %s10701_s3 }
 0x5ea   : >> { %3221 = vrot.lane.b32.xlu1 %v13161_v2, %s10701_s3 }
 0x5f1   : >> { %v8928_v43 = vpop.f32.mrb[108].mxu0 }
 0x5f2   : >> { %v13168_v44 = vadd.f32 %v8928_v43, %v16323_v16  ;;  %v2900_v21 = vpop.f32.mrb[109].mxu0 }
 0x5f3   : >> { %v8929_v22 = vpop.f32.mrb[110].mxu0  ;;  %v13176_v50 = vadd.f32 %v16323_v16, %v2900_v21 }
 0x5f4   : >> { %v13171_v59 = vadd.f32 %v8929_v22, %v16323_v16  ;;  %v2903_v23 = vpop.f32.mrb[111].mxu0  ;;  %3231 = vrot.lane.b32.xlu0 %v13168_v44, %s10701_s3 }
 0x5f5   : >> { %v13181_v24 = vadd.f32 %v16323_v16, %v2903_v23  ;;  %v8039_v29 = vmul.f32 -1.442695, %v13176_v50 }
 0x5f6   : >> { %3233 = vrot.lane.b32.xlu1 %v13171_v59, %s10701_s3 }
 0x5f8   : >> { %3227 = vrot.lane.b32.xlu0 %v13176_v50, %s10701_s3 }
 0x5fa   : >> { %3229 = vrot.lane.b32.xlu1 %v13181_v24, %s10701_s3 }
 0x601   : >> { %v8932_v22 = vpop.f32.mrb[112].mxu0 }
 0x602   : >> { %v13188_v43 = vadd.f32 %v8932_v22, %v16323_v16  ;;  %v2916_v25 = vpop.f32.mrb[113].mxu0 }
 0x603   : >> { %v8933_v26 = vpop.f32.mrb[114].mxu0  ;;  %v13196_v23 = vadd.f32 %v16323_v16, %v2916_v25 }
 0x604   : >> { %v13191_v21 = vadd.f32 %v8933_v26, %v16323_v16  ;;  %v2919_v34 = vpop.f32.mrb[115].mxu0  ;;  %3239 = vrot.lane.b32.xlu0 %v13188_v43, %s10701_s3 }
 0x605   : >> { %v13201_v35 = vadd.f32 %v16323_v16, %v2919_v34  ;;  %v8043_v3 = vmul.f32 -1.442695, %v13196_v23 }
 0x606   : >> { %3241 = vrot.lane.b32.xlu1 %v13191_v21, %s10701_s3 }
 0x608   : >> { %3235 = vrot.lane.b32.xlu0 %v13196_v23, %s10701_s3 }
 0x60a   : >> { %3237 = vrot.lane.b32.xlu1 %v13201_v35, %s10701_s3 }
 0x611   : >> { %v8936_v26 = vpop.f32.mrb[116].mxu0 }
 0x612   : >> { %v13208_v22 = vadd.f32 %v8936_v26, %v16323_v16  ;;  %v2932_v36 = vpop.f32.mrb[117].mxu0  ;;  %v8029_v26 = vmul.f32 -1.442695, %v13108_v61 }
 0x613   : >> { %v8937_v37 = vpop.f32.mrb[118].mxu0  ;;  %v13216_v34 = vadd.f32 %v16323_v16, %v2932_v36  ;;  %v8027_v36 = vmul.f32 -1.442695, %v13116_v10 }
 0x614   : >> { %v13211_v25 = vadd.f32 %v8937_v37, %v16323_v16  ;;  %v2935_v38 = vpop.f32.mrb[119].mxu0  ;;  %3247 = vrot.lane.b32.xlu0 %v13208_v22, %s10701_s3  ;;  %v8030_v37 = vmul.f32 -1.442695, %v13111_v53  ;;  %9845 = vpow2.f32 %v8029_v26 }
 0x615   : >> { %v13221_v39 = vadd.f32 %v16323_v16, %v2935_v38 }
 0x616   : >> { %3249 = vrot.lane.b32.xlu1 %v13211_v25, %s10701_s3  ;;  %9847 = vpow2.f32 %v8030_v37 }
 0x617   : >> { %9849 = vpow2.f32 %v8027_v36 }
 0x618   : >> { %3243 = vrot.lane.b32.xlu0 %v13216_v34, %s10701_s3  ;;  %9851 = vpow2.f32 %v8028_v40 }
 0x61a   : >> { %3245 = vrot.lane.b32.xlu1 %v13221_v39, %s10701_s3 }
 0x61e   : >> { %v9846_v37 = vpop.eup %9845 }
 0x61f   : >> { %v3077_v56 = vadd.f32 1.0, %v9846_v37 }
 0x620   : >> { %v9848_v40 = vpop.eup %9847 }
 0x621   : >> { %v8940_v54 = vpop.f32.mrb[120].mxu0  ;;  %v9850_v8 = vpop.eup %9849  ;;  %v3078_v47 = vadd.f32 1.0, %v9848_v40 }
 0x622   : >> { %v13232_v38 = vadd.f32 %v8940_v54, %v16323_v16  ;;  %v2948_v63 = vpop.f32.mrb[121].mxu0  ;;  %v8033_v54 = vmul.f32 -1.442695, %v13128_v48  ;;  %v3075_v51 = vadd.f32 1.0, %v9850_v8 }
 0x623   : >> { %v8941_v17 = vpop.f32.mrb[122].mxu0  ;;  %v13240_v26 = vadd.f32 %v16323_v16, %v2948_v63  ;;  %v8031_v63 = vmul.f32 -1.442695, %v13136_v27 }
 0x624   : >> { %v13235_v55 = vadd.f32 %v8941_v17, %v16323_v16  ;;  %v2951_v0 = vpop.f32.mrb[123].mxu0  ;;  %3255 = vrot.lane.b32.xlu0 %v13232_v38, %s10701_s3  ;;  %v8034_v17 = vmul.f32 -1.442695, %v13131_v60  ;;  %9853 = vpow2.f32 %v8033_v54 }
 0x625   : >> { %v13246_v36 = vadd.f32 %v16323_v16, %v2951_v0  ;;  %v9852_v0 = vpop.eup %9851 }
 0x626   : >> { %3257 = vrot.lane.b32.xlu1 %v13235_v55, %s10701_s3  ;;  %9855 = vpow2.f32 %v8034_v17  ;;  %v3076_v31 = vadd.f32 1.0, %v9852_v0 }
 0x627   : >> { %9857 = vrcp.f32 %v3077_v56 }
 0x628   : >> { %3251 = vrot.lane.b32.xlu0 %v13240_v26, %s10701_s3  ;;  %9859 = vpow2.f32 %v8031_v63 }
 0x629   : >> { %9861 = vrcp.f32 %v3078_v47 }
 0x62a   : >> { %3253 = vrot.lane.b32.xlu1 %v13246_v36, %s10701_s3  ;;  %9863 = vpow2.f32 %v8032_v62 }
 0x62b   : >> { %9865 = vrcp.f32 %v3075_v51  ;;  %v8037_v51 = vmul.f32 -1.442695, %v13148_v30 }
 0x62c   : >> { %9867 = vrcp.f32 %v3076_v31 }
 0x62d   : >> { %9869 = vpow2.f32 %v8037_v51 }
 0x62e   : >> { %v9854_v56 = vpop.eup %9853 }
 0x62f   : >> { %v3081_v17 = vadd.f32 1.0, %v9854_v56 }
 0x631   : >> { %v8944_v32 = vpop.f32.mrb[124].mxu0  ;;  %9871 = vrcp.f32 %v3081_v17 }
 0x632   : >> { %v13256_v37 = vadd.f32 %v8944_v32, %v16323_v16  ;;  %v2964_v41 = vpop.f32.mrb[125].mxu0  ;;  %v9856_v32 = vpop.eup %9855 }
 0x633   : >> { %v8945_v54 = vpop.f32.mrb[126].mxu0  ;;  %v13264_v47 = vadd.f32 %v16323_v16, %v2964_v41  ;;  %v13269_v62 = vpop.eup %9857  ;;  %v8038_v41 = vmul.f32 -1.442695, %v13151_v52  ;;  %v3082_v13 = vadd.f32 1.0, %v9856_v32  ;;  %v8036_v32 = vmul.f32 -1.442695, %v13161_v2 }
 0x634   : >> { %v13259_v15 = vadd.f32 %v8945_v54, %v16323_v16  ;;  %v2967_v40 = vpop.f32.mrb[127].mxu0  ;;  %3263 = vrot.lane.b32.xlu0 %v13256_v37, %s10701_s3  ;;  %v9860_v31 = vpop.eup %9859 }
 0x635   : >> { %v13272_v63 = vadd.f32 %v16323_v16, %v2967_v40  ;;  %v13277_v54 = vpop.eup %9861  ;;  %v8035_v40 = vmul.f32 -1.442695, %v13156_v18  ;;  %v3079_v16 = vadd.f32 1.0, %v9860_v31  ;;  %9873 = vpow2.f32 %v8038_v41 }
 0x636   : >> { %v3208_v8 = vpop.permute.xlu0 %3207  ;;  %3265 = vrot.lane.b32.xlu1 %v13259_v15, %s10701_s3  ;;  %v9864_v19 = vpop.eup %9863  ;;  %9875 = vrcp.f32 %v3082_v13  ;;  %v8041_v31 = vmul.f32 -1.442695, %v13168_v44 }
 0x637   : >> { %v3301_v45 = vmul.f32 %v13269_v62, %v3208_v8  ;;  %v13285_v46 = vpop.eup %9865  ;;  %v3080_v42 = vadd.f32 1.0, %v9864_v19  ;;  %9877 = vpow2.f32 %v8035_v40 }
 0x638   : >> { %v3210_v0 = vpop.permute.xlu1 %3209  ;;  %3259 = vrot.lane.b32.xlu0 %v13264_v47, %s10701_s3  ;;  %v13290_v51 = vpop.eup %9867  ;;  %9879 = vrcp.f32 %v3079_v16 }
 0x639   : >> { %v3302_v58 = vmul.f32 %v13277_v54, %v3210_v0  ;;  %9881 = vpow2.f32 %v8036_v32 }
 0x63a   : >> { %3261 = vrot.lane.b32.xlu1 %v13272_v63, %s10701_s3  ;;  %v3204_v56 = vpop.permute.xlu0 %3203  ;;  %9883 = vrcp.f32 %v3080_v42 }
 0x63b   : >> { %v3299_v4 = vmul.f32 %v13285_v46, %v3204_v56  ;;  %9885 = vpow2.f32 %v8041_v31 }
 0x63c   : >> { %3367 = vrot.lane.b32.xlu0 %v3301_v45, %s10700_s2  ;;  %v3206_v8 = vpop.permute.xlu1 %3205  ;;  %v9870_v45 = vpop.eup %9869 }
 0x63d   : >> { %v3300_v17 = vmul.f32 %v13290_v51, %v3206_v8  ;;  %v13295_v0 = vpop.eup %9871  ;;  %v3085_v16 = vadd.f32 1.0, %v9870_v45 }
 0x63e   : >> { %3369 = vrot.lane.b32.xlu1 %v3302_v58, %s10700_s2 }
 0x63f   : >> { %v9874_v19 = vpop.eup %9873  ;;  %9887 = vrcp.f32 %v3085_v16 }
 0x640   : >> { %3363 = vrot.lane.b32.xlu0 %v3299_v4, %s10700_s2  ;;  %v13299_v41 = vpop.eup %9875  ;;  %v8042_v4 = vmul.f32 -1.442695, %v13171_v59  ;;  %v3086_v8 = vadd.f32 1.0, %v9874_v19 }
 0x641   : >> { %v9878_v56 = vpop.eup %9877 }
 0x642   : >> { %3365 = vrot.lane.b32.xlu1 %v3300_v17, %s10700_s2  ;;  %v13304_v32 = vpop.eup %9879  ;;  %v3083_v12 = vadd.f32 1.0, %v9878_v56  ;;  %9889 = vpow2.f32 %v8042_v4  ;;  %v8045_v4 = vmul.f32 -1.442695, %v13188_v43 }
 0x643   : >> { %v9882_v28 = vpop.eup %9881  ;;  %9891 = vrcp.f32 %v3086_v8 }
 0x644   : >> { %v13309_v45 = vpop.eup %9883  ;;  %v3084_v19 = vadd.f32 1.0, %v9882_v28  ;;  %9893 = vpow2.f32 %v8039_v29  ;;  %v8046_v29 = vmul.f32 -1.442695, %v13191_v21 }
 0x645   : >> { %16324 = vst [vmem:[#allocation326_spill] sm:$0xff] %v13309_v45  ;;  %9895 = vrcp.f32 %v3083_v12  ;;  %v9886_v31 = vpop.eup %9885 }
 0x646   : >> { %v3216_v13 = vpop.permute.xlu0 %3215 }
 0x647   : >> { %v3305_v58 = vmul.f32 %v13295_v0, %v3216_v13 }
 0x648   : >> { %v3218_v40 = vpop.permute.xlu1 %3217 }
 0x649   : >> { %v3306_v42 = vmul.f32 %v13299_v41, %v3218_v40  ;;  %3375 = vrot.lane.b32.xlu0 %v3305_v58, %s10700_s2  ;;  %v8040_v58 = vmul.f32 -1.442695, %v13181_v24 }
 0x64a   : >> { %v3212_v17 = vpop.permute.xlu0 %3211 }
 0x64b   : >> { %v3303_v13 = vmul.f32 %v13304_v32, %v3212_v17  ;;  %3377 = vrot.lane.b32.xlu1 %v3306_v42, %s10700_s2  ;;  %9897 = vpow2.f32 %v8040_v58  ;;  %v13315_v42 = vpop.eup %9887 }
 0x64c   : >> { %v3214_v33 = vpop.permute.xlu1 %3213  ;;  %9899 = vrcp.f32 %v3084_v19  ;;  %16325 = vst [vmem:[#allocation327_spill] sm:$0xff] %v13315_v42  ;;  %v9890_v56 = vpop.eup %9889 }
 0x64d   : >> { %v3304_v40 = vmul.f32 %v13309_v45, %v3214_v33  ;;  %3371 = vrot.lane.b32.xlu0 %v3303_v13, %s10700_s2  ;;  %v13319_v33 = vpop.eup %9891  ;;  %v3089_v13 = vadd.f32 1.0, %v9886_v31  ;;  %9901 = vpow2.f32 %v8045_v4 }
 0x64e   : >> { %16326 = vst [vmem:[#allocation328_spill] sm:$0xff] %v13319_v33  ;;  %v9894_v28 = vpop.eup %9893 }
 0x64f   : >> { %3373 = vrot.lane.b32.xlu1 %v3304_v40, %s10700_s2  ;;  %v13324_v58 = vpop.eup %9895  ;;  %v3090_v40 = vadd.f32 1.0, %v9890_v56  ;;  %9903 = vrcp.f32 %v3089_v13 }
 0x650   : >> { %16327 = vst [vmem:[#allocation329_spill] sm:$0xff] %v13324_v58  ;;  %9905 = vpow2.f32 %v8046_v29  ;;  %v8049_v29 = vmul.f32 -1.442695, %v13208_v22 }
 0x651   : >> { %9907 = vrcp.f32 %v3090_v40 }
 0x652   : >> { %9909 = vpow2.f32 %v8043_v3  ;;  %v8050_v3 = vmul.f32 -1.442695, %v13211_v25 }
 0x655   : >> { %v9898_v7 = vpop.eup %9897 }
 0x656   : >> { %v3224_v16 = vpop.permute.xlu0 %3223  ;;  %v13329_v31 = vpop.eup %9899  ;;  %v3088_v56 = vadd.f32 1.0, %v9898_v7 }
 0x657   : >> { %v3309_v17 = vmul.f32 %v13315_v42, %v3224_v16  ;;  %16328 = vst [vmem:[#allocation330_spill] sm:$0xff] %v13329_v31  ;;  %v3087_v42 = vadd.f32 1.0, %v9894_v28  ;;  %v9902_v4 = vpop.eup %9901 }
 0x658   : >> { %v3226_v8 = vpop.permute.xlu1 %3225 }
 0x659   : >> { %v3310_v12 = vmul.f32 %v13319_v33, %v3226_v8  ;;  %3383 = vrot.lane.b32.xlu0 %v3309_v17, %s10700_s2  ;;  %v8044_v17 = vmul.f32 -1.442695, %v13201_v35  ;;  %9911 = vrcp.f32 %v3087_v42 }
 0x65a   : >> { %v3220_v19 = vpop.permute.xlu0 %3219 }
 0x65b   : >> { %v3307_v16 = vmul.f32 %v13324_v58, %v3220_v19  ;;  %3385 = vrot.lane.b32.xlu1 %v3310_v12, %s10700_s2  ;;  %9913 = vpow2.f32 %v8044_v17  ;;  %v13335_v12 = vpop.eup %9903  ;;  %v8047_v58 = vmul.f32 -1.442695, %v13216_v34 }
 0x65c   : >> { %v3222_v45 = vpop.permute.xlu1 %3221  ;;  %9915 = vrcp.f32 %v3088_v56  ;;  %16329 = vst [vmem:[#allocation331_spill] sm:$0xff] %v13335_v12  ;;  %v9906_v28 = vpop.eup %9905 }
 0x65d   : >> { %v3308_v8 = vmul.f32 %v13329_v31, %v3222_v45  ;;  %3379 = vrot.lane.b32.xlu0 %v3307_v16, %s10700_s2  ;;  %v13339_v45 = vpop.eup %9907  ;;  %v3093_v16 = vadd.f32 1.0, %v9902_v4  ;;  %9917 = vpow2.f32 %v8049_v29 }
 0x65e   : >> { %16330 = vst [vmem:[#allocation332_spill] sm:$0xff] %v13339_v45  ;;  %v9910_v7 = vpop.eup %9909 }
 0x65f   : >> { %3381 = vrot.lane.b32.xlu1 %v3308_v8, %s10700_s2  ;;  %v3094_v8 = vadd.f32 1.0, %v9906_v28  ;;  %9919 = vrcp.f32 %v3093_v16 }
 0x660   : >> { %9921 = vpow2.f32 %v8050_v3  ;;  %v8053_v3 = vmul.f32 -1.442695, %v13232_v38 }
 0x661   : >> { %9923 = vrcp.f32 %v3094_v8 }
 0x662   : >> { %9925 = vpow2.f32 %v8047_v58  ;;  %v8054_v58 = vmul.f32 -1.442695, %v13235_v55 }
 0x663   : >> { %v13344_v17 = vpop.eup %9911 }
 0x664   : >> { %16331 = vst [vmem:[#allocation333_spill] sm:$0xff] %v13344_v17 }
 0x665   : >> { %v9914_v31 = vpop.eup %9913 }
 0x666   : >> { %v3232_v13 = vpop.permute.xlu0 %3231  ;;  %v13349_v4 = vpop.eup %9915  ;;  %v3092_v28 = vadd.f32 1.0, %v9914_v31 }
 0x667   : >> { %v3313_v19 = vmul.f32 %v13335_v12, %v3232_v13  ;;  %16332 = vst [vmem:[#allocation334_spill] sm:$0xff] %v13349_v4  ;;  %v3091_v12 = vadd.f32 1.0, %v9910_v7  ;;  %v9918_v29 = vpop.eup %9917 }
 0x668   : >> { %v3234_v40 = vpop.permute.xlu1 %3233 }
 0x669   : >> { %v3314_v42 = vmul.f32 %v13339_v45, %v3234_v40  ;;  %3391 = vrot.lane.b32.xlu0 %v3313_v19, %s10700_s2  ;;  %v8048_v19 = vmul.f32 -1.442695, %v13221_v39  ;;  %9927 = vrcp.f32 %v3091_v12 }
 0x66a   : >> { %v3228_v56 = vpop.permute.xlu0 %3227 }
 0x66b   : >> { %v3311_v13 = vmul.f32 %v13344_v17, %v3228_v56  ;;  %3393 = vrot.lane.b32.xlu1 %v3314_v42, %s10700_s2  ;;  %9929 = vpow2.f32 %v8048_v19  ;;  %v13355_v42 = vpop.eup %9919  ;;  %v8051_v17 = vmul.f32 -1.442695, %v13240_v26 }
 0x66c   : >> { %v3230_v33 = vpop.permute.xlu1 %3229  ;;  %9931 = vrcp.f32 %v3092_v28  ;;  %16333 = vst [vmem:[#allocation335_spill] sm:$0xff] %v13355_v42  ;;  %v9922_v7 = vpop.eup %9921 }
 0x66d   : >> { %v3312_v40 = vmul.f32 %v13349_v4, %v3230_v33  ;;  %3387 = vrot.lane.b32.xlu0 %v3311_v13, %s10700_s2  ;;  %v13359_v33 = vpop.eup %9923  ;;  %v3097_v13 = vadd.f32 1.0, %v9918_v29  ;;  %9933 = vpow2.f32 %v8053_v3 }
 0x66e   : >> { %v9926_v31 = vpop.eup %9925 }
 0x66f   : >> { %3389 = vrot.lane.b32.xlu1 %v3312_v40, %s10700_s2  ;;  %v3098_v40 = vadd.f32 1.0, %v9922_v7  ;;  %9935 = vrcp.f32 %v3097_v13 }
 0x670   : >> { %9937 = vpow2.f32 %v8054_v58 }
 0x671   : >> { %9939 = vrcp.f32 %v3098_v40 }
 0x672   : >> { %9941 = vpow2.f32 %v8051_v17 }
 0x673   : >> { %v13364_v19 = vpop.eup %9927 }
 0x675   : >> { %v9930_v4 = vpop.eup %9929 }
 0x676   : >> { %v3240_v16 = vpop.permute.xlu0 %3239  ;;  %v13369_v29 = vpop.eup %9931  ;;  %v3096_v7 = vadd.f32 1.0, %v9930_v4 }
 0x677   : >> { %v3317_v56 = vmul.f32 %v13355_v42, %v3240_v16  ;;  %16334 = vst [vmem:[#allocation336_spill] sm:$0xff] %v13369_v29  ;;  %v3095_v42 = vadd.f32 1.0, %v9926_v31  ;;  %v9934_v3 = vpop.eup %9933 }
 0x678   : >> { %v3242_v8 = vpop.permute.xlu1 %3241 }
 0x679   : >> { %v3318_v12 = vmul.f32 %v13359_v33, %v3242_v8  ;;  %3399 = vrot.lane.b32.xlu0 %v3317_v56, %s10700_s2  ;;  %v8052_v56 = vmul.f32 -1.442695, %v13246_v36  ;;  %9943 = vrcp.f32 %v3095_v42 }
 0x67a   : >> { %v3236_v28 = vpop.permute.xlu0 %3235 }
 0x67b   : >> { %v3315_v16 = vmul.f32 %v13364_v19, %v3236_v28  ;;  %3401 = vrot.lane.b32.xlu1 %v3318_v12, %s10700_s2  ;;  %9945 = vpow2.f32 %v8052_v56  ;;  %v13375_v12 = vpop.eup %9935 }
 0x67c   : >> { %v3238_v45 = vpop.permute.xlu1 %3237  ;;  %9947 = vrcp.f32 %v3096_v7  ;;  %16335 = vst [vmem:[#allocation337_spill] sm:$0xff] %v13375_v12  ;;  %v9938_v31 = vpop.eup %9937 }
 0x67d   : >> { %v3316_v8 = vmul.f32 %v13369_v29, %v3238_v45  ;;  %3395 = vrot.lane.b32.xlu0 %v3315_v16, %s10700_s2  ;;  %v13378_v28 = vpop.eup %9939  ;;  %v3101_v45 = vadd.f32 1.0, %v9934_v3  ;;  %v3102_v42 = vadd.f32 1.0, %v9938_v31 }
 0x67e   : >> { %16336 = vst [vmem:[#allocation338_spill] sm:$0xff] %v13378_v28  ;;  %v9942_v16 = vpop.eup %9941 }
 0x67f   : >> { %3397 = vrot.lane.b32.xlu1 %v3316_v8, %s10700_s2  ;;  %v8055_v8 = vmul.f32 -1.442695, %v13264_v47  ;;  %9949 = vrcp.f32 %v3101_v45  ;;  %v3099_v3 = vadd.f32 1.0, %v9942_v16 }
 0x680   : >> { %9951 = vrcp.f32 %v3102_v42 }
 0x681   : >> { %9953 = vpow2.f32 %v8055_v8 }
 0x682   : >> { %9955 = vrcp.f32 %v3099_v3 }
 0x683   : >> { %v13382_v17 = vpop.eup %9943 }
 0x684   : >> { %16337 = vst [vmem:[#allocation339_spill] sm:$0xff] %v13382_v17 }
 0x685   : >> { %v9946_v56 = vpop.eup %9945 }
 0x686   : >> { %v3248_v13 = vpop.permute.xlu0 %3247  ;;  %v3100_v31 = vadd.f32 1.0, %v9946_v56 }
 0x687   : >> { %v3321_v58 = vmul.f32 %v13375_v12, %v3248_v13  ;;  %v13387_v13 = vpop.eup %9947 }
 0x688   : >> { %v3250_v29 = vpop.permute.xlu1 %3249  ;;  %16338 = vst [vmem:[#allocation340_spill] sm:$0xff] %v13387_v13 }
 0x689   : >> { %v3322_v4 = vmul.f32 %v13378_v28, %v3250_v29  ;;  %3407 = vrot.lane.b32.xlu0 %v3321_v58, %s10700_s2  ;;  %v8056_v29 = vmul.f32 -1.442695, %v13272_v63  ;;  %v8057_v28 = vmul.f32 -1.442695, %v13256_v37  ;;  %v13395_v45 = vpop.eup %9949 }
 0x68a   : >> { %v3244_v40 = vpop.permute.xlu0 %3243  ;;  %16339 = vst [vmem:[#allocation341_spill] sm:$0xff] %v13395_v45 }
 0x68b   : >> { %v3319_v7 = vmul.f32 %v13382_v17, %v3244_v40  ;;  %3409 = vrot.lane.b32.xlu1 %v3322_v4, %s10700_s2  ;;  %v8058_v4 = vmul.f32 -1.442695, %v13259_v15  ;;  %9957 = vpow2.f32 %v8056_v29  ;;  %v13398_v40 = vpop.eup %9951 }
 0x68c   : >> { %v3246_v12 = vpop.permute.xlu1 %3245  ;;  %9959 = vrcp.f32 %v3100_v31  ;;  %16340 = vst [vmem:[#allocation342_spill] sm:$0xff] %v13398_v40  ;;  %v9954_v56 = vpop.eup %9953 }
 0x68d   : >> { %v3320_v58 = vmul.f32 %v13387_v13, %v3246_v12  ;;  %3403 = vrot.lane.b32.xlu0 %v3319_v7, %s10700_s2  ;;  %9961 = vpow2.f32 %v8057_v28  ;;  %v13402_v7 = vpop.eup %9955  ;;  %v3103_v31 = vadd.f32 1.0, %v9954_v56 }
 0x68e   : >> { %9963 = vpow2.f32 %v8058_v4  ;;  %16341 = vst [vmem:[#allocation343_spill] sm:$0xff] %v13402_v7 }
 0x68f   : >> { %3405 = vrot.lane.b32.xlu1 %v3320_v58, %s10700_s2  ;;  %9965 = vrcp.f32 %v3103_v31 }
 0x695   : >> { %v9958_v29 = vpop.eup %9957 }
 0x696   : >> { %v3256_v16 = vpop.permute.xlu0 %3255  ;;  %v13406_v58 = vpop.eup %9959 }
 0x697   : >> { %v3325_v12 = vmul.f32 %v13395_v45, %v3256_v16  ;;  %v9962_v16 = vpop.eup %9961 }
 0x698   : >> { %v3258_v42 = vpop.permute.xlu1 %3257 }
 0x699   : >> { %v3326_v8 = vmul.f32 %v13398_v40, %v3258_v42  ;;  %3415 = vrot.lane.b32.xlu0 %v3325_v12, %s10700_s2  ;;  %v3104_v42 = vadd.f32 1.0, %v9958_v29  ;;  %v9964_v40 = vpop.eup %9963  ;;  %v3105_v12 = vadd.f32 1.0, %v9962_v16 }
 0x69a   : >> { %v3252_v3 = vpop.permute.xlu0 %3251  ;;  %v3106_v13 = vadd.f32 1.0, %v9964_v40 }
 0x69b   : >> { %v3323_v28 = vmul.f32 %v13402_v7, %v3252_v3  ;;  %3417 = vrot.lane.b32.xlu1 %v3326_v8, %s10700_s2  ;;  %9967 = vrcp.f32 %v3104_v42  ;;  %v13411_v7 = vpop.eup %9965 }
 0x69c   : >> { %v3254_v4 = vpop.permute.xlu1 %3253  ;;  %9969 = vrcp.f32 %v3105_v12 }
 0x69d   : >> { %v3324_v45 = vmul.f32 %v13406_v58, %v3254_v4  ;;  %3411 = vrot.lane.b32.xlu0 %v3323_v28, %s10700_s2  ;;  %9971 = vrcp.f32 %v3106_v13 }
 0x69f   : >> { %3413 = vrot.lane.b32.xlu1 %v3324_v45, %s10700_s2 }
 0x6a5   : >> { %v13414_v4 = vpop.eup %9967 }
 0x6a6   : >> { %v3264_v8 = vpop.permute.xlu0 %3263  ;;  %v13418_v45 = vpop.eup %9969 }
 0x6a7   : >> { %v3329_v31 = vmul.f32 %v13418_v45, %v3264_v8  ;;  %v13423_v16 = vpop.eup %9971 }
 0x6a8   : >> { %v3266_v3 = vpop.permute.xlu1 %3265 }
 0x6a9   : >> { %v3330_v12 = vmul.f32 %v13423_v16, %v3266_v3 }
 0x6aa   : >> { %v3260_v56 = vpop.permute.xlu0 %3259 }
 0x6ab   : >> { %v3327_v17 = vmul.f32 %v13411_v7, %v3260_v56 }
 0x6ac   : >> { %v3262_v28 = vpop.permute.xlu1 %3261 }
 0x6ad   : >> { %v3328_v29 = vmul.f32 %v13414_v4, %v3262_v28  ;;  %3419 = vrot.lane.b32.xlu0 %v3327_v17, %s10700_s2 }
 0x6ae   : >> { %v3368_v40 = vpop.permute.xlu0 %3367 }
 0x6af   : >> { %v3461_v13 = vadd.f32 %v3368_v40, %v13108_v61  ;;  %3421 = vrot.lane.b32.xlu1 %v3328_v29, %s10700_s2 }
 0x6b0   : >> { %v3370_v42 = vpop.permute.xlu1 %3369 }
 0x6b1   : >> { %9973 = vtanh.f32 %v3461_v13  ;;  %v3462_v56 = vadd.f32 %v3370_v42, %v13111_v53  ;;  %3423 = vrot.lane.b32.xlu0 %v3329_v31, %s10700_s2 }
 0x6b2   : >> { %v3364_v17 = vpop.permute.xlu0 %3363 }
 0x6b3   : >> { %9975 = vtanh.f32 %v3462_v56  ;;  %v3459_v28 = vadd.f32 %v3364_v17, %v13116_v10  ;;  %3425 = vrot.lane.b32.xlu1 %v3330_v12, %s10700_s2 }
 0x6b4   : >> { %v3366_v8 = vpop.permute.xlu1 %3365 }
 0x6b5   : >> { %9977 = vtanh.f32 %v3459_v28  ;;  %v3460_v61 = vadd.f32 %v3366_v8, %v13121_v49 }
 0x6b7   : >> { %9979 = vtanh.f32 %v3460_v61 }
 0x6bb   : >> { %v9974_v29 = vpop.eup %9973  ;;  %v3376_v40 = vpop.permute.xlu0 %3375 }
 0x6bc   : >> { %v3465_v3 = vadd.f32 %v3376_v40, %v13128_v48  ;;  %3591 = vrot.lane.b32.xlu0 %v9974_v29, %s10699_s23 }
 0x6bd   : >> { %v9976_v53 = vpop.eup %9975  ;;  %v3378_v13 = vpop.permute.xlu1 %3377 }
 0x6be   : >> { %9981 = vtanh.f32 %v3465_v3  ;;  %v3466_v31 = vadd.f32 %v3378_v13, %v13131_v60  ;;  %3593 = vrot.lane.b32.xlu1 %v9976_v53, %s10699_s23 }
 0x6bf   : >> { %v9978_v10 = vpop.eup %9977  ;;  %v3372_v42 = vpop.permute.xlu0 %3371 }
 0x6c0   : >> { %9983 = vtanh.f32 %v3466_v31  ;;  %v3463_v12 = vadd.f32 %v3372_v42, %v13136_v27  ;;  %3587 = vrot.lane.b32.xlu0 %v9978_v10, %s10699_s23 }
 0x6c1   : >> { %v9980_v49 = vpop.eup %9979  ;;  %v3374_v56 = vpop.permute.xlu1 %3373 }
 0x6c2   : >> { %9985 = vtanh.f32 %v3463_v12  ;;  %v3464_v48 = vadd.f32 %v3374_v56, %v13141_v57  ;;  %3589 = vrot.lane.b32.xlu1 %v9980_v49, %s10699_s23 }
 0x6c4   : >> { %9987 = vtanh.f32 %v3464_v48 }
 0x6c8   : >> { %v9982_v17 = vpop.eup %9981 }
 0x6c9   : >> { %3599 = vrot.lane.b32.xlu0 %v9982_v17, %s10699_s23 }
 0x6ca   : >> { %v9984_v60 = vpop.eup %9983 }
 0x6cb   : >> { %3601 = vrot.lane.b32.xlu1 %v9984_v60, %s10699_s23  ;;  %v3384_v28 = vpop.permute.xlu0 %3383 }
 0x6cc   : >> { %v9986_v8 = vpop.eup %9985  ;;  %v3469_v27 = vadd.f32 %v3384_v28, %v13148_v30 }
 0x6cd   : >> { %v3386_v61 = vpop.permute.xlu1 %3385  ;;  %3595 = vrot.lane.b32.xlu0 %v9986_v8, %s10699_s23 }
 0x6ce   : >> { %v9988_v29 = vpop.eup %9987  ;;  %9989 = vtanh.f32 %v3469_v27  ;;  %v3470_v57 = vadd.f32 %v3386_v61, %v13151_v52 }
 0x6cf   : >> { %3597 = vrot.lane.b32.xlu1 %v9988_v29, %s10699_s23  ;;  %v3380_v40 = vpop.permute.xlu0 %3379 }
 0x6d0   : >> { %9991 = vtanh.f32 %v3470_v57  ;;  %v3467_v3 = vadd.f32 %v3380_v40, %v13156_v18 }
 0x6d1   : >> { %v3382_v53 = vpop.permute.xlu1 %3381 }
 0x6d2   : >> { %9993 = vtanh.f32 %v3467_v3  ;;  %v3468_v13 = vadd.f32 %v3382_v53, %v13161_v2 }
 0x6d4   : >> { %9995 = vtanh.f32 %v3468_v13 }
 0x6d8   : >> { %v9990_v31 = vpop.eup %9989 }
 0x6d9   : >> { %3607 = vrot.lane.b32.xlu0 %v9990_v31, %s10699_s23 }
 0x6da   : >> { %v9992_v30 = vpop.eup %9991 }
 0x6db   : >> { %3609 = vrot.lane.b32.xlu1 %v9992_v30, %s10699_s23  ;;  %v3392_v10 = vpop.permute.xlu0 %3391 }
 0x6dc   : >> { %v9994_v42 = vpop.eup %9993  ;;  %v3473_v52 = vadd.f32 %v3392_v10, %v13168_v44 }
 0x6dd   : >> { %v3394_v12 = vpop.permute.xlu1 %3393  ;;  %3603 = vrot.lane.b32.xlu0 %v9994_v42, %s10699_s23 }
 0x6de   : >> { %v9996_v49 = vpop.eup %9995  ;;  %9997 = vtanh.f32 %v3473_v52  ;;  %v3474_v18 = vadd.f32 %v3394_v12, %v13171_v59 }
 0x6df   : >> { %3605 = vrot.lane.b32.xlu1 %v9996_v49, %s10699_s23  ;;  %v3388_v2 = vpop.permute.xlu0 %3387 }
 0x6e0   : >> { %9999 = vtanh.f32 %v3474_v18  ;;  %v3471_v56 = vadd.f32 %v3388_v2, %v13176_v50 }
 0x6e1   : >> { %v3390_v48 = vpop.permute.xlu1 %3389 }
 0x6e2   : >> { %10001 = vtanh.f32 %v3471_v56  ;;  %v3472_v17 = vadd.f32 %v3390_v48, %v13181_v24 }
 0x6e4   : >> { %10003 = vtanh.f32 %v3472_v17 }
 0x6e8   : >> { %v9998_v60 = vpop.eup %9997 }
 0x6e9   : >> { %3615 = vrot.lane.b32.xlu0 %v9998_v60, %s10699_s23 }
 0x6ea   : >> { %v10000_v44 = vpop.eup %9999 }
 0x6eb   : >> { %3617 = vrot.lane.b32.xlu1 %v10000_v44, %s10699_s23  ;;  %v3400_v28 = vpop.permute.xlu0 %3399 }
 0x6ec   : >> { %v10002_v8 = vpop.eup %10001  ;;  %v3477_v59 = vadd.f32 %v3400_v28, %v13188_v43 }
 0x6ed   : >> { %v3402_v27 = vpop.permute.xlu1 %3401  ;;  %3611 = vrot.lane.b32.xlu0 %v10002_v8, %s10699_s23 }
 0x6ee   : >> { %v10004_v61 = vpop.eup %10003  ;;  %10005 = vtanh.f32 %v3477_v59  ;;  %v3478_v50 = vadd.f32 %v3402_v27, %v13191_v21 }
 0x6ef   : >> { %3613 = vrot.lane.b32.xlu1 %v10004_v61, %s10699_s23  ;;  %v3396_v24 = vpop.permute.xlu0 %3395 }
 0x6f0   : >> { %10007 = vtanh.f32 %v3478_v50  ;;  %v3475_v29 = vadd.f32 %v3396_v24, %v13196_v23 }
 0x6f1   : >> { %v3398_v57 = vpop.permute.xlu1 %3397 }
 0x6f2   : >> { %10009 = vtanh.f32 %v3475_v29  ;;  %v3476_v40 = vadd.f32 %v3398_v57, %v13201_v35 }
 0x6f4   : >> { %10011 = vtanh.f32 %v3476_v40 }
 0x6f8   : >> { %v10006_v3 = vpop.eup %10005 }
 0x6f9   : >> { %3623 = vrot.lane.b32.xlu0 %v10006_v3, %s10699_s23  ;;  %v3525_v3 = vsub.f32 1.0, %v13269_v62 }
 0x6fa   : >> { %v10008_v43 = vpop.eup %10007 }
 0x6fb   : >> { %3625 = vrot.lane.b32.xlu1 %v10008_v43, %s10699_s23  ;;  %v3408_v53 = vpop.permute.xlu0 %3407 }
 0x6fc   : >> { %v10010_v13 = vpop.eup %10009  ;;  %v3481_v21 = vadd.f32 %v3408_v53, %v13208_v22  ;;  %v3526_v53 = vsub.f32 1.0, %v13277_v54 }
 0x6fd   : >> { %v3410_v31 = vpop.permute.xlu1 %3409  ;;  %3619 = vrot.lane.b32.xlu0 %v10010_v13, %s10699_s23 }
 0x6fe   : >> { %v10012_v30 = vpop.eup %10011  ;;  %10013 = vtanh.f32 %v3481_v21  ;;  %v3482_v23 = vadd.f32 %v3410_v31, %v13211_v25  ;;  %v3523_v21 = vsub.f32 1.0, %v13285_v46 }
 0x6ff   : >> { %3621 = vrot.lane.b32.xlu1 %v10012_v30, %s10699_s23  ;;  %v3404_v35 = vpop.permute.xlu0 %3403 }
 0x700   : >> { %10015 = vtanh.f32 %v3482_v23  ;;  %v3479_v10 = vadd.f32 %v3404_v35, %v13216_v34  ;;  %v3718_v35 = vmul.f32 %v13277_v54, %v12945_v20  ;;  %v3721_v54 = vmul.f32 %v13295_v0, %v12965_v1 }
 0x701   : >> { %v3406_v42 = vpop.permute.xlu1 %3405  ;;  %v3719_v1 = vmul.f32 %v13304_v32, %v12954_v6 }
 0x702   : >> { %10017 = vtanh.f32 %v3479_v10  ;;  %v3480_v52 = vadd.f32 %v3406_v42, %v13221_v39  ;;  %v3524_v42 = vsub.f32 1.0, %v13290_v51 }
 0x704   : >> { %10019 = vtanh.f32 %v3480_v52 }
 0x708   : >> { %v10014_v12 = vpop.eup %10013 }
 0x709   : >> { %3631 = vrot.lane.b32.xlu0 %v10014_v12, %s10699_s23  ;;  %v3529_v12 = vsub.f32 1.0, %v13295_v0 }
 0x70a   : >> { %v10016_v22 = vpop.eup %10015 }
 0x70b   : >> { %3633 = vrot.lane.b32.xlu1 %v10016_v22, %s10699_s23  ;;  %v3416_v49 = vpop.permute.xlu0 %3415 }
 0x70c   : >> { %v10018_v18 = vpop.eup %10017  ;;  %v3485_v25 = vadd.f32 %v3416_v49, %v13232_v38  ;;  %v3716_v49 = vmul.f32 %v13290_v51, %v12934_v14  ;;  %v3527_v14 = vsub.f32 1.0, %v13304_v32 }
 0x70d   : >> { %v3418_v2 = vpop.permute.xlu1 %3417  ;;  %3627 = vrot.lane.b32.xlu0 %v10018_v18, %s10699_s23 }
 0x70e   : >> { %v10020_v56 = vpop.eup %10019  ;;  %10021 = vtanh.f32 %v3485_v25  ;;  %v3486_v34 = vadd.f32 %v3418_v2, %v13235_v55  ;;  %v3530_v25 = vsub.f32 1.0, %v13299_v41 }
 0x70f   : >> { %3629 = vrot.lane.b32.xlu1 %v10020_v56, %s10699_s23  ;;  %v3412_v39 = vpop.permute.xlu0 %3411  ;;  %v3722_v56 = vmul.f32 %v13299_v41, %v12967_v11 }
 0x710   : >> { %10023 = vtanh.f32 %v3486_v34  ;;  %v3483_v48 = vadd.f32 %v3412_v39, %v13240_v26 }
 0x711   : >> { %v3414_v17 = vpop.permute.xlu1 %3413 }
 0x712   : >> { %10025 = vtanh.f32 %v3483_v48  ;;  %v3484_v60 = vadd.f32 %v3414_v17, %v13246_v36  ;;  %v16342_v48 = vld [vmem:[#allocation326_spill] sm:$0xff] }
 0x713   : >> { %v3528_v17 = vsub.f32 1.0, %v16342_v48 }
 0x714   : >> { %10027 = vtanh.f32 %v3484_v60 }
 0x718   : >> { %v10022_v44 = vpop.eup %10021 }
 0x719   : >> { %3639 = vrot.lane.b32.xlu0 %v10022_v44, %s10699_s23 }
 0x71a   : >> { %v10024_v38 = vpop.eup %10023 }
 0x71b   : >> { %3641 = vrot.lane.b32.xlu1 %v10024_v38, %s10699_s23  ;;  %v16343_v38 = vld [vmem:[#allocation309_spill] sm:$0xff] }
 0x71c   : >> { %v10026_v28 = vpop.eup %10025  ;;  %v3720_v11 = vmul.f32 %v16342_v48, %v16343_v38 }
 0x71d   : >> { %3635 = vrot.lane.b32.xlu0 %v10026_v28, %s10699_s23 }
 0x71e   : >> { %v10028_v55 = vpop.eup %10027 }
 0x71f   : >> { %3637 = vrot.lane.b32.xlu1 %v10028_v55, %s10699_s23  ;;  %v3420_v8 = vpop.permute.xlu0 %3419  ;;  %v16344_v55 = vld [vmem:[#allocation327_spill] sm:$0xff] }
 0x720   : >> { %v3487_v36 = vadd.f32 %v3420_v8, %v13264_v47  ;;  %v3533_v6 = vsub.f32 1.0, %v16344_v55  ;;  %v16345_v8 = vld [vmem:[#allocation306_spill] sm:$0xff] }
 0x721   : >> { %v3422_v59 = vpop.permute.xlu1 %3421 }
 0x722   : >> { %v3488_v24 = vadd.f32 %v3422_v59, %v13272_v63  ;;  %v3717_v63 = vmul.f32 %v13269_v62, %v12943_v5  ;;  %v3715_v5 = vmul.f32 %v13285_v46, %v12932_v9  ;;  %v3725_v59 = vmul.f32 %v16344_v55, %v16345_v8 }
 0x723   : >> { %v3424_v26 = vpop.permute.xlu0 %3423 }
 0x724   : >> { %v3489_v27 = vadd.f32 %v3424_v26, %v13256_v37 }
 0x725   : >> { %v3426_v61 = vpop.permute.xlu1 %3425 }
 0x726   : >> { %10029 = vtanh.f32 %v3489_v27  ;;  %v3490_v50 = vadd.f32 %v3426_v61, %v13259_v15  ;;  %v16346_v27 = vld [vmem:[#allocation328_spill] sm:$0xff] }
 0x727   : >> { %v3534_v61 = vsub.f32 1.0, %v16346_v27 }
 0x728   : >> { %10031 = vtanh.f32 %v3490_v50 }
 0x729   : >> { %10033 = vtanh.f32 %v3487_v36 }
 0x72a   : >> { %10035 = vtanh.f32 %v3488_v24  ;;  %v16347_v24 = vld [vmem:[#allocation305_spill] sm:$0xff] }
 0x72e   : >> { %v3592_v29 = vpop.permute.xlu0 %3591 }
 0x72f   : >> { %v3685_v37 = vmul.f32 %v3592_v29, %v3525_v3  ;;  %v3726_v29 = vmul.f32 %v16346_v27, %v16347_v24 }
 0x730   : >> { %v10030_v57 = vpop.eup %10029  ;;  %v3594_v40 = vpop.permute.xlu1 %3593 }
 0x731   : >> { %3647 = vrot.lane.b32.xlu0 %v10030_v57, %s10699_s23  ;;  %v3686_v13 = vmul.f32 %v3594_v40, %v3526_v53  ;;  %v3749_v23 = vadd.f32 %v3717_v63, %v3685_v37  ;;  %v16348_v40 = vld [vmem:[#allocation329_spill] sm:$0xff]  ;;  %v16349_v53 = vld [vmem:[#allocation308_spill] sm:$0xff]  ;;  %v16350_v63 = vld [vmem:[#allocation330_spill] sm:$0xff] }
 0x732   : >> { %v10032_v43 = vpop.eup %10031  ;;  %v3588_v15 = vpop.permute.xlu0 %3587  ;;  %v3531_v3 = vsub.f32 1.0, %v16348_v40 }
 0x733   : >> { %3649 = vrot.lane.b32.xlu1 %v10032_v43, %s10699_s23  ;;  %v10034_v47 = vpop.eup %10033  ;;  %v3683_v10 = vmul.f32 %v3588_v15, %v3523_v21  ;;  %v3750_v52 = vadd.f32 %v3718_v35, %v3686_v13  ;;  %v3532_v13 = vsub.f32 1.0, %v16350_v63 }
 0x734   : >> { %v10036_v31 = vpop.eup %10035  ;;  %v3590_v30 = vpop.permute.xlu1 %3589 }
 0x735   : >> { %3643 = vrot.lane.b32.xlu0 %v10034_v47, %s10699_s23  ;;  %v3684_v62 = vmul.f32 %v3590_v30, %v3524_v42  ;;  %v3747_v22 = vadd.f32 %v3715_v5, %v3683_v10  ;;  %v3723_v47 = vmul.f32 %v16348_v40, %v16349_v53  ;;  %v16351_v30 = vld [vmem:[#allocation307_spill] sm:$0xff]  ;;  %v16364_v53 = vld [vmem:[#allocation336_spill] sm:$0xff] }
 0x736   : >> { %v16352_v42 = vld [vmem:[#allocation331_spill] sm:$0xff] }
 0x737   : >> { %3645 = vrot.lane.b32.xlu1 %v10036_v31, %s10699_s23  ;;  %v3748_v2 = vadd.f32 %v3716_v49, %v3684_v62  ;;  %v16353_v62 = vld [vmem:[#allocation302_spill] sm:$0xff]  ;;  %v16354_v49 = vld [vmem:[#allocation332_spill] sm:$0xff] }
 0x739   : >> { %3815 = vrot.lane.b32.xlu0 %v3749_v23, %s10699_s23  ;;  %v3724_v23 = vmul.f32 %v16350_v63, %v16351_v30  ;;  %v16366_v30 = vld [vmem:[#allocation337_spill] sm:$0xff] }
 0x73b   : >> { %3817 = vrot.lane.b32.xlu1 %v3750_v52, %s10699_s23  ;;  %v3600_v20 = vpop.permute.xlu0 %3599  ;;  %v3537_v52 = vsub.f32 1.0, %v16352_v42 }
 0x73c   : >> { %v3689_v18 = vmul.f32 %v3600_v20, %v3529_v12  ;;  %v3729_v12 = vmul.f32 %v16352_v42, %v16353_v62  ;;  %v3538_v20 = vsub.f32 1.0, %v16354_v49 }
 0x73d   : >> { %v3602_v9 = vpop.permute.xlu1 %3601  ;;  %3811 = vrot.lane.b32.xlu0 %v3747_v22, %s10699_s23 }
 0x73e   : >> { %v3753_v46 = vadd.f32 %v3721_v54, %v3689_v18  ;;  %v3690_v34 = vmul.f32 %v3602_v9, %v3530_v25  ;;  %v16355_v25 = vld [vmem:[#allocation301_spill] sm:$0xff] }
 0x73f   : >> { %3813 = vrot.lane.b32.xlu1 %v3748_v2, %s10699_s23  ;;  %v3596_v51 = vpop.permute.xlu0 %3595  ;;  %v3730_v2 = vmul.f32 %v16354_v49, %v16355_v25 }
 0x740   : >> { %v3754_v39 = vadd.f32 %v3722_v56, %v3690_v34  ;;  %v3687_v0 = vmul.f32 %v3596_v51, %v3527_v14  ;;  %v16357_v51 = vld [vmem:[#allocation304_spill] sm:$0xff] }
 0x741   : >> { %v3598_v60 = vpop.permute.xlu1 %3597  ;;  %3823 = vrot.lane.b32.xlu0 %v3753_v46, %s10699_s23  ;;  %v16356_v46 = vld [vmem:[#allocation333_spill] sm:$0xff] }
 0x742   : >> { %v3751_v44 = vadd.f32 %v3719_v1, %v3687_v0  ;;  %v3688_v41 = vmul.f32 %v3598_v60, %v3528_v17  ;;  %v3535_v56 = vsub.f32 1.0, %v16356_v46  ;;  %v16358_v0 = vld [vmem:[#allocation334_spill] sm:$0xff] }
 0x743   : >> { %3825 = vrot.lane.b32.xlu1 %v3754_v39, %s10699_s23  ;;  %v3727_v39 = vmul.f32 %v16356_v46, %v16357_v51  ;;  %v3536_v48 = vsub.f32 1.0, %v16358_v0 }
 0x744   : >> { %v3752_v28 = vadd.f32 %v3720_v11, %v3688_v41 }
 0x745   : >> { %3819 = vrot.lane.b32.xlu0 %v3751_v44, %s10699_s23  ;;  %v16359_v44 = vld [vmem:[#allocation303_spill] sm:$0xff] }
 0x746   : >> { %v3728_v38 = vmul.f32 %v16358_v0, %v16359_v44 }
 0x747   : >> { %3821 = vrot.lane.b32.xlu1 %v3752_v28, %s10699_s23  ;;  %v16360_v28 = vld [vmem:[#allocation335_spill] sm:$0xff] }
 0x748   : >> { %v3541_v55 = vsub.f32 1.0, %v16360_v28 }
 0x74b   : >> { %v3608_v32 = vpop.permute.xlu0 %3607 }
 0x74c   : >> { %v3693_v26 = vmul.f32 %v3608_v32, %v3533_v6  ;;  %v16361_v32 = vld [vmem:[#allocation312_spill] sm:$0xff] }
 0x74d   : >> { %v3610_v36 = vpop.permute.xlu1 %3609  ;;  %v3733_v8 = vmul.f32 %v16360_v28, %v16361_v32 }
 0x74e   : >> { %v3757_v50 = vadd.f32 %v3725_v59, %v3693_v26  ;;  %v3694_v57 = vmul.f32 %v3610_v36, %v3534_v61  ;;  %v3542_v26 = vsub.f32 1.0, %v13359_v33  ;;  %v16362_v36 = vld [vmem:[#allocation313_spill] sm:$0xff] }
 0x74f   : >> { %v3604_v43 = vpop.permute.xlu0 %3603 }
 0x750   : >> { %v3758_v37 = vadd.f32 %v3726_v29, %v3694_v57  ;;  %v3691_v15 = vmul.f32 %v3604_v43, %v3531_v3  ;;  %3831 = vrot.lane.b32.xlu0 %v3757_v50, %s10699_s23  ;;  %v3734_v50 = vmul.f32 %v13359_v33, %v16362_v36  ;;  %v3539_v29 = vsub.f32 1.0, %v13364_v19  ;;  %v16363_v3 = vld [vmem:[#allocation310_spill] sm:$0xff] }
 0x751   : >> { %v3606_v21 = vpop.permute.xlu1 %3605  ;;  %v3731_v43 = vmul.f32 %v13364_v19, %v16363_v3  ;;  %v3545_v19 = vsub.f32 1.0, %v16366_v30  ;;  %v3548_v3 = vsub.f32 1.0, %v13406_v58 }
 0x752   : >> { %v3755_v31 = vadd.f32 %v3723_v47, %v3691_v15  ;;  %v3692_v35 = vmul.f32 %v3606_v21, %v3532_v13  ;;  %3833 = vrot.lane.b32.xlu1 %v3758_v37, %s10699_s23  ;;  %v3540_v47 = vsub.f32 1.0, %v16364_v53  ;;  %v16365_v13 = vld [vmem:[#allocation311_spill] sm:$0xff] }
 0x753   : >> { %v3732_v21 = vmul.f32 %v16364_v53, %v16365_v13  ;;  %v16380_v53 = vld [vmem:[#allocation319_spill] sm:$0xff] }
 0x754   : >> { %v3756_v10 = vadd.f32 %v3724_v23, %v3692_v35  ;;  %3827 = vrot.lane.b32.xlu0 %v3755_v31, %s10699_s23  ;;  %v16367_v35 = vld [vmem:[#allocation316_spill] sm:$0xff] }
 0x756   : >> { %3829 = vrot.lane.b32.xlu1 %v3756_v10, %s10699_s23  ;;  %v3737_v10 = vmul.f32 %v16366_v30, %v16367_v35  ;;  %v3553_v30 = vsub.f32 1.0, %v13418_v45 }
 0x75b   : >> { %v3616_v5 = vpop.permute.xlu0 %3615 }
 0x75c   : >> { %v3697_v22 = vmul.f32 %v3616_v5, %v3537_v52  ;;  %v16368_v52 = vld [vmem:[#allocation338_spill] sm:$0xff] }
 0x75d   : >> { %v3618_v54 = vpop.permute.xlu1 %3617  ;;  %v3546_v5 = vsub.f32 1.0, %v16368_v52 }
 0x75e   : >> { %v3761_v18 = vadd.f32 %v3729_v12, %v3697_v22  ;;  %v3698_v9 = vmul.f32 %v3618_v54, %v3538_v20  ;;  %v16369_v22 = vld [vmem:[#allocation317_spill] sm:$0xff]  ;;  %v16370_v54 = vld [vmem:[#allocation339_spill] sm:$0xff] }
 0x75f   : >> { %v3612_v34 = vpop.permute.xlu0 %3611  ;;  %v3738_v49 = vmul.f32 %v16368_v52, %v16369_v22 }
 0x760   : >> { %v3762_v14 = vadd.f32 %v3730_v2, %v3698_v9  ;;  %v3695_v1 = vmul.f32 %v3612_v34, %v3535_v56  ;;  %3839 = vrot.lane.b32.xlu0 %v3761_v18, %s10699_s23  ;;  %v3543_v18 = vsub.f32 1.0, %v16370_v54  ;;  %v16371_v9 = vld [vmem:[#allocation314_spill] sm:$0xff]  ;;  %v16372_v34 = vld [vmem:[#allocation340_spill] sm:$0xff] }
 0x761   : >> { %v3614_v17 = vpop.permute.xlu1 %3613  ;;  %v3735_v46 = vmul.f32 %v16370_v54, %v16371_v9  ;;  %v16386_v9 = vld [vmem:[#allocation325_spill] sm:$0xff] }
 0x762   : >> { %v3759_v60 = vadd.f32 %v3727_v39, %v3695_v1  ;;  %v3696_v11 = vmul.f32 %v3614_v17, %v3536_v48  ;;  %3841 = vrot.lane.b32.xlu1 %v3762_v14, %s10699_s23  ;;  %v3544_v14 = vsub.f32 1.0, %v16372_v34  ;;  %v16373_v1 = vld [vmem:[#allocation315_spill] sm:$0xff] }
 0x763   : >> { %v3736_v0 = vmul.f32 %v16372_v34, %v16373_v1 }
 0x764   : >> { %v3760_v41 = vadd.f32 %v3728_v38, %v3696_v11  ;;  %3835 = vrot.lane.b32.xlu0 %v3759_v60, %s10699_s23  ;;  %v16374_v60 = vld [vmem:[#allocation341_spill] sm:$0xff]  ;;  %v16375_v11 = vld [vmem:[#allocation320_spill] sm:$0xff] }
 0x765   : >> { %v3549_v44 = vsub.f32 1.0, %v16374_v60 }
 0x766   : >> { %3837 = vrot.lane.b32.xlu1 %v3760_v41, %s10699_s23  ;;  %v3741_v41 = vmul.f32 %v16374_v60, %v16375_v11 }
 0x76b   : >> { %v3624_v6 = vpop.permute.xlu0 %3623 }
 0x76c   : >> { %v3701_v59 = vmul.f32 %v3624_v6, %v3541_v55  ;;  %v16376_v55 = vld [vmem:[#allocation342_spill] sm:$0xff] }
 0x76d   : >> { %v3626_v27 = vpop.permute.xlu1 %3625  ;;  %v3550_v6 = vsub.f32 1.0, %v16376_v55 }
 0x76e   : >> { %v3765_v61 = vadd.f32 %v3733_v8, %v3701_v59  ;;  %v3702_v24 = vmul.f32 %v3626_v27, %v3542_v26  ;;  %v16377_v59 = vld [vmem:[#allocation321_spill] sm:$0xff] }
 0x76f   : >> { %v3620_v57 = vpop.permute.xlu0 %3619  ;;  %v3742_v26 = vmul.f32 %v16376_v55, %v16377_v59 }
 0x770   : >> { %v3766_v40 = vadd.f32 %v3734_v50, %v3702_v24  ;;  %v3699_v37 = vmul.f32 %v3620_v57, %v3539_v29  ;;  %3847 = vrot.lane.b32.xlu0 %v3765_v61, %s10699_s23  ;;  %v16378_v61 = vld [vmem:[#allocation343_spill] sm:$0xff]  ;;  %v16379_v29 = vld [vmem:[#allocation318_spill] sm:$0xff] }
 0x771   : >> { %v3622_v15 = vpop.permute.xlu1 %3621  ;;  %v3547_v36 = vsub.f32 1.0, %v16378_v61  ;;  %v3739_v57 = vmul.f32 %v16378_v61, %v16379_v29 }
 0x772   : >> { %v3763_v63 = vadd.f32 %v3731_v43, %v3699_v37  ;;  %v3700_v31 = vmul.f32 %v3622_v15, %v3540_v47  ;;  %3849 = vrot.lane.b32.xlu1 %v3766_v40, %s10699_s23  ;;  %v3740_v47 = vmul.f32 %v13406_v58, %v16380_v53  ;;  %v3552_v58 = vsub.f32 1.0, %v13414_v4 }
 0x774   : >> { %v3764_v33 = vadd.f32 %v3732_v21, %v3700_v31  ;;  %3843 = vrot.lane.b32.xlu0 %v3763_v63, %s10699_s23  ;;  %v3551_v31 = vsub.f32 1.0, %v13411_v7 }
 0x776   : >> { %3845 = vrot.lane.b32.xlu1 %v3764_v33, %s10699_s23 }
 0x77b   : >> { %v3632_v23 = vpop.permute.xlu0 %3631 }
 0x77c   : >> { %v3705_v42 = vmul.f32 %v3632_v23, %v3545_v19  ;;  %v16381_v19 = vld [vmem:[#allocation322_spill] sm:$0xff] }
 0x77d   : >> { %v3634_v62 = vpop.permute.xlu1 %3633  ;;  %v3743_v23 = vmul.f32 %v13411_v7, %v16381_v19 }
 0x77e   : >> { %v3769_v12 = vadd.f32 %v3737_v10, %v3705_v42  ;;  %v3706_v20 = vmul.f32 %v3634_v62, %v3546_v5  ;;  %v3554_v10 = vsub.f32 1.0, %v13423_v16  ;;  %v16382_v62 = vld [vmem:[#allocation323_spill] sm:$0xff] }
 0x77f   : >> { %v3628_v25 = vpop.permute.xlu0 %3627 }
 0x780   : >> { %v3770_v2 = vadd.f32 %v3738_v49, %v3706_v20  ;;  %v3703_v56 = vmul.f32 %v3628_v25, %v3543_v18  ;;  %3855 = vrot.lane.b32.xlu0 %v3769_v12, %s10699_s23  ;;  %v3744_v12 = vmul.f32 %v13414_v4, %v16382_v62  ;;  %v16384_v49 = vld [vmem:[#allocation324_spill] sm:$0xff] }
 0x781   : >> { %v3630_v51 = vpop.permute.xlu1 %3629  ;;  %v3745_v54 = vmul.f32 %v13418_v45, %v16384_v49 }
 0x782   : >> { %v3767_v39 = vadd.f32 %v3735_v46, %v3703_v56  ;;  %v3704_v48 = vmul.f32 %v3630_v51, %v3544_v14  ;;  %3857 = vrot.lane.b32.xlu1 %v3770_v2, %s10699_s23  ;;  %v3746_v46 = vmul.f32 %v13423_v16, %v16386_v9 }
 0x784   : >> { %v3768_v17 = vadd.f32 %v3736_v0, %v3704_v48  ;;  %3851 = vrot.lane.b32.xlu0 %v3767_v39, %s10699_s23 }
 0x786   : >> { %3853 = vrot.lane.b32.xlu1 %v3768_v17, %s10699_s23 }
 0x78b   : >> { %v3640_v38 = vpop.permute.xlu0 %3639 }
 0x78c   : >> { %v3709_v28 = vmul.f32 %v3640_v38, %v3549_v44 }
 0x78d   : >> { %v3642_v32 = vpop.permute.xlu1 %3641 }
 0x78e   : >> { %v3773_v8 = vadd.f32 %v3741_v41, %v3709_v28  ;;  %v3710_v27 = vmul.f32 %v3642_v32, %v3550_v6 }
 0x78f   : >> { %v3636_v50 = vpop.permute.xlu0 %3635 }
 0x790   : >> { %v3774_v24 = vadd.f32 %v3742_v26, %v3710_v27  ;;  %v3707_v40 = vmul.f32 %v3636_v50, %v3547_v36  ;;  %3863 = vrot.lane.b32.xlu0 %v3773_v8, %s10699_s23 }
 0x791   : >> { %v3638_v43 = vpop.permute.xlu1 %3637 }
 0x792   : >> { %v3771_v37 = vadd.f32 %v3739_v57, %v3707_v40  ;;  %v3708_v15 = vmul.f32 %v3638_v43, %v3548_v3  ;;  %3865 = vrot.lane.b32.xlu1 %v3774_v24, %s10699_s23 }
 0x794   : >> { %v3772_v63 = vadd.f32 %v3740_v47, %v3708_v15  ;;  %3859 = vrot.lane.b32.xlu0 %v3771_v37, %s10699_s23 }
 0x796   : >> { %3861 = vrot.lane.b32.xlu1 %v3772_v63, %s10699_s23 }
 0x7a3   : >> { %v3648_v13 = vpop.permute.xlu0 %3647 }
 0x7a4   : >> { %v3713_v52 = vmul.f32 %v3648_v13, %v3553_v30 }
 0x7a5   : >> { %v3650_v21 = vpop.permute.xlu1 %3649 }
 0x7a6   : >> { %v3714_v18 = vmul.f32 %v3650_v21, %v3554_v10  ;;  %v3777_v7 = vadd.f32 %v3745_v54, %v3713_v52 }
 0x7a7   : >> { %v3644_v33 = vpop.permute.xlu0 %3643 }
 0x7a8   : >> { %v3711_v35 = vmul.f32 %v3644_v33, %v3551_v31  ;;  %v3778_v56 = vadd.f32 %v3746_v46, %v3714_v18 }
 0x7a9   : >> { %v3646_v42 = vpop.permute.xlu1 %3645 }
 0x7aa   : >> { %v3775_v5 = vadd.f32 %v3743_v23, %v3711_v35  ;;  %v3712_v22 = vmul.f32 %v3646_v42, %v3552_v58 }
 0x7ab   : >> { %v13611_v30 = vpop.permute.xlu0 %3815  }
 0x7ac   : >> { %v16383_v20 = vmov %v13611_v30  ;;  %v3776_v25 = vadd.f32 %v3744_v12, %v3712_v22  ;;  %3867 = vrot.lane.b32.xlu0 %v3775_v5, %s10699_s23 }
 0x7ad   : >> { %v13616_v29 = vpop.permute.xlu1 %3817   ;;  %v16460_v30 = vmov %v16383_v20 }
 0x7ae   : >> { %v16385_v2 = vmov %v13616_v29  ;;  %3869 = vrot.lane.b32.xlu1 %v3776_v25, %s10699_s23  ;;  %v16493_v30 = vld [vmem:[#allocation201_spill] sm:$0xff] (%p13686_p3) }
 0x7af   : >> { %v13621_v33 = vpop.permute.xlu0 %3811   ;;  %v16459_v29 = vmov %v16385_v2 }
 0x7b0   : >> { %v16387_v4 = vmov %v13621_v33  ;;  %3871 = vrot.lane.b32.xlu0 %v3777_v7, %s10699_s23  ;;  %v16487_v29 = vld [vmem:[#allocation195_spill] sm:$0xff] (%p13686_p3) }
 0x7b1   : >> { %v13624_v32 = vpop.permute.xlu1 %3813   ;;  %v16462_v33 = vmov %v16387_v4 }
 0x7b2   : >> { %v16388_v34 = vmov %v13624_v32  ;;  %3873 = vrot.lane.b32.xlu1 %v3778_v56, %s10699_s23  ;;  %v10702_v33 = vmov (%p13686_p3), 0  }
 0x7b3   : >> { %v13627_v44 = vpop.permute.xlu0 %3823   ;;  %v16461_v32 = vmov %v16388_v34  ;;  %10038 = vset.pattern.permute.xlu1 (%p13686_p3), %v10702_v33  ;;  %10037 = vset.pattern.permute.xlu0 (%p13686_p3), %v10702_v33 }
 0x7b4   : >> { %v16389_v14 = vmov %v13627_v44  ;;  %v16482_v32 = vld [vmem:[#allocation192_spill] sm:$0xff] (%p13686_p3) }
 0x7b5   : >> { %v13629_v43 = vpop.permute.xlu1 %3825   ;;  %v16456_v44 = vmov %v16389_v14 }
 0x7b6   : >> { %v16390_v39 = vmov %v13629_v43  ;;  %v16477_v44 = vld [vmem:[#allocation185_spill] sm:$0xff] (%p13686_p3) }
 0x7b7   : >> { %v13631_v42 = vpop.permute.xlu0 %3819   ;;  %v16455_v43 = vmov %v16390_v39 }
 0x7b8   : >> { %v16391_v1 = vmov %v13631_v42  ;;  %v16489_v43 = vld [vmem:[#allocation197_spill] sm:$0xff] (%p13686_p3) }
 0x7b9   : >> { %v13633_v41 = vpop.permute.xlu1 %3821   ;;  %v16458_v42 = vmov %v16391_v1 }
 0x7ba   : >> { %v16392_v0 = vmov %v13633_v41  ;;  %v16496_v42 = vld [vmem:[#allocation43_spill] sm:$0xff] (%p13686_p3) }
 0x7bb   : >> { %v16457_v41 = vmov %v16392_v0 }
 0x7bc   : > { %v16479_v41 = vld [vmem:[#allocation187_spill] sm:$0xff] (%p13686_p3) }
 0x7c2   : >> { %v13635_v48 = vpop.permute.xlu0 %3831  }
 0x7c3   : >> { %v16393_v16 = vmov %v13635_v48 }
 0x7c4   : >> { %v13637_v47 = vpop.permute.xlu1 %3833   ;;  %v16452_v48 = vmov %v16393_v16 }
 0x7c5   : >> { %v16394_v17 = vmov %v13637_v47  ;;  %v16475_v48 = vld [vmem:[#allocation183_spill] sm:$0xff] (%p13686_p3) }
 0x7c6   : >> { %v13639_v46 = vpop.permute.xlu0 %3827   ;;  %v16451_v47 = vmov %v16394_v17 }
 0x7c7   : >> { %v16395_v38 = vmov %v13639_v46  ;;  %v16491_v47 = vld [vmem:[#allocation199_spill] sm:$0xff] (%p13686_p3) }
 0x7c8   : >> { %v13641_v45 = vpop.permute.xlu1 %3829   ;;  %v16454_v46 = vmov %v16395_v38 }
 0x7c9   : >> { %v16396_v6 = vmov %v13641_v45  ;;  %v16500_v46 = vld [vmem:[#allocation47_spill] sm:$0xff] (%p13686_p3) }
 0x7ca   : >> { %v16453_v45 = vmov %v16396_v6 }
 0x7cb   : > { %v16473_v45 = vld [vmem:[#allocation181_spill] sm:$0xff] (%p13686_p3) }
 0x7d2   : >> { %v13643_v52 = vpop.permute.xlu0 %3839  }
 0x7d3   : >> { %v16397_v8 = vmov %v13643_v52 }
 0x7d4   : >> { %v13645_v51 = vpop.permute.xlu1 %3841   ;;  %v16448_v52 = vmov %v16397_v8 }
 0x7d5   : >> { %v16398_v26 = vmov %v13645_v51  ;;  %v16497_v52 = vld [vmem:[#allocation44_spill] sm:$0xff] (%p13686_p3) }
 0x7d6   : >> { %v13647_v50 = vpop.permute.xlu0 %3835   ;;  %v16447_v51 = vmov %v16398_v26 }
 0x7d7   : >> { %v16399_v36 = vmov %v13647_v50  ;;  %v16474_v51 = vld [vmem:[#allocation184_spill] sm:$0xff] (%p13686_p3) }
 0x7d8   : >> { %v13649_v49 = vpop.permute.xlu1 %3837   ;;  %v16450_v50 = vmov %v16399_v36 }
 0x7d9   : >> { %v16400_v24 = vmov %v13649_v49  ;;  %v16486_v50 = vld [vmem:[#allocation196_spill] sm:$0xff] (%p13686_p3) }
 0x7da   : >> { %v16449_v49 = vmov %v16400_v24 }
 0x7db   : > { %v16498_v49 = vld [vmem:[#allocation45_spill] sm:$0xff] (%p13686_p3) }
 0x7e2   : >> { %v13651_v57 = vpop.permute.xlu0 %3847  }
 0x7e3   : >> { %v16401_v40 = vmov %v13651_v57 }
 0x7e4   : >> { %v13653_v56 = vpop.permute.xlu1 %3849   ;;  %v16444_v57 = vmov %v16401_v40 }
 0x7e5   : >> { %v16402_v3 = vmov %v13653_v56  ;;  %v16488_v57 = vld [vmem:[#allocation198_spill] sm:$0xff] (%p13686_p3) }
 0x7e6   : >> { %v13655_v55 = vpop.permute.xlu0 %3843   ;;  %v16443_v56 = vmov %v16402_v3 }
 0x7e7   : >> { %v16403_v37 = vmov %v13655_v55  ;;  %v16501_v56 = vld [vmem:[#allocation48_spill] sm:$0xff] (%p13686_p3) }
 0x7e8   : >> { %v13657_v53 = vpop.permute.xlu1 %3845   ;;  %v16446_v55 = vmov %v16403_v37 }
 0x7e9   : >> { %v16404_v15 = vmov %v13657_v53  ;;  %v16481_v55 = vld [vmem:[#allocation189_spill] sm:$0xff] (%p13686_p3) }
 0x7ea   : >> { %v16445_v53 = vmov %v16404_v15 }
 0x7eb   : > { %v16490_v53 = vld [vmem:[#allocation200_spill] sm:$0xff] (%p13686_p3) }
 0x7f2   : >> { %v13659_v60 = vpop.permute.xlu0 %3855  }
 0x7f3   : >> { %v16405_v63 = vmov %v13659_v60 }
 0x7f4   : >> { %v13661_v31 = vpop.permute.xlu1 %3857   ;;  %v16440_v60 = vmov %v16405_v63 }
 0x7f5   : >> { %16406 = vst [vmem:[#allocation344_spill] sm:$0xff] %v13661_v31  ;;  %v16407_v13 = vmov %v13661_v31  ;;  %v16476_v60 = vld [vmem:[#allocation186_spill] sm:$0xff] (%p13686_p3) }
 0x7f6   : >> { %v13663_v62 = vpop.permute.xlu0 %3851   ;;  %v16439_v31 = vmov %v16407_v13  ;;  %v16472_v13 = vld [vmem:[#allocation182_spill] sm:$0xff] (%p13686_p3) }
 0x7f7   : >> { %v16408_v21 = vmov %v13663_v62  ;;  %v16492_v31 = vld [vmem:[#allocation202_spill] sm:$0xff] (%p13686_p3) }
 0x7f8   : >> { %v13665_v59 = vpop.permute.xlu1 %3853   ;;  %v16442_v62 = vmov %v16408_v21 }
 0x7f9   : >> { %v16409_v19 = vmov %v13665_v59  ;;  %v9201_v62 = vpack.c.bf16 (%p13686_p3), %v16497_v52, %v16496_v42 }
 0x7fa   : >> { %v16441_v59 = vmov %v16409_v19 }
 0x7fb   : > { %v16483_v59 = vld [vmem:[#allocation191_spill] sm:$0xff] (%p13686_p3)  ;;  %9202 = vmatprep.subr.bf16.mxu0 (%p13686_p3), %v9201_v62 }
 0x7fc   : > { %9204 = vmatpush3.bf16.msra.mxu0 (%p13686_p3), %v9201_v62 }
 0x802   : >> { %v13667_v11 = vpop.permute.xlu0 %3863  }
 0x803   : >> { %16410 = vst [vmem:[#allocation345_spill] sm:$0xff] %v13667_v11  ;;  %v16435_v23 = vmov %v13667_v11 }
 0x804   : >> { %v13669_v58 = vpop.permute.xlu1 %3865   ;;  %v16436_v11 = vmov %v16435_v23  ;;  %v16469_v23 = vld [vmem:[#allocation177_spill] sm:$0xff] (%p13686_p3) }
 0x805   : >> { %16412 = vst [vmem:[#allocation346_spill] sm:$0xff] %v13669_v58  ;;  %v16413_v35 = vmov %v13669_v58  ;;  %v16478_v11 = vld [vmem:[#allocation188_spill] sm:$0xff] (%p13686_p3) }
 0x806   : >> { %v13671_v61 = vpop.permute.xlu0 %3859   ;;  %v16434_v58 = vmov %v16413_v35  ;;  %v16468_v35 = vld [vmem:[#allocation178_spill] sm:$0xff] (%p13686_p3) }
 0x807   : >> { %16414 = vst [vmem:[#allocation347_spill] sm:$0xff] %v13671_v61  ;;  %v16415_v5 = vmov %v13671_v61  ;;  %v16494_v58 = vld [vmem:[#allocation204_spill] sm:$0xff] (%p13686_p3) }
 0x808   : >> { %v13673_v28 = vpop.permute.xlu1 %3861   ;;  %v16438_v61 = vmov %v16415_v5  ;;  %v16471_v5 = vld [vmem:[#allocation179_spill] sm:$0xff] (%p13686_p3) }
 0x809   : >> { %16416 = vst [vmem:[#allocation348_spill] sm:$0xff] %v13673_v28  ;;  %v16417_v12 = vmov %v13673_v28  ;;  %v16485_v61 = vld [vmem:[#allocation193_spill] sm:$0xff] (%p13686_p3) }
 0x80a   : >> { %v16437_v28 = vmov %v16417_v12  ;;  %v16470_v12 = vld [vmem:[#allocation180_spill] sm:$0xff] (%p13686_p3) }
 0x80b   : > { %v16480_v28 = vld [vmem:[#allocation190_spill] sm:$0xff] (%p13686_p3) }
 0x81e   : >> { %v13675_v27 = vpop.permute.xlu0 %3867  }
 0x81f   : >> { %16418 = vst [vmem:[#allocation349_spill] sm:$0xff] %v13675_v27  ;;  %v16419_v22 = vmov %v13675_v27 }
 0x820   : >> { %v13677_v7 = vpop.permute.xlu1 %3869   ;;  %v16433_v27 = vmov %v16419_v22  ;;  %1174 = sbr.rel (!%p13686_p3) target bundleno = 485 (0x1e5), region = 200  ;;  %v16467_v22 = vld [vmem:[#allocation174_spill] sm:$0xff] (%p13686_p3) }
 0x821   : >> { %16420 = vst [vmem:[#allocation350_spill] sm:$0xff] %v13677_v7  ;;  %v16431_v54 = vmov %v13677_v7  ;;  %v16484_v27 = vld [vmem:[#allocation194_spill] sm:$0xff] (%p13686_p3) }
 0x822   : >> { %v13679_v10 = vpop.permute.xlu0 %3871   ;;  %v16432_v7 = vmov %v16431_v54  ;;  %v16466_v54 = vld [vmem:[#allocation176_spill] sm:$0xff] (%p13686_p3) }
 0x823   : >> { %16422 = vst [vmem:[#allocation351_spill] sm:$0xff] %v13679_v10  ;;  %v16429_v18 = vmov %v13679_v10  ;;  %v16499_v7 = vld [vmem:[#allocation46_spill] sm:$0xff] (%p13686_p3) }
 0x824   : >> { %v13681_v9 = vpop.permute.xlu1 %3873   ;;  %v16430_v10 = vmov %v16429_v18  ;;  %v16465_v18 = vld [vmem:[#allocation173_spill] sm:$0xff] (%p13686_p3) }
 0x825   : >> { %16424 = vst [vmem:[#allocation352_spill] sm:$0xff] %v13681_v9  ;;  %v16427_v25 = vmov %v13681_v9  ;;  %3909 = vperm.xlu0 (%p13686_p3), %10037, %v16465_v18   ;;  %v16495_v10 = vld [vmem:[#allocation203_spill] sm:$0xff] (%p13686_p3)  ;;  %v16506_v18 = vld [vmem:[#allocation53_spill] sm:$0xff] (%p13686_p3) }
 0x826   : >> { %v16428_v9 = vmov %v16427_v25  ;;  %v16464_v25 = vld [vmem:[#allocation175_spill] sm:$0xff] (%p13686_p3) }
 0x827   : > { %3919 = vperm.xlu1 %10038, %v16464_v25   ;;  %v9205_v9 = vpack.c.bf16 %v16499_v7, %v16498_v49  ;;  %v16507_v25 = vld [vmem:[#allocation54_spill] sm:$0xff] }
 0x828   : > { %v9221_v33 = vpack.c.bf16 %v16507_v25, %v16506_v18 }
 0x829   : > { %3914 = vperm.xlu0 %10037, %v16467_v22   ;;  %9206 = vmatprep.subr.bf16.mxu0 %v9205_v9  ;;  %v16505_v22 = vld [vmem:[#allocation52_spill] sm:$0xff] }
 0x82a   : > { %9208 = vmatpush3.bf16.msra.mxu0 %v9205_v9 }
 0x82b   : > { %3924 = vperm.xlu1 %10038, %v16466_v54  }
 0x82d   : > { %3929 = vperm.xlu0 %10037, %v16469_v23   ;;  %v16502_v23 = vld [vmem:[#allocation49_spill] sm:$0xff] }
 0x82f   : > { %3934 = vperm.xlu1 %10038, %v16468_v35   ;;  %v16503_v35 = vld [vmem:[#allocation50_spill] sm:$0xff] }
 0x831   : > { %3939 = vperm.xlu0 %10037, %v16471_v5   ;;  %v9213_v5 = vpack.c.bf16 %v16503_v35, %v16502_v23 }
 0x833   : > { %3944 = vperm.xlu1 %10038, %v16470_v12   ;;  %v16504_v12 = vld [vmem:[#allocation51_spill] sm:$0xff] }
 0x834   : > { %v9217_v54 = vpack.c.bf16 %v16505_v22, %v16504_v12 }
 0x835   : > { %3949 = vperm.xlu0 %10037, %v16473_v45  }
 0x837   : > { %3954 = vperm.xlu1 %10038, %v16472_v13   ;;  %v9209_v13 = vpack.c.bf16 %v16501_v56, %v16500_v46 }
 0x839   : > { %3959 = vperm.xlu0 %10037, %v16475_v48   ;;  %9210 = vmatprep.subr.bf16.mxu0 %v9209_v13 }
 0x83a   : > { %9212 = vmatpush3.bf16.msra.mxu0 %v9209_v13 }
 0x83b   : > { %3964 = vperm.xlu1 %10038, %v16474_v51   ;;  %9214 = vmatprep.subr.bf16.mxu0 %v9213_v5 }
 0x83d   : > { %3969 = vperm.xlu0 %10037, %v16477_v44  }
 0x83e   : > { %9216 = vmatpush3.bf16.msra.mxu0 %v9213_v5 }
 0x83f   : > { %3974 = vperm.xlu1 %10038, %v16476_v60   ;;  %9218 = vmatprep.subr.bf16.mxu0 %v9217_v54 }
 0x841   : > { %3979 = vperm.xlu0 %10037, %v16479_v41  }
 0x842   : > { %9220 = vmatpush3.bf16.msra.mxu0 %v9217_v54 }
 0x843   : > { %3984 = vperm.xlu1 %10038, %v16478_v11   ;;  %9222 = vmatprep.subr.bf16.mxu0 %v9221_v33 }
 0x845   : > { %3989 = vperm.xlu0 %10037, %v16481_v55  }
 0x846   : > { %9224 = vmatpush3.bf16.msra.mxu0 %v9221_v33 }
 0x847   : > { %3994 = vperm.xlu1 %10038, %v16480_v28  }
 0x849   : > { %3999 = vperm.xlu0 %10037, %v16483_v59  }
 0x84b   : > { %4004 = vperm.xlu1 %10038, %v16482_v32  }
 0x84d   : > { %4009 = vperm.xlu0 %10037, %v16485_v61  }
 0x84f   : > { %4014 = vperm.xlu1 %10038, %v16484_v27  }
 0x851   : > { %4019 = vperm.xlu0 %10037, %v16487_v29  }
 0x853   : > { %4024 = vperm.xlu1 %10038, %v16486_v50  }
 0x855   : > { %4029 = vperm.xlu0 %10037, %v16489_v43  }
 0x857   : > { %4034 = vperm.xlu1 %10038, %v16488_v57  }
 0x859   : > { %4039 = vperm.xlu0 %10037, %v16491_v47  }
 0x85b   : > { %4044 = vperm.xlu1 %10038, %v16490_v53  }
 0x85d   : > { %4049 = vperm.xlu0 %10037, %v16493_v30  }
 0x85f   : > { %4054 = vperm.xlu1 %10038, %v16492_v31  }
 0x861   : > { %4059 = vperm.xlu0 %10037, %v16495_v10  }
 0x863   : > { %4064 = vperm.xlu1 %10038, %v16494_v58  }
 0x8a4   : > { %v3910_v51 = vpop.permute.xlu0 %3909 }
 0x8a5   : > { %v13840_v60 = vmul.f32 %v3910_v51, %v16387_v4 }
 0x8a6   : > { %v3920_v45 = vpop.permute.xlu1 %3919 }
 0x8a7   : > { %v13837_v48 = vmul.f32 %v3920_v45, %v16383_v20  ;;  %v4293_v32 = vrot.slane %v13840_v60, 1 }
 0x8a8   : > { %v3915_v44 = vpop.permute.xlu0 %3914 }
 0x8a9   : > { %v13843_v41 = vmul.f32 %v3915_v44, %v16388_v34  ;;  %v4296_v28 = vrot.slane %v13837_v48, 1  ;;  %v4456_v27 = vrot.slane %v13837_v48, 2 }
 0x8aa   : > { %v3925_v11 = vpop.permute.xlu1 %3924 }
 0x8ab   : > { %v4294_v55 = vrot.slane %v13843_v41, 1  ;;  %v13849_v59 = vmul.f32 %v3925_v11, %v16385_v2  ;;  %v4454_v50 = vrot.slane %v13843_v41, 2  ;;  %v4453_v2 = vrot.slane %v13840_v60, 2 }
 0x8ac   : > { %v3930_v20 = vpop.permute.xlu0 %3929 }
 0x8ad   : > { %v13853_v4 = vmul.f32 %v3930_v20, %v16391_v1  ;;  %v4297_v61 = vsel %vm4292_vm2, %v4294_v55, %v4296_v28  ;;  %v4295_v34 = vsel %vm4292_vm2, %v4293_v32, %v4294_v55  ;;  %v4457_v57 = vsel %vm4452_vm3, %v4454_v50, %v4456_v27 }
 0x8ae   : > { %4358 = vrot.lane.b32.xlu1 %v4297_v61, %s10703_s15  ;;  %4356 = vrot.lane.b32.xlu0 %v4295_v34, %s10703_s15  ;;  %v3935_v29 = vpop.permute.xlu1 %3934  ;;  %v4455_v1 = vsel %vm4452_vm3, %v4453_v2, %v4454_v50  ;;  %v4298_v43 = vrot.slane %v13849_v59, 1  ;;  %v4458_v30 = vrot.slane %v13849_v59, 2 }
 0x8af   : > { %v4300_v53 = vrot.slane %v13853_v4, 1  ;;  %v13868_v31 = vmul.f32 %v3935_v29, %v16392_v0  ;;  %v4460_v52 = vrot.slane %v13853_v4, 2 }
 0x8b0   : > { %v3940_v47 = vpop.permute.xlu0 %3939  ;;  %v4299_v10 = vsel %vm4292_vm2, %v4296_v28, %v4298_v43  ;;  %v4459_v49 = vsel %vm4452_vm3, %v4456_v27, %v4458_v30 }
 0x8b1   : > { %v13872_v58 = vmul.f32 %v3940_v47, %v16389_v14  ;;  %v4301_v42 = vsel %vm4292_vm2, %v4298_v43, %v4300_v53  ;;  %v4461_v0 = vsel %vm4452_vm3, %v4458_v30, %v4460_v52  ;;  %v4302_v7 = vrot.slane %v13868_v31, 1 }
 0x8b2   : > { %4518 = vrot.lane.b32.xlu1 %v4457_v57, %s10704_s8  ;;  %4516 = vrot.lane.b32.xlu0 %v4455_v1, %s10704_s8  ;;  %v3945_v62 = vpop.permute.xlu1 %3944  ;;  %v4462_v56 = vrot.slane %v13868_v31, 2 }
 0x8b3   : > { %v4304_v14 = vrot.slane %v13872_v58, 1  ;;  %v13886_v46 = vmul.f32 %v3945_v62, %v16390_v39  ;;  %v4303_v23 = vsel %vm4292_vm2, %v4300_v53, %v4302_v7  ;;  %v4464_v5 = vrot.slane %v13872_v58, 2 }
 0x8b4   : > { %v3950_v9 = vpop.permute.xlu0 %3949  ;;  %v4463_v22 = vsel %vm4452_vm3, %v4460_v52, %v4462_v56 }
 0x8b5   : > { %v13890_v13 = vmul.f32 %v3950_v9, %v16395_v38  ;;  %v4305_v35 = vsel %vm4292_vm2, %v4302_v7, %v4304_v14  ;;  %v4465_v39 = vsel %vm4452_vm3, %v4462_v56, %v4464_v5  ;;  %v4306_v54 = vrot.slane %v13886_v46, 1 }
 0x8b6   : > { %4360 = vrot.lane.b32.xlu0 %v4299_v10, %s10703_s15  ;;  %4362 = vrot.lane.b32.xlu1 %v4301_v42, %s10703_s15  ;;  %v3955_v12 = vpop.permute.xlu1 %3954  ;;  %v4466_v33 = vrot.slane %v13886_v46, 2 }
 0x8b7   : > { %v4308_v38 = vrot.slane %v13890_v13, 1  ;;  %v13904_v25 = vmul.f32 %v3955_v12, %v16396_v6  ;;  %v4307_v51 = vsel %vm4292_vm2, %v4304_v14, %v4306_v54  ;;  %v4468_v11 = vrot.slane %v13890_v13, 2 }
 0x8b8   : > { %v3960_v18 = vpop.permute.xlu0 %3959  ;;  %v4467_v55 = vsel %vm4452_vm3, %v4464_v5, %v4466_v33 }
 0x8b9   : > { %v13908_v45 = vmul.f32 %v3960_v18, %v16393_v16  ;;  %v4309_v44 = vsel %vm4292_vm2, %v4306_v54, %v4308_v38  ;;  %v4469_v6 = vsel %vm4452_vm3, %v4466_v33, %v4468_v11  ;;  %v4310_v32 = vrot.slane %v13904_v25, 1 }
 0x8ba   : > { %4520 = vrot.lane.b32.xlu0 %v4459_v49, %s10704_s8  ;;  %4522 = vrot.lane.b32.xlu1 %v4461_v0, %s10704_s8  ;;  %v3965_v28 = vpop.permute.xlu1 %3964  ;;  %v4470_v61 = vrot.slane %v13904_v25, 2 }
 0x8bb   : > { %v4312_v16 = vrot.slane %v13908_v45, 1  ;;  %v13922_v27 = vmul.f32 %v3965_v28, %v16394_v17  ;;  %v4311_v50 = vsel %vm4292_vm2, %v4308_v38, %v4310_v32  ;;  %v4472_v29 = vrot.slane %v13908_v45, 2 }
 0x8bc   : > { %v3970_v20 = vpop.permute.xlu0 %3969  ;;  %v4471_v1 = vsel %vm4452_vm3, %v4468_v11, %v4470_v61 }
 0x8bd   : > { %v13926_v34 = vmul.f32 %v3970_v20, %v16399_v36  ;;  %v4313_v2 = vsel %vm4292_vm2, %v4310_v32, %v4312_v16  ;;  %v4473_v17 = vsel %vm4452_vm3, %v4470_v61, %v4472_v29  ;;  %v4314_v43 = vrot.slane %v13922_v27, 1 }
 0x8be   : > { %4364 = vrot.lane.b32.xlu0 %v4303_v23, %s10703_s15  ;;  %4366 = vrot.lane.b32.xlu1 %v4305_v35, %s10703_s15  ;;  %v3975_v57 = vpop.permute.xlu1 %3974  ;;  %v4474_v30 = vrot.slane %v13922_v27, 2 }
 0x8bf   : > { %v4316_v36 = vrot.slane %v13926_v34, 1  ;;  %v13940_v47 = vmul.f32 %v3975_v57, %v16400_v24  ;;  %v4315_v42 = vsel %vm4292_vm2, %v4312_v16, %v4314_v43  ;;  %v4476_v62 = vrot.slane %v13926_v34, 2 }
 0x8c0   : > { %v3980_v53 = vpop.permute.xlu0 %3979  ;;  %v4475_v0 = vsel %vm4452_vm3, %v4472_v29, %v4474_v30 }
 0x8c1   : > { %v13944_v10 = vmul.f32 %v3980_v53, %v16397_v8  ;;  %v4317_v52 = vsel %vm4292_vm2, %v4314_v43, %v4316_v36  ;;  %v4477_v24 = vsel %vm4452_vm3, %v4474_v30, %v4476_v62  ;;  %v4318_v7 = vrot.slane %v13940_v47, 1 }
 0x8c2   : > { %4524 = vrot.lane.b32.xlu0 %v4463_v22, %s10704_s8  ;;  %4526 = vrot.lane.b32.xlu1 %v4465_v39, %s10704_s8  ;;  %v3985_v49 = vpop.permute.xlu1 %3984  ;;  %v4478_v56 = vrot.slane %v13940_v47, 2 }
 0x8c3   : > { %v4320_v8 = vrot.slane %v13944_v10, 1  ;;  %v13958_v9 = vmul.f32 %v3985_v49, %v16398_v26  ;;  %v4319_v35 = vsel %vm4292_vm2, %v4316_v36, %v4318_v7  ;;  %v4480_v12 = vrot.slane %v13944_v10, 2 }
 0x8c4   : > { %v3990_v14 = vpop.permute.xlu0 %3989  ;;  %v4479_v39 = vsel %vm4452_vm3, %v4476_v62, %v4478_v56 }
 0x8c5   : > { %v13962_v23 = vmul.f32 %v3990_v14, %v16403_v37  ;;  %v4321_v5 = vsel %vm4292_vm2, %v4318_v7, %v4320_v8  ;;  %v4481_v26 = vsel %vm4452_vm3, %v4478_v56, %v4480_v12  ;;  %v4322_v54 = vrot.slane %v13958_v9, 1  ;;  %v16508_v14 = vld [vmem:[#allocation344_spill] sm:$0xff] }
 0x8c6   : > { %4368 = vrot.lane.b32.xlu0 %v4307_v51, %s10703_s15  ;;  %4370 = vrot.lane.b32.xlu1 %v4309_v44, %s10703_s15  ;;  %v3995_v22 = vpop.permute.xlu1 %3994  ;;  %v4482_v33 = vrot.slane %v13958_v9, 2 }
 0x8c7   : > { %v4324_v37 = vrot.slane %v13962_v23, 1  ;;  %v13976_v18 = vmul.f32 %v3995_v22, %v16404_v15  ;;  %v4323_v44 = vsel %vm4292_vm2, %v4320_v8, %v4322_v54  ;;  %v4484_v28 = vrot.slane %v13962_v23, 2 }
 0x8c8   : > { %v4000_v38 = vpop.permute.xlu0 %3999 }
 0x8c9   : > { %v13980_v51 = vmul.f32 %v4000_v38, %v16401_v40  ;;  %v4325_v11 = vsel %vm4292_vm2, %v4322_v54, %v4324_v37  ;;  %v4485_v15 = vsel %vm4452_vm3, %v4482_v33, %v4484_v28  ;;  %v4326_v32 = vrot.slane %v13976_v18, 1 }
 0x8ca   : > { %4528 = vrot.lane.b32.xlu0 %v4467_v55, %s10704_s8  ;;  %4530 = vrot.lane.b32.xlu1 %v4469_v6, %s10704_s8  ;;  %v4005_v55 = vpop.permute.xlu1 %4004  ;;  %v4483_v6 = vsel %vm4452_vm3, %v4480_v12, %v4482_v33  ;;  %v4486_v61 = vrot.slane %v13976_v18, 2 }
 0x8cb   : > { %v4328_v40 = vrot.slane %v13980_v51, 1  ;;  %v13994_v20 = vmul.f32 %v4005_v55, %v16402_v3  ;;  %v4488_v57 = vrot.slane %v13980_v51, 2 }
 0x8cc   : > { %v4010_v16 = vpop.permute.xlu0 %4009 }
 0x8cd   : > { %v4329_v29 = vsel %vm4292_vm2, %v4326_v32, %v4328_v40  ;;  %v4489_v3 = vsel %vm4452_vm3, %v4486_v61, %v4488_v57  ;;  %v4330_v43 = vrot.slane %v13994_v20, 1  ;;  %v4490_v30 = vrot.slane %v13994_v20, 2 }
 0x8ce   : > { %4372 = vrot.lane.b32.xlu0 %v4311_v50, %s10703_s15  ;;  %4374 = vrot.lane.b32.xlu1 %v4313_v2, %s10703_s15  ;;  %v13998_v50 = vmul.f32 %v4010_v16, %v16408_v21  ;;  %v4327_v2 = vsel %vm4292_vm2, %v4324_v37, %v4326_v32 }
 0x8d0   : > { %v4332_v21 = vrot.slane %v13998_v50, 1  ;;  %v4020_v36 = vpop.permute.xlu0 %4019  ;;  %v4492_v49 = vrot.slane %v13998_v50, 2 }
 0x8d2   : > { %4532 = vrot.lane.b32.xlu0 %v4471_v1, %s10704_s8  ;;  %4534 = vrot.lane.b32.xlu1 %v4473_v17, %s10704_s8  ;;  %v4015_v1 = vpop.permute.xlu1 %4014  ;;  %v4487_v17 = vsel %vm4452_vm3, %v4484_v28, %v4486_v61  ;;  %v4333_v62 = vsel %vm4292_vm2, %v4330_v43, %v4332_v21  ;;  %v16510_v28 = vld [vmem:[#allocation348_spill] sm:$0xff] }
 0x8d3   : > { %v14012_v53 = vmul.f32 %v4015_v1, %v16409_v19  ;;  %v4493_v19 = vsel %vm4452_vm3, %v4490_v30, %v4492_v49 }
 0x8d4   : > { %v4030_v8 = vpop.permute.xlu0 %4029 }
 0x8d5   : > { %v4334_v7 = vrot.slane %v14012_v53, 1 }
 0x8d6   : > { %4376 = vrot.lane.b32.xlu0 %v4315_v42, %s10703_s15  ;;  %4378 = vrot.lane.b32.xlu1 %v4317_v52, %s10703_s15  ;;  %v14016_v42 = vmul.f32 %v4020_v36, %v16405_v63  ;;  %v4331_v52 = vsel %vm4292_vm2, %v4328_v40, %v4330_v43  ;;  %v16512_v43 = vld [vmem:[#allocation346_spill] sm:$0xff] }
 0x8d7   : > { %v4335_v22 = vsel %vm4292_vm2, %v4332_v21, %v4334_v7 }
 0x8d8   : > { %v4336_v63 = vrot.slane %v14016_v42, 1 }
 0x8da   : > { %4536 = vrot.lane.b32.xlu0 %v4475_v0, %s10704_s8  ;;  %4538 = vrot.lane.b32.xlu1 %v4477_v24, %s10704_s8  ;;  %v4025_v0 = vpop.permute.xlu1 %4024  ;;  %v4491_v24 = vsel %vm4452_vm3, %v4488_v57, %v4490_v30  ;;  %v16513_v30 = vld [vmem:[#allocation349_spill] sm:$0xff] }
 0x8db   : > { %v14030_v56 = vmul.f32 %v4025_v0, %v16508_v14 }
 0x8dd   : > { %v4338_v33 = vrot.slane %v14030_v56, 1 }
 0x8de   : > { %4380 = vrot.lane.b32.xlu0 %v4319_v35, %s10703_s15  ;;  %4382 = vrot.lane.b32.xlu1 %v4321_v5, %s10703_s15  ;;  %v4494_v35 = vrot.slane %v14012_v53, 2  ;;  %v16509_v5 = vld [vmem:[#allocation347_spill] sm:$0xff]  ;;  %v4035_v54 = vpop.permute.xlu1 %4034 }
 0x8df   : > { %v14034_v12 = vmul.f32 %v4030_v8, %v16509_v5  ;;  %v14048_v55 = vmul.f32 %v4035_v54, %v16510_v28  ;;  %v4339_v40 = vsel %vm4292_vm2, %v4336_v63, %v4338_v33 }
 0x8e0   : > { %v4495_v37 = vsel %vm4452_vm3, %v4492_v49, %v4494_v35 }
 0x8e1   : > { %v4500_v61 = vrot.slane %v14034_v12, 2  ;;  %v4342_v1 = vrot.slane %v14048_v55, 1  ;;  %v4502_v36 = vrot.slane %v14048_v55, 2 }
 0x8e2   : > { %4540 = vrot.lane.b32.xlu0 %v4479_v39, %s10704_s8  ;;  %4542 = vrot.lane.b32.xlu1 %v4481_v26, %s10704_s8  ;;  %v4337_v39 = vsel %vm4292_vm2, %v4334_v7, %v4336_v63  ;;  %v4496_v26 = vrot.slane %v14016_v42, 2 }
 0x8e4   : > { %v4497_v38 = vsel %vm4452_vm3, %v4494_v35, %v4496_v26  ;;  %v16514_v35 = vld [vmem:[#allocation350_spill] sm:$0xff] }
 0x8e6   : > { %4384 = vrot.lane.b32.xlu0 %v4323_v44, %s10703_s15  ;;  %4386 = vrot.lane.b32.xlu1 %v4325_v11, %s10703_s15  ;;  %v4340_v44 = vrot.slane %v14034_v12, 1  ;;  %v4040_v11 = vpop.permute.xlu0 %4039 }
 0x8e8   : > { %v4341_v16 = vsel %vm4292_vm2, %v4338_v33, %v4340_v44 }
 0x8ea   : > { %4544 = vrot.lane.b32.xlu0 %v4483_v6, %s10704_s8  ;;  %4546 = vrot.lane.b32.xlu1 %v4485_v15, %s10704_s8  ;;  %v4498_v6 = vrot.slane %v14030_v56, 2  ;;  %v16511_v15 = vld [vmem:[#allocation345_spill] sm:$0xff] }
 0x8eb   : > { %v14052_v32 = vmul.f32 %v4040_v11, %v16511_v15 }
 0x8ec   : > { %v4501_v57 = vsel %vm4452_vm3, %v4498_v6, %v4500_v61 }
 0x8ed   : > { %v4504_v0 = vrot.slane %v14052_v32, 2 }
 0x8ee   : > { %4388 = vrot.lane.b32.xlu0 %v4327_v2, %s10703_s15  ;;  %4390 = vrot.lane.b32.xlu1 %v4329_v29, %s10703_s15  ;;  %v4045_v2 = vpop.permute.xlu1 %4044  ;;  %v4499_v29 = vsel %vm4452_vm3, %v4496_v26, %v4498_v6 }
 0x8ef   : > { %v14066_v21 = vmul.f32 %v4045_v2, %v16512_v43  ;;  %v4505_v7 = vsel %vm4452_vm3, %v4502_v36, %v4504_v0 }
 0x8f1   : > { %v4346_v63 = vrot.slane %v14066_v21, 1 }
 0x8f2   : > { %4548 = vrot.lane.b32.xlu0 %v4487_v17, %s10704_s8  ;;  %4550 = vrot.lane.b32.xlu1 %v4489_v3, %s10704_s8  ;;  %v4344_v17 = vrot.slane %v14052_v32, 1  ;;  %v4050_v3 = vpop.permute.xlu0 %4049 }
 0x8f4   : > { %v4345_v49 = vsel %vm4292_vm2, %v4342_v1, %v4344_v17  ;;  %v4347_v54 = vsel %vm4292_vm2, %v4344_v17, %v4346_v63 }
 0x8f6   : > { %4392 = vrot.lane.b32.xlu0 %v4331_v52, %s10703_s15  ;;  %4394 = vrot.lane.b32.xlu1 %v4333_v62, %s10703_s15  ;;  %v14070_v52 = vmul.f32 %v4050_v3, %v16513_v30  ;;  %v4343_v62 = vsel %vm4292_vm2, %v4340_v44, %v4342_v1  ;;  %v4060_v14 = vpop.permute.xlu0 %4059 }
 0x8f8   : > { %v4348_v8 = vrot.slane %v14070_v52, 1 }
 0x8fa   : > { %4552 = vrot.lane.b32.xlu0 %v4491_v24, %s10704_s8  ;;  %4554 = vrot.lane.b32.xlu1 %v4493_v19, %s10704_s8  ;;  %v4055_v24 = vpop.permute.xlu1 %4054  ;;  %v4503_v19 = vsel %vm4452_vm3, %v4500_v61, %v4502_v36 }
 0x8fb   : > { %v14084_v5 = vmul.f32 %v4055_v24, %v16514_v35 }
 0x8fd   : > { %v4350_v11 = vrot.slane %v14084_v5, 1  ;;  %v4510_v15 = vrot.slane %v14084_v5, 2 }
 0x8fe   : > { %4396 = vrot.lane.b32.xlu0 %v4335_v22, %s10703_s15  ;;  %4398 = vrot.lane.b32.xlu1 %v4337_v39, %s10703_s15  ;;  %v4506_v22 = vrot.slane %v14066_v21, 2  ;;  %v16515_v39 = vld [vmem:[#allocation351_spill] sm:$0xff]  ;;  %v4065_v6 = vpop.permute.xlu1 %4064 }
 0x8ff   : > { %v14088_v26 = vmul.f32 %v4060_v14, %v16515_v39  ;;  %v4351_v61 = vsel %vm4292_vm2, %v4348_v8, %v4350_v11 }
 0x900   : > { %v4507_v33 = vsel %vm4452_vm3, %v4504_v0, %v4506_v22 }
 0x901   : > { %v4352_v28 = vrot.slane %v14088_v26, 1 }
 0x902   : > { %4556 = vrot.lane.b32.xlu0 %v4495_v37, %s10704_s8  ;;  %4558 = vrot.lane.b32.xlu1 %v4497_v38, %s10704_s8  ;;  %v4349_v37 = vsel %vm4292_vm2, %v4346_v63, %v4348_v8  ;;  %v4508_v38 = vrot.slane %v14070_v52, 2 }
 0x903   : > { %v4353_v2 = vsel %vm4292_vm2, %v4350_v11, %v4352_v28 }
 0x904   : > { %v4509_v44 = vsel %vm4452_vm3, %v4506_v22, %v4508_v38  ;;  %v4511_v17 = vsel %vm4452_vm3, %v4508_v38, %v4510_v15 }
 0x906   : > { %4400 = vrot.lane.b32.xlu0 %v4339_v40, %s10703_s15  ;;  %4402 = vrot.lane.b32.xlu1 %v4341_v16, %s10703_s15  ;;  %v16516_v40 = vld [vmem:[#allocation352_spill] sm:$0xff] }
 0x907   : > { %v14103_v16 = vmul.f32 %v4065_v6, %v16516_v40  ;;  %v16519_v6 = vld [vmem:[#allocation143_spill] sm:$0xff] }
 0x909   : > { %v4354_v43 = vrot.slane %v14103_v16, 1 }
 0x90a   : > { %4560 = vrot.lane.b32.xlu0 %v4499_v29, %s10704_s8  ;;  %4562 = vrot.lane.b32.xlu1 %v4501_v57, %s10704_s8  ;;  %v4512_v29 = vrot.slane %v14088_v26, 2 }
 0x90b   : > { %v4355_v24 = vsel %vm4292_vm2, %v4352_v28, %v4354_v43 }
 0x90c   : > { %v4513_v3 = vsel %vm4452_vm3, %v4510_v15, %v4512_v29  ;;  %v16520_v15 = vld [vmem:[#allocation144_spill] sm:$0xff] }
 0x90e   : > { %4404 = vrot.lane.b32.xlu0 %v4343_v62, %s10703_s15  ;;  %4406 = vrot.lane.b32.xlu1 %v4345_v49, %s10703_s15 }
 0x912   : > { %4564 = vrot.lane.b32.xlu0 %v4503_v19, %s10704_s8  ;;  %4566 = vrot.lane.b32.xlu1 %v4505_v7, %s10704_s8  ;;  %v4514_v7 = vrot.slane %v14103_v16, 2 }
 0x914   : > { %v4515_v14 = vsel %vm4452_vm3, %v4512_v29, %v4514_v7 }
 0x916   : > { %4408 = vrot.lane.b32.xlu0 %v4347_v54, %s10703_s15  ;;  %4410 = vrot.lane.b32.xlu1 %v4349_v37, %s10703_s15 }
 0x91a   : > { %4568 = vrot.lane.b32.xlu0 %v4507_v33, %s10704_s8  ;;  %4570 = vrot.lane.b32.xlu1 %v4509_v44, %s10704_s8  ;;  %v16517_v33 = vld [vmem:[#allocation141_spill] sm:$0xff]  ;;  %v16518_v44 = vld [vmem:[#allocation142_spill] sm:$0xff] }
 0x91e   : > { %4412 = vrot.lane.b32.xlu0 %v4351_v61, %s10703_s15  ;;  %4414 = vrot.lane.b32.xlu1 %v4353_v2, %s10703_s15 }
 0x920   : > { %v4359_v57 = vpop.permute.xlu1 %4358  ;;  %v4357_v1 = vpop.permute.xlu0 %4356 }
 0x921   : > { %v4613_v36 = vsel %vm1236_vm0, %v13843_v41, %v4359_v57  ;;  %v4612_v49 = vsel %vm1236_vm0, %v13840_v60, %v4357_v1 }
 0x922   : > { %4572 = vrot.lane.b32.xlu0 %v4511_v17, %s10704_s8  ;;  %4574 = vrot.lane.b32.xlu1 %v4513_v3, %s10704_s8  ;;  %v16521_v17 = vld [vmem:[#allocation145_spill] sm:$0xff]  ;;  %v16522_v3 = vld [vmem:[#allocation146_spill] sm:$0xff] }
 0x924   : > { %v4519_v30 = vpop.permute.xlu1 %4518  ;;  %v4517_v62 = vpop.permute.xlu0 %4516 }
 0x925   : > { %v4646_v0 = vsel %vm2769_vm1, %v4613_v36, %v4519_v30  ;;  %v4645_v19 = vsel %vm2769_vm1, %v4612_v49, %v4517_v62  ;;  %v16523_v30 = vld [vmem:[#allocation147_spill] sm:$0xff]  ;;  %v16524_v62 = vld [vmem:[#allocation148_spill] sm:$0xff] }
 0x926   : > { %4416 = vrot.lane.b32.xlu0 %v4355_v24, %s10703_s15  ;;  %4418 = vrot.lane.b32.xlu1 %v4354_v43, %s10703_s15 }
 0x927   : > { %8970 = vmatprep.mubr.msk.f32.mxu0 %vm4683_vm4, %v4645_v19 }
 0x928   : > { %8971 = vmatmul.mubr.msk.f32.vlgmr.msra.gmra.mrb[0].mxu0 %vm4683_vm4, %v4646_v0  ;;  %v4363_v63 = vpop.permute.xlu1 %4362  ;;  %v4361_v8 = vpop.permute.xlu0 %4360 }
 0x929   : > { %v4615_v35 = vsel %vm1236_vm0, %v13849_v59, %v4363_v63  ;;  %v4614_v22 = vsel %vm1236_vm0, %v13837_v48, %v4361_v8  ;;  %v16525_v8 = vld [vmem:[#allocation149_spill] sm:$0xff] }
 0x92a   : > { %4576 = vrot.lane.b32.xlu0 %v4515_v14, %s10704_s8  ;;  %4578 = vrot.lane.b32.xlu1 %v4514_v7, %s10704_s8  ;;  %v16526_v14 = vld [vmem:[#allocation150_spill] sm:$0xff] }
 0x92c   : > { %v4523_v39 = vpop.permute.xlu1 %4522  ;;  %v4521_v54 = vpop.permute.xlu0 %4520 }
 0x92d   : > { %v4648_v37 = vsel %vm2769_vm1, %v4615_v35, %v4523_v39  ;;  %v4647_v38 = vsel %vm2769_vm1, %v4614_v22, %v4521_v54  ;;  %v16527_v39 = vld [vmem:[#allocation151_spill] sm:$0xff]  ;;  %v16528_v54 = vld [vmem:[#allocation152_spill] sm:$0xff] }
 0x92e   : > { %4131 = vrot.lane.b32.xlu0 %v16517_v33, %s10703_s15  ;;  %4133 = vrot.lane.b32.xlu1 %v16518_v44, %s10703_s15 }
 0x92f   : > { %8973 = vmatprep.mubr.msk.f32.mxu0 %vm4683_vm4, %v4647_v38 }
 0x930   : > { %8974 = vmatmul.mubr.msk.f32.gmra.mrb[2].mxu0 %vm4683_vm4, %v4648_v37  ;;  %v4367_v11 = vpop.permute.xlu1 %4366  ;;  %v4365_v28 = vpop.permute.xlu0 %4364 }
 0x931   : > { %v4617_v40 = vsel %vm1236_vm0, %v13868_v31, %v4367_v11  ;;  %v4616_v61 = vsel %vm1236_vm0, %v13853_v4, %v4365_v28 }
 0x932   : > { %4135 = vrot.lane.b32.xlu0 %v16519_v6, %s10703_s15  ;;  %4137 = vrot.lane.b32.xlu1 %v16520_v15, %s10703_s15  ;;  %v16529_v6 = vld [vmem:[#allocation153_spill] sm:$0xff]  ;;  %v16530_v15 = vld [vmem:[#allocation154_spill] sm:$0xff] }
 0x934   : > { %v4527_v2 = vpop.permute.xlu1 %4526  ;;  %v4525_v29 = vpop.permute.xlu0 %4524 }
 0x935   : > { %v4650_v57 = vsel %vm2769_vm1, %v4617_v40, %v4527_v2  ;;  %v4649_v1 = vsel %vm2769_vm1, %v4616_v61, %v4525_v29  ;;  %v16531_v2 = vld [vmem:[#allocation155_spill] sm:$0xff]  ;;  %v16532_v29 = vld [vmem:[#allocation156_spill] sm:$0xff] }
 0x936   : > { %4139 = vrot.lane.b32.xlu0 %v16521_v17, %s10703_s15  ;;  %4141 = vrot.lane.b32.xlu1 %v16522_v3, %s10703_s15 }
 0x937   : > { %8976 = vmatprep.mubr.msk.f32.mxu0 %vm4683_vm4, %v4649_v1 }
 0x938   : > { %8977 = vmatmul.mubr.msk.f32.gmra.mrb[4].mxu0 %vm4683_vm4, %v4650_v57  ;;  %v4371_v43 = vpop.permute.xlu1 %4370  ;;  %v4369_v36 = vpop.permute.xlu0 %4368 }
 0x939   : > { %v4619_v49 = vsel %vm1236_vm0, %v13886_v46, %v4371_v43  ;;  %v4618_v0 = vsel %vm1236_vm0, %v13872_v58, %v4369_v36 }
 0x93a   : > { %4143 = vrot.lane.b32.xlu0 %v16523_v30, %s10703_s15  ;;  %4145 = vrot.lane.b32.xlu1 %v16524_v62, %s10703_s15  ;;  %v16533_v30 = vld [vmem:[#allocation157_spill] sm:$0xff] }
 0x93c   : > { %v4531_v24 = vpop.permute.xlu1 %4530  ;;  %v4529_v19 = vpop.permute.xlu0 %4528 }
 0x93d   : > { %v4652_v7 = vsel %vm2769_vm1, %v4619_v49, %v4531_v24  ;;  %v4651_v63 = vsel %vm2769_vm1, %v4618_v0, %v4529_v19  ;;  %v16534_v0 = vld [vmem:[#allocation158_spill] sm:$0xff] }
 0x93e   : > { %4147 = vrot.lane.b32.xlu0 %v16525_v8, %s10703_s15  ;;  %4149 = vrot.lane.b32.xlu1 %v16526_v14, %s10703_s15 }
 0x93f   : > { %8979 = vmatprep.mubr.msk.f32.mxu0 %vm4683_vm4, %v4651_v63 }
 0x940   : > { %8980 = vmatmul.mubr.msk.f32.gmra.mrb[6].mxu0 %vm4683_vm4, %v4652_v7  ;;  %v4375_v35 = vpop.permute.xlu1 %4374  ;;  %v4373_v22 = vpop.permute.xlu0 %4372 }
 0x941   : > { %v4621_v37 = vsel %vm1236_vm0, %v13904_v25, %v4375_v35  ;;  %v4620_v38 = vsel %vm1236_vm0, %v13890_v13, %v4373_v22  ;;  %v16535_v35 = vld [vmem:[#allocation159_spill] sm:$0xff] }
 0x942   : > { %4151 = vrot.lane.b32.xlu0 %v16527_v39, %s10703_s15  ;;  %4153 = vrot.lane.b32.xlu1 %v16528_v54, %s10703_s15  ;;  %v16536_v54 = vld [vmem:[#allocation160_spill] sm:$0xff] }
 0x944   : > { %v4535_v33 = vpop.permute.xlu1 %4534  ;;  %v4533_v44 = vpop.permute.xlu0 %4532 }
 0x945   : > { %v4654_v11 = vsel %vm2769_vm1, %v4621_v37, %v4535_v33  ;;  %v4653_v28 = vsel %vm2769_vm1, %v4620_v38, %v4533_v44 }
 0x946   : > { %4155 = vrot.lane.b32.xlu0 %v16529_v6, %s10703_s15  ;;  %4157 = vrot.lane.b32.xlu1 %v16530_v15, %s10703_s15  ;;  %v16537_v6 = vld [vmem:[#allocation161_spill] sm:$0xff] }
 0x947   : > { %8982 = vmatprep.mubr.msk.f32.mxu0 %vm4683_vm4, %v4653_v28 }
 0x948   : > { %8983 = vmatmul.mubr.msk.f32.gmra.mrb[8].mxu0 %vm4683_vm4, %v4654_v11  ;;  %v4379_v40 = vpop.permute.xlu1 %4378  ;;  %v4377_v61 = vpop.permute.xlu0 %4376 }
 0x949   : > { %v4623_v57 = vsel %vm1236_vm0, %v13922_v27, %v4379_v40  ;;  %v4622_v1 = vsel %vm1236_vm0, %v13908_v45, %v4377_v61  ;;  %v16538_v61 = vld [vmem:[#allocation162_spill] sm:$0xff] }
 0x94a   : > { %4159 = vrot.lane.b32.xlu0 %v16531_v2, %s10703_s15  ;;  %4161 = vrot.lane.b32.xlu1 %v16532_v29, %s10703_s15 }
 0x94c   : > { %v4539_v17 = vpop.permute.xlu1 %4538  ;;  %v4537_v3 = vpop.permute.xlu0 %4536 }
 0x94d   : > { %v4656_v43 = vsel %vm2769_vm1, %v4623_v57, %v4539_v17  ;;  %v4655_v36 = vsel %vm2769_vm1, %v4622_v1, %v4537_v3 }
 0x94e   : > { %4163 = vrot.lane.b32.xlu0 %v16533_v30, %s10703_s15  ;;  %8985 = vmatprep.mubr.msk.f32.mxu0 %vm4683_vm4, %v4655_v36 }
 0x94f   : > { %8986 = vmatmul.mubr.msk.f32.gmra.mrb[10].mxu0 %vm4683_vm4, %v4656_v43  ;;  %v16539_v43 = vld [vmem:[#allocation163_spill] sm:$0xff] }
 0x950   : > { %v4383_v62 = vpop.permute.xlu1 %4382  ;;  %v4381_v49 = vpop.permute.xlu0 %4380 }
 0x951   : > { %v4625_v24 = vsel %vm1236_vm0, %v13940_v47, %v4383_v62  ;;  %v4624_v19 = vsel %vm1236_vm0, %v13926_v34, %v4381_v49  ;;  %v16540_v62 = vld [vmem:[#allocation164_spill] sm:$0xff] }
 0x952   : > { %4165 = vrot.lane.b32.xlu0 %v16534_v0, %s10703_s15 }
 0x954   : > { %v4543_v7 = vpop.permute.xlu1 %4542  ;;  %v4541_v63 = vpop.permute.xlu0 %4540 }
 0x955   : > { %v4658_v8 = vsel %vm2769_vm1, %v4625_v24, %v4543_v7  ;;  %v4657_v14 = vsel %vm2769_vm1, %v4624_v19, %v4541_v63 }
 0x956   : > { %4167 = vrot.lane.b32.xlu0 %v16535_v35, %s10703_s15  ;;  %8988 = vmatprep.mubr.msk.f32.mxu0 %vm4683_vm4, %v4657_v14 }
 0x957   : > { %8989 = vmatmul.mubr.msk.f32.gmra.mrb[12].mxu0 %vm4683_vm4, %v4658_v8  ;;  %v16541_v8 = vld [vmem:[#allocation165_spill] sm:$0xff] }
 0x958   : > { %v4387_v22 = vpop.permute.xlu1 %4386  ;;  %v4385_v39 = vpop.permute.xlu0 %4384 }
 0x959   : > { %v4627_v37 = vsel %vm1236_vm0, %v13958_v9, %v4387_v22  ;;  %v4626_v38 = vsel %vm1236_vm0, %v13944_v10, %v4385_v39  ;;  %v16542_v22 = vld [vmem:[#allocation166_spill] sm:$0xff] }
 0x95a   : > { %4169 = vrot.lane.b32.xlu0 %v16536_v54, %s10703_s15 }
 0x95c   : > { %v4547_v33 = vpop.permute.xlu1 %4546  ;;  %v4545_v44 = vpop.permute.xlu0 %4544 }
 0x95d   : > { %v4660_v11 = vsel %vm2769_vm1, %v4627_v37, %v4547_v33  ;;  %v4659_v28 = vsel %vm2769_vm1, %v4626_v38, %v4545_v44 }
 0x95e   : > { %4171 = vrot.lane.b32.xlu0 %v16537_v6, %s10703_s15  ;;  %8991 = vmatprep.mubr.msk.f32.mxu0 %vm4683_vm4, %v4659_v28 }
 0x95f   : > { %8992 = vmatmul.mubr.msk.f32.gmra.mrb[14].mxu0 %vm4683_vm4, %v4660_v11  ;;  %v16543_v11 = vld [vmem:[#allocation167_spill] sm:$0xff] }
 0x960   : > { %v4391_v15 = vpop.permute.xlu1 %4390  ;;  %v4389_v40 = vpop.permute.xlu0 %4388 }
 0x961   : > { %v4629_v2 = vsel %vm1236_vm0, %v13976_v18, %v4391_v15  ;;  %v4628_v29 = vsel %vm1236_vm0, %v13962_v23, %v4389_v40  ;;  %v16544_v15 = vld [vmem:[#allocation168_spill] sm:$0xff] }
 0x962   : > { %4173 = vrot.lane.b32.xlu0 %v16538_v61, %s10703_s15 }
 0x964   : > { %v4551_v57 = vpop.permute.xlu1 %4550  ;;  %v4549_v1 = vpop.permute.xlu0 %4548 }
 0x965   : > { %v4662_v17 = vsel %vm2769_vm1, %v4629_v2, %v4551_v57  ;;  %v4661_v3 = vsel %vm2769_vm1, %v4628_v29, %v4549_v1 }
 0x966   : > { %4175 = vrot.lane.b32.xlu0 %v16539_v43, %s10703_s15  ;;  %8994 = vmatprep.mubr.msk.f32.mxu0 %vm4683_vm4, %v4661_v3 }
 0x967   : > { %8995 = vmatmul.mubr.msk.f32.gmra.mrb[16].mxu0 %vm4683_vm4, %v4662_v17  ;;  %v16545_v17 = vld [vmem:[#allocation169_spill] sm:$0xff] }
 0x968   : > { %v4395_v36 = vpop.permute.xlu1 %4394  ;;  %v4393_v30 = vpop.permute.xlu0 %4392 }
 0x969   : > { %v4631_v49 = vsel %vm1236_vm0, %v13994_v20, %v4395_v36  ;;  %v4630_v0 = vsel %vm1236_vm0, %v13980_v51, %v4393_v30  ;;  %v16546_v36 = vld [vmem:[#allocation170_spill] sm:$0xff] }
 0x96a   : > { %4177 = vrot.lane.b32.xlu0 %v16540_v62, %s10703_s15 }
 0x96c   : > { %v4555_v24 = vpop.permute.xlu1 %4554  ;;  %v4553_v19 = vpop.permute.xlu0 %4552 }
 0x96d   : > { %v4664_v7 = vsel %vm2769_vm1, %v4631_v49, %v4555_v24  ;;  %v4663_v63 = vsel %vm2769_vm1, %v4630_v0, %v4553_v19 }
 0x96e   : > { %4179 = vrot.lane.b32.xlu0 %v16541_v8, %s10703_s15  ;;  %8997 = vmatprep.mubr.msk.f32.mxu0 %vm4683_vm4, %v4663_v63 }
 0x96f   : > { %8998 = vmatmul.mubr.msk.f32.gmra.mrb[18].mxu0 %vm4683_vm4, %v4664_v7  ;;  %v16547_v7 = vld [vmem:[#allocation171_spill] sm:$0xff] }
 0x970   : > { %v4399_v14 = vpop.permute.xlu1 %4398  ;;  %v4397_v35 = vpop.permute.xlu0 %4396 }
 0x971   : > { %v4633_v39 = vsel %vm1236_vm0, %v14012_v53, %v4399_v14  ;;  %v4632_v54 = vsel %vm1236_vm0, %v13998_v50, %v4397_v35  ;;  %v16548_v14 = vld [vmem:[#allocation172_spill] sm:$0xff] }
 0x972   : > { %4181 = vrot.lane.b32.xlu0 %v16542_v22, %s10703_s15 }
 0x974   : > { %v4559_v37 = vpop.permute.xlu1 %4558  ;;  %v4557_v38 = vpop.permute.xlu0 %4556 }
 0x975   : > { %v4666_v33 = vsel %vm2769_vm1, %v4633_v39, %v4559_v37  ;;  %v4665_v44 = vsel %vm2769_vm1, %v4632_v54, %v4557_v38 }
 0x976   : > { %4183 = vrot.lane.b32.xlu0 %v16543_v11, %s10703_s15  ;;  %9000 = vmatprep.mubr.msk.f32.mxu0 %vm4683_vm4, %v4665_v44 }
 0x977   : > { %9001 = vmatmul.mubr.msk.f32.gmra.mrb[20].mxu0 %vm4683_vm4, %v4666_v33 }
 0x978   : > { %v4403_v28 = vpop.permute.xlu1 %4402  ;;  %v4401_v6 = vpop.permute.xlu0 %4400 }
 0x979   : > { %v4635_v40 = vsel %vm1236_vm0, %v14030_v56, %v4403_v28  ;;  %v4634_v61 = vsel %vm1236_vm0, %v14016_v42, %v4401_v6 }
 0x97a   : > { %4185 = vrot.lane.b32.xlu0 %v16544_v15, %s10703_s15 }
 0x97c   : > { %v4563_v2 = vpop.permute.xlu1 %4562  ;;  %v4561_v29 = vpop.permute.xlu0 %4560 }
 0x97d   : > { %v4668_v57 = vsel %vm2769_vm1, %v4635_v40, %v4563_v2  ;;  %v4667_v1 = vsel %vm2769_vm1, %v4634_v61, %v4561_v29 }
 0x97e   : > { %4187 = vrot.lane.b32.xlu0 %v16545_v17, %s10703_s15  ;;  %9003 = vmatprep.mubr.msk.f32.mxu0 %vm4683_vm4, %v4667_v1 }
 0x97f   : > { %9004 = vmatmul.mubr.msk.f32.gmra.mrb[22].mxu0 %vm4683_vm4, %v4668_v57 }
 0x980   : > { %v4407_v3 = vpop.permute.xlu1 %4406  ;;  %v4405_v43 = vpop.permute.xlu0 %4404 }
 0x981   : > { %v4637_v30 = vsel %vm1236_vm0, %v14048_v55, %v4407_v3  ;;  %v4636_v62 = vsel %vm1236_vm0, %v14034_v12, %v4405_v43 }
 0x982   : > { %4189 = vrot.lane.b32.xlu0 %v16546_v36, %s10703_s15 }
 0x984   : > { %v4567_v49 = vpop.permute.xlu1 %4566  ;;  %v4565_v0 = vpop.permute.xlu0 %4564 }
 0x985   : > { %v4670_v24 = vsel %vm2769_vm1, %v4637_v30, %v4567_v49  ;;  %v4669_v19 = vsel %vm2769_vm1, %v4636_v62, %v4565_v0 }
 0x986   : > { %4191 = vrot.lane.b32.xlu0 %v16547_v7, %s10703_s15  ;;  %9006 = vmatprep.mubr.msk.f32.mxu0 %vm4683_vm4, %v4669_v19 }
 0x987   : > { %9007 = vmatmul.mubr.msk.f32.gmra.mrb[24].mxu0 %vm4683_vm4, %v4670_v24 }
 0x988   : > { %v4411_v63 = vpop.permute.xlu1 %4410  ;;  %v4409_v8 = vpop.permute.xlu0 %4408 }
 0x989   : > { %v4639_v35 = vsel %vm1236_vm0, %v14066_v21, %v4411_v63  ;;  %v4638_v22 = vsel %vm1236_vm0, %v14052_v32, %v4409_v8 }
 0x98a   : > { %4193 = vrot.lane.b32.xlu0 %v16548_v14, %s10703_s15 }
 0x98c   : > { %v4571_v39 = vpop.permute.xlu1 %4570  ;;  %v4569_v54 = vpop.permute.xlu0 %4568 }
 0x98d   : > { %v4672_v37 = vsel %vm2769_vm1, %v4639_v35, %v4571_v39  ;;  %v4671_v38 = vsel %vm2769_vm1, %v4638_v22, %v4569_v54 }
 0x98e   : > { %9009 = vmatprep.mubr.msk.f32.mxu0 %vm4683_vm4, %v4671_v38 }
 0x98f   : > { %9010 = vmatmul.mubr.msk.f32.gmra.mrb[26].mxu0 %vm4683_vm4, %v4672_v37 }
 0x990   : > { %v4415_v33 = vpop.permute.xlu1 %4414  ;;  %v4413_v44 = vpop.permute.xlu0 %4412 }
 0x991   : > { %v4641_v11 = vsel %vm1236_vm0, %v14084_v5, %v4415_v33  ;;  %v4640_v28 = vsel %vm1236_vm0, %v14070_v52, %v4413_v44 }
 0x994   : > { %v4575_v6 = vpop.permute.xlu1 %4574  ;;  %v4573_v15 = vpop.permute.xlu0 %4572 }
 0x995   : > { %v4674_v40 = vsel %vm2769_vm1, %v4641_v11, %v4575_v6  ;;  %v4673_v61 = vsel %vm2769_vm1, %v4640_v28, %v4573_v15 }
 0x996   : > { %9012 = vmatprep.mubr.msk.f32.mxu0 %vm4683_vm4, %v4673_v61 }
 0x997   : > { %9013 = vmatmul.mubr.msk.f32.gmra.mrb[28].mxu0 %vm4683_vm4, %v4674_v40 }
 0x998   : > { %v4419_v2 = vpop.permute.xlu1 %4418  ;;  %v4417_v29 = vpop.permute.xlu0 %4416 }
 0x999   : > { %v4643_v57 = vsel %vm1236_vm0, %v14103_v16, %v4419_v2  ;;  %v4642_v1 = vsel %vm1236_vm0, %v14088_v26, %v4417_v29 }
 0x99c   : > { %v4579_v17 = vpop.permute.xlu1 %4578  ;;  %v4577_v3 = vpop.permute.xlu0 %4576 }
 0x99d   : > { %v4676_v43 = vsel %vm2769_vm1, %v4643_v57, %v4579_v17  ;;  %v4675_v36 = vsel %vm2769_vm1, %v4642_v1, %v4577_v3 }
 0x99e   : > { %9015 = vmatprep.mubr.msk.f32.mxu0 %vm4683_vm4, %v4675_v36 }
 0x99f   : > { %9016 = vmatmul.mubr.msk.f32.gmra.mrb[30].mxu0 %vm4683_vm4, %v4676_v43 }
 0x9a0   : > { %v4134_v30 = vpop.permute.xlu1 %4133  ;;  %v4132_v62 = vpop.permute.xlu0 %4131 }
 0x9a1   : > { %v14316_v49 = vsel %vm1236_vm0, %v13843_v41, %v4134_v30  ;;  %v14320_v0 = vsel %vm1236_vm0, %v13840_v60, %v4132_v62 }
 0x9a2   : > { %v5996_v24 = vrot.slane %v14316_v49, 1  ;;  %v5995_v19 = vrot.slane %v14320_v0, 1 }
 0x9a4   : > { %v4138_v7 = vpop.permute.xlu1 %4137  ;;  %v4136_v63 = vpop.permute.xlu0 %4135  ;;  %v5997_v8 = vsel %vm4292_vm2, %v5995_v19, %v5996_v24 }
 0x9a5   : > { %v14327_v14 = vsel %vm1236_vm0, %v13849_v59, %v4138_v7  ;;  %v14331_v41 = vsel %vm1236_vm0, %v13837_v48, %v4136_v63  ;;  %6058 = vrot.lane.b32.xlu1 %v5997_v8, %s10704_s8 }
 0x9a6   : > { %v5998_v60 = vrot.slane %v14331_v41, 1  ;;  %v6000_v35 = vrot.slane %v14327_v14, 1 }
 0x9a8   : > { %v4140_v22 = vpop.permute.xlu0 %4139  ;;  %v5999_v39 = vsel %vm4292_vm2, %v5996_v24, %v5998_v60  ;;  %v4142_v59 = vpop.permute.xlu1 %4141  ;;  %v6001_v38 = vsel %vm4292_vm2, %v5998_v60, %v6000_v35 }
 0x9a9   : > { %v14339_v54 = vsel %vm1236_vm0, %v13853_v4, %v4140_v22  ;;  %6060 = vrot.lane.b32.xlu1 %v5999_v39, %s10704_s8  ;;  %v14346_v33 = vsel %vm1236_vm0, %v13868_v31, %v4142_v59 }
 0x9aa   : > { %v6002_v37 = vrot.slane %v14339_v54, 1  ;;  %v6004_v44 = vrot.slane %v14346_v33, 1 }
 0x9ac   : > { %v4144_v48 = vpop.permute.xlu0 %4143  ;;  %v6003_v4 = vsel %vm4292_vm2, %v6000_v35, %v6002_v37  ;;  %v4146_v6 = vpop.permute.xlu1 %4145  ;;  %v6005_v31 = vsel %vm4292_vm2, %v6002_v37, %v6004_v44 }
 0x9ad   : > { %6062 = vrot.lane.b32.xlu1 %v6001_v38, %s10704_s8  ;;  %v14353_v28 = vsel %vm1236_vm0, %v13872_v58, %v4144_v48  ;;  %v14360_v61 = vsel %vm1236_vm0, %v13886_v46, %v4146_v6 }
 0x9ae   : > { %v6006_v15 = vrot.slane %v14353_v28, 1  ;;  %v6008_v2 = vrot.slane %v14360_v61, 1 }
 0x9b0   : > { %v4148_v11 = vpop.permute.xlu0 %4147  ;;  %v6007_v58 = vsel %vm4292_vm2, %v6004_v44, %v6006_v15  ;;  %v4150_v1 = vpop.permute.xlu1 %4149  ;;  %v6009_v46 = vsel %vm4292_vm2, %v6006_v15, %v6008_v2 }
 0x9b1   : > { %6064 = vrot.lane.b32.xlu1 %v6003_v4, %s10704_s8  ;;  %v14367_v57 = vsel %vm1236_vm0, %v13890_v13, %v4148_v11  ;;  %v14374_v43 = vsel %vm1236_vm0, %v13904_v25, %v4150_v1 }
 0x9b2   : > { %v6010_v17 = vrot.slane %v14367_v57, 1  ;;  %v6012_v36 = vrot.slane %v14374_v43, 1 }
 0x9b4   : > { %v4152_v40 = vpop.permute.xlu0 %4151  ;;  %v6011_v13 = vsel %vm4292_vm2, %v6008_v2, %v6010_v17  ;;  %v4154_v24 = vpop.permute.xlu1 %4153  ;;  %v6013_v63 = vsel %vm4292_vm2, %v6010_v17, %v6012_v36 }
 0x9b5   : > { %6066 = vrot.lane.b32.xlu1 %v6005_v31, %s10704_s8  ;;  %v14381_v62 = vsel %vm1236_vm0, %v13908_v45, %v4152_v40  ;;  %v14392_v8 = vsel %vm1236_vm0, %v13922_v27, %v4154_v24 }
 0x9b6   : > { %v6014_v25 = vrot.slane %v14381_v62, 1  ;;  %v6016_v35 = vrot.slane %v14392_v8, 1 }
 0x9b8   : > { %v4156_v29 = vpop.permute.xlu0 %4155  ;;  %v6015_v39 = vsel %vm4292_vm2, %v6012_v36, %v6014_v25  ;;  %v6017_v44 = vsel %vm4292_vm2, %v6014_v25, %v6016_v35 }
 0x9b9   : > { %6068 = vrot.lane.b32.xlu1 %v6007_v58, %s10704_s8  ;;  %v14406_v27 = vsel %vm1236_vm0, %v13926_v34, %v4156_v29 }
 0x9ba   : > { %v6018_v48 = vrot.slane %v14406_v27, 1 }
 0x9bc   : > { %v4160_v3 = vpop.permute.xlu0 %4159  ;;  %v6019_v40 = vsel %vm4292_vm2, %v6016_v35, %v6018_v48 }
 0x9bd   : > { %6070 = vrot.lane.b32.xlu1 %v6009_v46, %s10704_s8 }
 0x9c0   : > { %v4164_v30 = vpop.permute.xlu0 %4163 }
 0x9c1   : > { %6072 = vrot.lane.b32.xlu1 %v6011_v13, %s10704_s8  ;;  %v14386_v19 = vsel %vm1236_vm0, %v13962_v23, %v4164_v30 }
 0x9c2   : > { %v6026_v60 = vrot.slane %v14386_v19, 1 }
 0x9c4   : > { %v4166_v7 = vpop.permute.xlu0 %4165 }
 0x9c5   : > { %v14396_v45 = vsel %vm1236_vm0, %v13976_v18, %v4166_v7  ;;  %6074 = vrot.lane.b32.xlu1 %v6013_v63, %s10704_s8  ;;  %v4158_v18 = vpop.permute.xlu1 %4157 }
 0x9c6   : > { %v6028_v23 = vrot.slane %v14396_v45, 1  ;;  %v14418_v11 = vsel %vm1236_vm0, %v13940_v47, %v4158_v18  ;;  %v14432_v47 = vsel %vm1236_vm0, %v13944_v10, %v4160_v3 }
 0x9c7   : > { %v6020_v6 = vrot.slane %v14418_v11, 1  ;;  %v6022_v29 = vrot.slane %v14432_v47, 1 }
 0x9c8   : > { %v4168_v22 = vpop.permute.xlu0 %4167  ;;  %v6029_v59 = vsel %vm4292_vm2, %v6026_v60, %v6028_v23 }
 0x9c9   : > { %6076 = vrot.lane.b32.xlu1 %v6015_v39, %s10704_s8  ;;  %6090 = vrot.lane.b32.xlu0 %v6029_v59, %s10704_s8  ;;  %v14412_v37 = vsel %vm1236_vm0, %v13980_v51, %v4168_v22  ;;  %v6021_v1 = vsel %vm4292_vm2, %v6018_v48, %v6020_v6  ;;  %v6023_v30 = vsel %vm4292_vm2, %v6020_v6, %v6022_v29 }
 0x9ca   : > { %v6030_v4 = vrot.slane %v14412_v37, 1 }
 0x9cc   : > { %v4170_v38 = vpop.permute.xlu0 %4169  ;;  %v6031_v59 = vsel %vm4292_vm2, %v6028_v23, %v6030_v4 }
 0x9cd   : > { %v14422_v34 = vsel %vm1236_vm0, %v13994_v20, %v4170_v38  ;;  %6078 = vrot.lane.b32.xlu1 %v6017_v44, %s10704_s8  ;;  %v4162_v20 = vpop.permute.xlu1 %4161 }
 0x9ce   : > { %16549 = vst [vmem:[#allocation29_spill] sm:$0xff] %v14422_v34  ;;  %v6032_v51 = vrot.slane %v14422_v34, 1  ;;  %v14444_v17 = vsel %vm1236_vm0, %v13958_v9, %v4162_v20 }
 0x9cf   : > { %v6024_v46 = vrot.slane %v14444_v17, 1 }
 0x9d0   : > { %v4172_v15 = vpop.permute.xlu0 %4171  ;;  %v6033_v31 = vsel %vm4292_vm2, %v6030_v4, %v6032_v51 }
 0x9d1   : > { %6080 = vrot.lane.b32.xlu1 %v6019_v40, %s10704_s8  ;;  %6094 = vrot.lane.b32.xlu0 %v6033_v31, %s10704_s8  ;;  %v14438_v2 = vsel %vm1236_vm0, %v13998_v50, %v4172_v15  ;;  %v6025_v24 = vsel %vm4292_vm2, %v6022_v29, %v6024_v46  ;;  %v6027_v22 = vsel %vm4292_vm2, %v6024_v46, %v6026_v60 }
 0x9d2   : > { %16550 = vst [vmem:[#allocation30_spill] sm:$0xff] %v14438_v2  ;;  %v6034_v3 = vrot.slane %v14438_v2, 1 }
 0x9d4   : > { %v4174_v58 = vpop.permute.xlu0 %4173  ;;  %v6035_v44 = vsel %vm4292_vm2, %v6032_v51, %v6034_v3 }
 0x9d5   : > { %v14448_v10 = vsel %vm1236_vm0, %v14012_v53, %v4174_v58  ;;  %6082 = vrot.lane.b32.xlu1 %v6021_v1, %s10704_s8 }
 0x9d6   : > { %16551 = vst [vmem:[#allocation31_spill] sm:$0xff] %v14448_v10  ;;  %v6036_v50 = vrot.slane %v14448_v10, 1 }
 0x9d8   : > { %v4176_v36 = vpop.permute.xlu0 %4175  ;;  %v6037_v13 = vsel %vm4292_vm2, %v6034_v3, %v6036_v50 }
 0x9d9   : > { %6084 = vrot.lane.b32.xlu1 %v6023_v30, %s10704_s8  ;;  %6098 = vrot.lane.b32.xlu0 %v6037_v13, %s10704_s8  ;;  %v14460_v9 = vsel %vm1236_vm0, %v14016_v42, %v4176_v36  ;;  %v16561_v13 = vld [vmem:[#allocation55_spill] sm:$0xff] }
 0x9da   : > { %16552 = vst [vmem:[#allocation32_spill] sm:$0xff] %v14460_v9  ;;  %v6038_v7 = vrot.slane %v14460_v9, 1 }
 0x9dc   : > { %v4178_v53 = vpop.permute.xlu0 %4177  ;;  %v6039_v23 = vsel %vm4292_vm2, %v6036_v50, %v6038_v7 }
 0x9dd   : > { %v14465_v25 = vsel %vm1236_vm0, %v14030_v56, %v4178_v53  ;;  %6086 = vrot.lane.b32.xlu1 %v6025_v24, %s10704_s8 }
 0x9de   : > { %16553 = vst [vmem:[#allocation33_spill] sm:$0xff] %v14465_v25  ;;  %v6040_v63 = vrot.slane %v14465_v25, 1 }
 0x9e0   : > { %v4180_v35 = vpop.permute.xlu0 %4179  ;;  %v6041_v39 = vsel %vm4292_vm2, %v6038_v7, %v6040_v63 }
 0x9e1   : > { %6088 = vrot.lane.b32.xlu1 %v6027_v22, %s10704_s8  ;;  %6102 = vrot.lane.b32.xlu0 %v6041_v39, %s10704_s8  ;;  %v14476_v42 = vsel %vm1236_vm0, %v14034_v12, %v4180_v35 }
 0x9e2   : > { %16554 = vst [vmem:[#allocation34_spill] sm:$0xff] %v14476_v42  ;;  %v6042_v60 = vrot.slane %v14476_v42, 1 }
 0x9e4   : > { %v4182_v56 = vpop.permute.xlu0 %4181  ;;  %v6043_v31 = vsel %vm4292_vm2, %v6040_v63, %v6042_v60 }
 0x9e5   : > { %v14481_v18 = vsel %vm1236_vm0, %v14048_v55, %v4182_v56  ;;  %6092 = vrot.lane.b32.xlu1 %v6031_v59, %s10704_s8 }
 0x9e6   : > { %16555 = vst [vmem:[#allocation35_spill] sm:$0xff] %v14481_v18  ;;  %v6044_v48 = vrot.slane %v14481_v18, 1 }
 0x9e8   : > { %v4184_v38 = vpop.permute.xlu0 %4183  ;;  %v6045_v6 = vsel %vm4292_vm2, %v6042_v60, %v6044_v48 }
 0x9e9   : > { %6096 = vrot.lane.b32.xlu1 %v6035_v44, %s10704_s8  ;;  %6106 = vrot.lane.b32.xlu0 %v6045_v6, %s10704_s8  ;;  %v14492_v12 = vsel %vm1236_vm0, %v14052_v32, %v4184_v38 }
 0x9ea   : > { %16556 = vst [vmem:[#allocation36_spill] sm:$0xff] %v14492_v12  ;;  %v6046_v51 = vrot.slane %v14492_v12, 1 }
 0x9ec   : > { %v4186_v55 = vpop.permute.xlu0 %4185  ;;  %v6047_v58 = vsel %vm4292_vm2, %v6044_v48, %v6046_v51 }
 0x9ed   : > { %v14497_v4 = vsel %vm1236_vm0, %v14066_v21, %v4186_v55  ;;  %6100 = vrot.lane.b32.xlu1 %v6039_v23, %s10704_s8 }
 0x9ee   : > { %16557 = vst [vmem:[#allocation37_spill] sm:$0xff] %v14497_v4  ;;  %v6048_v15 = vrot.slane %v14497_v4, 1 }
 0x9f0   : > { %v4188_v40 = vpop.permute.xlu0 %4187  ;;  %v6049_v20 = vsel %vm4292_vm2, %v6046_v51, %v6048_v15 }
 0x9f1   : > { %v14506_v32 = vsel %vm1236_vm0, %v14070_v52, %v4188_v40  ;;  %6104 = vrot.lane.b32.xlu1 %v6043_v31, %s10704_s8  ;;  %6110 = vrot.lane.b32.xlu0 %v6049_v20, %s10704_s8 }
 0x9f2   : > { %16558 = vst [vmem:[#allocation38_spill] sm:$0xff] %v14506_v32  ;;  %v6050_v21 = vrot.slane %v14506_v32, 1 }
 0x9f4   : > { %v4190_v29 = vpop.permute.xlu0 %4189  ;;  %v6051_v52 = vsel %vm4292_vm2, %v6048_v15, %v6050_v21 }
 0x9f5   : > { %v14514_v1 = vsel %vm1236_vm0, %v14084_v5, %v4190_v29  ;;  %6108 = vrot.lane.b32.xlu1 %v6047_v58, %s10704_s8  ;;  %v16563_v29 = vld [vmem:[#allocation110_spill] sm:$0xff] }
 0x9f6   : > { %16559 = vst [vmem:[#allocation39_spill] sm:$0xff] %v14514_v1  ;;  %v6052_v3 = vrot.slane %v14514_v1, 1  ;;  %8093 = vmatprep.mubr.msk.f32.mxu1 %vm5323_vm5, %v16563_v29 }
 0x9f8   : > { %v4192_v50 = vpop.permute.xlu0 %4191  ;;  %v6053_v46 = vsel %vm4292_vm2, %v6050_v21, %v6052_v3 }
 0x9f9   : > { %v14522_v36 = vsel %vm1236_vm0, %v14088_v26, %v4192_v50  ;;  %6112 = vrot.lane.b32.xlu1 %v6051_v52, %s10704_s8  ;;  %6114 = vrot.lane.b32.xlu0 %v6053_v46, %s10704_s8 }
 0x9fa   : > { %16560 = vst [vmem:[#allocation40_spill] sm:$0xff] %v14522_v36  ;;  %v6054_v5 = vrot.slane %v14522_v36, 1 }
 0x9fb   : > { %v8972_v30 = vpop.f32.mrb[0].mxu0 }
 0x9fc   : > { %v4852_v53 = vadd.f32 %v8972_v30, %v16561_v13  ;;  %v4846_v24 = vpop.f32.mrb[1].mxu0  ;;  %v4194_v7 = vpop.permute.xlu0 %4193  ;;  %v6055_v63 = vsel %vm4292_vm2, %v6052_v3, %v6054_v5 }
 0x9fd   : > { %v4847_v35 = vadd.f32 %v16561_v13, %v4846_v24  ;;  %v14532_v22 = vsel %vm1236_vm0, %v14103_v16, %v4194_v7  ;;  %6116 = vrot.lane.b32.xlu1 %v6055_v63, %s10704_s8 }
 0x9fe   : > { %16562 = vst [vmem:[#allocation41_spill] sm:$0xff] %v14532_v22  ;;  %v5006_v26 = vmax.f32 %v4852_v53, 0.0  ;;  %v6056_v39 = vrot.slane %v14532_v22, 1 }
 0x9ff   : > { %v5005_v56 = vmax.f32 %v4847_v35, 0.0 }
 0xa00   : > { %v5070_v59 = vrot.slane %v5006_v26, 1  ;;  %v5197_v60 = vrot.slane %v5006_v26, 2  ;;  %v6057_v48 = vsel %vm4292_vm2, %v6054_v5, %v6056_v39 }
 0xa01   : > { %v5069_v38 = vrot.slane %v5005_v56, 1  ;;  %v5196_v44 = vrot.slane %v5005_v56, 2  ;;  %6120 = vrot.lane.b32.xlu1 %v6056_v39, %s10704_s8  ;;  %6118 = vrot.lane.b32.xlu0 %v6057_v48, %s10704_s8 }
 0xa03   : > { %v8975_v6 = vpop.f32.mrb[2].mxu0  ;;  %v5071_v16 = vsel %vm4292_vm2, %v5069_v38, %v5070_v59  ;;  %v5198_v55 = vsel %vm4452_vm3, %v5196_v44, %v5197_v60 }
 0xa04   : > { %v4862_v23 = vadd.f32 %v8975_v6, %v16561_v13  ;;  %v4856_v51 = vpop.f32.mrb[3].mxu0  ;;  %v5164_v15 = vmax.f32 %v5005_v56, %v5071_v16 }
 0xa05   : > { %v4857_v40 = vadd.f32 %v16561_v13, %v4856_v51 }
 0xa06   : > { %v5008_v31 = vmax.f32 %v4862_v23, 0.0  ;;  %v14543_v20 = vmax.f32 %v5164_v15, %v5198_v55 }
 0xa07   : > { %v5007_v21 = vmax.f32 %v4857_v40, 0.0 }
 0xa08   : > { %v5074_v58 = vrot.slane %v5008_v31, 1  ;;  %v5201_v3 = vrot.slane %v5008_v31, 2 }
 0xa09   : > { %v5072_v50 = vrot.slane %v5007_v21, 1  ;;  %v5199_v52 = vrot.slane %v5007_v21, 2 }
 0xa0b   : > { %v5075_v46 = vsel %vm4292_vm2, %v5072_v50, %v5074_v58  ;;  %v8978_v5 = vpop.f32.mrb[4].mxu0  ;;  %v5073_v30 = vsel %vm4292_vm2, %v5070_v59, %v5072_v50  ;;  %v5200_v53 = vsel %vm4452_vm3, %v5197_v60, %v5199_v52  ;;  %v5202_v24 = vsel %vm4452_vm3, %v5199_v52, %v5201_v3 }
 0xa0c   : > { %v5166_v7 = vmax.f32 %v5007_v21, %v5075_v46  ;;  %v4872_v63 = vadd.f32 %v8978_v5, %v16561_v13  ;;  %v4866_v35 = vpop.f32.mrb[5].mxu0  ;;  %v5165_v39 = vmax.f32 %v5006_v26, %v5073_v30 }
 0xa0d   : > { %v4867_v56 = vadd.f32 %v16561_v13, %v4866_v35 }
 0xa0e   : > { %v5010_v48 = vmax.f32 %v4872_v63, 0.0  ;;  %v14553_v38 = vmax.f32 %v5165_v39, %v5200_v53  ;;  %v14555_v44 = vmax.f32 %v5166_v7, %v5202_v24 }
 0xa0f   : > { %v5009_v6 = vmax.f32 %v4867_v56, 0.0 }
 0xa10   : > { %v5078_v16 = vrot.slane %v5010_v48, 1  ;;  %v5205_v55 = vrot.slane %v5010_v48, 2 }
 0xa11   : > { %v5076_v60 = vrot.slane %v5009_v6, 1  ;;  %v5203_v23 = vrot.slane %v5009_v6, 2 }
 0xa13   : > { %v5079_v51 = vsel %vm4292_vm2, %v5076_v60, %v5078_v16  ;;  %v8981_v15 = vpop.f32.mrb[6].mxu0  ;;  %v5077_v26 = vsel %vm4292_vm2, %v5074_v58, %v5076_v60  ;;  %v5204_v40 = vsel %vm4452_vm3, %v5201_v3, %v5203_v23  ;;  %v5206_v21 = vsel %vm4452_vm3, %v5203_v23, %v5205_v55 }
 0xa14   : > { %v5168_v50 = vmax.f32 %v5009_v6, %v5079_v51  ;;  %v4882_v52 = vadd.f32 %v8981_v15, %v16561_v13  ;;  %v4876_v46 = vpop.f32.mrb[7].mxu0  ;;  %v5167_v5 = vmax.f32 %v5008_v31, %v5077_v26 }
 0xa15   : > { %v4877_v30 = vadd.f32 %v16561_v13, %v4876_v46 }
 0xa16   : > { %v5012_v53 = vmax.f32 %v4882_v52, 0.0  ;;  %v14565_v24 = vmax.f32 %v5167_v5, %v5204_v40  ;;  %v14567_v7 = vmax.f32 %v5168_v50, %v5206_v21 }
 0xa17   : > { %v5011_v63 = vmax.f32 %v4877_v30, 0.0 }
 0xa18   : > { %v5082_v35 = vrot.slane %v5012_v53, 1  ;;  %v5209_v39 = vrot.slane %v5012_v53, 2 }
 0xa19   : > { %v5080_v3 = vrot.slane %v5011_v63, 1  ;;  %v5207_v56 = vrot.slane %v5011_v63, 2 }
 0xa1b   : > { %v5083_v6 = vsel %vm4292_vm2, %v5080_v3, %v5082_v35  ;;  %v8984_v60 = vpop.f32.mrb[8].mxu0  ;;  %v5081_v31 = vsel %vm4292_vm2, %v5078_v16, %v5080_v3  ;;  %v5208_v23 = vsel %vm4452_vm3, %v5205_v55, %v5207_v56  ;;  %v5210_v51 = vsel %vm4452_vm3, %v5207_v56, %v5209_v39 }
 0xa1c   : > { %v5170_v15 = vmax.f32 %v5011_v63, %v5083_v6  ;;  %v4892_v26 = vadd.f32 %v8984_v60, %v16561_v13  ;;  %v4886_v40 = vpop.f32.mrb[9].mxu0  ;;  %v5169_v21 = vmax.f32 %v5010_v48, %v5081_v31 }
 0xa1d   : > { %v4887_v50 = vadd.f32 %v16561_v13, %v4886_v40 }
 0xa1e   : > { %v5014_v52 = vmax.f32 %v4892_v26, 0.0  ;;  %v14577_v46 = vmax.f32 %v5169_v21, %v5208_v23  ;;  %v14579_v5 = vmax.f32 %v5170_v15, %v5210_v51 }
 0xa1f   : > { %v5013_v30 = vmax.f32 %v4887_v50, 0.0 }
 0xa20   : > { %v5086_v58 = vrot.slane %v5014_v52, 1  ;;  %v5213_v55 = vrot.slane %v5014_v52, 2 }
 0xa21   : > { %v5084_v3 = vrot.slane %v5013_v30, 1  ;;  %v5211_v56 = vrot.slane %v5013_v30, 2 }
 0xa22   : > { %v8987_v63 = vpop.f32.mrb[10].mxu0 }
 0xa23   : > { %v5087_v6 = vsel %vm4292_vm2, %v5084_v3, %v5086_v58  ;;  %v4902_v48 = vadd.f32 %v8987_v63, %v16561_v13  ;;  %v4896_v60 = vpop.f32.mrb[11].mxu0  ;;  %v5085_v31 = vsel %vm4292_vm2, %v5082_v35, %v5084_v3  ;;  %v5212_v23 = vsel %vm4452_vm3, %v5209_v39, %v5211_v56 }
 0xa24   : > { %v5172_v51 = vmax.f32 %v5013_v30, %v5087_v6  ;;  %v4897_v15 = vadd.f32 %v16561_v13, %v4896_v60  ;;  %v5171_v26 = vmax.f32 %v5012_v53, %v5085_v31  ;;  %v5214_v21 = vsel %vm4452_vm3, %v5211_v56, %v5213_v55 }
 0xa25   : > { %v5016_v40 = vmax.f32 %v4902_v48, 0.0 }
 0xa26   : > { %v5015_v50 = vmax.f32 %v4897_v15, 0.0  ;;  %v14589_v16 = vmax.f32 %v5171_v26, %v5212_v23  ;;  %v14591_v59 = vmax.f32 %v5172_v51, %v5214_v21 }
 0xa27   : > { %v5090_v29 = vrot.slane %v5016_v40, 1  ;;  %v5217_v22 = vrot.slane %v5016_v40, 2 }
 0xa28   : > { %v5088_v63 = vrot.slane %v5015_v50, 1  ;;  %v5215_v36 = vrot.slane %v5015_v50, 2 }
 0xa2a   : > { %v5091_v39 = vsel %vm4292_vm2, %v5088_v63, %v5090_v29  ;;  %v8990_v30 = vpop.f32.mrb[12].mxu0  ;;  %v5089_v53 = vsel %vm4292_vm2, %v5086_v58, %v5088_v63  ;;  %v5216_v3 = vsel %vm4452_vm3, %v5213_v55, %v5215_v36  ;;  %v5218_v56 = vsel %vm4452_vm3, %v5215_v36, %v5217_v22 }
 0xa2b   : > { %v5174_v6 = vmax.f32 %v5015_v50, %v5091_v39  ;;  %v4912_v48 = vadd.f32 %v8990_v30, %v16561_v13  ;;  %v4906_v60 = vpop.f32.mrb[13].mxu0  ;;  %v5173_v31 = vmax.f32 %v5014_v52, %v5089_v53 }
 0xa2c   : > { %v4907_v23 = vadd.f32 %v16561_v13, %v4906_v60 }
 0xa2d   : > { %v5018_v51 = vmax.f32 %v4912_v48, 0.0  ;;  %v14601_v15 = vmax.f32 %v5173_v31, %v5216_v3  ;;  %v14603_v26 = vmax.f32 %v5174_v6, %v5218_v56 }
 0xa2e   : > { %v5017_v21 = vmax.f32 %v4907_v23, 0.0 }
 0xa2f   : > { %v5094_v35 = vrot.slane %v5018_v51, 1  ;;  %v5221_v1 = vrot.slane %v5018_v51, 2 }
 0xa30   : > { %v5092_v55 = vrot.slane %v5017_v21, 1  ;;  %v5219_v36 = vrot.slane %v5017_v21, 2 }
 0xa32   : > { %v5095_v50 = vsel %vm4292_vm2, %v5092_v55, %v5094_v35  ;;  %v8993_v63 = vpop.f32.mrb[14].mxu0  ;;  %v5093_v52 = vsel %vm4292_vm2, %v5090_v29, %v5092_v55  ;;  %v5220_v39 = vsel %vm4452_vm3, %v5217_v22, %v5219_v36  ;;  %v5222_v30 = vsel %vm4452_vm3, %v5219_v36, %v5221_v1 }
 0xa33   : > { %v5176_v53 = vmax.f32 %v5017_v21, %v5095_v50  ;;  %v4922_v3 = vadd.f32 %v8993_v63, %v16561_v13  ;;  %v4916_v56 = vpop.f32.mrb[15].mxu0  ;;  %v5175_v6 = vmax.f32 %v5016_v40, %v5093_v52 }
 0xa34   : > { %v4917_v48 = vadd.f32 %v16561_v13, %v4916_v56 }
 0xa35   : > { %v5020_v60 = vmax.f32 %v4922_v3, 0.0  ;;  %v14613_v31 = vmax.f32 %v5175_v6, %v5220_v39  ;;  %v14615_v23 = vmax.f32 %v5176_v53, %v5222_v30 }
 0xa36   : > { %v5019_v58 = vmax.f32 %v4917_v48, 0.0 }
 0xa37   : > { %v5098_v32 = vrot.slane %v5020_v60, 1  ;;  %v5225_v4 = vrot.slane %v5020_v60, 2 }
 0xa38   : > { %v5096_v29 = vrot.slane %v5019_v58, 1  ;;  %v5223_v55 = vrot.slane %v5019_v58, 2 }
 0xa3a   : > { %v5099_v21 = vsel %vm4292_vm2, %v5096_v29, %v5098_v32  ;;  %v8996_v36 = vpop.f32.mrb[16].mxu0  ;;  %v5097_v40 = vsel %vm4292_vm2, %v5094_v35, %v5096_v29  ;;  %v5224_v50 = vsel %vm4452_vm3, %v5221_v1, %v5223_v55  ;;  %v5226_v63 = vsel %vm4452_vm3, %v5223_v55, %v5225_v4 }
 0xa3b   : > { %v5178_v52 = vmax.f32 %v5019_v58, %v5099_v21  ;;  %v4932_v39 = vadd.f32 %v8996_v36, %v16561_v13  ;;  %v4926_v30 = vpop.f32.mrb[17].mxu0  ;;  %v5177_v53 = vmax.f32 %v5018_v51, %v5097_v40 }
 0xa3c   : > { %v4927_v3 = vadd.f32 %v16561_v13, %v4926_v30 }
 0xa3d   : > { %v5022_v56 = vmax.f32 %v4932_v39, 0.0  ;;  %v14625_v6 = vmax.f32 %v5177_v53, %v5224_v50  ;;  %v14627_v48 = vmax.f32 %v5178_v52, %v5226_v63 }
 0xa3e   : > { %v5021_v22 = vmax.f32 %v4927_v3, 0.0 }
 0xa3f   : > { %v5102_v12 = vrot.slane %v5022_v56, 1  ;;  %v5229_v18 = vrot.slane %v5022_v56, 2 }
 0xa40   : > { %v5100_v35 = vrot.slane %v5021_v22, 1  ;;  %v5227_v29 = vrot.slane %v5021_v22, 2 }
 0xa42   : > { %v8999_v58 = vpop.f32.mrb[18].mxu0  ;;  %v5103_v55 = vsel %vm4292_vm2, %v5100_v35, %v5102_v12  ;;  %v5230_v51 = vsel %vm4452_vm3, %v5227_v29, %v5229_v18  ;;  %v5101_v21 = vsel %vm4292_vm2, %v5098_v32, %v5100_v35  ;;  %v5228_v36 = vsel %vm4452_vm3, %v5225_v4, %v5227_v29 }
 0xa43   : > { %v4942_v40 = vadd.f32 %v8999_v58, %v16561_v13  ;;  %v4936_v50 = vpop.f32.mrb[19].mxu0  ;;  %v5180_v63 = vmax.f32 %v5021_v22, %v5103_v55  ;;  %v5179_v52 = vmax.f32 %v5020_v60, %v5101_v21 }
 0xa44   : > { %v4937_v39 = vadd.f32 %v16561_v13, %v4936_v50 }
 0xa45   : > { %v5024_v30 = vmax.f32 %v4942_v40, 0.0  ;;  %v5307_v53 = vmax.f32 %v5180_v63, %v5230_v51  ;;  %v14637_v3 = vmax.f32 %v5179_v52, %v5228_v36 }
 0xa46   : > { %v5023_v1 = vmax.f32 %v4937_v39, 0.0 }
 0xa47   : > { %v5106_v42 = vrot.slane %v5024_v30, 1  ;;  %v5233_v25 = vrot.slane %v5024_v30, 2 }
 0xa48   : > { %v5104_v32 = vrot.slane %v5023_v1, 1  ;;  %v5231_v35 = vrot.slane %v5023_v1, 2 }
 0xa4a   : > { %v5107_v4 = vsel %vm4292_vm2, %v5104_v32, %v5106_v42  ;;  %v9002_v29 = vpop.f32.mrb[20].mxu0  ;;  %v5105_v22 = vsel %vm4292_vm2, %v5102_v12, %v5104_v32  ;;  %v5232_v60 = vsel %vm4452_vm3, %v5229_v18, %v5231_v35  ;;  %v5234_v58 = vsel %vm4452_vm3, %v5231_v35, %v5233_v25 }
 0xa4b   : > { %v5182_v55 = vmax.f32 %v5023_v1, %v5107_v4  ;;  %v4952_v51 = vadd.f32 %v9002_v29, %v16561_v13  ;;  %v4946_v21 = vpop.f32.mrb[21].mxu0  ;;  %v5181_v36 = vmax.f32 %v5022_v56, %v5105_v22  ;;  %v16564_v1 = vpack.c.bf16 %v14553_v38, %v14543_v20 }
 0xa4c   : > { %v4947_v40 = vadd.f32 %v16561_v13, %v4946_v21 }
 0xa4d   : > { %v5026_v50 = vmax.f32 %v4952_v51, 0.0  ;;  %v5308_v63 = vmax.f32 %v5181_v36, %v5232_v60  ;;  %v5309_v52 = vmax.f32 %v5182_v55, %v5234_v58 }
 0xa4e   : > { %v5025_v39 = vmax.f32 %v4947_v40, 0.0 }
 0xa4f   : > { %v5110_v9 = vrot.slane %v5026_v50, 1  ;;  %v5237_v10 = vrot.slane %v5026_v50, 2  ;;  %v9225_v2 = vpack.c.bf16 %v5308_v63, %v5307_v53  ;;  %v16565_v63 = vpack.c.bf16 %v14565_v24, %v14555_v44 }
 0xa50   : > { %v5108_v34 = vrot.slane %v5025_v39, 1  ;;  %v5235_v12 = vrot.slane %v5025_v39, 2 }
 0xa51   : > { %9226 = vmatprep.subr.bf16.mxu1 %v9225_v2 }
 0xa52   : > { %v5111_v18 = vsel %vm4292_vm2, %v5108_v34, %v5110_v9  ;;  %v9005_v32 = vpop.f32.mrb[22].mxu0  ;;  %9228 = vmatpush3.bf16.msra.mxu1 %v16564_v1  ;;  %v5109_v56 = vsel %vm4292_vm2, %v5106_v42, %v5108_v34  ;;  %v5236_v35 = vsel %vm4452_vm3, %v5233_v25, %v5235_v12  ;;  %v5238_v4 = vsel %vm4452_vm3, %v5235_v12, %v5237_v10 }
 0xa53   : > { %v5184_v29 = vmax.f32 %v5025_v39, %v5111_v18  ;;  %v4962_v22 = vadd.f32 %v9005_v32, %v16561_v13  ;;  %v4956_v53 = vpop.f32.mrb[23].mxu0  ;;  %v5183_v60 = vmax.f32 %v5024_v30, %v5109_v56 }
 0xa54   : > { %v4957_v2 = vadd.f32 %v16561_v13, %v4956_v53 }
 0xa55   : > { %v5028_v58 = vmax.f32 %v4962_v22, 0.0  ;;  %v5310_v55 = vmax.f32 %v5183_v60, %v5236_v35  ;;  %v5311_v51 = vmax.f32 %v5184_v29, %v5238_v4 }
 0xa56   : > { %v5027_v21 = vmax.f32 %v4957_v2, 0.0 }
 0xa57   : > { %v5114_v36 = vrot.slane %v5028_v58, 1  ;;  %v5241_v20 = vrot.slane %v5028_v58, 2  ;;  %v9229_v38 = vpack.c.bf16 %v5310_v55, %v5309_v52  ;;  %v16566_v55 = vpack.c.bf16 %v14577_v46, %v14567_v7 }
 0xa58   : > { %v5112_v40 = vrot.slane %v5027_v21, 1  ;;  %v5239_v34 = vrot.slane %v5027_v21, 2 }
 0xa59   : > { %9230 = vmatprep.subr.bf16.mxu1 %v9229_v38 }
 0xa5a   : > { %v5115_v25 = vsel %vm4292_vm2, %v5112_v40, %v5114_v36  ;;  %v9008_v42 = vpop.f32.mrb[24].mxu0  ;;  %9232 = vmatpush3.bf16.msra.mxu1 %v16565_v63  ;;  %v5113_v30 = vsel %vm4292_vm2, %v5110_v9, %v5112_v40  ;;  %v5240_v39 = vsel %vm4452_vm3, %v5237_v10, %v5239_v34  ;;  %v5242_v12 = vsel %vm4452_vm3, %v5239_v34, %v5241_v20 }
 0xa5b   : > { %v5186_v18 = vmax.f32 %v5027_v21, %v5115_v25  ;;  %v4972_v32 = vadd.f32 %v9008_v42, %v16561_v13  ;;  %v4966_v52 = vpop.f32.mrb[25].mxu0  ;;  %v5185_v1 = vmax.f32 %v5026_v50, %v5113_v30 }
 0xa5c   : > { %v4967_v56 = vadd.f32 %v16561_v13, %v4966_v52 }
 0xa5d   : > { %v5030_v35 = vmax.f32 %v4972_v32, 0.0  ;;  %v5312_v4 = vmax.f32 %v5185_v1, %v5240_v39  ;;  %v5313_v29 = vmax.f32 %v5186_v18, %v5242_v12  ;;  %v16567_v1 = vpack.c.bf16 %v14589_v16, %v14579_v5 }
 0xa5e   : > { %v5029_v22 = vmax.f32 %v4967_v56, 0.0 }
 0xa5f   : > { %v5118_v53 = vrot.slane %v5030_v35, 1  ;;  %v5245_v44 = vrot.slane %v5030_v35, 2  ;;  %v9233_v24 = vpack.c.bf16 %v5312_v4, %v5311_v51 }
 0xa60   : > { %v5116_v60 = vrot.slane %v5029_v22, 1  ;;  %v5243_v9 = vrot.slane %v5029_v22, 2 }
 0xa61   : > { %9234 = vmatprep.subr.bf16.mxu1 %v9233_v24 }
 0xa62   : > { %v5119_v10 = vsel %vm4292_vm2, %v5116_v60, %v5118_v53  ;;  %v9011_v2 = vpop.f32.mrb[26].mxu0  ;;  %9236 = vmatpush3.bf16.msra.mxu1 %v16566_v55  ;;  %v5117_v50 = vsel %vm4292_vm2, %v5114_v36, %v5116_v60  ;;  %v5244_v21 = vsel %vm4452_vm3, %v5241_v20, %v5243_v9  ;;  %v5246_v38 = vsel %vm4452_vm3, %v5243_v9, %v5245_v44 }
 0xa63   : > { %v5188_v40 = vmax.f32 %v5029_v22, %v5119_v10  ;;  %v4982_v34 = vadd.f32 %v9011_v2, %v16561_v13  ;;  %v4976_v51 = vpop.f32.mrb[27].mxu0  ;;  %v5187_v25 = vmax.f32 %v5028_v58, %v5117_v50 }
 0xa64   : > { %v4977_v42 = vadd.f32 %v16561_v13, %v4976_v51 }
 0xa65   : > { %v5032_v63 = vmax.f32 %v4982_v34, 0.0  ;;  %v5314_v30 = vmax.f32 %v5187_v25, %v5244_v21  ;;  %v5315_v39 = vmax.f32 %v5188_v40, %v5246_v38  ;;  %v16568_v34 = vpack.c.bf16 %v14601_v15, %v14591_v59 }
 0xa66   : > { %v5031_v12 = vmax.f32 %v4977_v42, 0.0 }
 0xa67   : > { %v5122_v18 = vrot.slane %v5032_v63, 1  ;;  %v5249_v7 = vrot.slane %v5032_v63, 2  ;;  %v9237_v46 = vpack.c.bf16 %v5314_v30, %v5313_v29 }
 0xa68   : > { %v5120_v32 = vrot.slane %v5031_v12, 1  ;;  %v5247_v36 = vrot.slane %v5031_v12, 2 }
 0xa69   : > { %9238 = vmatprep.subr.bf16.mxu1 %v9237_v46 }
 0xa6a   : > { %v5123_v20 = vsel %vm4292_vm2, %v5120_v32, %v5122_v18  ;;  %v9014_v52 = vpop.f32.mrb[28].mxu0  ;;  %9240 = vmatpush3.bf16.msra.mxu1 %v16567_v1  ;;  %v5121_v58 = vsel %vm4292_vm2, %v5118_v53, %v5120_v32  ;;  %v5248_v56 = vsel %vm4452_vm3, %v5245_v44, %v5247_v36  ;;  %v5250_v4 = vsel %vm4452_vm3, %v5247_v36, %v5249_v7 }
 0xa6b   : > { %v5190_v22 = vmax.f32 %v5031_v12, %v5123_v20  ;;  %v4992_v24 = vadd.f32 %v9014_v52, %v16561_v13  ;;  %v4986_v29 = vpop.f32.mrb[29].mxu0  ;;  %v5189_v60 = vmax.f32 %v5030_v35, %v5121_v58 }
 0xa6c   : > { %v4987_v9 = vadd.f32 %v16561_v13, %v4986_v29 }
 0xa6d   : > { %v5034_v10 = vmax.f32 %v4992_v24, 0.0  ;;  %v5316_v2 = vmax.f32 %v5189_v60, %v5248_v56  ;;  %v5317_v55 = vmax.f32 %v5190_v22, %v5250_v4 }
 0xa6e   : > { %v5033_v50 = vmax.f32 %v4987_v9, 0.0 }
 0xa6f   : > { %v5126_v21 = vrot.slane %v5034_v10, 1  ;;  %v5253_v5 = vrot.slane %v5034_v10, 2  ;;  %v9241_v16 = vpack.c.bf16 %v5316_v2, %v5315_v39 }
 0xa70   : > { %v5124_v38 = vrot.slane %v5033_v50, 1  ;;  %v5251_v53 = vrot.slane %v5033_v50, 2 }
 0xa71   : > { %9242 = vmatprep.subr.bf16.mxu1 %v9241_v16  ;;  %v16665_v16 = vld [vmem:[#allocation124_spill] sm:$0xff] }
 0xa72   : > { %v5127_v44 = vsel %vm4292_vm2, %v5124_v38, %v5126_v21  ;;  %v9017_v40 = vpop.f32.mrb[30].mxu0  ;;  %9244 = vmatpush3.bf16.msra.mxu1 %v16568_v34  ;;  %v5125_v35 = vsel %vm4292_vm2, %v5122_v18, %v5124_v38  ;;  %v5252_v51 = vsel %vm4452_vm3, %v5249_v7, %v5251_v53  ;;  %v5254_v25 = vsel %vm4452_vm3, %v5251_v53, %v5253_v5  ;;  %v16576_v38 = vld [vmem:[#allocation109_spill] sm:$0xff]  ;;  %v16577_v53 = vld [vmem:[#allocation112_spill] sm:$0xff]  ;;  %v16582_v34 = vld [vmem:[#allocation115_spill] sm:$0xff] }
 0xa73   : > { %v5192_v42 = vmax.f32 %v5033_v50, %v5127_v44  ;;  %v5002_v30 = vadd.f32 %v9017_v40, %v16561_v13  ;;  %v4996_v39 = vpop.f32.mrb[31].mxu0  ;;  %v5191_v12 = vmax.f32 %v5032_v63, %v5125_v35  ;;  %v16569_v63 = vpack.c.bf16 %v14613_v31, %v14603_v26  ;;  %v16573_v31 = vld [vmem:[#allocation56_spill] sm:$0xff]  ;;  %v16578_v44 = vld [vmem:[#allocation111_spill] sm:$0xff] }
 0xa74   : > { %v4997_v46 = vadd.f32 %v16561_v13, %v4996_v39  ;;  %v16572_v26 = vpack.c.bf16 %v14625_v6, %v14615_v23  ;;  %v16579_v23 = vld [vmem:[#allocation114_spill] sm:$0xff]  ;;  %v16580_v6 = vld [vmem:[#allocation113_spill] sm:$0xff]  ;;  %v16581_v40 = vld [vmem:[#allocation116_spill] sm:$0xff] }
 0xa75   : > { %v5036_v32 = vmax.f32 %v5002_v30, 0.0  ;;  %v5318_v36 = vmax.f32 %v5191_v12, %v5252_v51  ;;  %v5319_v20 = vmax.f32 %v5192_v42, %v5254_v25  ;;  %v16585_v35 = vld [vmem:[#allocation120_spill] sm:$0xff]  ;;  %v16586_v51 = vld [vmem:[#allocation119_spill] sm:$0xff]  ;;  %v16587_v25 = vld [vmem:[#allocation122_spill] sm:$0xff] }
 0xa76   : > { %v5035_v52 = vmax.f32 %v4997_v46, 0.0  ;;  %v16588_v42 = vld [vmem:[#allocation121_spill] sm:$0xff]  ;;  %v16589_v30 = vld [vmem:[#allocation124_spill] sm:$0xff]  ;;  %v16590_v39 = vld [vmem:[#allocation123_spill] sm:$0xff] }
 0xa77   : > { %v5130_v1 = vrot.slane %v5036_v32, 1  ;;  %v5257_v59 = vrot.slane %v5036_v32, 2  ;;  %v9245_v15 = vpack.c.bf16 %v5318_v36, %v5317_v55  ;;  %v16591_v12 = vld [vmem:[#allocation126_spill] sm:$0xff]  ;;  %v16592_v46 = vld [vmem:[#allocation125_spill] sm:$0xff]  ;;  %v16594_v36 = vld [vmem:[#allocation127_spill] sm:$0xff] }
 0xa78   : > { %v5128_v58 = vrot.slane %v5035_v52, 1  ;;  %v5255_v18 = vrot.slane %v5035_v52, 2 }
 0xa79   : > { %v5195_v56 = vmax.f32 %v5036_v32, %v5130_v1  ;;  %9246 = vmatprep.subr.bf16.mxu1 %v9245_v15  ;;  %v16593_v32 = vld [vmem:[#allocation128_spill] sm:$0xff]  ;;  %v16599_v15 = vld [vmem:[#allocation58_spill] sm:$0xff] }
 0xa7a   : > { %v5131_v7 = vsel %vm4292_vm2, %v5128_v58, %v5130_v1  ;;  %v5258_v4 = vsel %vm4452_vm3, %v5255_v18, %v5257_v59  ;;  %9248 = vmatpush3.bf16.msra.mxu1 %v16569_v63  ;;  %v5129_v13 = vsel %vm4292_vm2, %v5126_v21, %v5128_v58  ;;  %v5256_v22 = vsel %vm4452_vm3, %v5253_v5, %v5255_v18  ;;  %v16597_v1 = vld [vmem:[#allocation132_spill] sm:$0xff]  ;;  %v16600_v58 = vld [vmem:[#allocation59_spill] sm:$0xff] }
 0xa7b   : > { %v5194_v24 = vmax.f32 %v5035_v52, %v5131_v7  ;;  %v5193_v29 = vmax.f32 %v5034_v10, %v5129_v13  ;;  %v5322_v60 = vmax.f32 %v5195_v56, %v5257_v59  ;;  %v16574_v10 = vld [vmem:[#allocation57_spill] sm:$0xff]  ;;  %v16575_v5 = vpack.c.bf16 %v14637_v3, %v14627_v48  ;;  %v16583_v48 = vld [vmem:[#allocation118_spill] sm:$0xff]  ;;  %v16598_v59 = vld [vmem:[#allocation131_spill] sm:$0xff] }
 0xa7c   : > { %v9258_v21 = vpack.c.bf16 %v16574_v10, %v16573_v31  ;;  %v16584_v3 = vld [vmem:[#allocation117_spill] sm:$0xff]  ;;  %v9262_v18 = vpack.c.bf16 %v16600_v58, %v16599_v15  ;;  %v10706_v56 = vmov 0.0|0.0   ;;  %v16606_v58 = vld [vmem:[#allocation66_spill] sm:$0xff] }
 0xa7d   : > { %v5321_v9 = vmax.f32 %v5194_v24, %v5258_v4  ;;  %v5320_v2 = vmax.f32 %v5193_v29, %v5256_v22  ;;  %v16596_v52 = vld [vmem:[#allocation129_spill] sm:$0xff]  ;;  %v16602_v29 = vld [vmem:[#allocation62_spill] sm:$0xff] }
 0xa7e   : > { %v16601_v24 = vld [vmem:[#allocation61_spill] sm:$0xff] }
 0xa7f   : > { %v9249_v55 = vpack.c.bf16 %v5320_v2, %v5319_v20  ;;  %v9253_v50 = vpack.c.bf16 %v5322_v60, %v5321_v9  ;;  %v16595_v20 = vld [vmem:[#allocation130_spill] sm:$0xff]  ;;  %v9301_v60 = vpack.c.bf16 %v16602_v29, %v16601_v24  ;;  %v16605_v15 = vld [vmem:[#allocation65_spill] sm:$0xff] }
 0xa81   : > { %9250 = vmatprep.subr.bf16.mxu1 %v9249_v55 }
 0xa82   : > { %9252 = vmatpush3.bf16.msra.mxu1 %v16572_v26  ;;  %v16604_v26 = vld [vmem:[#allocation64_spill] sm:$0xff] }
 0xa83   : > { %9255 = vmatprep.subr.msk.bf16.mxu1 %vm14700_vm8, %v9253_v50  ;;  %v16603_v50 = vld [vmem:[#allocation63_spill] sm:$0xff] }
 0xa84   : > { %v9304_v31 = vpack.c.bf16 %v16604_v26, %v16603_v50  ;;  %v6059_v26 = vpop.permute.xlu1 %6058 }
 0xa86   : > { %9257 = vmatpush3.bf16.msra.mxu1 %v16575_v5 }
 0xa87   : > { %9259 = vmatprep.subr.bf16.mxu1 %v9258_v21 }
 0xa89   : > { %5429 = vmatmul.mubr.f32.vlgmr.msra.gmra.mrb[0].mxu1 %v16576_v38 }
 0xa8a   : > { %8094 = vmatprep.mubr.msk.f32.mxu1 %vm5323_vm5, %v16577_v53  ;;  %9261 = vmatpush3.bf16.msra.mxu1 %v9258_v21 }
 0xa8b   : > { %9263 = vmatprep.subr.bf16.mxu1 %v9262_v18 }
 0xa8d   : > { %5434 = vmatmul.mubr.f32.gmra.mrb[2].mxu1 %v16578_v44 }
 0xa8e   : > { %8095 = vmatprep.mubr.msk.f32.mxu1 %vm5323_vm5, %v16579_v23  ;;  %9265 = vmatpush3.bf16.msra.mxu1 %v9262_v18  ;;  %v9307_v18 = vpack.c.bf16 %v16606_v58, %v16605_v15  ;;  %v16612_v15 = vld [vmem:[#allocation72_spill] sm:$0xff] }
 0xa8f   : > { %9300 = vmatprep.subr.bf16.mxu1 %v10706_v56 }
 0xa91   : > { %5439 = vmatmul.mubr.f32.gmra.mrb[4].mxu1 %v16580_v6 }
 0xa92   : > { %8096 = vmatprep.mubr.msk.f32.mxu1 %vm5323_vm5, %v16581_v40 }
 0xa95   : > { %5444 = vmatmul.mubr.f32.gmra.mrb[6].mxu1 %v16582_v34 }
 0xa96   : > { %8097 = vmatprep.mubr.msk.f32.mxu1 %vm5323_vm5, %v16583_v48 }
 0xa99   : > { %5449 = vmatmul.mubr.f32.gmra.mrb[8].mxu1 %v16584_v3 }
 0xa9a   : > { %8098 = vmatprep.mubr.msk.f32.mxu1 %vm5323_vm5, %v16585_v35 }
 0xa9d   : > { %5454 = vmatmul.mubr.f32.gmra.mrb[10].mxu1 %v16586_v51 }
 0xa9e   : > { %8099 = vmatprep.mubr.msk.f32.mxu1 %vm5323_vm5, %v16587_v25 }
 0xaa1   : > { %5459 = vmatmul.mubr.f32.gmra.mrb[12].mxu1 %v16588_v42 }
 0xaa2   : > { %8100 = vmatprep.mubr.msk.f32.mxu1 %vm5323_vm5, %v16589_v30 }
 0xaa5   : > { %5464 = vmatmul.mubr.f32.gmra.mrb[14].mxu1 %v16590_v39 }
 0xaa6   : > { %8101 = vmatprep.mubr.msk.f32.mxu1 %vm5323_vm5, %v16591_v12 }
 0xaa9   : > { %5469 = vmatmul.mubr.f32.gmra.mrb[16].mxu1 %v16592_v46 }
 0xaaa   : > { %8102 = vmatprep.mubr.msk.f32.mxu1 %vm5323_vm5, %v16593_v32 }
 0xaad   : > { %5474 = vmatmul.mubr.f32.gmra.mrb[18].mxu1 %v16594_v36 }
 0xaae   : > { %8103 = vmatprep.mubr.msk.f32.mxu1 %vm5323_vm5, %v16595_v20 }
 0xab1   : > { %5479 = vmatmul.mubr.f32.gmra.mrb[20].mxu1 %v16596_v52 }
 0xab2   : > { %8104 = vmatprep.mubr.msk.f32.mxu1 %vm5323_vm5, %v16597_v1 }
 0xab5   : > { %5484 = vmatmul.mubr.f32.gmra.mrb[22].mxu1 %v16598_v59 }
 0xb5c   : > { %v8662_v7 = vpop.f32.mrb[0].mxu1 }
 0xb5d   : > { %v8663_v4 = vpop.f32.mrb[1].mxu1 }
 0xb5e   : > { %v8664_v63 = vadd.f32 %v8663_v4, %v8662_v7 }
 0xb60   : > { %v8665_v13 = vpop.f32.mrb[2].mxu1  ;;  %9026 = vmatprep.mubr.msk.f32.mxu1 %vm1236_vm0, %v8664_v63 }
 0xb61   : > { %v8666_v22 = vpop.f32.mrb[3].mxu1 }
 0xb62   : > { %v8667_v9 = vadd.f32 %v8666_v22, %v8665_v13  ;;  %v16607_v13 = vld [vmem:[#allocation67_spill] sm:$0xff]  ;;  %v16608_v22 = vld [vmem:[#allocation68_spill] sm:$0xff] }
 0xb63   : > { %v9310_v24 = vpack.c.bf16 %v16608_v22, %v16607_v13  ;;  %v16613_v13 = vld [vmem:[#allocation73_spill] sm:$0xff]  ;;  %v16614_v22 = vld [vmem:[#allocation74_spill] sm:$0xff] }
 0xb64   : > { %v8668_v2 = vpop.f32.mrb[4].mxu1  ;;  %9027 = vmatmul.mubr.msk.f32.vlgmr.msra.gmra.mrb[24].mxu1 %vm1236_vm0, %v8667_v9 }
 0xb65   : > { %9302 = vmatpush1.bf16.msra.mxu1 %v9301_v60  ;;  %v8669_v55 = vpop.f32.mrb[5].mxu1 }
 0xb66   : > { %v8670_v10 = vadd.f32 %v8669_v55, %v8668_v2  ;;  %9303 = vmatprep.subr.bf16.mxu1 %v10706_v56  ;;  %v16609_v2 = vld [vmem:[#allocation69_spill] sm:$0xff]  ;;  %v16610_v55 = vld [vmem:[#allocation70_spill] sm:$0xff] }
 0xb67   : > { %v9313_v50 = vpack.c.bf16 %v16610_v55, %v16609_v2  ;;  %v16615_v2 = vld [vmem:[#allocation75_spill] sm:$0xff]  ;;  %v16616_v55 = vld [vmem:[#allocation76_spill] sm:$0xff] }
 0xb68   : > { %v8671_v21 = vpop.f32.mrb[6].mxu1  ;;  %9029 = vmatprep.mubr.msk.f32.mxu1 %vm1236_vm0, %v8670_v10 }
 0xb69   : > { %9305 = vmatpush1.bf16.msra.mxu1 %v9304_v31  ;;  %v8672_v5 = vpop.f32.mrb[7].mxu1 }
 0xb6a   : > { %v8673_v7 = vadd.f32 %v8672_v5, %v8671_v21  ;;  %9306 = vmatprep.subr.bf16.mxu1 %v10706_v56  ;;  %v16611_v5 = vld [vmem:[#allocation71_spill] sm:$0xff] }
 0xb6b   : > { %v9316_v58 = vpack.c.bf16 %v16612_v15, %v16611_v5  ;;  %v16617_v15 = vld [vmem:[#allocation77_spill] sm:$0xff] }
 0xb6c   : > { %9030 = vmatmul.mubr.msk.f32.gmra.mrb[26].mxu1 %vm1236_vm0, %v8673_v7  ;;  %v8674_v4 = vpop.f32.mrb[8].mxu1  ;;  %v6061_v7 = vpop.permute.xlu1 %6060 }
 0xb6d   : > { %9308 = vmatpush1.bf16.msra.mxu1 %v9307_v18  ;;  %v8675_v63 = vpop.f32.mrb[9].mxu1 }
 0xb6e   : > { %v8676_v29 = vadd.f32 %v8675_v63, %v8674_v4  ;;  %9309 = vmatprep.subr.bf16.mxu1 %v10706_v56 }
 0xb70   : > { %v8677_v60 = vpop.f32.mrb[10].mxu1  ;;  %9032 = vmatprep.mubr.msk.f32.mxu1 %vm1236_vm0, %v8676_v29 }
 0xb71   : > { %9311 = vmatpush1.bf16.msra.mxu1 %v9310_v24  ;;  %v8678_v9 = vpop.f32.mrb[11].mxu1  ;;  %v9319_v24 = vpack.c.bf16 %v16614_v22, %v16613_v13 }
 0xb72   : > { %v8679_v31 = vadd.f32 %v8678_v9, %v8677_v60  ;;  %9312 = vmatprep.subr.bf16.mxu1 %v10706_v56 }
 0xb74   : > { %9033 = vmatmul.mubr.msk.f32.gmra.mrb[28].mxu1 %vm1236_vm0, %v8679_v31  ;;  %v8680_v10 = vpop.f32.mrb[12].mxu1  ;;  %v6063_v31 = vpop.permute.xlu1 %6062 }
 0xb75   : > { %9314 = vmatpush1.bf16.msra.mxu1 %v9313_v50  ;;  %v8681_v21 = vpop.f32.mrb[13].mxu1  ;;  %v9322_v50 = vpack.c.bf16 %v16616_v55, %v16615_v2  ;;  %v6155_v2 = vrot.slane %v14316_v49, 2  ;;  %v6154_v55 = vrot.slane %v14320_v0, 2 }
 0xb76   : > { %v8682_v18 = vadd.f32 %v8681_v21, %v8680_v10  ;;  %9315 = vmatprep.subr.bf16.mxu1 %v10706_v56 }
 0xb78   : > { %v8683_v4 = vpop.f32.mrb[14].mxu1  ;;  %9035 = vmatprep.mubr.msk.f32.mxu1 %vm1236_vm0, %v8682_v18 }
 0xb79   : > { %9317 = vmatpush1.bf16.msra.mxu1 %v9316_v58  ;;  %v8684_v63 = vpop.f32.mrb[15].mxu1  ;;  %v16618_v58 = vld [vmem:[#allocation78_spill] sm:$0xff] }
 0xb7a   : > { %v8685_v29 = vadd.f32 %v8684_v63, %v8683_v4  ;;  %9318 = vmatprep.subr.bf16.mxu1 %v10706_v56  ;;  %v9325_v18 = vpack.c.bf16 %v16618_v58, %v16617_v15  ;;  %v6065_v63 = vpop.permute.xlu1 %6064 }
 0xb7c   : > { %9036 = vmatmul.mubr.msk.f32.gmra.mrb[30].mxu1 %vm1236_vm0, %v8685_v29  ;;  %v8686_v60 = vpop.f32.mrb[16].mxu1  ;;  %v16620_v29 = vld [vmem:[#allocation80_spill] sm:$0xff] }
 0xb7d   : > { %9320 = vmatpush1.bf16.msra.mxu1 %v9319_v24  ;;  %v8687_v9 = vpop.f32.mrb[17].mxu1  ;;  %v16619_v24 = vld [vmem:[#allocation79_spill] sm:$0xff] }
 0xb7e   : > { %v8688_v10 = vadd.f32 %v8687_v9, %v8686_v60  ;;  %9321 = vmatprep.subr.bf16.mxu1 %v10706_v56  ;;  %v9328_v60 = vpack.c.bf16 %v16620_v29, %v16619_v24  ;;  %v6067_v58 = vpop.permute.xlu1 %6066  ;;  %v6157_v29 = vrot.slane %v14331_v41, 2 }
 0xb80   : > { %v8689_v21 = vpop.f32.mrb[18].mxu1  ;;  %9038 = vmatprep.mubr.msk.f32.mxu1 %vm1236_vm0, %v8688_v10 }
 0xb81   : > { %9323 = vmatpush1.bf16.msra.mxu1 %v9322_v50  ;;  %v8690_v5 = vpop.f32.mrb[19].mxu1 }
 0xb82   : > { %v8691_v4 = vadd.f32 %v8690_v5, %v8689_v21  ;;  %9324 = vmatprep.subr.bf16.mxu1 %v10706_v56  ;;  %v16621_v21 = vld [vmem:[#allocation81_spill] sm:$0xff]  ;;  %v16622_v5 = vld [vmem:[#allocation82_spill] sm:$0xff] }
 0xb83   : > { %v9331_v15 = vpack.c.bf16 %v16622_v5, %v16621_v21  ;;  %v6218_v21 = vsel %vm2769_vm1, %v14316_v49, %v6061_v7  ;;  %v6220_v49 = vsel %vm2769_vm1, %v14327_v14, %v6065_v63  ;;  %v6165_v7 = vrot.slane %v14353_v28, 2 }
 0xb84   : > { %9039 = vmatmul.mubr.msk.f32.gmra.mrb[32].mxu1 %vm1236_vm0, %v8691_v4  ;;  %v8692_v13 = vpop.f32.mrb[20].mxu1  ;;  %v6156_v4 = vsel %vm4452_vm3, %v6154_v55, %v6155_v2  ;;  %v6158_v55 = vsel %vm4452_vm3, %v6155_v2, %v6157_v29  ;;  %v6169_v63 = vrot.slane %v14367_v57, 2 }
 0xb85   : > { %9326 = vmatpush1.bf16.msra.mxu1 %v9325_v18  ;;  %v8693_v22 = vpop.f32.mrb[21].mxu1 }
 0xb86   : > { %v8694_v9 = vadd.f32 %v8693_v22, %v8692_v13  ;;  %9327 = vmatprep.subr.bf16.mxu1 %v10706_v56  ;;  %v16623_v13 = vld [vmem:[#allocation83_spill] sm:$0xff]  ;;  %v16624_v22 = vld [vmem:[#allocation84_spill] sm:$0xff] }
 0xb87   : > { %v9334_v24 = vpack.c.bf16 %v16624_v22, %v16623_v13 }
 0xb88   : > { %v8695_v50 = vpop.f32.mrb[22].mxu1  ;;  %9041 = vmatprep.mubr.msk.f32.mxu1 %vm1236_vm0, %v8694_v9  ;;  %v6217_v9 = vsel %vm2769_vm1, %v14320_v0, %v6059_v26  ;;  %v6219_v0 = vsel %vm2769_vm1, %v14331_v41, %v6063_v31  ;;  %v6163_v26 = vrot.slane %v14346_v33, 2  ;;  %v6221_v41 = vsel %vm2769_vm1, %v14339_v54, %v6067_v58 }
 0xb89   : > { %9329 = vmatpush1.bf16.msra.mxu1 %v9328_v60  ;;  %v8696_v10 = vpop.f32.mrb[23].mxu1  ;;  %v6069_v60 = vpop.permute.xlu1 %6068  ;;  %v6167_v31 = vrot.slane %v14360_v61, 2  ;;  %v6171_v58 = vrot.slane %v14374_v43, 2 }
 0xb8a   : > { %v8697_v18 = vadd.f32 %v8696_v10, %v8695_v50  ;;  %9330 = vmatprep.subr.bf16.mxu1 %v10706_v56  ;;  %v6159_v50 = vrot.slane %v14327_v14, 2  ;;  %v6166_v13 = vsel %vm4452_vm3, %v6163_v26, %v6165_v7  ;;  %v6222_v14 = vsel %vm2769_vm1, %v14346_v33, %v6069_v60 }
 0xb8b   : > { %v6173_v60 = vrot.slane %v14381_v62, 2 }
 0xb8c   : > { %9042 = vmatmul.mubr.msk.f32.gmra.mrb[34].mxu1 %vm1236_vm0, %v8697_v18  ;;  %v6160_v5 = vsel %vm4452_vm3, %v6157_v29, %v6159_v50  ;;  %v6170_v29 = vsel %vm4452_vm3, %v6167_v31, %v6169_v63 }
 0xb8d   : > { %9332 = vmatpush1.bf16.msra.mxu1 %v9331_v15  ;;  %8133 = vmatprep.mubr.msk.f32.mxu1 %vm2769_vm1, %v6156_v4  ;;  %v6071_v10 = vpop.permute.xlu1 %6070 }
 0xb8e   : > { %9333 = vmatprep.subr.bf16.mxu1 %v10706_v56  ;;  %v6161_v56 = vrot.slane %v14339_v54, 2  ;;  %v6223_v54 = vsel %vm2769_vm1, %v14353_v28, %v6071_v10 }
 0xb90   : > { %v6162_v2 = vsel %vm4452_vm3, %v6159_v50, %v6161_v56  ;;  %v6164_v18 = vsel %vm4452_vm3, %v6161_v56, %v6163_v26  ;;  %v6172_v50 = vsel %vm4452_vm3, %v6169_v63, %v6171_v58  ;;  %v6177_v56 = vrot.slane %v14406_v27, 2 }
 0xb91   : > { %9335 = vmatpush1.bf16.msra.mxu1 %v9334_v24  ;;  %v6073_v15 = vpop.permute.xlu1 %6072  ;;  %v6168_v24 = vsel %vm4452_vm3, %v6165_v7, %v6167_v31  ;;  %v6179_v26 = vrot.slane %v14418_v11, 2  ;;  %v6185_v31 = vrot.slane %v14386_v19, 2 }
 0xb92   : > { %v6224_v33 = vsel %vm2769_vm1, %v14360_v61, %v6073_v15 }
 0xb93   : > { %v6180_v7 = vsel %vm4452_vm3, %v6177_v56, %v6179_v26 }
 0xb94   : > { %6384 = vmatmul.mubr.f32.vlgmr.msra.gmra.mrb[36].mxu1 %v6217_v9 }
 0xb95   : > { %8134 = vmatprep.mubr.msk.f32.mxu1 %vm2769_vm1, %v6158_v55  ;;  %v6075_v4 = vpop.permute.xlu1 %6074  ;;  %v6175_v55 = vrot.slane %v14392_v8, 2 }
 0xb96   : > { %v6225_v28 = vsel %vm2769_vm1, %v14367_v57, %v6075_v4 }
 0xb97   : > { %v6178_v15 = vsel %vm4452_vm3, %v6175_v55, %v6177_v56 }
 0xb98   : > { %6389 = vmatmul.mubr.f32.gmra.mrb[38].mxu1 %v6218_v21  ;;  %v6174_v21 = vsel %vm4452_vm3, %v6171_v58, %v6173_v60 }
 0xb99   : > { %8135 = vmatprep.mubr.msk.f32.mxu1 %vm2769_vm1, %v6160_v5  ;;  %v6077_v22 = vpop.permute.xlu1 %6076  ;;  %v6176_v5 = vsel %vm4452_vm3, %v6173_v60, %v6175_v55 }
 0xb9a   : > { %v6226_v61 = vsel %vm2769_vm1, %v14374_v43, %v6077_v22 }
 0xb9c   : > { %6394 = vmatmul.mubr.f32.gmra.mrb[40].mxu1 %v6219_v0 }
 0xb9d   : > { %8136 = vmatprep.mubr.msk.f32.mxu1 %vm2769_vm1, %v6162_v2  ;;  %v6079_v9 = vpop.permute.xlu1 %6078  ;;  %v6181_v2 = vrot.slane %v14432_v47, 2 }
 0xb9e   : > { %v6227_v57 = vsel %vm2769_vm1, %v14381_v62, %v6079_v9 }
 0xb9f   : > { %v6182_v4 = vsel %vm4452_vm3, %v6179_v26, %v6181_v2 }
 0xba0   : > { %6399 = vmatmul.mubr.f32.gmra.mrb[42].mxu1 %v6220_v49 }
 0xba1   : > { %8137 = vmatprep.mubr.msk.f32.mxu1 %vm2769_vm1, %v6164_v18  ;;  %v6081_v10 = vpop.permute.xlu1 %6080  ;;  %v6183_v18 = vrot.slane %v14444_v17, 2 }
 0xba2   : > { %v6228_v43 = vsel %vm2769_vm1, %v14392_v8, %v6081_v10 }
 0xba3   : > { %v6186_v22 = vsel %vm4452_vm3, %v6183_v18, %v6185_v31 }
 0xba4   : > { %6404 = vmatmul.mubr.f32.gmra.mrb[44].mxu1 %v6221_v41 }
 0xba5   : > { %8138 = vmatprep.mubr.msk.f32.mxu1 %vm2769_vm1, %v6166_v13  ;;  %v6083_v0 = vpop.permute.xlu1 %6082  ;;  %v6184_v13 = vsel %vm4452_vm3, %v6181_v2, %v6183_v18  ;;  %v16630_v18 = vld [vmem:[#allocation34_spill] sm:$0xff] }
 0xba6   : > { %v6229_v62 = vsel %vm2769_vm1, %v14406_v27, %v6083_v0  ;;  %v16628_v0 = vld [vmem:[#allocation32_spill] sm:$0xff] }
 0xba8   : > { %6409 = vmatmul.mubr.f32.gmra.mrb[46].mxu1 %v6222_v14  ;;  %v6187_v14 = vrot.slane %v14396_v45, 2 }
 0xba9   : > { %8139 = vmatprep.mubr.msk.f32.mxu1 %vm2769_vm1, %v6168_v24  ;;  %v6085_v49 = vpop.permute.xlu1 %6084  ;;  %v6189_v24 = vrot.slane %v14412_v37, 2 }
 0xbaa   : > { %v6230_v8 = vsel %vm2769_vm1, %v14418_v11, %v6085_v49  ;;  %v6188_v58 = vsel %vm4452_vm3, %v6185_v31, %v6187_v14 }
 0xbab   : > { %v6190_v60 = vsel %vm4452_vm3, %v6187_v14, %v6189_v24 }
 0xbac   : > { %6414 = vmatmul.mubr.f32.gmra.mrb[48].mxu1 %v6223_v54  ;;  %v6091_v54 = vpop.permute.xlu0 %6090 }
 0xbad   : > { %8140 = vmatprep.mubr.msk.f32.mxu1 %vm2769_vm1, %v6170_v29  ;;  %v6087_v41 = vpop.permute.xlu1 %6086  ;;  %v16625_v29 = vld [vmem:[#allocation29_spill] sm:$0xff] }
 0xbae   : > { %v6231_v27 = vsel %vm2769_vm1, %v14432_v47, %v6087_v41  ;;  %v6233_v47 = vsel %vm2769_vm1, %v14386_v19, %v6091_v54  ;;  %v6191_v9 = vrot.slane %v16625_v29, 2 }
 0xbb0   : > { %6419 = vmatmul.mubr.f32.gmra.mrb[50].mxu1 %v6224_v33  ;;  %v6095_v55 = vpop.permute.xlu0 %6094  ;;  %v6192_v10 = vsel %vm4452_vm3, %v6189_v24, %v6191_v9 }
 0xbb1   : > { %8141 = vmatprep.mubr.msk.f32.mxu1 %vm2769_vm1, %v6172_v50  ;;  %v6089_v63 = vpop.permute.xlu1 %6088  ;;  %v16626_v50 = vld [vmem:[#allocation30_spill] sm:$0xff]  ;;  %v6235_v19 = vsel %vm2769_vm1, %v14412_v37, %v6095_v55 }
 0xbb2   : > { %v6232_v11 = vsel %vm2769_vm1, %v14444_v17, %v6089_v63 }
 0xbb4   : > { %6424 = vmatmul.mubr.f32.gmra.mrb[52].mxu1 %v6225_v28  ;;  %v6193_v28 = vrot.slane %v16626_v50, 2  ;;  %v6099_v26 = vpop.permute.xlu0 %6098 }
 0xbb5   : > { %8142 = vmatprep.mubr.msk.f32.mxu1 %vm2769_vm1, %v6174_v21  ;;  %v6093_v33 = vpop.permute.xlu1 %6092  ;;  %v16627_v21 = vld [vmem:[#allocation31_spill] sm:$0xff]  ;;  %v6237_v37 = vsel %vm2769_vm1, %v16626_v50, %v6099_v26 }
 0xbb6   : > { %v6234_v17 = vsel %vm2769_vm1, %v14396_v45, %v6093_v33 }
 0xbb8   : > { %6429 = vmatmul.mubr.f32.gmra.mrb[54].mxu1 %v6226_v61  ;;  %v6195_v61 = vrot.slane %v16627_v21, 2  ;;  %v6103_v41 = vpop.permute.xlu0 %6102 }
 0xbb9   : > { %8143 = vmatprep.mubr.msk.f32.mxu1 %vm2769_vm1, %v6176_v5  ;;  %v6097_v56 = vpop.permute.xlu1 %6096  ;;  %v6194_v5 = vsel %vm4452_vm3, %v6191_v9, %v6193_v28  ;;  %v6239_v31 = vsel %vm2769_vm1, %v16628_v0, %v6103_v41 }
 0xbba   : > { %v6236_v45 = vsel %vm2769_vm1, %v16625_v29, %v6097_v56  ;;  %v16633_v29 = vld [vmem:[#allocation37_spill] sm:$0xff] }
 0xbbb   : > { %v6207_v9 = vrot.slane %v16633_v29, 2 }
 0xbbc   : > { %6434 = vmatmul.mubr.f32.gmra.mrb[56].mxu1 %v6227_v57  ;;  %v6197_v57 = vrot.slane %v16628_v0, 2  ;;  %v6107_v54 = vpop.permute.xlu0 %6106 }
 0xbbd   : > { %8144 = vmatprep.mubr.msk.f32.mxu1 %vm2769_vm1, %v6178_v15  ;;  %v6196_v15 = vsel %vm4452_vm3, %v6193_v28, %v6195_v61  ;;  %v6101_v49 = vpop.permute.xlu1 %6100  ;;  %v16635_v28 = vld [vmem:[#allocation38_spill] sm:$0xff] }
 0xbbe   : > { %v6209_v55 = vrot.slane %v16635_v28, 2 }
 0xbc0   : > { %6439 = vmatmul.mubr.f32.gmra.mrb[58].mxu1 %v6228_v43  ;;  %v16629_v43 = vld [vmem:[#allocation33_spill] sm:$0xff] }
 0xbc1   : > { %8145 = vmatprep.mubr.msk.f32.mxu1 %vm2769_vm1, %v6180_v7  ;;  %v6199_v2 = vrot.slane %v16629_v43, 2  ;;  %v6198_v7 = vsel %vm4452_vm3, %v6195_v61, %v6197_v57  ;;  %v6105_v14 = vpop.permute.xlu1 %6104  ;;  %v16636_v61 = vld [vmem:[#allocation39_spill] sm:$0xff] }
 0xbc2   : > { %v6211_v56 = vrot.slane %v16636_v61, 2 }
 0xbc4   : > { %6444 = vmatmul.mubr.f32.gmra.mrb[60].mxu1 %v6229_v62  ;;  %v6238_v62 = vsel %vm2769_vm1, %v16627_v21, %v6101_v49 }
 0xbc5   : > { %8146 = vmatprep.mubr.msk.f32.mxu1 %vm2769_vm1, %v6182_v4  ;;  %v6201_v4 = vrot.slane %v16630_v18, 2  ;;  %v6109_v33 = vpop.permute.xlu1 %6108 }
 0xbc7   : > { %v6202_v63 = vsel %vm4452_vm3, %v6199_v2, %v6201_v4 }
 0xbc8   : > { %6449 = vmatmul.mubr.f32.gmra.mrb[62].mxu1 %v6230_v8  ;;  %v6200_v8 = vsel %vm4452_vm3, %v6197_v57, %v6199_v2  ;;  %v16637_v57 = vld [vmem:[#allocation40_spill] sm:$0xff]  ;;  %v16638_v2 = vld [vmem:[#allocation41_spill] sm:$0xff] }
 0xbc9   : > { %8147 = vmatprep.mubr.msk.f32.mxu1 %vm2769_vm1, %v6184_v13  ;;  %v16631_v13 = vld [vmem:[#allocation35_spill] sm:$0xff]  ;;  %v6213_v26 = vrot.slane %v16637_v57, 2  ;;  %v6215_v49 = vrot.slane %v16638_v2, 2 }
 0xbca   : > { %v6242_v50 = vsel %vm2769_vm1, %v16631_v13, %v6109_v33 }
 0xbcb   : > { %v6216_v41 = vsel %vm4452_vm3, %v6213_v26, %v6215_v49 }
 0xbcc   : > { %6454 = vmatmul.mubr.f32.gmra.mrb[64].mxu1 %v6231_v27  ;;  %v6203_v27 = vrot.slane %v16631_v13, 2 }
 0xbcd   : > { %8148 = vmatprep.mubr.msk.f32.mxu1 %vm2769_vm1, %v6186_v22  ;;  %v6240_v22 = vsel %vm2769_vm1, %v16629_v43, %v6105_v14  ;;  %v16639_v14 = vld [vmem:[#allocation60_spill] sm:$0xff] }
 0xbd0   : > { %6459 = vmatmul.mubr.f32.gmra.mrb[66].mxu1 %v6232_v11  ;;  %v16632_v11 = vld [vmem:[#allocation36_spill] sm:$0xff] }
 0xbd1   : > { %8149 = vmatprep.mubr.msk.f32.mxu1 %vm2769_vm1, %v6188_v58  ;;  %v6205_v24 = vrot.slane %v16632_v11, 2  ;;  %v6204_v58 = vsel %vm4452_vm3, %v6201_v4, %v6203_v27 }
 0xbd4   : > { %6464 = vmatmul.mubr.f32.gmra.mrb[68].mxu1 %v6233_v47  ;;  %v6241_v47 = vsel %vm2769_vm1, %v16630_v18, %v6107_v54 }
 0xbd5   : > { %8150 = vmatprep.mubr.msk.f32.mxu1 %vm2769_vm1, %v6190_v60  ;;  %v6206_v60 = vsel %vm4452_vm3, %v6203_v27, %v6205_v24 }
 0xbd8   : > { %6469 = vmatmul.mubr.f32.gmra.mrb[70].mxu1 %v6234_v17  ;;  %v16634_v17 = vld [vmem:[#allocation133_spill] sm:$0xff] }
 0xbd9   : > { %8151 = vmatprep.mubr.msk.f32.mxu1 %vm2769_vm1, %v6192_v10  ;;  %9068 = vmatprep.mubr.msk.f32.mxu0 %vm5727_vm9, %v16634_v17  ;;  %v6111_v10 = vpop.permute.xlu0 %6110 }
 0xbda   : > { %v6243_v21 = vsel %vm2769_vm1, %v16632_v11, %v6111_v10 }
 0xbdc   : > { %6474 = vmatmul.mubr.f32.gmra.mrb[72].mxu1 %v6235_v19  ;;  %v6208_v19 = vsel %vm4452_vm3, %v6205_v24, %v6207_v9 }
 0xbdd   : > { %8152 = vmatprep.mubr.msk.f32.mxu1 %vm2769_vm1, %v6194_v5  ;;  %v6113_v5 = vpop.permute.xlu1 %6112 }
 0xbde   : > { %v6244_v0 = vsel %vm2769_vm1, %v16633_v29, %v6113_v5 }
 0xbe0   : > { %6479 = vmatmul.mubr.f32.gmra.mrb[74].mxu1 %v6236_v45  ;;  %v6210_v45 = vsel %vm4452_vm3, %v6207_v9, %v6209_v55 }
 0xbe1   : > { %8153 = vmatprep.mubr.msk.f32.mxu1 %vm2769_vm1, %v6196_v15  ;;  %v6115_v15 = vpop.permute.xlu0 %6114 }
 0xbe2   : > { %v6245_v43 = vsel %vm2769_vm1, %v16635_v28, %v6115_v15 }
 0xbe4   : > { %6484 = vmatmul.mubr.f32.gmra.mrb[76].mxu1 %v6237_v37  ;;  %v6212_v37 = vsel %vm4452_vm3, %v6209_v55, %v6211_v56 }
 0xbe5   : > { %8154 = vmatprep.mubr.msk.f32.mxu1 %vm2769_vm1, %v6198_v7  ;;  %v6117_v7 = vpop.permute.xlu1 %6116  ;;  %v6119_v4 = vpop.permute.xlu0 %6118 }
 0xbe6   : > { %v6246_v18 = vsel %vm2769_vm1, %v16636_v61, %v6117_v7 }
 0xbe8   : > { %6489 = vmatmul.mubr.f32.gmra.mrb[78].mxu1 %v6238_v62  ;;  %v6214_v62 = vsel %vm4452_vm3, %v6211_v56, %v6213_v26 }
 0xbe9   : > { %8155 = vmatprep.mubr.msk.f32.mxu1 %vm2769_vm1, %v6200_v8  ;;  %v6247_v8 = vsel %vm2769_vm1, %v16637_v57, %v6119_v4 }
 0xbec   : > { %6494 = vmatmul.mubr.f32.gmra.mrb[80].mxu1 %v6239_v31  ;;  %v6121_v31 = vpop.permute.xlu1 %6120 }
 0xbed   : > { %8156 = vmatprep.mubr.msk.f32.mxu1 %vm2769_vm1, %v6202_v63  ;;  %v6248_v13 = vsel %vm2769_vm1, %v16638_v2, %v6121_v31 }
 0xbf0   : > { %6499 = vmatmul.mubr.f32.gmra.mrb[82].mxu1 %v6240_v22 }
 0xbf1   : > { %8157 = vmatprep.mubr.msk.f32.mxu1 %vm2769_vm1, %v6204_v58 }
 0xbf4   : > { %6504 = vmatmul.mubr.f32.gmra.mrb[84].mxu1 %v6241_v47 }
 0xbf5   : > { %8158 = vmatprep.mubr.msk.f32.mxu1 %vm2769_vm1, %v6206_v60 }
 0xbf8   : > { %6509 = vmatmul.mubr.f32.gmra.mrb[86].mxu1 %v6242_v50 }
 0xbf9   : > { %8159 = vmatprep.mubr.msk.f32.mxu1 %vm2769_vm1, %v6208_v19 }
 0xbfc   : > { %6514 = vmatmul.mubr.f32.gmra.mrb[88].mxu1 %v6243_v21 }
 0xbfd   : > { %8160 = vmatprep.mubr.msk.f32.mxu1 %vm2769_vm1, %v6210_v45 }
 0xc00   : > { %6519 = vmatmul.mubr.f32.gmra.mrb[90].mxu1 %v6244_v0 }
 0xc01   : > { %8161 = vmatprep.mubr.msk.f32.mxu1 %vm2769_vm1, %v6212_v37 }
 0xc04   : > { %6524 = vmatmul.mubr.f32.gmra.mrb[92].mxu1 %v6245_v43 }
 0xc05   : > { %8162 = vmatprep.mubr.msk.f32.mxu1 %vm2769_vm1, %v6214_v62 }
 0xc08   : > { %6529 = vmatmul.mubr.f32.gmra.mrb[94].mxu1 %v6246_v18 }
 0xc09   : > { %8163 = vmatprep.mubr.msk.f32.mxu1 %vm2769_vm1, %v6216_v41 }
 0xc0c   : > { %6534 = vmatmul.mubr.f32.gmra.mrb[96].mxu1 %v6247_v8 }
 0xc0d   : > { %8164 = vmatprep.mubr.msk.f32.mxu1 %vm2769_vm1, %v6215_v49 }
 0xc10   : > { %6539 = vmatmul.mubr.f32.gmra.mrb[98].mxu1 %v6248_v13 }
 0xc37   : > { %v9028_v27 = vpop.f32.mrb[24].mxu1 }
 0xc38   : > { %v5603_v63 = vadd.f32 %v9028_v27, %v16639_v14  ;;  %v5597_v22 = vpop.f32.mrb[25].mxu1 }
 0xc39   : > { %v5598_v11 = vadd.f32 %v16639_v14, %v5597_v22 }
 0xc3a   : > { %v5657_v24 = vmax.f32 %v5603_v63, 0.0 }
 0xc3b   : > { %v5656_v54 = vmax.f32 %v5598_v11, 0.0 }
 0xc3c   : > { %v5681_v58 = vrot.slane %v5657_v24, 1 }
 0xc3d   : > { %v5680_v47 = vrot.slane %v5656_v54, 1 }
 0xc3f   : > { %v5682_v29 = vsel %vm4292_vm2, %v5680_v47, %v5681_v58  ;;  %v9031_v9 = vpop.f32.mrb[26].mxu1 }
 0xc40   : > { %v5715_v33 = vmax.f32 %v5656_v54, %v5682_v29  ;;  %v5613_v60 = vadd.f32 %v9031_v9, %v16639_v14  ;;  %v5607_v50 = vpop.f32.mrb[27].mxu1 }
 0xc41   : > { %v5608_v28 = vadd.f32 %v16639_v14, %v5607_v50 }
 0xc42   : > { %v5659_v55 = vmax.f32 %v5613_v60, 0.0 }
 0xc43   : > { %v5658_v10 = vmax.f32 %v5608_v28, 0.0 }
 0xc44   : > { %v5685_v19 = vrot.slane %v5659_v55, 1 }
 0xc45   : > { %v5683_v21 = vrot.slane %v5658_v10, 1 }
 0xc47   : > { %v5686_v61 = vsel %vm4292_vm2, %v5683_v21, %v5685_v19  ;;  %v9034_v56 = vpop.f32.mrb[28].mxu1  ;;  %v5684_v5 = vsel %vm4292_vm2, %v5681_v58, %v5683_v21 }
 0xc48   : > { %v5717_v45 = vmax.f32 %v5658_v10, %v5686_v61  ;;  %v5623_v0 = vadd.f32 %v9034_v56, %v16639_v14  ;;  %v5617_v57 = vpop.f32.mrb[29].mxu1  ;;  %v5716_v26 = vmax.f32 %v5657_v24, %v5684_v5 }
 0xc49   : > { %v5618_v15 = vadd.f32 %v16639_v14, %v5617_v57 }
 0xc4a   : > { %v5661_v37 = vmax.f32 %v5623_v0, 0.0  ;;  %v9266_v43 = vpack.c.bf16 %v5716_v26, %v5715_v33 }
 0xc4b   : > { %v5660_v2 = vmax.f32 %v5618_v15, 0.0 }
 0xc4c   : > { %v5689_v49 = vrot.slane %v5661_v37, 1  ;;  %9267 = vmatprep.subr.bf16.mxu0 %v9266_v43 }
 0xc4d   : > { %v5687_v7 = vrot.slane %v5660_v2, 1  ;;  %9269 = vmatpush3.bf16.msra.mxu0 %v9266_v43 }
 0xc4f   : > { %v5690_v62 = vsel %vm4292_vm2, %v5687_v7, %v5689_v49  ;;  %v9037_v18 = vpop.f32.mrb[30].mxu1  ;;  %v5688_v4 = vsel %vm4292_vm2, %v5685_v19, %v5687_v7 }
 0xc50   : > { %v5719_v41 = vmax.f32 %v5660_v2, %v5690_v62  ;;  %v5633_v8 = vadd.f32 %v9037_v18, %v16639_v14  ;;  %v5627_v31 = vpop.f32.mrb[31].mxu1  ;;  %v5718_v13 = vmax.f32 %v5659_v55, %v5688_v4 }
 0xc51   : > { %v5628_v27 = vadd.f32 %v16639_v14, %v5627_v31 }
 0xc52   : > { %v5663_v63 = vmax.f32 %v5633_v8, 0.0  ;;  %v9270_v22 = vpack.c.bf16 %v5718_v13, %v5717_v45  ;;  %v16640_v13 = vld [vmem:[#allocation85_spill] sm:$0xff] }
 0xc53   : > { %v5662_v11 = vmax.f32 %v5628_v27, 0.0 }
 0xc54   : > { %v5693_v24 = vrot.slane %v5663_v63, 1  ;;  %9271 = vmatprep.subr.bf16.mxu0 %v9270_v22 }
 0xc55   : > { %v5691_v54 = vrot.slane %v5662_v11, 1  ;;  %9273 = vmatpush3.bf16.msra.mxu0 %v9270_v22 }
 0xc57   : > { %v5694_v58 = vsel %vm4292_vm2, %v5691_v54, %v5693_v24  ;;  %v9040_v47 = vpop.f32.mrb[32].mxu1  ;;  %v5692_v29 = vsel %vm4292_vm2, %v5689_v49, %v5691_v54 }
 0xc58   : > { %v5721_v9 = vmax.f32 %v5662_v11, %v5694_v58  ;;  %v5643_v33 = vadd.f32 %v9040_v47, %v16639_v14  ;;  %v5637_v60 = vpop.f32.mrb[33].mxu1  ;;  %v5720_v50 = vmax.f32 %v5661_v37, %v5692_v29  ;;  %v16641_v58 = vmov 0 }
 0xc59   : > { %v5638_v28 = vadd.f32 %v16639_v14, %v5637_v60  ;;  %v16642_v58 = vsel %vm14985_vm10, 4294967295, %v16641_v58  ;;  %v16645_v60 = vld [vmem:[#allocation96_spill] sm:$0xff] }
 0xc5a   : > { %v5665_v55 = vmax.f32 %v5643_v33, 0.0  ;;  %v9274_v10 = vpack.c.bf16 %v5720_v50, %v5719_v41  ;;  %16643 = vst [vmem:[#allocation42_spill] sm:$0xff] %v16642_v58  ;;  %v16644_v33 = vld [vmem:[#allocation95_spill] sm:$0xff] }
 0xc5b   : > { %v5664_v19 = vmax.f32 %v5638_v28, 0.0  ;;  %v9292_v50 = vpack.c.bf16 %v16645_v60, %v16644_v33 }
 0xc5c   : > { %v5697_v21 = vrot.slane %v5665_v55, 1  ;;  %9275 = vmatprep.subr.bf16.mxu0 %v9274_v10 }
 0xc5d   : > { %v5695_v61 = vrot.slane %v5664_v19, 1  ;;  %9277 = vmatpush3.bf16.msra.mxu0 %v9274_v10 }
 0xc5f   : > { %v5698_v56 = vsel %vm4292_vm2, %v5695_v61, %v5697_v21  ;;  %v9043_v5 = vpop.f32.mrb[34].mxu1  ;;  %v5696_v45 = vsel %vm4292_vm2, %v5693_v24, %v5695_v61 }
 0xc60   : > { %v5723_v0 = vmax.f32 %v5664_v19, %v5698_v56  ;;  %v5653_v57 = vadd.f32 %v9043_v5, %v16639_v14  ;;  %v5647_v26 = vpop.f32.mrb[35].mxu1  ;;  %v5722_v15 = vmax.f32 %v5663_v63, %v5696_v45 }
 0xc61   : > { %v5648_v37 = vadd.f32 %v16639_v14, %v5647_v26  ;;  %v16647_v26 = vld [vmem:[#allocation98_spill] sm:$0xff] }
 0xc62   : > { %v5667_v43 = vmax.f32 %v5653_v57, 0.0  ;;  %v9278_v2 = vpack.c.bf16 %v5722_v15, %v5721_v9  ;;  %v16646_v57 = vld [vmem:[#allocation97_spill] sm:$0xff] }
 0xc63   : > { %v5666_v49 = vmax.f32 %v5648_v37, 0.0  ;;  %v9296_v15 = vpack.c.bf16 %v16647_v26, %v16646_v57 }
 0xc64   : > { %v5701_v7 = vrot.slane %v5667_v43, 1  ;;  %9279 = vmatprep.subr.bf16.mxu0 %v9278_v2 }
 0xc65   : > { %v5699_v62 = vrot.slane %v5666_v49, 1  ;;  %9281 = vmatpush3.bf16.msra.mxu0 %v9278_v2 }
 0xc66   : > { %v5726_v8 = vmax.f32 %v5667_v43, %v5701_v7 }
 0xc67   : > { %v5702_v18 = vsel %vm4292_vm2, %v5699_v62, %v5701_v7  ;;  %v6385_v4 = vpop.f32.mrb[36].mxu1  ;;  %v5700_v41 = vsel %vm4292_vm2, %v5697_v21, %v5699_v62 }
 0xc68   : > { %v5725_v31 = vmax.f32 %v5666_v49, %v5702_v18  ;;  %v6386_v27 = vadd.f32 %v16640_v13, %v6385_v4  ;;  %v6387_v22 = vpop.f32.mrb[37].mxu1  ;;  %v5724_v63 = vmax.f32 %v5665_v55, %v5700_v41  ;;  %v16648_v18 = vld [vmem:[#allocation134_spill] sm:$0xff]  ;;  %v16649_v4 = vld [vmem:[#allocation135_spill] sm:$0xff] }
 0xc6a   : > { %v9286_v11 = vpack.c.bf16 %v5726_v8, %v5725_v31  ;;  %v9282_v14 = vpack.c.bf16 %v5724_v63, %v5723_v0  ;;  %v6544_v24 = vmax.f32 %v6386_v27, 0.0 }
 0xc6b   : > { %v6390_v54 = vpop.f32.mrb[38].mxu1 }
 0xc6c   : > { %v6391_v47 = vadd.f32 %v16640_v13, %v6390_v54  ;;  %v6392_v29 = vpop.f32.mrb[39].mxu1  ;;  %9283 = vmatprep.subr.bf16.mxu0 %v9282_v14  ;;  %v6608_v28 = vrot.slane %v6544_v24, 1  ;;  %v6735_v10 = vrot.slane %v6544_v24, 2 }
 0xc6d   : > { %9285 = vmatpush3.bf16.msra.mxu0 %v9282_v14  ;;  %v16651_v29 = vld [vmem:[#allocation137_spill] sm:$0xff] }
 0xc6e   : > { %v6545_v9 = vmax.f32 %v6391_v47, 0.0  ;;  %9288 = vmatprep.subr.msk.bf16.mxu0 %vm14985_vm10, %v9286_v11  ;;  %v16650_v47 = vld [vmem:[#allocation136_spill] sm:$0xff] }
 0xc6f   : > { %v6395_v55 = vpop.f32.mrb[40].mxu1 }
 0xc70   : > { %v6609_v19 = vrot.slane %v6545_v9, 1  ;;  %v6736_v21 = vrot.slane %v6545_v9, 2  ;;  %v6396_v61 = vadd.f32 %v16640_v13, %v6395_v55  ;;  %v6397_v56 = vpop.f32.mrb[41].mxu1 }
 0xc71   : > { %9291 = vmatpush3.bf16.msk.msra.mxu0 %vm14985_vm10, %v9286_v11 }
 0xc72   : > { %v6610_v5 = vsel %vm4292_vm2, %v6608_v28, %v6609_v19  ;;  %v6737_v45 = vsel %vm4452_vm3, %v6735_v10, %v6736_v21  ;;  %v6546_v0 = vmax.f32 %v6396_v61, 0.0  ;;  %9293 = vmatprep.subr.bf16.mxu0 %v9292_v50 }
 0xc73   : > { %v6703_v37 = vmax.f32 %v6544_v24, %v6610_v5  ;;  %v6400_v43 = vpop.f32.mrb[42].mxu1  ;;  %v16652_v5 = vld [vmem:[#allocation138_spill] sm:$0xff] }
 0xc74   : > { %v6611_v2 = vrot.slane %v6546_v0, 1  ;;  %v6738_v49 = vrot.slane %v6546_v0, 2  ;;  %v6401_v7 = vadd.f32 %v16640_v13, %v6400_v43  ;;  %v6402_v62 = vpop.f32.mrb[43].mxu1  ;;  %9069 = vmatmul.mubr.msk.f32.vlgmr.msra.gmra.mrb[32].mxu0 %vm5727_vm9, %v16648_v18 }
 0xc75   : > { %9071 = vmatprep.mubr.msk.f32.mxu0 %vm5727_vm9, %v16649_v4  ;;  %9295 = vmatpush3.bf16.msra.mxu0 %v9292_v50  ;;  %v15006_v41 = vmax.f32 %v6703_v37, %v6737_v45 }
 0xc76   : > { %v6612_v8 = vsel %vm4292_vm2, %v6609_v19, %v6611_v2  ;;  %v6739_v31 = vsel %vm4452_vm3, %v6736_v21, %v6738_v49  ;;  %v6547_v27 = vmax.f32 %v6401_v7, 0.0  ;;  %9297 = vmatprep.subr.bf16.mxu0 %v9296_v15 }
 0xc77   : > { %v6704_v22 = vmax.f32 %v6545_v9, %v6612_v8  ;;  %v6405_v63 = vpop.f32.mrb[44].mxu1 }
 0xc78   : > { %v6613_v11 = vrot.slane %v6547_v27, 1  ;;  %v6740_v14 = vrot.slane %v6547_v27, 2  ;;  %v6406_v24 = vadd.f32 %v16640_v13, %v6405_v63  ;;  %v6407_v54 = vpop.f32.mrb[45].mxu1  ;;  %9072 = vmatmul.mubr.msk.f32.gmra.mrb[34].mxu0 %vm5727_vm9, %v16650_v47 }
 0xc79   : > { %9074 = vmatprep.mubr.msk.f32.mxu0 %vm5727_vm9, %v16651_v29  ;;  %9299 = vmatpush3.bf16.msra.mxu0 %v9296_v15  ;;  %v15015_v33 = vmax.f32 %v6704_v22, %v6739_v31 }
 0xc7a   : > { %v6614_v60 = vsel %vm4292_vm2, %v6611_v2, %v6613_v11  ;;  %v6741_v50 = vsel %vm4452_vm3, %v6738_v49, %v6740_v14  ;;  %v6548_v9 = vmax.f32 %v6406_v24, 0.0 }
 0xc7b   : > { %v6705_v28 = vmax.f32 %v6546_v0, %v6614_v60  ;;  %v6410_v55 = vpop.f32.mrb[46].mxu1 }
 0xc7c   : > { %v6615_v19 = vrot.slane %v6548_v9, 1  ;;  %v6742_v21 = vrot.slane %v6548_v9, 2  ;;  %v6411_v61 = vadd.f32 %v16640_v13, %v6410_v55  ;;  %v6412_v56 = vpop.f32.mrb[47].mxu1  ;;  %9075 = vmatmul.mubr.msk.f32.gmra.mrb[36].mxu0 %vm5727_vm9, %v16652_v5 }
 0xc7d   : > { %v15024_v45 = vmax.f32 %v6705_v28, %v6741_v50 }
 0xc7e   : > { %v6616_v57 = vsel %vm4292_vm2, %v6613_v11, %v6615_v19  ;;  %v6743_v26 = vsel %vm4452_vm3, %v6740_v14, %v6742_v21  ;;  %v6549_v15 = vmax.f32 %v6411_v61, 0.0 }
 0xc7f   : > { %v6706_v0 = vmax.f32 %v6547_v27, %v6616_v57  ;;  %v6415_v37 = vpop.f32.mrb[48].mxu1 }
 0xc80   : > { %v6617_v43 = vrot.slane %v6549_v15, 1  ;;  %v6744_v2 = vrot.slane %v6549_v15, 2  ;;  %v6416_v49 = vadd.f32 %v16640_v13, %v6415_v37  ;;  %v6417_v7 = vpop.f32.mrb[49].mxu1 }
 0xc81   : > { %v15029_v62 = vmax.f32 %v6706_v0, %v6743_v26 }
 0xc82   : > { %v6618_v8 = vsel %vm4292_vm2, %v6615_v19, %v6617_v43  ;;  %v6745_v31 = vsel %vm4452_vm3, %v6742_v21, %v6744_v2  ;;  %v6550_v22 = vmax.f32 %v6416_v49, 0.0 }
 0xc83   : > { %v6707_v63 = vmax.f32 %v6548_v9, %v6618_v8  ;;  %v6420_v24 = vpop.f32.mrb[50].mxu1 }
 0xc84   : > { %v6619_v14 = vrot.slane %v6550_v22, 1  ;;  %v6746_v27 = vrot.slane %v6550_v22, 2  ;;  %v6421_v54 = vadd.f32 %v16640_v13, %v6420_v24  ;;  %v6422_v60 = vpop.f32.mrb[51].mxu1 }
 0xc85   : > { %v15036_v50 = vmax.f32 %v6707_v63, %v6745_v31 }
 0xc86   : > { %v6620_v28 = vsel %vm4292_vm2, %v6617_v43, %v6619_v14  ;;  %v6747_v55 = vsel %vm4452_vm3, %v6744_v2, %v6746_v27  ;;  %v6551_v19 = vmax.f32 %v6421_v54, 0.0 }
 0xc87   : > { %v6708_v61 = vmax.f32 %v6549_v15, %v6620_v28  ;;  %v6425_v21 = vpop.f32.mrb[52].mxu1 }
 0xc88   : > { %v6621_v56 = vrot.slane %v6551_v19, 1  ;;  %v6748_v9 = vrot.slane %v6551_v19, 2  ;;  %v6426_v57 = vadd.f32 %v16640_v13, %v6425_v21  ;;  %v6427_v26 = vpop.f32.mrb[53].mxu1 }
 0xc89   : > { %v15041_v0 = vmax.f32 %v6708_v61, %v6747_v55 }
 0xc8a   : > { %v6622_v37 = vsel %vm4292_vm2, %v6619_v14, %v6621_v56  ;;  %v6749_v49 = vsel %vm4452_vm3, %v6746_v27, %v6748_v9  ;;  %v6552_v7 = vmax.f32 %v6426_v57, 0.0 }
 0xc8b   : > { %v6709_v8 = vmax.f32 %v6550_v22, %v6622_v37  ;;  %v6430_v31 = vpop.f32.mrb[54].mxu1 }
 0xc8c   : > { %v6623_v2 = vrot.slane %v6552_v7, 1  ;;  %v6750_v15 = vrot.slane %v6552_v7, 2  ;;  %v6431_v63 = vadd.f32 %v16640_v13, %v6430_v31  ;;  %v6432_v24 = vpop.f32.mrb[55].mxu1 }
 0xc8d   : > { %v15048_v54 = vmax.f32 %v6709_v8, %v6749_v49 }
 0xc8e   : > { %v6624_v60 = vsel %vm4292_vm2, %v6621_v56, %v6623_v2  ;;  %v6751_v28 = vsel %vm4452_vm3, %v6748_v9, %v6750_v15  ;;  %v6553_v14 = vmax.f32 %v6431_v63, 0.0 }
 0xc8f   : > { %v6710_v55 = vmax.f32 %v6551_v19, %v6624_v60  ;;  %v6435_v27 = vpop.f32.mrb[56].mxu1 }
 0xc90   : > { %v6625_v61 = vrot.slane %v6553_v14, 1  ;;  %v6752_v22 = vrot.slane %v6553_v14, 2  ;;  %v6436_v21 = vadd.f32 %v16640_v13, %v6435_v27  ;;  %v6437_v57 = vpop.f32.mrb[57].mxu1 }
 0xc91   : > { %v15053_v26 = vmax.f32 %v6710_v55, %v6751_v28 }
 0xc92   : > { %v6626_v37 = vsel %vm4292_vm2, %v6623_v2, %v6625_v61  ;;  %v6753_v31 = vsel %vm4452_vm3, %v6750_v15, %v6752_v22  ;;  %v6554_v49 = vmax.f32 %v6436_v21, 0.0 }
 0xc93   : > { %v6711_v8 = vmax.f32 %v6552_v7, %v6626_v37  ;;  %v6440_v24 = vpop.f32.mrb[58].mxu1 }
 0xc94   : > { %v6627_v9 = vrot.slane %v6554_v49, 1  ;;  %v6754_v19 = vrot.slane %v6554_v49, 2  ;;  %v6441_v63 = vadd.f32 %v16640_v13, %v6440_v24  ;;  %v6442_v60 = vpop.f32.mrb[59].mxu1 }
 0xc95   : > { %v15060_v43 = vmax.f32 %v6711_v8, %v6753_v31 }
 0xc96   : > { %v6628_v28 = vsel %vm4292_vm2, %v6625_v61, %v6627_v9  ;;  %v6755_v55 = vsel %vm4452_vm3, %v6752_v22, %v6754_v19  ;;  %v6555_v2 = vmax.f32 %v6441_v63, 0.0 }
 0xc97   : > { %v6712_v27 = vmax.f32 %v6553_v14, %v6628_v28  ;;  %v6445_v15 = vpop.f32.mrb[60].mxu1 }
 0xc98   : > { %v6629_v21 = vrot.slane %v6555_v2, 1  ;;  %v6756_v7 = vrot.slane %v6555_v2, 2  ;;  %v6446_v57 = vadd.f32 %v16640_v13, %v6445_v15  ;;  %v6447_v37 = vpop.f32.mrb[61].mxu1 }
 0xc99   : > { %v15065_v56 = vmax.f32 %v6712_v27, %v6755_v55 }
 0xc9a   : > { %v6630_v11 = vsel %vm4292_vm2, %v6627_v9, %v6629_v21  ;;  %v6757_v24 = vsel %vm4452_vm3, %v6754_v19, %v6756_v7  ;;  %v6556_v31 = vmax.f32 %v6446_v57, 0.0 }
 0xc9b   : > { %v6713_v8 = vmax.f32 %v6554_v49, %v6630_v11  ;;  %v6450_v60 = vpop.f32.mrb[62].mxu1 }
 0xc9c   : > { %v6631_v22 = vrot.slane %v6556_v31, 1  ;;  %v6758_v14 = vrot.slane %v6556_v31, 2  ;;  %v6451_v63 = vadd.f32 %v16640_v13, %v6450_v60  ;;  %v6452_v28 = vpop.f32.mrb[63].mxu1 }
 0xc9d   : > { %v15072_v10 = vmax.f32 %v6713_v8, %v6757_v24 }
 0xc9e   : > { %v6632_v55 = vsel %vm4292_vm2, %v6629_v21, %v6631_v22  ;;  %v6759_v27 = vsel %vm4452_vm3, %v6756_v7, %v6758_v14  ;;  %v6557_v9 = vmax.f32 %v6451_v63, 0.0 }
 0xc9f   : > { %v6714_v15 = vmax.f32 %v6555_v2, %v6632_v55  ;;  %v6455_v19 = vpop.f32.mrb[64].mxu1 }
 0xca0   : > { %v6633_v57 = vrot.slane %v6557_v9, 1  ;;  %v6760_v11 = vrot.slane %v6557_v9, 2  ;;  %v6456_v49 = vadd.f32 %v16640_v13, %v6455_v19  ;;  %v6457_v37 = vpop.f32.mrb[65].mxu1 }
 0xca1   : > { %v15077_v61 = vmax.f32 %v6714_v15, %v6759_v27 }
 0xca2   : > { %v6634_v5 = vsel %vm4292_vm2, %v6631_v22, %v6633_v57  ;;  %v6761_v60 = vsel %vm4452_vm3, %v6758_v14, %v6760_v11  ;;  %v6558_v24 = vmax.f32 %v6456_v49, 0.0 }
 0xca3   : > { %v6715_v8 = vmax.f32 %v6556_v31, %v6634_v5  ;;  %v6460_v28 = vpop.f32.mrb[66].mxu1 }
 0xca4   : > { %v6635_v7 = vrot.slane %v6558_v24, 1  ;;  %v6762_v2 = vrot.slane %v6558_v24, 2  ;;  %v6461_v63 = vadd.f32 %v16640_v13, %v6460_v28  ;;  %v6462_v55 = vpop.f32.mrb[67].mxu1 }
 0xca5   : > { %v15084_v29 = vmax.f32 %v6715_v8, %v6761_v60 }
 0xca6   : > { %v6636_v27 = vsel %vm4292_vm2, %v6633_v57, %v6635_v7  ;;  %v6763_v15 = vsel %vm4452_vm3, %v6760_v11, %v6762_v2  ;;  %v6559_v22 = vmax.f32 %v6461_v63, 0.0 }
 0xca7   : > { %v6716_v19 = vmax.f32 %v6557_v9, %v6636_v27  ;;  %v6465_v14 = vpop.f32.mrb[68].mxu1 }
 0xca8   : > { %v6637_v49 = vrot.slane %v6559_v22, 1  ;;  %v6764_v5 = vrot.slane %v6559_v22, 2  ;;  %v6466_v31 = vadd.f32 %v16640_v13, %v6465_v14  ;;  %v6467_v37 = vpop.f32.mrb[69].mxu1 }
 0xca9   : > { %v15089_v21 = vmax.f32 %v6716_v19, %v6763_v15 }
 0xcaa   : > { %v6638_v47 = vsel %vm4292_vm2, %v6635_v7, %v6637_v49  ;;  %v6765_v28 = vsel %vm4452_vm3, %v6762_v2, %v6764_v5  ;;  %v6560_v60 = vmax.f32 %v6466_v31, 0.0 }
 0xcab   : > { %v6717_v8 = vmax.f32 %v6558_v24, %v6638_v47  ;;  %v6470_v55 = vpop.f32.mrb[70].mxu1 }
 0xcac   : > { %v6639_v11 = vrot.slane %v6560_v60, 1  ;;  %v6766_v9 = vrot.slane %v6560_v60, 2  ;;  %v6471_v63 = vadd.f32 %v16640_v13, %v6470_v55  ;;  %v6472_v27 = vpop.f32.mrb[71].mxu1 }
 0xcad   : > { %v15096_v4 = vmax.f32 %v6717_v8, %v6765_v28 }
 0xcae   : > { %v6640_v15 = vsel %vm4292_vm2, %v6637_v49, %v6639_v11  ;;  %v6767_v19 = vsel %vm4452_vm3, %v6764_v5, %v6766_v9  ;;  %v6561_v7 = vmax.f32 %v6471_v63, 0.0 }
 0xcaf   : > { %v6718_v14 = vmax.f32 %v6559_v22, %v6640_v15  ;;  %v6475_v2 = vpop.f32.mrb[72].mxu1 }
 0xcb0   : > { %v6641_v31 = vrot.slane %v6561_v7, 1  ;;  %v6768_v47 = vrot.slane %v6561_v7, 2  ;;  %v6476_v24 = vadd.f32 %v16640_v13, %v6475_v2  ;;  %v6477_v37 = vpop.f32.mrb[73].mxu1 }
 0xcb1   : > { %v15101_v57 = vmax.f32 %v6718_v14, %v6767_v19 }
 0xcb2   : > { %v6562_v18 = vmax.f32 %v6476_v24, 0.0  ;;  %v6642_v55 = vsel %vm4292_vm2, %v6639_v11, %v6641_v31  ;;  %v6769_v28 = vsel %vm4452_vm3, %v6766_v9, %v6768_v47 }
 0xcb3   : > { %v6480_v8 = vpop.f32.mrb[74].mxu1  ;;  %v6719_v27 = vmax.f32 %v6560_v60, %v6642_v55 }
 0xcb4   : > { %v6643_v5 = vrot.slane %v6562_v18, 1  ;;  %v6770_v22 = vrot.slane %v6562_v18, 2  ;;  %v6481_v63 = vadd.f32 %v16640_v13, %v6480_v8  ;;  %v6482_v15 = vpop.f32.mrb[75].mxu1 }
 0xcb5   : > { %v6846_v58 = vmax.f32 %v6719_v27, %v6769_v28 }
 0xcb6   : > { %v6563_v2 = vmax.f32 %v6481_v63, 0.0  ;;  %v6644_v19 = vsel %vm4292_vm2, %v6641_v31, %v6643_v5  ;;  %v6771_v14 = vsel %vm4452_vm3, %v6768_v47, %v6770_v22 }
 0xcb7   : > { %v6485_v24 = vpop.f32.mrb[76].mxu1  ;;  %v6720_v11 = vmax.f32 %v6561_v7, %v6644_v19 }
 0xcb8   : > { %v6645_v37 = vrot.slane %v6563_v2, 1  ;;  %v6772_v9 = vrot.slane %v6563_v2, 2  ;;  %v6486_v60 = vadd.f32 %v16640_v13, %v6485_v24  ;;  %v6487_v55 = vpop.f32.mrb[77].mxu1 }
 0xcb9   : > { %v6847_v17 = vmax.f32 %v6720_v11, %v6771_v14 }
 0xcba   : > { %v6564_v49 = vmax.f32 %v6486_v60, 0.0  ;;  %v6646_v59 = vsel %vm4292_vm2, %v6643_v5, %v6645_v37  ;;  %v6773_v8 = vsel %vm4452_vm3, %v6770_v22, %v6772_v9 }
 0xcbb   : > { %v6490_v15 = vpop.f32.mrb[78].mxu1  ;;  %v9336_v28 = vpack.c.bf16 %v6847_v17, %v6846_v58  ;;  %v6721_v27 = vmax.f32 %v6562_v18, %v6646_v59 }
 0xcbc   : > { %v6647_v63 = vrot.slane %v6564_v49, 1  ;;  %v6774_v31 = vrot.slane %v6564_v49, 2  ;;  %v6491_v47 = vadd.f32 %v16640_v13, %v6490_v15  ;;  %v6492_v1 = vpop.f32.mrb[79].mxu1 }
 0xcbd   : > { %9337 = vmatprep.subr.bf16.mxu0 %v9336_v28  ;;  %v15114_v7 = vmax.f32 %v6721_v27, %v6773_v8 }
 0xcbe   : > { %v6565_v19 = vmax.f32 %v6491_v47, 0.0  ;;  %v6648_v24 = vsel %vm4292_vm2, %v6645_v37, %v6647_v63  ;;  %v6775_v14 = vsel %vm4452_vm3, %v6772_v9, %v6774_v31 }
 0xcbf   : > { %v6495_v11 = vpop.f32.mrb[80].mxu1  ;;  %v6722_v5 = vmax.f32 %v6563_v2, %v6648_v24 }
 0xcc0   : > { %v6649_v60 = vrot.slane %v6565_v19, 1  ;;  %v6776_v22 = vrot.slane %v6565_v19, 2  ;;  %v6496_v17 = vadd.f32 %v16640_v13, %v6495_v11  ;;  %v6497_v59 = vpop.f32.mrb[81].mxu1 }
 0xcc1   : > { %v15119_v58 = vmax.f32 %v6722_v5, %v6775_v14 }
 0xcc2   : > { %v6566_v18 = vmax.f32 %v6496_v17, 0.0  ;;  %v6650_v1 = vsel %vm4292_vm2, %v6647_v63, %v6649_v60  ;;  %v6777_v55 = vsel %vm4452_vm3, %v6774_v31, %v6776_v22 }
 0xcc3   : > { %v6500_v8 = vpop.f32.mrb[82].mxu1  ;;  %v6723_v15 = vmax.f32 %v6564_v49, %v6650_v1 }
 0xcc4   : > { %v6651_v9 = vrot.slane %v6566_v18, 1  ;;  %v6778_v28 = vrot.slane %v6566_v18, 2  ;;  %v6501_v2 = vadd.f32 %v16640_v13, %v6500_v8  ;;  %v6502_v27 = vpop.f32.mrb[83].mxu1 }
 0xcc5   : > { %v15126_v47 = vmax.f32 %v6723_v15, %v6777_v55 }
 0xcc6   : > { %v6567_v24 = vmax.f32 %v6501_v2, 0.0  ;;  %v6652_v14 = vsel %vm4292_vm2, %v6649_v60, %v6651_v9  ;;  %v6779_v11 = vsel %vm4452_vm3, %v6776_v22, %v6778_v28 }
 0xcc7   : > { %v6505_v63 = vpop.f32.mrb[84].mxu1  ;;  %v6724_v5 = vmax.f32 %v6565_v19, %v6652_v14 }
 0xcc8   : > { %v6653_v31 = vrot.slane %v6567_v24, 1  ;;  %v6780_v17 = vrot.slane %v6567_v24, 2  ;;  %v6506_v59 = vadd.f32 %v16640_v13, %v6505_v63  ;;  %v6507_v37 = vpop.f32.mrb[85].mxu1 }
 0xcc9   : > { %v15131_v49 = vmax.f32 %v6724_v5, %v6779_v11 }
 0xcca   : > { %v6568_v1 = vmax.f32 %v6506_v59, 0.0  ;;  %v6654_v8 = vsel %vm4292_vm2, %v6651_v9, %v6653_v31  ;;  %v6781_v55 = vsel %vm4452_vm3, %v6778_v28, %v6780_v17 }
 0xccb   : > { %v6510_v15 = vpop.f32.mrb[86].mxu1  ;;  %v6725_v2 = vmax.f32 %v6566_v18, %v6654_v8 }
 0xccc   : > { %v6655_v22 = vrot.slane %v6568_v1, 1  ;;  %v6782_v27 = vrot.slane %v6568_v1, 2  ;;  %v6511_v19 = vadd.f32 %v16640_v13, %v6510_v15  ;;  %v6512_v14 = vpop.f32.mrb[87].mxu1 }
 0xccd   : > { %v15138_v52 = vmax.f32 %v6725_v2, %v6781_v55 }
 0xcce   : > { %v6569_v37 = vmax.f32 %v6511_v19, 0.0  ;;  %v6656_v11 = vsel %vm4292_vm2, %v6653_v31, %v6655_v22  ;;  %v6783_v63 = vsel %vm4452_vm3, %v6780_v17, %v6782_v27 }
 0xccf   : > { %v6515_v9 = vpop.f32.mrb[88].mxu1  ;;  %v6726_v5 = vmax.f32 %v6567_v24, %v6656_v11 }
 0xcd0   : > { %v6657_v28 = vrot.slane %v6569_v37, 1  ;;  %v6784_v59 = vrot.slane %v6569_v37, 2  ;;  %v6516_v20 = vadd.f32 %v16640_v13, %v6515_v9  ;;  %v6517_v60 = vpop.f32.mrb[89].mxu1 }
 0xcd1   : > { %v15143_v18 = vmax.f32 %v6726_v5, %v6783_v63 }
 0xcd2   : > { %v6570_v8 = vmax.f32 %v6516_v20, 0.0  ;;  %v6658_v15 = vsel %vm4292_vm2, %v6655_v22, %v6657_v28  ;;  %v6785_v55 = vsel %vm4452_vm3, %v6782_v27, %v6784_v59 }
 0xcd3   : > { %v6520_v2 = vpop.f32.mrb[90].mxu1  ;;  %v6727_v19 = vmax.f32 %v6568_v1, %v6658_v15 }
 0xcd4   : > { %v6659_v17 = vrot.slane %v6570_v8, 1  ;;  %v6786_v14 = vrot.slane %v6570_v8, 2  ;;  %v6521_v24 = vadd.f32 %v16640_v13, %v6520_v2  ;;  %v6522_v11 = vpop.f32.mrb[91].mxu1 }
 0xcd5   : > { %v15150_v36 = vmax.f32 %v6727_v19, %v6785_v55 }
 0xcd6   : > { %v6571_v60 = vmax.f32 %v6521_v24, 0.0  ;;  %v6660_v63 = vsel %vm4292_vm2, %v6657_v28, %v6659_v17  ;;  %v6787_v20 = vsel %vm4452_vm3, %v6784_v59, %v6786_v14 }
 0xcd7   : > { %v6525_v22 = vpop.f32.mrb[92].mxu1  ;;  %v6728_v9 = vmax.f32 %v6569_v37, %v6660_v63 }
 0xcd8   : > { %v6661_v27 = vrot.slane %v6571_v60, 1  ;;  %v6788_v5 = vrot.slane %v6571_v60, 2  ;;  %v6526_v32 = vadd.f32 %v16640_v13, %v6525_v22  ;;  %v6527_v31 = vpop.f32.mrb[93].mxu1 }
 0xcd9   : > { %v15155_v1 = vmax.f32 %v6728_v9, %v6787_v20 }
 0xcda   : > { %v6572_v15 = vmax.f32 %v6526_v32, 0.0  ;;  %v6662_v2 = vsel %vm4292_vm2, %v6659_v17, %v6661_v27  ;;  %v6789_v55 = vsel %vm4452_vm3, %v6786_v14, %v6788_v5 }
 0xcdb   : > { %v6530_v19 = vpop.f32.mrb[94].mxu1  ;;  %v9352_v28 = vpack.c.bf16 %v15155_v1, %v15150_v36  ;;  %v6729_v24 = vmax.f32 %v6570_v8, %v6662_v2 }
 0xcdc   : > { %v6663_v59 = vrot.slane %v6572_v15, 1  ;;  %v6790_v11 = vrot.slane %v6572_v15, 2  ;;  %v6531_v37 = vadd.f32 %v16640_v13, %v6530_v19  ;;  %v6532_v63 = vpop.f32.mrb[95].mxu1 }
 0xcdd   : > { %v6856_v46 = vmax.f32 %v6729_v24, %v6789_v55 }
 0xcde   : > { %v6573_v22 = vmax.f32 %v6531_v37, 0.0  ;;  %v6664_v31 = vsel %vm4292_vm2, %v6661_v27, %v6663_v59  ;;  %v6791_v32 = vsel %vm4452_vm3, %v6788_v5, %v6790_v11 }
 0xcdf   : > { %v6535_v20 = vpop.f32.mrb[96].mxu1  ;;  %v6730_v17 = vmax.f32 %v6571_v60, %v6664_v31 }
 0xce0   : > { %v6665_v9 = vrot.slane %v6573_v22, 1  ;;  %v6792_v14 = vrot.slane %v6573_v22, 2  ;;  %v6536_v12 = vadd.f32 %v16640_v13, %v6535_v20  ;;  %v6537_v39 = vpop.f32.mrb[97].mxu1 }
 0xce1   : > { %v6857_v36 = vmax.f32 %v6730_v17, %v6791_v32 }
 0xce2   : > { %v6574_v8 = vmax.f32 %v6536_v12, 0.0  ;;  %v6666_v1 = vsel %vm4292_vm2, %v6663_v59, %v6665_v9  ;;  %v6793_v2 = vsel %vm4452_vm3, %v6790_v11, %v6792_v14 }
 0xce3   : > { %v6540_v19 = vpop.f32.mrb[98].mxu1  ;;  %v9356_v55 = vpack.c.bf16 %v6857_v36, %v6856_v46  ;;  %v6731_v24 = vmax.f32 %v6572_v15, %v6666_v1 }
 0xce4   : > { %v6667_v37 = vrot.slane %v6574_v8, 1  ;;  %v6794_v27 = vrot.slane %v6574_v8, 2  ;;  %v6541_v5 = vadd.f32 %v16640_v13, %v6540_v19  ;;  %v6542_v63 = vpop.f32.mrb[99].mxu1 }
 0xce5   : > { %v6858_v60 = vmax.f32 %v6731_v24, %v6793_v2 }
 0xce6   : > { %v6575_v31 = vmax.f32 %v6541_v5, 0.0  ;;  %v6668_v30 = vsel %vm4292_vm2, %v6665_v9, %v6667_v37  ;;  %v6795_v39 = vsel %vm4452_vm3, %v6792_v14, %v6794_v27  ;;  %v16654_v9 = vpack.c.bf16 %v15119_v58, %v15114_v7  ;;  %v16658_v7 = vld [vmem:[#allocation110_spill] sm:$0xff] }
 0xce7   : > { %v6732_v32 = vmax.f32 %v6573_v22, %v6668_v30  ;;  %v16653_v30 = vpack.c.bf16 %v15015_v33, %v15006_v41  ;;  %v16657_v33 = vpack.c.bf16 %v15041_v0, %v15036_v50  ;;  %v16661_v58 = vpack.c.bf16 %v15065_v56, %v15060_v43  ;;  %v16680_v43 = vld [vmem:[#allocation91_spill] sm:$0xff]  ;;  %v16682_v56 = vld [vmem:[#allocation93_spill] sm:$0xff] }
 0xce8   : > { %v6669_v12 = vrot.slane %v6575_v31, 1  ;;  %v6796_v20 = vrot.slane %v6575_v31, 2  ;;  %v16662_v50 = vpack.c.bf16 %v15077_v61, %v15072_v10  ;;  %v16663_v0 = vpack.c.bf16 %v15089_v21, %v15084_v29  ;;  %v16679_v10 = vld [vmem:[#allocation90_spill] sm:$0xff] }
 0xce9   : > { %v6859_v59 = vmax.f32 %v6732_v32, %v6795_v39 }
 0xcea   : > { %v6670_v11 = vsel %vm4292_vm2, %v6667_v37, %v6669_v12  ;;  %v6734_v17 = vmax.f32 %v6575_v31, %v6669_v12  ;;  %v6797_v46 = vsel %vm4452_vm3, %v6794_v27, %v6796_v20  ;;  %v16656_v27 = vpack.c.bf16 %v15131_v49, %v15126_v47 }
 0xceb   : > { %v6733_v15 = vmax.f32 %v6574_v8, %v6670_v11  ;;  %v9360_v36 = vpack.c.bf16 %v6859_v59, %v6858_v60  ;;  %v16655_v8 = vpack.c.bf16 %v15029_v62, %v15024_v45  ;;  %v16659_v45 = vpack.c.bf16 %v15143_v18, %v15138_v52 }
 0xcec   : > { %v6861_v1 = vmax.f32 %v6734_v17, %v6796_v20  ;;  %v16660_v62 = vpack.c.bf16 %v15053_v26, %v15048_v54  ;;  %v16664_v52 = vpack.c.bf16 %v15101_v57, %v15096_v4  ;;  %v16678_v4 = vld [vmem:[#allocation89_spill] sm:$0xff]  ;;  %v9377_v54 = vpack.c.bf16 %v16680_v43, %v16679_v10  ;;  %v16681_v26 = vld [vmem:[#allocation92_spill] sm:$0xff] }
 0xced   : > { %v6860_v13 = vmax.f32 %v6733_v15, %v6797_v46  ;;  %v9381_v61 = vpack.c.bf16 %v16682_v56, %v16681_v26 }
 0xcef   : > { %v9364_v19 = vpack.c.bf16 %v6861_v1, %v6860_v13 }
 0xd47   : > { %v9070_v2 = vpop.f32.mrb[32].mxu0 }
 0xd48   : > { %v5815_v24 = vpop.f32.mrb[33].mxu0 }
 0xd49   : > { %9085 = vmatprep.mubr.msk.f32.mxu0 %vm1236_vm0, %v5815_v24 }
 0xd4a   : > { %9086 = vmatmul.mubr.msk.f32.vlgmr.msra.gmra.mrb[38].mxu0 %vm1236_vm0, %v9070_v2 }
 0xd4b   : > { %9339 = vmatpush3.bf16.msra.mxu0 %v16653_v30  ;;  %v9073_v22 = vpop.f32.mrb[34].mxu0 }
 0xd4c   : > { %9341 = vmatprep.subr.bf16.mxu0 %v16654_v9  ;;  %v5825_v14 = vpop.f32.mrb[35].mxu0 }
 0xd4d   : > { %9088 = vmatprep.mubr.msk.f32.mxu0 %vm1236_vm0, %v5825_v14 }
 0xd4e   : > { %9089 = vmatmul.mubr.msk.f32.gmra.mrb[40].mxu0 %vm1236_vm0, %v9073_v22 }
 0xd4f   : > { %9343 = vmatpush3.bf16.msra.mxu0 %v16655_v8  ;;  %v9076_v37 = vpop.f32.mrb[36].mxu0 }
 0xd50   : > { %9345 = vmatprep.subr.bf16.mxu0 %v16656_v27  ;;  %v5835_v41 = vpop.f32.mrb[37].mxu0 }
 0xd51   : > { %9091 = vmatprep.mubr.msk.f32.mxu0 %vm1236_vm0, %v5835_v41 }
 0xd52   : > { %9092 = vmatmul.mubr.msk.f32.gmra.mrb[42].mxu0 %vm1236_vm0, %v9076_v37 }
 0xd53   : > { %9347 = vmatpush3.bf16.msra.mxu0 %v16657_v33  ;;  %8166 = vmatprep.mubr.msk.f32.mxu0 %vm5323_vm5, %v16658_v7 }
 0xd54   : > { %9349 = vmatprep.subr.bf16.mxu0 %v16659_v45 }
 0xd57   : > { %9351 = vmatpush3.bf16.msra.mxu0 %v16660_v62 }
 0xd58   : > { %9353 = vmatprep.subr.bf16.mxu0 %v9352_v28 }
 0xd5b   : > { %9355 = vmatpush3.bf16.msra.mxu0 %v16661_v58 }
 0xd5c   : > { %9357 = vmatprep.subr.bf16.mxu0 %v9356_v55 }
 0xd5f   : > { %9359 = vmatpush3.bf16.msra.mxu0 %v16662_v50 }
 0xd60   : > { %9361 = vmatprep.subr.bf16.mxu0 %v9360_v36 }
 0xd63   : > { %9363 = vmatpush3.bf16.msra.mxu0 %v16663_v0 }
 0xd64   : > { %9366 = vmatprep.subr.msk.bf16.mxu0 %vm14700_vm8, %v9364_v19 }
 0xd67   : > { %9368 = vmatpush3.bf16.msra.mxu0 %v16664_v52 }
 0xd6a   : > { %6930 = vmatmul.mubr.f32.vlgmr.msra.gmra.mrb[44].mxu0 %v16576_v38  ;;  %v16666_v38 = vld [vmem:[#allocation123_spill] sm:$0xff] }
 0xd6b   : > { %8167 = vmatprep.mubr.msk.f32.mxu0 %vm5323_vm5, %v16577_v53  ;;  %v16667_v53 = vld [vmem:[#allocation126_spill] sm:$0xff] }
 0xd6e   : > { %6935 = vmatmul.mubr.f32.gmra.mrb[46].mxu0 %v16578_v44  ;;  %v16668_v44 = vld [vmem:[#allocation125_spill] sm:$0xff] }
 0xd6f   : > { %8168 = vmatprep.mubr.msk.f32.mxu0 %vm5323_vm5, %v16579_v23  ;;  %v16669_v23 = vld [vmem:[#allocation128_spill] sm:$0xff] }
 0xd72   : > { %6940 = vmatmul.mubr.f32.gmra.mrb[48].mxu0 %v16580_v6  ;;  %v16670_v6 = vld [vmem:[#allocation127_spill] sm:$0xff] }
 0xd73   : > { %8169 = vmatprep.mubr.msk.f32.mxu0 %vm5323_vm5, %v16581_v40  ;;  %v16671_v40 = vld [vmem:[#allocation130_spill] sm:$0xff] }
 0xd76   : > { %6945 = vmatmul.mubr.f32.gmra.mrb[50].mxu0 %v16582_v34  ;;  %v16672_v34 = vld [vmem:[#allocation129_spill] sm:$0xff] }
 0xd77   : > { %8170 = vmatprep.mubr.msk.f32.mxu0 %vm5323_vm5, %v16583_v48  ;;  %v16673_v48 = vld [vmem:[#allocation132_spill] sm:$0xff] }
 0xd7a   : > { %6950 = vmatmul.mubr.f32.gmra.mrb[52].mxu0 %v16584_v3  ;;  %v16674_v3 = vld [vmem:[#allocation131_spill] sm:$0xff] }
 0xd7b   : > { %8171 = vmatprep.mubr.msk.f32.mxu0 %vm5323_vm5, %v16585_v35  ;;  %v16675_v35 = vld [vmem:[#allocation86_spill] sm:$0xff] }
 0xd7e   : > { %6955 = vmatmul.mubr.f32.gmra.mrb[54].mxu0 %v16586_v51  ;;  %v16676_v51 = vld [vmem:[#allocation87_spill] sm:$0xff] }
 0xd7f   : > { %8172 = vmatprep.mubr.msk.f32.mxu0 %vm5323_vm5, %v16587_v25  ;;  %v9369_v25 = vpack.c.bf16 %v16676_v51, %v16675_v35 }
 0xd81   : > { %9370 = vmatprep.subr.bf16.mxu0 %v9369_v25 }
 0xd82   : > { %6960 = vmatmul.mubr.f32.gmra.mrb[56].mxu0 %v16588_v42  ;;  %v16677_v42 = vld [vmem:[#allocation88_spill] sm:$0xff] }
 0xd83   : > { %8173 = vmatprep.mubr.msk.f32.mxu0 %vm5323_vm5, %v16665_v16  ;;  %v9373_v29 = vpack.c.bf16 %v16678_v4, %v16677_v42  ;;  %9372 = vmatpush3.bf16.msra.mxu0 %v9369_v25  ;;  %v16683_v16 = vld [vmem:[#allocation133_spill] sm:$0xff] }
 0xd85   : > { %9374 = vmatprep.subr.bf16.mxu0 %v9373_v29 }
 0xd86   : > { %6965 = vmatmul.mubr.f32.gmra.mrb[58].mxu0 %v16666_v38 }
 0xd87   : > { %8174 = vmatprep.mubr.msk.f32.mxu0 %vm5323_vm5, %v16667_v53  ;;  %9376 = vmatpush3.bf16.msra.mxu0 %v9373_v29  ;;  %v16684_v53 = vld [vmem:[#allocation94_spill] sm:$0xff] }
 0xd88   : > { %9378 = vmatprep.subr.bf16.mxu0 %v9377_v54 }
 0xd8a   : > { %6970 = vmatmul.mubr.f32.gmra.mrb[60].mxu0 %v16668_v44 }
 0xd8b   : > { %8175 = vmatprep.mubr.msk.f32.mxu0 %vm5323_vm5, %v16669_v23  ;;  %9380 = vmatpush3.bf16.msra.mxu0 %v9377_v54 }
 0xd8c   : > { %9382 = vmatprep.subr.bf16.mxu0 %v9381_v61 }
 0xd8e   : > { %6975 = vmatmul.mubr.f32.gmra.mrb[62].mxu0 %v16670_v6 }
 0xd8f   : > { %8176 = vmatprep.mubr.msk.f32.mxu0 %vm5323_vm5, %v16671_v40  ;;  %9384 = vmatpush3.bf16.msra.mxu0 %v9381_v61 }
 0xd92   : > { %6980 = vmatmul.mubr.f32.gmra.mrb[64].mxu0 %v16672_v34 }
 0xd93   : > { %8177 = vmatprep.mubr.msk.f32.mxu0 %vm5323_vm5, %v16673_v48 }
 0xd96   : > { %6985 = vmatmul.mubr.f32.gmra.mrb[66].mxu0 %v16674_v3 }
 0xe1d   : > { %v15257_v21 = vpop.f32.mrb[38].mxu0 }
 0xe1e   : > { %v15259_v57 = vpop.f32.mrb[39].mxu0 }
 0xe21   : > { %v15261_v47 = vpop.f32.mrb[40].mxu0 }
 0xe22   : > { %v15263_v49 = vpop.f32.mrb[41].mxu0 }
 0xe25   : > { %v15265_v18 = vpop.f32.mrb[42].mxu0 }
 0xe26   : > { %v15267_v28 = vpop.f32.mrb[43].mxu0 }
 0xe3d   : > { %v8774_v55 = vpop.f32.mrb[44].mxu0 }
 0xe3e   : > { %v8775_v5 = vpop.f32.mrb[45].mxu0 }
 0xe3f   : > { %v8776_v63 = vadd.f32 %v8775_v5, %v8774_v55 }
 0xe41   : > { %v8777_v60 = vpop.f32.mrb[46].mxu0  ;;  %9110 = vmatprep.mubr.msk.f32.mxu0 %vm2769_vm1, %v8776_v63 }
 0xe42   : > { %v8778_v31 = vpop.f32.mrb[47].mxu0 }
 0xe43   : > { %v8779_v39 = vadd.f32 %v8778_v31, %v8777_v60 }
 0xe45   : > { %v8780_v32 = vpop.f32.mrb[48].mxu0  ;;  %9111 = vmatmul.mubr.msk.f32.vlgmr.msra.gmra.mrb[68].mxu0 %vm2769_vm1, %v8779_v39 }
 0xe46   : > { %v8781_v12 = vpop.f32.mrb[49].mxu0 }
 0xe47   : > { %v8782_v20 = vadd.f32 %v8781_v12, %v8780_v32 }
 0xe49   : > { %v8783_v59 = vpop.f32.mrb[50].mxu0  ;;  %9113 = vmatprep.mubr.msk.f32.mxu0 %vm2769_vm1, %v8782_v20 }
 0xe4a   : > { %v8784_v11 = vpop.f32.mrb[51].mxu0 }
 0xe4b   : > { %v8785_v17 = vadd.f32 %v8784_v11, %v8783_v59 }
 0xe4d   : > { %9114 = vmatmul.mubr.msk.f32.gmra.mrb[70].mxu0 %vm2769_vm1, %v8785_v17  ;;  %v8786_v46 = vpop.f32.mrb[52].mxu0 }
 0xe4e   : > { %v8787_v15 = vpop.f32.mrb[53].mxu0 }
 0xe4f   : > { %v8788_v36 = vadd.f32 %v8787_v15, %v8786_v46 }
 0xe51   : > { %v8789_v1 = vpop.f32.mrb[54].mxu0  ;;  %9116 = vmatprep.mubr.msk.f32.mxu0 %vm2769_vm1, %v8788_v36 }
 0xe52   : > { %v8790_v13 = vpop.f32.mrb[55].mxu0 }
 0xe53   : > { %v8791_v19 = vadd.f32 %v8790_v13, %v8789_v1 }
 0xe55   : > { %v8792_v2 = vpop.f32.mrb[56].mxu0  ;;  %9117 = vmatmul.mubr.msk.f32.gmra.mrb[72].mxu0 %vm2769_vm1, %v8791_v19 }
 0xe56   : > { %v8793_v24 = vpop.f32.mrb[57].mxu0 }
 0xe57   : > { %v8794_v30 = vadd.f32 %v8793_v24, %v8792_v2 }
 0xe59   : > { %v8795_v22 = vpop.f32.mrb[58].mxu0  ;;  %9119 = vmatprep.mubr.msk.f32.mxu0 %vm2769_vm1, %v8794_v30 }
 0xe5a   : > { %v8796_v9 = vpop.f32.mrb[59].mxu0 }
 0xe5b   : > { %v8797_v14 = vadd.f32 %v8796_v9, %v8795_v22 }
 0xe5d   : > { %v8798_v8 = vpop.f32.mrb[60].mxu0  ;;  %9120 = vmatmul.mubr.msk.f32.gmra.mrb[74].mxu0 %vm2769_vm1, %v8797_v14 }
 0xe5e   : > { %v8799_v37 = vpop.f32.mrb[61].mxu0 }
 0xe5f   : > { %v8800_v27 = vadd.f32 %v8799_v37, %v8798_v8 }
 0xe61   : > { %v8801_v41 = vpop.f32.mrb[62].mxu0  ;;  %9122 = vmatprep.mubr.msk.f32.mxu0 %vm2769_vm1, %v8800_v27 }
 0xe62   : > { %v8802_v33 = vpop.f32.mrb[63].mxu0 }
 0xe63   : > { %v8803_v7 = vadd.f32 %v8802_v33, %v8801_v41 }
 0xe65   : > { %v8804_v45 = vpop.f32.mrb[64].mxu0  ;;  %9123 = vmatmul.mubr.msk.f32.gmra.mrb[76].mxu0 %vm2769_vm1, %v8803_v7 }
 0xe66   : > { %v8805_v62 = vpop.f32.mrb[65].mxu0 }
 0xe67   : > { %v8806_v58 = vadd.f32 %v8805_v62, %v8804_v45 }
 0xe69   : > { %v8807_v50 = vpop.f32.mrb[66].mxu0  ;;  %9125 = vmatprep.mubr.msk.f32.mxu0 %vm2769_vm1, %v8806_v58 }
 0xe6a   : > { %v8808_v0 = vpop.f32.mrb[67].mxu0 }
 0xe6b   : > { %v8809_v52 = vadd.f32 %v8808_v0, %v8807_v50 }
 0xe6d   : > { %9126 = vmatmul.mubr.msk.f32.gmra.mrb[78].mxu0 %vm2769_vm1, %v8809_v52 }
 0xe6e   : > { %9152 = vmatprep.mubr.msk.f32.mxu0 %vm5727_vm9, %v16683_v16 }
 0xf18   : > { %v9112_v38 = vpop.f32.mrb[68].mxu0 }
 0xf19   : > { %v7104_v44 = vadd.f32 %v9112_v38, %v16684_v53  ;;  %v7098_v23 = vpop.f32.mrb[69].mxu0 }
 0xf1a   : > { %v7099_v6 = vadd.f32 %v16684_v53, %v7098_v23 }
 0xf1b   : > { %v7158_v40 = vmax.f32 %v7104_v44, 0.0 }
 0xf1c   : > { %v7157_v34 = vmax.f32 %v7099_v6, 0.0 }
 0xf1d   : > { %v7182_v48 = vrot.slane %v7158_v40, 1 }
 0xf1e   : > { %v7181_v3 = vrot.slane %v7157_v34, 1 }
 0xf20   : > { %v7183_v35 = vsel %vm4292_vm2, %v7181_v3, %v7182_v48  ;;  %v9115_v51 = vpop.f32.mrb[70].mxu0 }
 0xf21   : > { %v7216_v25 = vmax.f32 %v7157_v34, %v7183_v35  ;;  %v7114_v42 = vadd.f32 %v9115_v51, %v16684_v53  ;;  %v7108_v4 = vpop.f32.mrb[71].mxu0 }
 0xf22   : > { %v7109_v29 = vadd.f32 %v16684_v53, %v7108_v4 }
 0xf23   : > { %v7160_v10 = vmax.f32 %v7114_v42, 0.0 }
 0xf24   : > { %v7159_v43 = vmax.f32 %v7109_v29, 0.0 }
 0xf25   : > { %v7186_v54 = vrot.slane %v7160_v10, 1 }
 0xf26   : > { %v7184_v26 = vrot.slane %v7159_v43, 1 }
 0xf28   : > { %v7187_v56 = vsel %vm4292_vm2, %v7184_v26, %v7186_v54  ;;  %v9118_v61 = vpop.f32.mrb[72].mxu0  ;;  %v7185_v55 = vsel %vm4292_vm2, %v7182_v48, %v7184_v26 }
 0xf29   : > { %v7218_v5 = vmax.f32 %v7159_v43, %v7187_v56  ;;  %v7124_v63 = vadd.f32 %v9118_v61, %v16684_v53  ;;  %v7118_v60 = vpop.f32.mrb[73].mxu0  ;;  %v7217_v31 = vmax.f32 %v7158_v40, %v7185_v55 }
 0xf2a   : > { %v7119_v39 = vadd.f32 %v16684_v53, %v7118_v60  ;;  %v16688_v60 = vld [vmem:[#allocation102_spill] sm:$0xff] }
 0xf2b   : > { %v7162_v32 = vmax.f32 %v7124_v63, 0.0  ;;  %v9385_v12 = vpack.c.bf16 %v7217_v31, %v7216_v25  ;;  %v16689_v31 = vld [vmem:[#allocation103_spill] sm:$0xff] }
 0xf2c   : > { %v7161_v20 = vmax.f32 %v7119_v39, 0.0  ;;  %v9415_v39 = vpack.c.bf16 %v16689_v31, %v16688_v60 }
 0xf2d   : > { %v7190_v59 = vrot.slane %v7162_v32, 1  ;;  %9386 = vmatprep.subr.bf16.mxu0 %v9385_v12 }
 0xf2e   : > { %v7188_v11 = vrot.slane %v7161_v20, 1  ;;  %9388 = vmatpush3.bf16.msra.mxu0 %v9385_v12  ;;  %v16691_v12 = vld [vmem:[#allocation135_spill] sm:$0xff] }
 0xf30   : > { %v7191_v17 = vsel %vm4292_vm2, %v7188_v11, %v7190_v59  ;;  %v9121_v46 = vpop.f32.mrb[74].mxu0  ;;  %v7189_v15 = vsel %vm4292_vm2, %v7186_v54, %v7188_v11 }
 0xf31   : > { %v7220_v36 = vmax.f32 %v7161_v20, %v7191_v17  ;;  %v7134_v1 = vadd.f32 %v9121_v46, %v16684_v53  ;;  %v7128_v13 = vpop.f32.mrb[75].mxu0  ;;  %v7219_v19 = vmax.f32 %v7160_v10, %v7189_v15  ;;  %v16692_v20 = vld [vmem:[#allocation104_spill] sm:$0xff]  ;;  %v16695_v46 = vld [vmem:[#allocation137_spill] sm:$0xff]  ;;  %v16696_v15 = vld [vmem:[#allocation106_spill] sm:$0xff] }
 0xf32   : > { %v7129_v2 = vadd.f32 %v16684_v53, %v7128_v13  ;;  %v16694_v17 = vld [vmem:[#allocation136_spill] sm:$0xff]  ;;  %v16698_v13 = vld [vmem:[#allocation138_spill] sm:$0xff] }
 0xf33   : > { %v7164_v24 = vmax.f32 %v7134_v1, 0.0  ;;  %v9389_v30 = vpack.c.bf16 %v7219_v19, %v7218_v5  ;;  %v16687_v5 = vld [vmem:[#allocation101_spill] sm:$0xff] }
 0xf34   : > { %v7163_v22 = vmax.f32 %v7129_v2, 0.0 }
 0xf35   : > { %v7194_v9 = vrot.slane %v7164_v24, 1  ;;  %9390 = vmatprep.subr.bf16.mxu0 %v9389_v30 }
 0xf36   : > { %v7192_v14 = vrot.slane %v7163_v22, 1  ;;  %9392 = vmatpush3.bf16.msra.mxu0 %v9389_v30 }
 0xf38   : > { %v7195_v8 = vsel %vm4292_vm2, %v7192_v14, %v7194_v9  ;;  %v9124_v37 = vpop.f32.mrb[76].mxu0  ;;  %v7193_v27 = vsel %vm4292_vm2, %v7190_v59, %v7192_v14  ;;  %v16693_v59 = vld [vmem:[#allocation105_spill] sm:$0xff]  ;;  %v16699_v14 = vld [vmem:[#allocation139_spill] sm:$0xff] }
 0xf39   : > { %v7222_v41 = vmax.f32 %v7163_v22, %v7195_v8  ;;  %v7144_v33 = vadd.f32 %v9124_v37, %v16684_v53  ;;  %v7138_v7 = vpop.f32.mrb[77].mxu0  ;;  %v7221_v45 = vmax.f32 %v7162_v32, %v7193_v27  ;;  %v16690_v32 = vld [vmem:[#allocation134_spill] sm:$0xff]  ;;  %v9419_v11 = vpack.c.bf16 %v16693_v59, %v16692_v20  ;;  %v16700_v37 = vld [vmem:[#allocation99_spill] sm:$0xff] }
 0xf3a   : > { %v7139_v62 = vadd.f32 %v16684_v53, %v7138_v7  ;;  %v5940_v27 = vadd.f32 %v15257_v21, %v16700_v37  ;;  %v5945_v21 = vadd.f32 %v16700_v37, %v15263_v49 }
 0xf3b   : > { %v7166_v58 = vmax.f32 %v7144_v33, 0.0  ;;  %v9393_v50 = vpack.c.bf16 %v7221_v45, %v7220_v36  ;;  %v16697_v36 = vld [vmem:[#allocation107_spill] sm:$0xff]  ;;  %v5935_v45 = vadd.f32 %v16700_v37, %v15259_v57 }
 0xf3c   : > { %v7165_v0 = vmax.f32 %v7139_v62, 0.0  ;;  %v9423_v1 = vpack.c.bf16 %v16697_v36, %v16696_v15 }
 0xf3d   : > { %v7198_v52 = vrot.slane %v7166_v58, 1  ;;  %9394 = vmatprep.subr.bf16.mxu0 %v9393_v50 }
 0xf3e   : > { %v7196_v16 = vrot.slane %v7165_v0, 1  ;;  %9396 = vmatpush3.bf16.msra.mxu0 %v9393_v50 }
 0xf40   : > { %v7199_v38 = vsel %vm4292_vm2, %v7196_v16, %v7198_v52  ;;  %v9127_v44 = vpop.f32.mrb[78].mxu0  ;;  %v7197_v23 = vsel %vm4292_vm2, %v7194_v9, %v7196_v16 }
 0xf41   : > { %v7224_v6 = vmax.f32 %v7165_v0, %v7199_v38  ;;  %v7154_v40 = vadd.f32 %v9127_v44, %v16684_v53  ;;  %v7148_v34 = vpop.f32.mrb[79].mxu0  ;;  %v7223_v48 = vmax.f32 %v7164_v24, %v7197_v23 }
 0xf42   : > { %v7149_v3 = vadd.f32 %v16684_v53, %v7148_v34  ;;  %v16686_v53 = vld [vmem:[#allocation100_spill] sm:$0xff]  ;;  %v5960_v34 = vadd.f32 %v15265_v18, %v16700_v37 }
 0xf43   : > { %v7168_v35 = vmax.f32 %v7154_v40, 0.0  ;;  %v9397_v51 = vpack.c.bf16 %v7223_v48, %v7222_v41  ;;  %v9411_v63 = vpack.c.bf16 %v16687_v5, %v16686_v53  ;;  %v16701_v41 = vld [vmem:[#allocation108_spill] sm:$0xff] }
 0xf44   : > { %v7167_v25 = vmax.f32 %v7149_v3, 0.0 }
 0xf45   : > { %v7202_v42 = vrot.slane %v7168_v35, 1  ;;  %9398 = vmatprep.subr.bf16.mxu0 %v9397_v51 }
 0xf46   : > { %v7200_v4 = vrot.slane %v7167_v25, 1  ;;  %9400 = vmatpush3.bf16.msra.mxu0 %v9397_v51 }
 0xf47   : > { %v7227_v43 = vmax.f32 %v7168_v35, %v7202_v42 }
 0xf48   : > { %v7203_v29 = vsel %vm4292_vm2, %v7200_v4, %v7202_v42  ;;  %v7201_v10 = vsel %vm4292_vm2, %v7198_v52, %v7200_v4  ;;  %v5950_v52 = vadd.f32 %v15261_v47, %v16700_v37  ;;  %v5955_v47 = vadd.f32 %v16700_v37, %v15267_v28  ;;  %v16702_v4 = vld [vmem:[#allocation140_spill] sm:$0xff] }
 0xf49   : > { %v7226_v54 = vmax.f32 %v7167_v25, %v7203_v29  ;;  %v7225_v26 = vmax.f32 %v7166_v58, %v7201_v10 }
 0xf4b   : > { %v9405_v56 = vpack.c.bf16 %v7227_v43, %v7226_v54  ;;  %v9401_v61 = vpack.c.bf16 %v7225_v26, %v7224_v6 }
 0xf4d   : > { %9402 = vmatprep.subr.bf16.mxu0 %v9401_v61 }
 0xf4e   : > { %9404 = vmatpush3.bf16.msra.mxu0 %v9401_v61 }
 0xf4f   : > { %9407 = vmatprep.subr.msk.bf16.mxu0 %vm14985_vm10, %v9405_v56 }
 0xf52   : > { %9410 = vmatpush3.bf16.msk.msra.mxu0 %vm14985_vm10, %v9405_v56 }
 0xf53   : > { %9412 = vmatprep.subr.bf16.mxu0 %v9411_v63 }
 0xf55   : > { %9153 = vmatmul.mubr.msk.f32.vlgmr.msra.gmra.mrb[80].mxu0 %vm5727_vm9, %v16690_v32 }
 0xf56   : > { %9155 = vmatprep.mubr.msk.f32.mxu0 %vm5727_vm9, %v16691_v12  ;;  %9414 = vmatpush3.bf16.msra.mxu0 %v9411_v63 }
 0xf57   : > { %9416 = vmatprep.subr.bf16.mxu0 %v9415_v39 }
 0xf59   : > { %9156 = vmatmul.mubr.msk.f32.gmra.mrb[82].mxu0 %vm5727_vm9, %v16694_v17 }
 0xf5a   : > { %9158 = vmatprep.mubr.msk.f32.mxu0 %vm5727_vm9, %v16695_v46  ;;  %9418 = vmatpush3.bf16.msra.mxu0 %v9415_v39 }
 0xf5b   : > { %9420 = vmatprep.subr.bf16.mxu0 %v9419_v11 }
 0xf5d   : > { %9159 = vmatmul.mubr.msk.f32.gmra.mrb[84].mxu0 %vm5727_vm9, %v16698_v13 }
 0xf5e   : > { %9422 = vmatpush3.bf16.msra.mxu0 %v9419_v11 }
 0xf5f   : > { %9424 = vmatprep.subr.bf16.mxu0 %v9423_v1 }
 0xf62   : > { %9426 = vmatpush3.bf16.msra.mxu0 %v9423_v1 }
0x1028   : > { %v9154_v19 = vpop.f32.mrb[80].mxu0 }
0x1029   : > { %v7297_v2 = vpop.f32.mrb[81].mxu0 }
0x102a   : > { %9177 = vmatprep.mubr.msk.f32.mxu0 %vm2769_vm1, %v7297_v2 }
0x102b   : > { %9178 = vmatmul.mubr.msk.f32.vlgmr.msra.gmra.mrb[86].mxu0 %vm2769_vm1, %v9154_v19 }
0x102c   : > { %v9157_v24 = vpop.f32.mrb[82].mxu0 }
0x102d   : > { %v7307_v30 = vpop.f32.mrb[83].mxu0 }
0x102e   : > { %9180 = vmatprep.mubr.msk.f32.mxu0 %vm2769_vm1, %v7307_v30 }
0x102f   : > { %9181 = vmatmul.mubr.msk.f32.gmra.mrb[88].mxu0 %vm2769_vm1, %v9157_v24 }
0x1030   : > { %v9160_v22 = vpop.f32.mrb[84].mxu0 }
0x1031   : > { %v7317_v9 = vpop.f32.mrb[85].mxu0 }
0x1032   : > { %9183 = vmatprep.mubr.msk.f32.mxu0 %vm2769_vm1, %v7317_v9 }
0x1033   : > { %9184 = vmatmul.mubr.msk.f32.gmra.mrb[90].mxu0 %vm2769_vm1, %v9160_v22 }
0x1034   : > { %9198 = vmatprep.mubr.msk.f32.mxu0 %vm7451_vm11, %v16699_v14 }
0x10fe   : > { %v9179_v8 = vpop.f32.mrb[86].mxu0 }
0x10ff   : > { %v7422_v33 = vadd.f32 %v9179_v8, %v16701_v41  ;;  %v7416_v7 = vpop.f32.mrb[87].mxu0 }
0x1100   : > { %v7417_v62 = vadd.f32 %v16701_v41, %v7416_v7 }
0x1101   : > { %v7446_v58 = vmul.f32 %v7422_v33, %v5940_v27 }
0x1102   : > { %v7445_v50 = vmul.f32 %v7417_v62, %v5935_v45  ;;  %v9182_v0 = vpop.f32.mrb[88].mxu0 }
0x1103   : > { %v7432_v16 = vadd.f32 %v9182_v0, %v16701_v41  ;;  %v7426_v38 = vpop.f32.mrb[89].mxu0 }
0x1104   : > { %v7427_v44 = vadd.f32 %v16701_v41, %v7426_v38  ;;  %v9427_v23 = vpack.c.bf16 %v7446_v58, %v7445_v50 }
0x1105   : > { %v7448_v6 = vmul.f32 %v7432_v16, %v5950_v52 }
0x1106   : > { %v7447_v40 = vmul.f32 %v7427_v44, %v5945_v21  ;;  %v9185_v57 = vpop.f32.mrb[90].mxu0  ;;  %9428 = vmatprep.subr.bf16.mxu0 %v9427_v23 }
0x1107   : > { %v7442_v48 = vadd.f32 %v9185_v57, %v16701_v41  ;;  %v7436_v3 = vpop.f32.mrb[91].mxu0  ;;  %9430 = vmatpush3.bf16.msra.mxu0 %v9427_v23 }
0x1108   : > { %v7437_v35 = vadd.f32 %v16701_v41, %v7436_v3  ;;  %v9431_v49 = vpack.c.bf16 %v7448_v6, %v7447_v40 }
0x1109   : > { %v7450_v51 = vmul.f32 %v7442_v48, %v5960_v34 }
0x110a   : > { %v7449_v25 = vmul.f32 %v7437_v35, %v5955_v47  ;;  %9432 = vmatprep.subr.bf16.mxu0 %v9431_v49 }
0x110b   : > { %9434 = vmatpush3.bf16.msra.mxu0 %v9431_v49 }
0x110c   : > { %v9435_v42 = vpack.c.bf16 %v7450_v51, %v7449_v25 }
0x110e   : > { %9436 = vmatprep.subr.bf16.mxu0 %v9435_v42 }
0x110f   : > { %9438 = vmatpush3.bf16.msra.mxu0 %v9435_v42 }
0x1112   : > { %9199 = vmatmul.mubr.msk.f32.vlgmr.msra.gmra.mrb[92].mxu0 %vm7451_vm11, %v16702_v4 }
0x11e5   : > { %v9200_v18 = vpop.f32.mrb[92].mxu0 }
0x11e6   : > { %v7524_v29 = vpop.f32.mrb[93].mxu0  ;;  %v7537_v10 = vsel %vm7533_vm12, %v9200_v18, -inf }
0x11e7   : > { %v7534_v28 = vsel %vm7533_vm12, %v7524_v29, -inf  ;;  %7538 = vmax.xlane.f32.xlu1 %v7537_v10 }
0x11e8   : > { %7535 = vmax.xlane.f32.xlu0 %v7534_v28 }
0x1274   : > { %v7539_v43 = vpop.xlane.xlu1 %7538 }
0x1275   : > { %v7541_v54 = vsub.f32 %v9200_v18, %v7539_v43  ;;  %v7536_v26 = vpop.xlane.xlu0 %7535 }
0x1276   : > { %v7540_v56 = vsub.f32 %v7524_v29, %v7536_v26 }
0x1277   : > { %v7544_v61 = vmul.f32 1.442695, %v7541_v54 }
0x1278   : > { %v7542_v55 = vmul.f32 1.442695, %v7540_v56 }
0x127a   : > { %10039 = vpow2.f32 %v7542_v55 }
0x127b   : > { %10041 = vpow2.f32 %v7544_v61 }
0x1284   : > { %v10040_v53 = vpop.eup %10039 }
0x1285   : > { %v7546_v5 = vsel %vm7533_vm12, %v10040_v53, 0.0  ;;  %v10042_v63 = vpop.eup %10041 }
0x1286   : > { %7547 = vadd.xlane.f32.xlu0 %v7546_v5  ;;  %v7549_v60 = vsel %vm7533_vm12, %v10042_v63, 0.0 }
0x128a   : > { %7550 = vadd.xlane.f32.xlu0 %v7549_v60 }
0x1313   : > { %v7548_v31 = vpop.xlane.xlu0 %7547 }
0x1314   : > { %10043 = vrcp.f32 %v7548_v31 }
0x1317   : > { %v7551_v39 = vpop.xlane.xlu0 %7550 }
0x1318   : > { %10045 = vrcp.f32 %v7551_v39 }
0x131e   : > { %v10044_v32 = vpop.eup %10043 }
0x131f   : > { %v7553_v12 = vmul.f32 %v10044_v32, %v10040_v53 }
0x1321   : > { %7556 = vst.msk [vmem:[%s11175_s20] sm:$0xff] %vm7533_vm12, %v7553_v12 }
0x1322   : > { %v10046_v20 = vpop.eup %10045 }
0x1323   : > { %v7555_v59 = vmul.f32 %v10046_v20, %v10042_v63 }
0x1325   : > { %7557 = vst.msk [vmem:[%s11175_s20 + $0x8] sm:$0xff] %vm7533_vm12, %v7555_v59 }
0x1326 PF: > { %s16703_s25 = sld [smem:[#allocation28_spill]] }
0x132c   : > { %s39_s3 = sadd.s32 1, %s16703_s25  }
0x132d   : > { %p36_p13 = scmp.ge.s32.totalorder %s39_s3, 4  }
0x132f   :  { %38 = sbr.rel (!%p36_p13) target bundleno = 20 (0x14), region = 211 }
0x1336   :  { %7579 = vsyncpa [#allocation3], 1 }
0x1337   :  { %7581 = vsyncpa [#allocation3 + $0x1], 1 }
0x1338   :  { %7582 = vsyncpa [#allocation5], 1 }
0x1339   :  { %7583 = vsyncpa [#allocation8], 1 }
0x133a   :  { %7584 = vsyncpa [#allocation11], 1 }
0x133b   :  { %7585 = vsyncpa [#allocation14], 1 }
0x133c   :  { %7586 = vsyncpa [#allocation17], 1 }
0x133d   :  { %7587 = vsyncpa [#allocation20], 1 }

</bundles_post_ra>
